<compile_context>
chip_gen: v5e
topology: v5e:2x2
jax: 0.10.0
libtpu: 0.0.40
codegen_flags: <defaults>
</compile_context>

<pallas_src>
import jax
import jax.numpy as jnp
from jax.experimental import pallas as pl
from jax.experimental.pallas import tpu as pltpu


# ---------------------------------------------------------------------------
# shared kernel pieces
# ---------------------------------------------------------------------------
def _layer1_and_init(x_ref, w1_ref, b1_ref, h1_ref, acc3_ref):
    """Layer 1 (tiny K) on the VPU + zero the layer-3 accumulator."""
    x = x_ref[...]                       # (M, K1) f32
    w1 = w1_ref[...]                     # (K1, H1) f32
    h1 = b1_ref[...]                     # (1, H1); broadcasts to (M, H1)
    for k in range(x.shape[1]):          # K1 == 2 -> two broadcast FMAs
        h1 = h1 + x[:, k:k + 1] * w1[k:k + 1, :]
    h1_ref[...] = jnp.maximum(h1, 0.0).astype(h1_ref.dtype)   # store bf16
    acc3_ref[...] = jnp.zeros_like(acc3_ref)


def _stream_step(h1_ref, w2_ref, b2_ref, w3_ref, acc3_ref):
    """One weight-stream step: layer-2 tile + partial layer-3 accumulation.

    bf16 x bf16 MXU matmuls with f32 accumulation; no f32 weight upcasts.
    """
    h2 = jnp.dot(h1_ref[...], w2_ref[...],            # bf16 @ bf16 -> f32
                 preferred_element_type=jnp.float32)
    h2 = jnp.maximum(h2 + b2_ref[...], 0.0).astype(jnp.bfloat16)
    acc3_ref[...] += jnp.dot(h2, w3_ref[...],         # bf16 @ bf16 -> f32
                             preferred_element_type=jnp.float32)


# ---------------------------------------------------------------------------
# single-TensorCore fully fused kernel (v5e / v6e)
# ---------------------------------------------------------------------------
def _fused_mlp_kernel(x_ref, w1_ref, b1_ref, w2_ref, b2_ref, w3_ref, b3_ref,
                      w4t_ref, b4_ref, o_ref, h1_ref, acc3_ref):
    j = pl.program_id(0)

    @pl.when(j == 0)
    def _init():
        _layer1_and_init(x_ref, w1_ref, b1_ref, h1_ref, acc3_ref)

    _stream_step(h1_ref, w2_ref, b2_ref, w3_ref, acc3_ref)

    @pl.when(j == pl.num_programs(0) - 1)
    def _finalize():
        h3 = jnp.maximum(acc3_ref[...] + b3_ref[...], 0.0)
        out = jnp.sum(h3 * w4t_ref[...], axis=-1, keepdims=True) + b4_ref[...]
        o_ref[...] = out.astype(o_ref.dtype)


# ---------------------------------------------------------------------------
# two-TensorCore partial kernel (v7x): each core produces a layer-3 partial
# ---------------------------------------------------------------------------
def _fused_mlp_partial_kernel(x_ref, w1_ref, b1_ref, w2_ref, b2_ref, w3_ref,
                              o_ref, h1_ref, acc3_ref):
    j = pl.program_id(1)

    @pl.when(j == 0)
    def _init():
        _layer1_and_init(x_ref, w1_ref, b1_ref, h1_ref, acc3_ref)

    _stream_step(h1_ref, w2_ref, b2_ref, w3_ref, acc3_ref)

    @pl.when(j == pl.num_programs(1) - 1)
    def _finalize():
        o_ref[...] = acc3_ref[...]        # f32 partial, summed in XLA epilogue


# ---------------------------------------------------------------------------
# wrapper
# ---------------------------------------------------------------------------
def _pick_tile(n, candidates=(2048, 1024, 512, 256, 128)):
    for tn in candidates:
        if n % tn == 0:
            return tn
    return n


def _num_tensorcores():
    """2 on v7x (two independent TensorCores per chip), else 1."""
    try:
        kind = jax.devices()[0].device_kind.lower().replace(" ", "")
    except Exception:  # pragma: no cover - detection failure -> safe default
        return 1
    if "v7" in kind or "tpu7" in kind:
        return 2
    return 1


def fused_mlp(x, params, *, num_cores=None):
    """Full MLP forward.  params = 4 x (W(in, out), b(out))."""
    (w1, b1), (w2, b2), (w3, b3), (w4, b4) = params
    M, K1 = x.shape
    H1 = w1.shape[1]          # 1024
    H2 = w2.shape[1]          # 4096
    H3 = w3.shape[1]          # 512
    NO = w4.shape[1]          # 1

    if num_cores is None:
        num_cores = _num_tensorcores()
    if num_cores < 1 or H2 % num_cores != 0:
        num_cores = 1

    per_core = H2 // num_cores
    tn = _pick_tile(per_core)
    nj = per_core // tn       # grid steps per core along the shared H2 axis

    b1r = b1.reshape(1, H1)
    b2r = b2.reshape(1, H2)
    b3r = b3.reshape(1, H3)
    w4t = w4.reshape(1, H3)   # (512, 1) -> (1, 512): row vector for VPU dot
    b4r = b4.reshape(1, NO)

    scratch = [
        pltpu.VMEM((M, H1), jnp.bfloat16),   # h1 (resident across all tiles)
        pltpu.VMEM((M, H3), jnp.float32),    # layer-3 accumulator
    ]

    if num_cores == 1:
        # Fully fused, single output.  Grid axis is a reduction for acc3
        # (and h1 is computed at j == 0) -> must stay sequential.
        return pl.pallas_call(
            _fused_mlp_kernel,
            out_shape=jax.ShapeDtypeStruct((M, NO), jnp.float32),
            grid_spec=pltpu.PrefetchScalarGridSpec(
                num_scalar_prefetch=0,
                grid=(nj,),
                in_specs=[
                    pl.BlockSpec((M, K1), lambda j: (0, 0)),    # x (resident)
                    pl.BlockSpec((K1, H1), lambda j: (0, 0)),   # w1 (resident)
                    pl.BlockSpec((1, H1), lambda j: (0, 0)),    # b1
                    pl.BlockSpec((H1, tn), lambda j: (0, j)),   # w2 tile (bf16)
                    pl.BlockSpec((1, tn), lambda j: (0, j)),    # b2 tile
                    pl.BlockSpec((tn, H3), lambda j: (j, 0)),   # w3 tile (bf16)
                    pl.BlockSpec((1, H3), lambda j: (0, 0)),    # b3
                    pl.BlockSpec((1, H3), lambda j: (0, 0)),    # w4^T
                    pl.BlockSpec((1, NO), lambda j: (0, 0)),    # b4
                ],
                out_specs=pl.BlockSpec((M, NO), lambda j: (0, 0)),
                scratch_shapes=scratch,
            ),
            compiler_params=pltpu.CompilerParams(
                dimension_semantics=("arbitrary",),
                vmem_limit_bytes=32 << 20,
            ),
        )(x, w1, b1r, w2, b2r, w3, b3r, w4t, b4r)

    # v7x: split the weight stream across both TensorCores.  Each core owns
    # half of the H2/K-stream and writes an f32 partial of layer 3.
    partials = pl.pallas_call(
        _fused_mlp_partial_kernel,
        out_shape=jax.ShapeDtypeStruct((num_cores, M, H3), jnp.float32),
        grid_spec=pltpu.PrefetchScalarGridSpec(
            num_scalar_prefetch=0,
            grid=(num_cores, nj),
            in_specs=[
                pl.BlockSpec((M, K1), lambda c, j: (0, 0)),
                pl.BlockSpec((K1, H1), lambda c, j: (0, 0)),
                pl.BlockSpec((1, H1), lambda c, j: (0, 0)),
                pl.BlockSpec((H1, tn), lambda c, j: (0, c * nj + j)),
                pl.BlockSpec((1, tn), lambda c, j: (0, c * nj + j)),
                pl.BlockSpec((tn, H3), lambda c, j: (c * nj + j, 0)),
            ],
            out_specs=pl.BlockSpec((None, M, H3), lambda c, j: (c, 0, 0)),
            scratch_shapes=scratch,
        ),
        compiler_params=pltpu.CompilerParams(
            dimension_semantics=("parallel", "arbitrary"),
            vmem_limit_bytes=32 << 20,
        ),
    )(x, w1, b1r, w2, b2r, w3)

    # Tiny (batch x 512) epilogue in plain XLA: sum cross-core partials,
    # bias + ReLU, then the 512 -> 1 output layer.
    h3 = jnp.maximum(jnp.sum(partials, axis=0) + b3r, 0.0)
    return h3 @ w4 + b4r


# ---------------------------------------------------------------------------
# parameters / reference / test harness
# ---------------------------------------------------------------------------
def init_linear_params(key, in_features, out_features, weight_dtype=jnp.float32):
    """Deterministic init mirroring torch.nn.Linear's U(-1/sqrt(fan_in), +)."""
    kw, kb = jax.random.split(key)
    bound = 1.0 / jnp.sqrt(jnp.float32(in_features))
    # stored as (in, out) == transpose of PyTorch's (out, in)
    w = jax.random.uniform(kw, (in_features, out_features), jnp.float32,
                           minval=-bound, maxval=bound).astype(weight_dtype)
    b = jax.random.uniform(kb, (out_features,), jnp.float32,
                           minval=-bound, maxval=bound)
    return w, b


def model_forward(params, x):
    return fused_mlp(x, params)


def reference_forward(params, x):
    """Pure-JAX reference using the same bf16 weight/activation quantization."""
    (w1, b1), (w2, b2), (w3, b3), (w4, b4) = params
    h1 = jnp.maximum(x @ w1 + b1, 0.0).astype(jnp.bfloat16)
    h2 = jnp.dot(h1, w2, preferred_element_type=jnp.float32) + b2
    h2 = jnp.maximum(h2, 0.0).astype(jnp.bfloat16)
    h3 = jnp.dot(h2, w3, preferred_element_type=jnp.float32) + b3
    h3 = jnp.maximum(h3, 0.0)
    return h3 @ w4 + b4


if __name__ == "__main__":
    num_i, num_o = 2, 1
    batch = 8

    root = jax.random.PRNGKey(0)
    k_x, k1, k2, k3, k4 = jax.random.split(root, 5)

    params = (
        init_linear_params(k1, num_i, 1024),                            # f32 (tiny)
        init_linear_params(k2, 1024, 4096, weight_dtype=jnp.bfloat16),  # bf16 stream
        init_linear_params(k3, 4096, 512, weight_dtype=jnp.bfloat16),   # bf16 stream
        init_linear_params(k4, 512, num_o),                             # f32 (tiny)
    )

    x = jax.random.normal(k_x, (batch, num_i), jnp.float32)

    out = jax.jit(model_forward)(params, x)
    jax.block_until_ready(out)

    expected = reference_forward(params, x)
    assert out.shape == (batch, num_o)
    assert jnp.allclose(out, expected, rtol=2e-2, atol=2e-3), (out, expected)

    print("KERNEL_OK")
</pallas_src>

<mosaic_0001>
module attributes {stable_mosaic.version = 11 : i64} {
  func.func @_fused_mlp_kernel(%arg0: i32, %arg1: memref<8x2xf32, #tpu.memory_space<vmem>>, %arg2: memref<2x1024xf32, #tpu.memory_space<vmem>>, %arg3: memref<1x1024xf32, #tpu.memory_space<vmem>>, %arg4: memref<1024x2048xbf16, #tpu.memory_space<vmem>>, %arg5: memref<1x2048xf32, #tpu.memory_space<vmem>>, %arg6: memref<2048x512xbf16, #tpu.memory_space<vmem>>, %arg7: memref<1x512xf32, #tpu.memory_space<vmem>>, %arg8: memref<1x512xf32, #tpu.memory_space<vmem>>, %arg9: memref<1x1xf32, #tpu.memory_space<vmem>>, %arg10: memref<8x1xf32, #tpu.memory_space<vmem>>, %arg11: memref<8x1024xbf16, #tpu.memory_space<vmem>>, %arg12: memref<8x512xf32, #tpu.memory_space<vmem>>) attributes {dimension_semantics = [#tpu.dimension_semantics<arbitrary>], iteration_bounds = array<i64: 2>, scalar_prefetch = 0 : i64, scratch_operands = 2 : i64, tpu.core_type = #tpu.core_type<tc>, window_params = [{pipeline_mode = #tpu.pipeline_mode<synchronous>, transform_indices = @transform_0, window_bounds = array<i64: 8, 2>}, {pipeline_mode = #tpu.pipeline_mode<synchronous>, transform_indices = @transform_1, window_bounds = array<i64: 2, 1024>}, {pipeline_mode = #tpu.pipeline_mode<synchronous>, transform_indices = @transform_2, window_bounds = array<i64: 1, 1024>}, {transform_indices = @transform_3, window_bounds = array<i64: 1024, 2048>}, {transform_indices = @transform_4, window_bounds = array<i64: 1, 2048>}, {transform_indices = @transform_5, window_bounds = array<i64: 2048, 512>}, {pipeline_mode = #tpu.pipeline_mode<synchronous>, transform_indices = @transform_6, window_bounds = array<i64: 1, 512>}, {pipeline_mode = #tpu.pipeline_mode<synchronous>, transform_indices = @transform_7, window_bounds = array<i64: 1, 512>}, {pipeline_mode = #tpu.pipeline_mode<synchronous>, transform_indices = @transform_8, window_bounds = array<i64: 1, 1>}, {pipeline_mode = #tpu.pipeline_mode<synchronous>, transform_indices = @transform_9, window_bounds = array<i64: 8, 1>}]} {
    %c0_i32 = arith.constant 0 : i32
    %0 = arith.cmpi eq, %arg0, %c0_i32 : i32
    %1 = arith.extui %0 : i1 to i32
    %c0_i32_0 = arith.constant 0 : i32
    %2 = arith.cmpi ne, %1, %c0_i32_0 : i32
    scf.if %2 {
      %c0_15 = arith.constant 0 : index
      %c0_16 = arith.constant 0 : index
      %20 = vector.load %arg1[%c0_15, %c0_16] : memref<8x2xf32, #tpu.memory_space<vmem>>, vector<8x2xf32>
      %c0_17 = arith.constant 0 : index
      %c0_18 = arith.constant 0 : index
      %21 = vector.load %arg2[%c0_17, %c0_18] : memref<2x1024xf32, #tpu.memory_space<vmem>>, vector<2x1024xf32>
      %c0_19 = arith.constant 0 : index
      %c0_20 = arith.constant 0 : index
      %22 = vector.load %arg3[%c0_19, %c0_20] : memref<1x1024xf32, #tpu.memory_space<vmem>>, vector<1x1024xf32>
      %23 = vector.extract_strided_slice %20 {offsets = [0, 0], sizes = [8, 1], strides = [1, 1]} : vector<8x2xf32> to vector<8x1xf32>
      %24 = vector.extract_strided_slice %21 {offsets = [0, 0], sizes = [1, 1024], strides = [1, 1]} : vector<2x1024xf32> to vector<1x1024xf32>
      %25 = vector.broadcast %23 : vector<8x1xf32> to vector<8x1024xf32>
      %26 = vector.broadcast %24 : vector<1x1024xf32> to vector<8x1024xf32>
      %27 = arith.mulf %25, %26 : vector<8x1024xf32>
      %28 = vector.broadcast %22 : vector<1x1024xf32> to vector<8x1024xf32>
      %29 = arith.addf %28, %27 : vector<8x1024xf32>
      %30 = vector.extract_strided_slice %20 {offsets = [0, 1], sizes = [8, 1], strides = [1, 1]} : vector<8x2xf32> to vector<8x1xf32>
      %31 = vector.extract_strided_slice %21 {offsets = [1, 0], sizes = [1, 1024], strides = [1, 1]} : vector<2x1024xf32> to vector<1x1024xf32>
      %32 = vector.broadcast %30 : vector<8x1xf32> to vector<8x1024xf32>
      %33 = vector.broadcast %31 : vector<1x1024xf32> to vector<8x1024xf32>
      %34 = arith.mulf %32, %33 : vector<8x1024xf32>
      %35 = arith.addf %29, %34 : vector<8x1024xf32>
      %cst_21 = arith.constant 0.000000e+00 : f32
      %36 = vector.broadcast %cst_21 : f32 to vector<8x1024xf32>
      %37 = arith.maximumf %35, %36 : vector<8x1024xf32>
      %38 = arith.truncf %37 : vector<8x1024xf32> to vector<8x1024xbf16>
      %c0_22 = arith.constant 0 : index
      %c0_23 = arith.constant 0 : index
      %39 = vector.load %arg11[%c0_22, %c0_23] : memref<8x1024xbf16, #tpu.memory_space<vmem>>, vector<8x1024xbf16>
      tpu.vector_store %arg11[%c0_22, %c0_23], %38 {strides = array<i32>} : memref<8x1024xbf16, #tpu.memory_space<vmem>>, vector<8x1024xbf16>,
      %cst_24 = arith.constant 0.000000e+00 : f32
      %40 = vector.broadcast %cst_24 : f32 to vector<8x512xf32>
      %c0_25 = arith.constant 0 : index
      %c0_26 = arith.constant 0 : index
      %41 = vector.load %arg12[%c0_25, %c0_26] : memref<8x512xf32, #tpu.memory_space<vmem>>, vector<8x512xf32>
      tpu.vector_store %arg12[%c0_25, %c0_26], %40 {strides = array<i32>} : memref<8x512xf32, #tpu.memory_space<vmem>>, vector<8x512xf32>,
    } else {
    }
    %c0 = arith.constant 0 : index
    %c0_1 = arith.constant 0 : index
    %3 = vector.load %arg11[%c0, %c0_1] : memref<8x1024xbf16, #tpu.memory_space<vmem>>, vector<8x1024xbf16>
    %c0_2 = arith.constant 0 : index
    %c0_3 = arith.constant 0 : index
    %4 = vector.load %arg4[%c0_2, %c0_3] : memref<1024x2048xbf16, #tpu.memory_space<vmem>>, vector<1024x2048xbf16>
    %cst = arith.constant dense<0.000000e+00> : vector<8x2048xf32>
    %5 = tpu.matmul %3, %4, %cst {dimension_numbers = #tpu.dot_dimension_numbers<[1], [0], [0], [1], [0, 0, 1, 1], [], []>} : vector<8x1024xbf16>, vector<1024x2048xbf16>, vector<8x2048xf32> -> vector<8x2048xf32>
    %c0_4 = arith.constant 0 : index
    %c0_5 = arith.constant 0 : index
    %6 = vector.load %arg5[%c0_4, %c0_5] : memref<1x2048xf32, #tpu.memory_space<vmem>>, vector<1x2048xf32>
    %7 = vector.broadcast %6 : vector<1x2048xf32> to vector<8x2048xf32>
    %8 = arith.addf %5, %7 : vector<8x2048xf32>
    %cst_6 = arith.constant 0.000000e+00 : f32
    %9 = vector.broadcast %cst_6 : f32 to vector<8x2048xf32>
    %10 = arith.maximumf %8, %9 : vector<8x2048xf32>
    %11 = arith.truncf %10 : vector<8x2048xf32> to vector<8x2048xbf16>
    %c0_7 = arith.constant 0 : index
    %c0_8 = arith.constant 0 : index
    %12 = vector.load %arg12[%c0_7, %c0_8] : memref<8x512xf32, #tpu.memory_space<vmem>>, vector<8x512xf32>
    %c0_9 = arith.constant 0 : index
    %c0_10 = arith.constant 0 : index
    %13 = vector.load %arg6[%c0_9, %c0_10] : memref<2048x512xbf16, #tpu.memory_space<vmem>>, vector<2048x512xbf16>
    %cst_11 = arith.constant dense<0.000000e+00> : vector<8x512xf32>
    %14 = tpu.matmul %11, %13, %cst_11 {dimension_numbers = #tpu.dot_dimension_numbers<[1], [0], [0], [1], [0, 0, 1, 1], [], []>} : vector<8x2048xbf16>, vector<2048x512xbf16>, vector<8x512xf32> -> vector<8x512xf32>
    %15 = arith.addf %12, %14 : vector<8x512xf32>
    %c0_12 = arith.constant 0 : index
    %c0_13 = arith.constant 0 : index
    %16 = vector.load %arg12[%c0_12, %c0_13] : memref<8x512xf32, #tpu.memory_space<vmem>>, vector<8x512xf32>
    tpu.vector_store %arg12[%c0_12, %c0_13], %15 {strides = array<i32>} : memref<8x512xf32, #tpu.memory_space<vmem>>, vector<8x512xf32>,
    %c1_i32 = arith.constant 1 : i32
    %17 = arith.cmpi eq, %arg0, %c1_i32 : i32
    %18 = arith.extui %17 : i1 to i32
    %c0_i32_14 = arith.constant 0 : i32
    %19 = arith.cmpi ne, %18, %c0_i32_14 : i32
    scf.if %19 {
      %c0_15 = arith.constant 0 : index
      %c0_16 = arith.constant 0 : index
      %20 = vector.load %arg12[%c0_15, %c0_16] : memref<8x512xf32, #tpu.memory_space<vmem>>, vector<8x512xf32>
      %c0_17 = arith.constant 0 : index
      %c0_18 = arith.constant 0 : index
      %21 = vector.load %arg7[%c0_17, %c0_18] : memref<1x512xf32, #tpu.memory_space<vmem>>, vector<1x512xf32>
      %22 = vector.broadcast %21 : vector<1x512xf32> to vector<8x512xf32>
      %23 = arith.addf %20, %22 : vector<8x512xf32>
      %cst_19 = arith.constant 0.000000e+00 : f32
      %24 = vector.broadcast %cst_19 : f32 to vector<8x512xf32>
      %25 = arith.maximumf %23, %24 : vector<8x512xf32>
      %c0_20 = arith.constant 0 : index
      %c0_21 = arith.constant 0 : index
      %26 = vector.load %arg8[%c0_20, %c0_21] : memref<1x512xf32, #tpu.memory_space<vmem>>, vector<1x512xf32>
      %27 = vector.broadcast %26 : vector<1x512xf32> to vector<8x512xf32>
      %28 = arith.mulf %25, %27 : vector<8x512xf32>
      %cst_22 = arith.constant dense<0.000000e+00> : vector<8xf32>
      %29 = vector.multi_reduction <add>, %28, %cst_22 [1] : vector<8x512xf32> to vector<8xf32>
      %30 = vector.shape_cast %29 : vector<8xf32> to vector<8x1xf32>
      %c0_23 = arith.constant 0 : index
      %c0_24 = arith.constant 0 : index
      %31 = vector.load %arg9[%c0_23, %c0_24] : memref<1x1xf32, #tpu.memory_space<vmem>>, vector<1x1xf32>
      %32 = vector.broadcast %31 : vector<1x1xf32> to vector<8x1xf32>
      %33 = arith.addf %30, %32 : vector<8x1xf32>
      %c0_25 = arith.constant 0 : index
      %c0_26 = arith.constant 0 : index
      %34 = vector.load %arg10[%c0_25, %c0_26] : memref<8x1xf32, #tpu.memory_space<vmem>>, vector<8x1xf32>
      tpu.vector_store %arg10[%c0_25, %c0_26], %33 {strides = array<i32>} : memref<8x1xf32, #tpu.memory_space<vmem>>, vector<8x1xf32>,
    } else {
    }
    return
  }
  func.func @transform_0(%arg0: i32) -> (i32, i32) {
    %c0_i32 = arith.constant 0 : i32
    %c0_i32_0 = arith.constant 0 : i32
    %c0_i32_1 = arith.constant 0 : i32
    return %c0_i32, %c0_i32_0 : i32, i32
  }
  func.func @transform_1(%arg0: i32) -> (i32, i32) {
    %c0_i32 = arith.constant 0 : i32
    %c0_i32_0 = arith.constant 0 : i32
    %c0_i32_1 = arith.constant 0 : i32
    return %c0_i32, %c0_i32_0 : i32, i32
  }
  func.func @transform_2(%arg0: i32) -> (i32, i32) {
    %c0_i32 = arith.constant 0 : i32
    %c0_i32_0 = arith.constant 0 : i32
    %c0_i32_1 = arith.constant 0 : i32
    return %c0_i32, %c0_i32_0 : i32, i32
  }
  func.func @transform_3(%arg0: i32) -> (i32, i32) {
    %c0_i32 = arith.constant 0 : i32
    %c0_i32_0 = arith.constant 0 : i32
    return %c0_i32, %arg0 : i32, i32
  }
  func.func @transform_4(%arg0: i32) -> (i32, i32) {
    %c0_i32 = arith.constant 0 : i32
    %c0_i32_0 = arith.constant 0 : i32
    return %c0_i32, %arg0 : i32, i32
  }
  func.func @transform_5(%arg0: i32) -> (i32, i32) {
    %c0_i32 = arith.constant 0 : i32
    %c0_i32_0 = arith.constant 0 : i32
    return %arg0, %c0_i32 : i32, i32
  }
  func.func @transform_6(%arg0: i32) -> (i32, i32) {
    %c0_i32 = arith.constant 0 : i32
    %c0_i32_0 = arith.constant 0 : i32
    %c0_i32_1 = arith.constant 0 : i32
    return %c0_i32, %c0_i32_0 : i32, i32
  }
  func.func @transform_7(%arg0: i32) -> (i32, i32) {
    %c0_i32 = arith.constant 0 : i32
    %c0_i32_0 = arith.constant 0 : i32
    %c0_i32_1 = arith.constant 0 : i32
    return %c0_i32, %c0_i32_0 : i32, i32
  }
  func.func @transform_8(%arg0: i32) -> (i32, i32) {
    %c0_i32 = arith.constant 0 : i32
    %c0_i32_0 = arith.constant 0 : i32
    %c0_i32_1 = arith.constant 0 : i32
    return %c0_i32, %c0_i32_0 : i32, i32
  }
  func.func @transform_9(%arg0: i32) -> (i32, i32) {
    %c0_i32 = arith.constant 0 : i32
    %c0_i32_0 = arith.constant 0 : i32
    %c0_i32_1 = arith.constant 0 : i32
    return %c0_i32, %c0_i32_0 : i32, i32
  }
}

</mosaic_0001>

<bundles_post_ra>
// kernel: model_forward.1
= control target key start
LH: loop header
LB: loop body
LE: loop exit
PB: predicated region body
PF: predicated region fallthrough
CT: control target
= control target key end

     0   :  { %s24499_s0 = inlined_call_operand.vmem [shape: f32[8,2], index: 0, kind: input, shape index: {}]   ;;  %s24500_s1 = inlined_call_operand.hbm [shape: f32[2,1024], index: 1, kind: input, shape index: {}]   ;;  %s24501_s2 = inlined_call_operand.hbm [shape: f32[1,1024], index: 2, kind: input, shape index: {}]   ;;  %s24502_s3 = inlined_call_operand.hbm [shape: bf16[1024,4096], index: 3, kind: input, shape index: {}]   ;;  %s24503_s4 = inlined_call_operand.hbm [shape: f32[1,4096], index: 4, kind: input, shape index: {}]   ;;  %s24504_s5 = inlined_call_operand.hbm [shape: bf16[4096,512], index: 5, kind: input, shape index: {}]   ;;  %s24505_s6 = inlined_call_operand.hbm [shape: f32[1,512], index: 6, kind: input, shape index: {}]   ;;  %s24506_s7 = inlined_call_operand.hbm [shape: f32[1,512], index: 7, kind: input, shape index: {}]   ;;  %s24507_s8 = inlined_call_operand.<no memory space> [shape: f32[1,1], index: 8, kind: input, shape index: {}]   ;;  %s24508_s9 = inlined_call_operand.vmem [shape: f32[8,1], index: 9, kind: output, shape index: {}]  }
   0x1   :  { %24512 = sst [smem:[#allocation23_spill]] %s24499_s0  ;;  %v14_v0 = vstv %s24507_s8 }
   0x2   :  { %24513 = sst [smem:[#allocation24_spill]] %s24500_s1  ;;  %15 = vst [vmem:[#allocation4] sm:$0x1] %v14_v0 }
   0x3   :  { %24514 = sst [smem:[#allocation25_spill]] %s24501_s2 }
   0x4   :  { %24515 = sst [smem:[#allocation26_spill]] %s24502_s3 }
   0x5   :  { %24516 = sst [smem:[#allocation27_spill]] %s24508_s9 }
   0x6   :  { %16 = vsyncpa [#allocation6], 0 }
   0x7   :  { %17 = vsyncpa [#allocation8], 0 }
   0x8   :  { %18 = vsyncpa [#allocation14], 0  ;;  %s20751_s11 = smov 0   ;;  %s20753_s12 = smov 0  }
   0x9   :  { %s20755_s13 = smov 0   ;;  %s20757_s14 = smov 0  }
   0xa LB: > { %24517 = sst [smem:[#allocation20_spill]] %s20680_s13  ;;  %s20770_s8 = sadd.s32 4294967295, %s20684_s14   ;;  %s20684_s14 = sphi %s20757_s14, %s24530_s14   ;;  %s20680_s13 = sphi %s20755_s13, %s24532_s13   ;;  %s20676_s12 = sphi %s20753_s12, %s24534_s12   ;;  %s20672_s11 = sphi %s20751_s11, %s24533_s11  }
   0xb   : > { %s20773_s15 = sadd.s32 1, %s20684_s14   ;;  %s94_s17 = sadd.s32 1, %s20680_s13 }
   0xc   : > { %24518 = sst [smem:[#allocation21_spill]] %s20773_s15  ;;  %s91_s16 = ssub.s32 %s20684_s14, %s20773_s15 }
   0xd   : > { %p92_p0 = scmp.eq.s32.totalorder %s91_s16, 0  ;;  %p101_p1 = scmp.ne.s32.totalorder %s20680_s13, %s20676_s12 }
   0xe   : > { %p102_p2 = scmp.eq.s32.totalorder %s20684_s14, 0  ;;  %p107_p3 = scmp.ne.s32.totalorder %s20676_s12, %s20672_s11 }
   0xf   : > { %s20783_s18 = scalar_select %p92_p0, %s20680_s13, %s94_s17  }
  0x10   : > { %p20785_p4 = por %p102_p2, %p101_p1  ;;  %p108_p5 = scmp.eq.s32.totalorder %s20770_s8, 0 }
  0x11   : > { %24519 = sst [smem:[#allocation22_spill]] %s20783_s18  ;;  %p12607_p6 = scmp.ge.s32.totalorder %s20684_s14, 1 }
  0x12   : > { %p254_p7 = scmp.lt.s32.totalorder %s20684_s14, 3  ;;  %p20794_p8 = por %p108_p5, %p107_p3 }
  0x13   : > { %p12608_p9 = scmp.ne.s32.totalorder %s20770_s8, 0  ;;  %s24523_s1 = sld [smem:[#allocation24_spill]] }
  0x14   : > { %p20799_p10 = pnand %p12607_p6, %p254_p7  ;;  %s20686_s25 = smov [#allocation5]  }
  0x15   : > { %s271_s26 = sshll.u32 %s20686_s25, 4  ;;  %p20366_p13 = scmp.lt.s32.totalorder %s20684_s14, 2  ;;  %s272_s26 = int_to_ptr.vmem [resolvable:$true] %s271_s26 }
  0x16   : > { %p20339_p11 = pneg %p20799_p10  ;;  %s321_s28 = sand.u32 1, %s20684_s14  }
  0x17   : > { %s20817_s29 = sand.u32 1, %s20680_s13   ;;  %p20821_p0 = pnand %p20366_p13, %p20785_p4 }
  0x18   : > { %p20810_p12 = pnand %p20339_p11, %p108_p5  ;;  %s12613_s10 = sshll.u32 %s20817_s29, 13 }
  0x19   : > { %s269_s24 = sshll.u32 %s24523_s1, 4  ;;  %s18778_s11 = sshll.u32 %s20684_s14, 6  ;;  %s270_s24 = int_to_ptr.hbm [resolvable:$true] %s269_s24 }
  0x1a   : > { %20342 = dma.hbm_to_vmem [thread:$0]  (!%p20810_p12), %s270_s24, 256, %s272_s26, [#allocation6]  }
  0x1b   : > { %s24526_s3 = sld [smem:[#allocation26_spill]]  ;;  %s325_s25 = scalar_lea.vmem [#allocation9], %s12613_s10 }
  0x1c   : > { %s333_s1 = sshll.u32 %s325_s25, 4  ;;  %s24527_s2 = sld [smem:[#allocation25_spill]]  ;;  %s334_s1 = int_to_ptr.vmem [resolvable:$true] %s333_s1 }
  0x1d   : > { %s20835_s15 = scalar_lea.sflag [#allocation6], %s321_s28  ;;  %p20458_p2 = pneg %p20821_p0 }
  0x21   : > { %s330_s22 = scalar_lea.hbm %s24526_s3, %s18778_s11  ;;  %s20461_s11 = scalar_lea.hbm %s24526_s3, 16384 }
  0x22   : > { %s331_s23 = sshll.u32 %s330_s22, 4  ;;  %s281_s13 = sshll.u32 %s24527_s2, 4  ;;  %s332_s23 = int_to_ptr.hbm [resolvable:$true] %s331_s23  ;;  %s282_s13 = int_to_ptr.hbm [resolvable:$true] %s281_s13 }
  0x23   : > { %s20454_s9 = sshra.s32 %s332_s23, 4  ;;  %s20455_s9 = int_to_ptr.hbm [resolvable:$true] %s20454_s9 }
  0x24   : > { %s20456_s24 = scalar_lea.hbm %s20455_s9, 8192  ;;  %p20462_p6 = scmp.lt.s32.totalorder %s20455_s9, %s24526_s3 }
  0x25   : > { %p20457_p1 = scmp.ne.s32.totalorder %s20455_s9, %s20456_s24  ;;  %p20463_p7 = scmp.lt.s32.totalorder %s20461_s11, %s20456_s24 }
  0x27   : > { %p20459_p3 = pnand %p20458_p2, %p20457_p1  ;;  %p20464_p11 = por %p20463_p7, %p20462_p6 }
  0x29   : > { %p20460_p4 = pneg %p20459_p3 }
  0x2b   : > { %p20465_p13 = pnand %p20464_p11, %p20460_p4 }
  0x2d   : > { %20468 = shalt.err (!%p20465_p13)
}
  0x2e   : > { %s20687_s18 = smov 2048   ;;  %s20688_s28 = smov 1024  }
  0x2f   : > { %s20689_s22 = smov 64   ;;  %s20690_s25 = smov [#allocation7]  }
  0x30   : > { %20355 = dma.hbm_to_vmem [thread:$0]  (!%p20821_p0), %s332_s23, 131072, %s334_s1, %s20835_s15, %s20687_s18, %s20688_s28, %s20689_s22  }
  0x31   : > { %s283_s19 = sshll.u32 %s20690_s25, 4  ;;  %s12616_s26 = sshll.u32 %s20817_s29, 4  ;;  %s284_s19 = int_to_ptr.vmem [resolvable:$true] %s283_s19 }
  0x32   : > { %20345 = dma.hbm_to_vmem [thread:$0]  (!%p20810_p12), %s282_s13, 128, %s284_s19, [#allocation8]  }
  0x33   : > { %s12617_s9 = sshll.u32 %s20684_s14, 4  ;;  %s347_s24 = scalar_lea.vmem [#allocation10], %s12616_s26 }
  0x34   : > { %s355_s10 = sshll.u32 %s347_s24, 4  ;;  %s351_s17 = scalar_lea.hbm %s24503_s4, %s12617_s9  ;;  %s356_s10 = int_to_ptr.vmem [resolvable:$true] %s355_s10 }
  0x35   : > { %s353_s2 = sshll.u32 %s351_s17, 4  ;;  %s293_s1 = sshll.u32 %s24505_s6, 4  ;;  %s354_s2 = int_to_ptr.hbm [resolvable:$true] %s353_s2  ;;  %s294_s1 = int_to_ptr.hbm [resolvable:$true] %s293_s1 }
  0x36   : > { %s20514_s23 = sshra.s32 %s354_s2, 4  ;;  %s20521_s22 = scalar_lea.hbm %s24503_s4, 32  ;;  %s20515_s23 = int_to_ptr.hbm [resolvable:$true] %s20514_s23 }
  0x37   : > { %s20516_s18 = scalar_lea.hbm %s20515_s23, 16  ;;  %p20522_p6 = scmp.lt.s32.totalorder %s20515_s23, %s24503_s4 }
  0x38   : > { %p20517_p1 = scmp.ne.s32.totalorder %s20515_s23, %s20516_s18  ;;  %p20523_p7 = scmp.lt.s32.totalorder %s20521_s22, %s20516_s18 }
  0x3a   : > { %p20519_p3 = pnand %p20517_p1, %p20458_p2  ;;  %p20524_p11 = por %p20523_p7, %p20522_p6 }
  0x3c   : > { %p20520_p4 = pneg %p20519_p3 }
  0x3e   : > { %p20525_p13 = pnand %p20524_p11, %p20520_p4 }
  0x40   : > { %20528 = shalt.err (!%p20525_p13)
}
  0x41   : > { %20358 = dma.hbm_to_vmem [thread:$0]  (!%p20821_p0), %s354_s2, 256, %s356_s10, %s20835_s15  }
  0x42   : > { %s305_s26 = sshll.u32 %s24506_s7, 4  ;;  %s20691_s9 = smov [#allocation12]   ;;  %s306_s26 = int_to_ptr.hbm [resolvable:$true] %s305_s26 }
  0x43   : > { %s295_s24 = sshll.u32 %s20691_s9, 4  ;;  %s20692_s11 = smov [#allocation13]   ;;  %s296_s24 = int_to_ptr.vmem [resolvable:$true] %s295_s24 }
  0x44   : > { %20348 = dma.hbm_to_vmem [thread:$0]  (!%p20810_p12), %s294_s1, 64, %s296_s24, [#allocation8]  }
  0x45   : > { %s307_s16 = sshll.u32 %s20692_s11, 4  ;;  %s12618_s17 = sshll.u32 %s20817_s29, 12  ;;  %s308_s16 = int_to_ptr.vmem [resolvable:$true] %s307_s16 }
  0x46   : > { %20351 = dma.hbm_to_vmem [thread:$0]  (!%p20810_p12), %s306_s26, 64, %s308_s16, [#allocation14]  }
  0x47   : > { %s18780_s23 = sshll.u32 %s20684_s14, 12  ;;  %s366_s18 = scalar_lea.vmem [#allocation11], %s12618_s17 }
  0x48   : > { %s375_s2 = sshll.u32 %s366_s18, 4  ;;  %s372_s28 = scalar_lea.hbm %s24504_s5, %s18780_s23  ;;  %s376_s2 = int_to_ptr.vmem [resolvable:$true] %s375_s2 }
  0x49   : > { %s373_s22 = sshll.u32 %s372_s28, 4  ;;  %s20611_s14 = scalar_lea.hbm %s24504_s5, 8192  ;;  %s374_s22 = int_to_ptr.hbm [resolvable:$true] %s373_s22 }
  0x4a   : > { %s20604_s25 = sshra.s32 %s374_s22, 4  ;;  %s20605_s25 = int_to_ptr.hbm [resolvable:$true] %s20604_s25 }
  0x4b   : > { %s20606_s1 = scalar_lea.hbm %s20605_s25, 4096  ;;  %p20612_p12 = scmp.lt.s32.totalorder %s20605_s25, %s24504_s5 }
  0x4c   : > { %p20607_p1 = scmp.ne.s32.totalorder %s20605_s25, %s20606_s1  ;;  %p20613_p6 = scmp.lt.s32.totalorder %s20611_s14, %s20606_s1 }
  0x4e   : > { %p20609_p3 = pnand %p20607_p1, %p20458_p2  ;;  %p20614_p7 = por %p20613_p6, %p20612_p12 }
  0x50   : > { %p20610_p4 = pneg %p20609_p3 }
  0x52   : > { %p20615_p11 = pnand %p20614_p7, %p20610_p4 }
  0x54   : > { %20618 = shalt.err (!%p20615_p11)
}
  0x55   : > { %s20693_s3 = smov 256   ;;  %s20694_s26 = smov 16  }
  0x56   : > { %20361 = dma.hbm_to_vmem [thread:$0]  (!%p20821_p0), %s374_s22, 65536, %s376_s2, %s20835_s15, %s20693_s3, %s20693_s3, %s20694_s26  }
  0x57   : > { %387 = sbr.rel (%p20799_p10) target bundleno = 2594 (0xa22), region = 56 }
  0x5c   : > { %20651 = dma.done.wait (%p108_p5), [#allocation6], 256  }
  0x5d   : > { %20653 = vsyncadd (%p108_p5), [#allocation6], 4294967040 }
  0x5e   : > { %20655 = dma.done.wait (%p108_p5), [#allocation8], 128  }
  0x5f   : > { %20657 = vsyncadd (%p108_p5), [#allocation8], 4294967168  ;;  %s399_s30 = sand.u32 1, %s20770_s8   ;;  %s401_s15 = sand.u32 1, %s20676_s12  }
  0x60   : > { %s12625_s9 = sshll.u32 %s401_s15, 13  ;;  %s400_s21 = scalar_lea.sflag [#allocation6], %s399_s30 }
  0x61   : > { %s20909_s24 = scalar_lea.vmem [#allocation9], %s12625_s9 }
  0x62   : > { %20659 = dma.done.wait (%p20794_p8), %s400_s21, 196864  }
  0x63   : > { %20661 = vsyncadd (%p20794_p8), %s400_s21, 4294770432  ;;  %s12626_s11 = sshll.u32 %s401_s15, 4  ;;  %s12627_s16 = sshll.u32 %s401_s15, 12 }
  0x64   : > { %s20915_s17 = scalar_lea.vmem [#allocation10], %s12626_s11  ;;  %s20917_s23 = scalar_lea.vmem [#allocation11], %s12627_s16 }
  0x65   : > { %20663 = dma.done.wait (%p108_p5), [#allocation8], 64  }
  0x66   : > { %20665 = vsyncadd (%p108_p5), [#allocation8], 4294967232 }
  0x67   : > { %20667 = dma.done.wait (%p108_p5), [#allocation14], 64  }
  0x68   : > { %20669 = vsyncadd (%p108_p5), [#allocation14], 4294967232  ;;  %480 = sbr.rel (%p12608_p9) target bundleno = 247 (0xf7), region = 88  ;;  %s24528_s2 = sld [smem:[#allocation23_spill]] (!%p12608_p9) }
  0x6d   : > { %v20695_v2 = vmov 0   ;;  %v20696_v3 = vmov 1   ;;  %v20697_v4 = vmov 0.0   ;;  %v482_v5 = vld [vmem:[#allocation5] sm:$0xff]  ;;  %v483_v6 = vld [vmem:[#allocation5 + $0x8] sm:$0xff]  ;;  %v484_v15 = vld [vmem:[#allocation7] sm:$0xff] }
  0x6e   : > { %v481_v1 = vld [vmem:[%s24528_s2] sm:$0xff]  ;;  %20415 = vset.pattern.permute.xlu0 %v20695_v2  ;;  %609 = vst [vmem:[#allocation3] sm:$0xff] %v20697_v4  ;;  %v492_v7 = vperm.slane %v482_v5, 0  ;;  %v493_v8 = vperm.slane %v482_v5, 2  ;;  %v494_v9 = vperm.slane %v482_v5, 4  ;;  %v495_v10 = vperm.slane %v482_v5, 6 }
  0x6f   : > { %487 = vperm.xlu0 %20415, %v481_v1   ;;  %610 = vst [vmem:[#allocation3 + $0x18] sm:$0xff] %v20697_v4  ;;  %v496_v11 = vperm.slane %v483_v6, 0  ;;  %v497_v12 = vperm.slane %v483_v6, 2  ;;  %v498_v13 = vperm.slane %v483_v6, 4  ;;  %v499_v14 = vperm.slane %v483_v6, 6 }
  0x70   : > { %611 = vst [vmem:[#allocation3 + $0x8] sm:$0xff] %v20697_v4  ;;  %v508_v16 = vperm.slane %v492_v7, 0  ;;  %v509_v17 = vperm.slane %v493_v8, 0  ;;  %v510_v18 = vperm.slane %v494_v9, 0  ;;  %v511_v19 = vperm.slane %v495_v10, 0 }
  0x71   : > { %612 = vst [vmem:[#allocation3 + $0x10] sm:$0xff] %v20697_v4  ;;  %v512_v20 = vperm.slane %v496_v11, 0  ;;  %v513_v21 = vperm.slane %v497_v12, 0  ;;  %v514_v22 = vperm.slane %v498_v13, 0  ;;  %v515_v23 = vperm.slane %v499_v14, 0 }
  0x72   : > { %v525_v25 = vperm.slane %v484_v15, 0  ;;  %v526_v26 = vperm.slane %v484_v15, 1  ;;  %v527_v27 = vperm.slane %v484_v15, 2  ;;  %v528_v28 = vperm.slane %v484_v15, 3 }
  0x73   : > { %v529_v29 = vperm.slane %v484_v15, 4  ;;  %v530_v30 = vperm.slane %v484_v15, 5  ;;  %v531_v31 = vperm.slane %v484_v15, 6  ;;  %v532_v32 = vperm.slane %v484_v15, 7 }
  0x74   : > { %v553_v33 = vperm.slane %v482_v5, 1  ;;  %v554_v34 = vperm.slane %v482_v5, 3  ;;  %v555_v35 = vperm.slane %v482_v5, 5  ;;  %v556_v36 = vperm.slane %v482_v5, 7 }
  0x75   : > { %v557_v37 = vperm.slane %v483_v6, 1  ;;  %v558_v38 = vperm.slane %v483_v6, 3  ;;  %v559_v39 = vperm.slane %v483_v6, 5  ;;  %v560_v40 = vperm.slane %v483_v6, 7 }
  0x76   : > { %v569_v49 = vperm.slane %v553_v33, 1  ;;  %v570_v50 = vperm.slane %v554_v34, 1  ;;  %v571_v51 = vperm.slane %v555_v35, 1  ;;  %v572_v52 = vperm.slane %v556_v36, 1 }
  0x77   : > { %20416 = vset.pattern.permute.xlu0 %v20696_v3  ;;  %v573_v53 = vperm.slane %v557_v37, 1  ;;  %v574_v54 = vperm.slane %v558_v38, 1  ;;  %v575_v55 = vperm.slane %v559_v39, 1  ;;  %v576_v56 = vperm.slane %v560_v40, 1 }
  0x78   : > { %550 = vperm.xlu0 %20416, %v481_v1  }
  0xe1   : > { %v488_v24 = vpop.permute.xlu0 %487 }
  0xe2   : > { %v516_v41 = vmul.f32 %v508_v16, %v488_v24  ;;  %v517_v42 = vmul.f32 %v509_v17, %v488_v24  ;;  %v518_v43 = vmul.f32 %v510_v18, %v488_v24  ;;  %v519_v44 = vmul.f32 %v511_v19, %v488_v24 }
  0xe3   : > { %v520_v45 = vmul.f32 %v512_v20, %v488_v24  ;;  %v521_v46 = vmul.f32 %v513_v21, %v488_v24  ;;  %v522_v47 = vmul.f32 %v514_v22, %v488_v24  ;;  %v523_v48 = vmul.f32 %v515_v23, %v488_v24 }
  0xe4   : > { %v541_v57 = vadd.f32 %v525_v25, %v516_v41  ;;  %v542_v58 = vadd.f32 %v526_v26, %v517_v42  ;;  %v543_v59 = vadd.f32 %v527_v27, %v518_v43  ;;  %v544_v60 = vadd.f32 %v528_v28, %v519_v44 }
  0xe5   : > { %v545_v61 = vadd.f32 %v529_v29, %v520_v45  ;;  %v546_v62 = vadd.f32 %v530_v30, %v521_v46  ;;  %v547_v63 = vadd.f32 %v531_v31, %v522_v47  ;;  %v548_v0 = vadd.f32 %v532_v32, %v523_v48 }
  0xea   : > { %v551_v1 = vpop.permute.xlu0 %550 }
  0xeb   : > { %v577_v2 = vmul.f32 %v569_v49, %v551_v1  ;;  %v578_v3 = vmul.f32 %v570_v50, %v551_v1  ;;  %v579_v4 = vmul.f32 %v571_v51, %v551_v1  ;;  %v580_v5 = vmul.f32 %v572_v52, %v551_v1 }
  0xec   : > { %v581_v6 = vmul.f32 %v573_v53, %v551_v1  ;;  %v582_v7 = vmul.f32 %v574_v54, %v551_v1  ;;  %v583_v8 = vmul.f32 %v575_v55, %v551_v1  ;;  %v584_v9 = vmul.f32 %v576_v56, %v551_v1 }
  0xed   : > { %v585_v10 = vadd.f32 %v577_v2, %v541_v57  ;;  %v586_v11 = vadd.f32 %v578_v3, %v542_v58  ;;  %v587_v12 = vadd.f32 %v579_v4, %v543_v59  ;;  %v588_v13 = vadd.f32 %v580_v5, %v544_v60 }
  0xee   : > { %v589_v14 = vadd.f32 %v581_v6, %v545_v61  ;;  %v590_v15 = vadd.f32 %v582_v7, %v546_v62  ;;  %v591_v16 = vadd.f32 %v583_v8, %v547_v63  ;;  %v592_v17 = vadd.f32 %v584_v9, %v548_v0 }
  0xef   : > { %v593_v18 = vmax.f32 %v585_v10, 0.0  ;;  %v594_v19 = vmax.f32 %v586_v11, 0.0  ;;  %v595_v20 = vmax.f32 %v587_v12, 0.0  ;;  %v596_v21 = vmax.f32 %v588_v13, 0.0 }
  0xf0   : > { %v597_v22 = vmax.f32 %v589_v14, 0.0  ;;  %v598_v23 = vmax.f32 %v590_v15, 0.0  ;;  %v599_v24 = vmax.f32 %v591_v16, 0.0  ;;  %v600_v25 = vmax.f32 %v592_v17, 0.0 }
  0xf1   : > { %v601_v26 = vpack.c.bf16 %v594_v19, %v593_v18  ;;  %v602_v27 = vpack.c.bf16 %v596_v21, %v595_v20 }
  0xf2   : > { %v603_v28 = vpack.c.bf16 %v598_v23, %v597_v22  ;;  %v604_v29 = vpack.c.bf16 %v600_v25, %v599_v24 }
  0xf3   : > { %605 = vst [vmem:[#allocation2 + $0x10] sm:$0xff] %v601_v26 }
  0xf4   : > { %606 = vst [vmem:[#allocation2] sm:$0xff] %v602_v27 }
  0xf5   : > { %607 = vst [vmem:[#allocation2 + $0x18] sm:$0xff] %v603_v28 }
  0xf6   : > { %608 = vst [vmem:[#allocation2 + $0x8] sm:$0xff] %v604_v29 }
  0xf7 PF: > { %v13081_v30 = vld [vmem:[%s20909_s24 + $0x380] sm:$0xf]  ;;  %p18775_p5 = scmp.ne.s32.totalorder %s20770_s8, 1 }
  0xf8   : > { %v18901_v31 = vld [vmem:[%s20909_s24 + $0x3bc] sm:$0xf0]  ;;  %s24529_s13 = sld [smem:[#allocation27_spill]] (!%p18775_p5) }
  0xf9   : > { %v13593_v32 = vld [vmem:[%s20909_s24 + $0x780] sm:$0xf]  ;;  %v13082_v33 = vor.u32 %v18901_v31, %v13081_v30 }
  0xfa   : > { %v19029_v34 = vld [vmem:[%s20909_s24 + $0x7bc] sm:$0xf0] }
  0xfb   : > { %v14105_v35 = vld [vmem:[%s20909_s24 + $0xb80] sm:$0xf]  ;;  %v13594_v37 = vor.u32 %v19029_v34, %v13593_v32  ;;  %6825 = vmatpush.bf16.msra.mxu0 %v13082_v33 }
  0xfc   : > { %v19157_v36 = vld [vmem:[%s20909_s24 + $0xbbc] sm:$0xf0] }
  0xfd   : > { %v14106_v38 = vor.u32 %v19157_v36, %v14105_v35  ;;  %v14617_v39 = vld [vmem:[%s20909_s24 + $0xf80] sm:$0xf]  ;;  %6838 = vmatpush.bf16.msra.mxu1 %v13594_v37 }
  0xfe   : > { %v19285_v40 = vld [vmem:[%s20909_s24 + $0xfbc] sm:$0xf0] }
  0xff   : > { %v13017_v41 = vld [vmem:[%s20909_s24 + $0x300] sm:$0xf]  ;;  %v14618_v42 = vor.u32 %v19285_v40, %v14617_v39  ;;  %6851 = vmatpush.bf16.msra.mxu2 %v14106_v38 }
 0x100   : > { %v18885_v43 = vld [vmem:[%s20909_s24 + $0x33c] sm:$0xf0] }
 0x101   : > { %v13529_v44 = vld [vmem:[%s20909_s24 + $0x700] sm:$0xf]  ;;  %v13018_v46 = vor.u32 %v18885_v43, %v13017_v41  ;;  %6864 = vmatpush.bf16.msra.mxu3 %v14618_v42 }
 0x102   : > { %v19013_v45 = vld [vmem:[%s20909_s24 + $0x73c] sm:$0xf0] }
 0x103   : > { %v13530_v47 = vor.u32 %v19013_v45, %v13529_v44  ;;  %v14041_v48 = vld [vmem:[%s20909_s24 + $0xb00] sm:$0xf]  ;;  %6826 = vmatpush.bf16.msra.mxu0 %v13018_v46 }
 0x104   : > { %v19141_v49 = vld [vmem:[%s20909_s24 + $0xb3c] sm:$0xf0] }
 0x105   : > { %v14553_v50 = vld [vmem:[%s20909_s24 + $0xf00] sm:$0xf]  ;;  %v14042_v51 = vor.u32 %v19141_v49, %v14041_v48  ;;  %6839 = vmatpush.bf16.msra.mxu1 %v13530_v47 }
 0x106   : > { %v19269_v52 = vld [vmem:[%s20909_s24 + $0xf3c] sm:$0xf0] }
 0x107   : > { %v12953_v53 = vld [vmem:[%s20909_s24 + $0x280] sm:$0xf]  ;;  %v14554_v55 = vor.u32 %v19269_v52, %v14553_v50  ;;  %6852 = vmatpush.bf16.msra.mxu2 %v14042_v51 }
 0x108   : > { %v18869_v54 = vld [vmem:[%s20909_s24 + $0x2bc] sm:$0xf0] }
 0x109   : > { %v13465_v56 = vld [vmem:[%s20909_s24 + $0x680] sm:$0xf]  ;;  %v12954_v59 = vor.u32 %v18869_v54, %v12953_v53  ;;  %6865 = vmatpush.bf16.msra.mxu3 %v14554_v55 }
 0x10a   : > { %v18997_v57 = vld [vmem:[%s20909_s24 + $0x6bc] sm:$0xf0] }
 0x10b   : > { %v13977_v58 = vld [vmem:[%s20909_s24 + $0xa80] sm:$0xf]  ;;  %v13466_v63 = vor.u32 %v18997_v57, %v13465_v56  ;;  %6827 = vmatpush.bf16.msra.mxu0 %v12954_v59 }
 0x10c   : > { %v19125_v60 = vld [vmem:[%s20909_s24 + $0xabc] sm:$0xf0] }
 0x10d   : > { %v14489_v61 = vld [vmem:[%s20909_s24 + $0xe80] sm:$0xf]  ;;  %v13978_v0 = vor.u32 %v19125_v60, %v13977_v58  ;;  %6840 = vmatpush.bf16.msra.mxu1 %v13466_v63 }
 0x10e   : > { %v19253_v62 = vld [vmem:[%s20909_s24 + $0xebc] sm:$0xf0] }
 0x10f   : > { %v12889_v1 = vld [vmem:[%s20909_s24 + $0x200] sm:$0xf]  ;;  %v14490_v4 = vor.u32 %v19253_v62, %v14489_v61  ;;  %6853 = vmatpush.bf16.msra.mxu2 %v13978_v0 }
 0x110   : > { %v18853_v2 = vld [vmem:[%s20909_s24 + $0x23c] sm:$0xf0] }
 0x111   : > { %v13401_v3 = vld [vmem:[%s20909_s24 + $0x600] sm:$0xf]  ;;  %v12890_v10 = vor.u32 %v18853_v2, %v12889_v1  ;;  %6866 = vmatpush.bf16.msra.mxu3 %v14490_v4 }
 0x112   : > { %v18981_v5 = vld [vmem:[%s20909_s24 + $0x63c] sm:$0xf0] }
 0x113   : > { %v13913_v6 = vld [vmem:[%s20909_s24 + $0xa00] sm:$0xf]  ;;  %v13402_v11 = vor.u32 %v18981_v5, %v13401_v3  ;;  %6828 = vmatpush.bf16.msra.mxu0 %v12890_v10 }
 0x114   : > { %v19109_v7 = vld [vmem:[%s20909_s24 + $0xa3c] sm:$0xf0] }
 0x115   : > { %v14425_v8 = vld [vmem:[%s20909_s24 + $0xe00] sm:$0xf]  ;;  %v13914_v12 = vor.u32 %v19109_v7, %v13913_v6  ;;  %6841 = vmatpush.bf16.msra.mxu1 %v13402_v11 }
 0x116   : > { %v19237_v9 = vld [vmem:[%s20909_s24 + $0xe3c] sm:$0xf0] }
 0x117   : > { %v12825_v13 = vld [vmem:[%s20909_s24 + $0x180] sm:$0xf]  ;;  %v14426_v16 = vor.u32 %v19237_v9, %v14425_v8  ;;  %6854 = vmatpush.bf16.msra.mxu2 %v13914_v12 }
 0x118   : > { %v18837_v14 = vld [vmem:[%s20909_s24 + $0x1bc] sm:$0xf0] }
 0x119   : > { %v13337_v15 = vld [vmem:[%s20909_s24 + $0x580] sm:$0xf]  ;;  %v12826_v22 = vor.u32 %v18837_v14, %v12825_v13  ;;  %6867 = vmatpush.bf16.msra.mxu3 %v14426_v16 }
 0x11a   : > { %v18965_v17 = vld [vmem:[%s20909_s24 + $0x5bc] sm:$0xf0] }
 0x11b   : > { %v13849_v18 = vld [vmem:[%s20909_s24 + $0x980] sm:$0xf]  ;;  %v13338_v23 = vor.u32 %v18965_v17, %v13337_v15  ;;  %6829 = vmatpush.bf16.msra.mxu0 %v12826_v22 }
 0x11c   : > { %v19093_v19 = vld [vmem:[%s20909_s24 + $0x9bc] sm:$0xf0] }
 0x11d   : > { %v14361_v20 = vld [vmem:[%s20909_s24 + $0xd80] sm:$0xf]  ;;  %v13850_v24 = vor.u32 %v19093_v19, %v13849_v18  ;;  %6842 = vmatpush.bf16.msra.mxu1 %v13338_v23 }
 0x11e   : > { %v19221_v21 = vld [vmem:[%s20909_s24 + $0xdbc] sm:$0xf0] }
 0x11f   : > { %v12761_v25 = vld [vmem:[%s20909_s24 + $0x100] sm:$0xf]  ;;  %v14362_v28 = vor.u32 %v19221_v21, %v14361_v20  ;;  %6855 = vmatpush.bf16.msra.mxu2 %v13850_v24  ;;  %v614_v24 = vld [vmem:[#allocation2] sm:$0xff] }
 0x120   : > { %v18821_v26 = vld [vmem:[%s20909_s24 + $0x13c] sm:$0xf0] }
 0x121   : > { %v13273_v27 = vld [vmem:[%s20909_s24 + $0x500] sm:$0xf]  ;;  %v12762_v34 = vor.u32 %v18821_v26, %v12761_v25  ;;  %6868 = vmatpush.bf16.msra.mxu3 %v14362_v28 }
 0x122   : > { %v18949_v29 = vld [vmem:[%s20909_s24 + $0x53c] sm:$0xf0] }
 0x123   : > { %v13785_v30 = vld [vmem:[%s20909_s24 + $0x900] sm:$0xf]  ;;  %v13274_v35 = vor.u32 %v18949_v29, %v13273_v27  ;;  %6830 = vmatpush.bf16.msra.mxu0 %v12762_v34  ;;  %v1683_v29 = vunpack.c.l.b16 %v614_v24 }
 0x124   : > { %v19077_v31 = vld [vmem:[%s20909_s24 + $0x93c] sm:$0xf0] }
 0x125   : > { %v14297_v32 = vld [vmem:[%s20909_s24 + $0xd00] sm:$0xf]  ;;  %v13786_v36 = vor.u32 %v19077_v31, %v13785_v30  ;;  %6843 = vmatpush.bf16.msra.mxu1 %v13274_v35  ;;  %v1684_v30 = vunpack.c.h.b16 %v614_v24  ;;  %v21020_v34 = vpack.c.b16 %v1683_v29, %v1683_v29  ;;  %v613_v35 = vld [vmem:[#allocation2 + $0x10] sm:$0xff] }
 0x126   : > { %v19205_v33 = vld [vmem:[%s20909_s24 + $0xd3c] sm:$0xf0] }
 0x127   : > { %v12697_v37 = vld [vmem:[%s20909_s24 + $0x80] sm:$0xf]  ;;  %v14298_v40 = vor.u32 %v19205_v33, %v14297_v32  ;;  %6856 = vmatpush.bf16.msra.mxu2 %v13786_v36  ;;  %v21022_v36 = vpack.c.b16 %v1684_v30, %v1684_v30 }
 0x128   : > { %v18805_v38 = vld [vmem:[%s20909_s24 + $0xbc] sm:$0xf0] }
 0x129   : > { %v13209_v39 = vld [vmem:[%s20909_s24 + $0x480] sm:$0xf]  ;;  %v12698_v46 = vor.u32 %v18805_v38, %v12697_v37  ;;  %6869 = vmatpush.bf16.msra.mxu3 %v14298_v40 }
 0x12a   : > { %v18933_v41 = vld [vmem:[%s20909_s24 + $0x4bc] sm:$0xf0] }
 0x12b   : > { %v13721_v42 = vld [vmem:[%s20909_s24 + $0x880] sm:$0xf]  ;;  %v13210_v49 = vor.u32 %v18933_v41, %v13209_v39  ;;  %6831 = vmatpush.bf16.msra.mxu0 %v12698_v46 }
 0x12c   : > { %v19061_v43 = vld [vmem:[%s20909_s24 + $0x8bc] sm:$0xf0] }
 0x12d   : > { %v14233_v44 = vld [vmem:[%s20909_s24 + $0xc80] sm:$0xf]  ;;  %v13722_v50 = vor.u32 %v19061_v43, %v13721_v42  ;;  %6844 = vmatpush.bf16.msra.mxu1 %v13210_v49  ;;  %v1681_v42 = vunpack.c.l.b16 %v613_v35  ;;  %v1682_v43 = vunpack.c.h.b16 %v613_v35 }
 0x12e   : > { %v19189_v45 = vld [vmem:[%s20909_s24 + $0xcbc] sm:$0xf0] }
 0x12f   : > { %v12633_v47 = vld [vmem:[%s20909_s24] sm:$0xf]  ;;  %v14234_v54 = vor.u32 %v19189_v45, %v14233_v44  ;;  %6857 = vmatpush.bf16.msra.mxu2 %v13722_v50  ;;  %v21033_v50 = vpack.c.b16 %v1681_v42, %v1681_v42  ;;  %v19021_v42 = vld [vmem:[%s20909_s24 + $0x784] sm:$0xf] }
 0x130   : > { %v18789_v48 = vld [vmem:[%s20909_s24 + $0x3c] sm:$0xf0] }
 0x131   : > { %v13145_v51 = vld [vmem:[%s20909_s24 + $0x400] sm:$0xf]  ;;  %v12634_v61 = vor.u32 %v18789_v48, %v12633_v47  ;;  %6870 = vmatpush.bf16.msra.mxu3 %v14234_v54 }
 0x132   : > { %v18917_v52 = vld [vmem:[%s20909_s24 + $0x43c] sm:$0xf0] }
 0x133   : > { %v13657_v53 = vld [vmem:[%s20909_s24 + $0x800] sm:$0xf]  ;;  %v13146_v1 = vor.u32 %v18917_v52, %v13145_v51  ;;  %6832 = vmatpush.bf16.msra.mxu0 %v12634_v61  ;;  %v21036_v51 = vpack.c.b16 %v1682_v43, %v1682_v43 }
 0x134   : > { %v19045_v55 = vld [vmem:[%s20909_s24 + $0x83c] sm:$0xf0] }
 0x135   : > { %v14169_v56 = vld [vmem:[%s20909_s24 + $0xc00] sm:$0xf]  ;;  %v13658_v2 = vor.u32 %v19045_v55, %v13657_v53  ;;  %6845 = vmatpush.bf16.msra.mxu1 %v13146_v1 }
 0x136   : > { %v19173_v57 = vld [vmem:[%s20909_s24 + $0xc3c] sm:$0xf0]  ;;  %6833 = vmatmul.bf16.vlgmr.msra.gmra.mxu0 %v21033_v50 }
 0x137   : > { %v15129_v58 = vld [vmem:[%s20909_s24 + $0x1380] sm:$0xf]  ;;  %v14170_v5 = vor.u32 %v19173_v57, %v14169_v56  ;;  %6858 = vmatpush.bf16.msra.mxu2 %v13658_v2 }
 0x138   : > { %v19413_v59 = vld [vmem:[%s20909_s24 + $0x13bc] sm:$0xf0]  ;;  %6846 = vmatmul.bf16.vlgmr.msra.gmra.mxu1 %v21036_v51 }
 0x139   : > { %v15641_v60 = vld [vmem:[%s20909_s24 + $0x1780] sm:$0xf]  ;;  %v15130_v6 = vor.u32 %v19413_v59, %v15129_v58  ;;  %6871 = vmatpush.bf16.msra.mxu3 %v14170_v5 }
 0x13a   : > { %v19541_v62 = vld [vmem:[%s20909_s24 + $0x17bc] sm:$0xf0]  ;;  %6859 = vmatmul.bf16.vlgmr.msra.gmra.mxu2 %v21020_v34 }
 0x13b   : > { %v16153_v63 = vld [vmem:[%s20909_s24 + $0x1b80] sm:$0xf]  ;;  %v15642_v7 = vor.u32 %v19541_v62, %v15641_v60  ;;  %6877 = vmatpush.bf16.msrb.mxu0 %v15130_v6 }
 0x13c   : > { %v19669_v0 = vld [vmem:[%s20909_s24 + $0x1bbc] sm:$0xf0]  ;;  %6872 = vmatmul.bf16.vlgmr.msra.gmra.mxu3 %v21022_v36 }
 0x13d   : > { %v16665_v3 = vld [vmem:[%s20909_s24 + $0x1f80] sm:$0xf]  ;;  %v16154_v8 = vor.u32 %v19669_v0, %v16153_v63  ;;  %6890 = vmatpush.bf16.msrb.mxu1 %v15642_v7 }
 0x13e   : > { %v19797_v4 = vld [vmem:[%s20909_s24 + $0x1fbc] sm:$0xf0] }
 0x13f   : > { %v15065_v9 = vld [vmem:[%s20909_s24 + $0x1300] sm:$0xf]  ;;  %v16666_v12 = vor.u32 %v19797_v4, %v16665_v3  ;;  %6903 = vmatpush.bf16.msrb.mxu2 %v16154_v8 }
 0x140   : > { %v19397_v10 = vld [vmem:[%s20909_s24 + $0x133c] sm:$0xf0] }
 0x141   : > { %v15577_v11 = vld [vmem:[%s20909_s24 + $0x1700] sm:$0xf]  ;;  %v15066_v18 = vor.u32 %v19397_v10, %v15065_v9  ;;  %6916 = vmatpush.bf16.msrb.mxu3 %v16666_v12 }
 0x142   : > { %v19525_v13 = vld [vmem:[%s20909_s24 + $0x173c] sm:$0xf0] }
 0x143   : > { %v16089_v14 = vld [vmem:[%s20909_s24 + $0x1b00] sm:$0xf]  ;;  %v15578_v20 = vor.u32 %v19525_v13, %v15577_v11  ;;  %6878 = vmatpush.bf16.msrb.mxu0 %v15066_v18 }
 0x144   : > { %v19653_v15 = vld [vmem:[%s20909_s24 + $0x1b3c] sm:$0xf0] }
 0x145   : > { %v16601_v16 = vld [vmem:[%s20909_s24 + $0x1f00] sm:$0xf]  ;;  %v16090_v21 = vor.u32 %v19653_v15, %v16089_v14  ;;  %6891 = vmatpush.bf16.msrb.mxu1 %v15578_v20 }
 0x146   : > { %v19781_v17 = vld [vmem:[%s20909_s24 + $0x1f3c] sm:$0xf0] }
 0x147   : > { %v15001_v19 = vld [vmem:[%s20909_s24 + $0x1280] sm:$0xf]  ;;  %v16602_v25 = vor.u32 %v19781_v17, %v16601_v16  ;;  %6904 = vmatpush.bf16.msrb.mxu2 %v16090_v21 }
 0x148   : > { %v19381_v22 = vld [vmem:[%s20909_s24 + $0x12bc] sm:$0xf0] }
 0x149   : > { %v15513_v23 = vld [vmem:[%s20909_s24 + $0x1680] sm:$0xf]  ;;  %v15002_v33 = vor.u32 %v19381_v22, %v15001_v19  ;;  %6917 = vmatpush.bf16.msrb.mxu3 %v16602_v25 }
 0x14a   : > { %v19509_v26 = vld [vmem:[%s20909_s24 + $0x16bc] sm:$0xf0] }
 0x14b   : > { %v16025_v27 = vld [vmem:[%s20909_s24 + $0x1a80] sm:$0xf]  ;;  %v15514_v37 = vor.u32 %v19509_v26, %v15513_v23  ;;  %6879 = vmatpush.bf16.msrb.mxu0 %v15002_v33  ;;  %v616_v33 = vld [vmem:[#allocation2 + $0x8] sm:$0xff] }
 0x14c   : > { %v19637_v28 = vld [vmem:[%s20909_s24 + $0x1abc] sm:$0xf0] }
 0x14d   : > { %v16537_v31 = vld [vmem:[%s20909_s24 + $0x1e80] sm:$0xf]  ;;  %v16026_v38 = vor.u32 %v19637_v28, %v16025_v27  ;;  %6892 = vmatpush.bf16.msrb.mxu1 %v15514_v37 }
 0x14e   : > { %v19765_v32 = vld [vmem:[%s20909_s24 + $0x1ebc] sm:$0xf0] }
 0x14f   : > { %v14937_v39 = vld [vmem:[%s20909_s24 + $0x1200] sm:$0xf]  ;;  %v16538_v44 = vor.u32 %v19765_v32, %v16537_v31  ;;  %6905 = vmatpush.bf16.msrb.mxu2 %v16026_v38 }
 0x150   : > { %v19365_v40 = vld [vmem:[%s20909_s24 + $0x123c] sm:$0xf0] }
 0x151   : > { %v15449_v41 = vld [vmem:[%s20909_s24 + $0x1600] sm:$0xf]  ;;  %v14938_v52 = vor.u32 %v19365_v40, %v14937_v39  ;;  %6918 = vmatpush.bf16.msrb.mxu3 %v16538_v44  ;;  %v18893_v40 = vld [vmem:[%s20909_s24 + $0x384] sm:$0xf] }
 0x152   : > { %v19493_v45 = vld [vmem:[%s20909_s24 + $0x163c] sm:$0xf0]  ;;  %v13595_v44 = vld [vmem:[%s20909_s24 + $0x7c0] sm:$0xf0] }
 0x153   : > { %v15961_v46 = vld [vmem:[%s20909_s24 + $0x1a00] sm:$0xf]  ;;  %v15450_v53 = vor.u32 %v19493_v45, %v15449_v41  ;;  %6880 = vmatpush.bf16.msrb.mxu0 %v14938_v52  ;;  %v13083_v41 = vld [vmem:[%s20909_s24 + $0x3c0] sm:$0xf0] }
 0x154   : > { %v19621_v47 = vld [vmem:[%s20909_s24 + $0x1a3c] sm:$0xf0]  ;;  %v19149_v45 = vld [vmem:[%s20909_s24 + $0xb84] sm:$0xf] }
 0x155   : > { %v16473_v48 = vld [vmem:[%s20909_s24 + $0x1e00] sm:$0xf]  ;;  %v15962_v54 = vor.u32 %v19621_v47, %v15961_v46  ;;  %6893 = vmatpush.bf16.msrb.mxu1 %v15450_v53  ;;  %v14107_v46 = vld [vmem:[%s20909_s24 + $0xbc0] sm:$0xf0]  ;;  %v1687_v47 = vunpack.c.l.b16 %v616_v33 }
 0x156   : > { %v19749_v49 = vld [vmem:[%s20909_s24 + $0x1e3c] sm:$0xf0]  ;;  %v19277_v52 = vld [vmem:[%s20909_s24 + $0xf84] sm:$0xf] }
 0x157   : > { %v14873_v55 = vld [vmem:[%s20909_s24 + $0x1180] sm:$0xf]  ;;  %v16474_v58 = vor.u32 %v19749_v49, %v16473_v48  ;;  %6906 = vmatpush.bf16.msrb.mxu2 %v15962_v54  ;;  %v14619_v53 = vld [vmem:[%s20909_s24 + $0xfc0] sm:$0xf0] }
 0x158   : > { %v19349_v56 = vld [vmem:[%s20909_s24 + $0x11bc] sm:$0xf0] }
 0x159   : > { %v15385_v57 = vld [vmem:[%s20909_s24 + $0x1580] sm:$0xf]  ;;  %v14874_v0 = vor.u32 %v19349_v56, %v14873_v55  ;;  %6919 = vmatpush.bf16.msrb.mxu3 %v16474_v58  ;;  %v1688_v55 = vunpack.c.h.b16 %v616_v33  ;;  %v14427_v33 = vld [vmem:[%s20909_s24 + $0xe40] sm:$0xf0] }
 0x15a   : > { %v19477_v59 = vld [vmem:[%s20909_s24 + $0x15bc] sm:$0xf0] }
 0x15b   : > { %v15897_v60 = vld [vmem:[%s20909_s24 + $0x1980] sm:$0xf]  ;;  %v15386_v1 = vor.u32 %v19477_v59, %v15385_v57  ;;  %6881 = vmatpush.bf16.msrb.mxu0 %v14874_v0  ;;  %v13086_v57 = vor.u32 %v18893_v40, %v13083_v41  ;;  %v13598_v59 = vor.u32 %v19021_v42, %v13595_v44  ;;  %v14622_v0 = vor.u32 %v19277_v52, %v14619_v53  ;;  %v12827_v40 = vld [vmem:[%s20909_s24 + $0x1c0] sm:$0xf0] }
 0x15c   : > { %v19605_v61 = vld [vmem:[%s20909_s24 + $0x19bc] sm:$0xf0]  ;;  %v18957_v41 = vld [vmem:[%s20909_s24 + $0x584] sm:$0xf] }
 0x15d   : > { %v16409_v62 = vld [vmem:[%s20909_s24 + $0x1d80] sm:$0xf]  ;;  %v15898_v2 = vor.u32 %v19605_v61, %v15897_v60  ;;  %6894 = vmatpush.bf16.msrb.mxu1 %v15386_v1  ;;  %v14110_v60 = vor.u32 %v19149_v45, %v14107_v46  ;;  %v18877_v61 = vld [vmem:[%s20909_s24 + $0x304] sm:$0xf] }
 0x15e   : > { %v19733_v63 = vld [vmem:[%s20909_s24 + $0x1dbc] sm:$0xf0]  ;;  %v13531_v1 = vld [vmem:[%s20909_s24 + $0x740] sm:$0xf0] }
 0x15f   : > { %v14809_v3 = vld [vmem:[%s20909_s24 + $0x1100] sm:$0xf]  ;;  %v16410_v6 = vor.u32 %v19733_v63, %v16409_v62  ;;  %6907 = vmatpush.bf16.msrb.mxu2 %v15898_v2  ;;  %v13019_v62 = vld [vmem:[%s20909_s24 + $0x340] sm:$0xf0] }
 0x160   : > { %v19333_v4 = vld [vmem:[%s20909_s24 + $0x113c] sm:$0xf0]  ;;  %v19005_v63 = vld [vmem:[%s20909_s24 + $0x704] sm:$0xf] }
 0x161   : > { %v15321_v5 = vld [vmem:[%s20909_s24 + $0x1500] sm:$0xf]  ;;  %v14810_v12 = vor.u32 %v19333_v4, %v14809_v3  ;;  %6920 = vmatpush.bf16.msrb.mxu3 %v16410_v6  ;;  %v19133_v2 = vld [vmem:[%s20909_s24 + $0xb04] sm:$0xf]  ;;  %v21086_v4 = vpack.c.b16 %v1687_v47, %v1687_v47 }
 0x162   : > { %v19461_v7 = vld [vmem:[%s20909_s24 + $0x153c] sm:$0xf0]  ;;  %v14043_v3 = vld [vmem:[%s20909_s24 + $0xb40] sm:$0xf0] }
 0x163   : > { %v15833_v8 = vld [vmem:[%s20909_s24 + $0x1900] sm:$0xf]  ;;  %v15322_v13 = vor.u32 %v19461_v7, %v15321_v5  ;;  %6882 = vmatpush.bf16.msrb.mxu0 %v14810_v12  ;;  %v19261_v5 = vld [vmem:[%s20909_s24 + $0xf04] sm:$0xf]  ;;  %v14046_v12 = vor.u32 %v19133_v2, %v14043_v3 }
 0x164   : > { %v19589_v9 = vld [vmem:[%s20909_s24 + $0x193c] sm:$0xf0]  ;;  %v14555_v6 = vld [vmem:[%s20909_s24 + $0xf40] sm:$0xf0] }
 0x165   : > { %v16345_v10 = vld [vmem:[%s20909_s24 + $0x1d00] sm:$0xf]  ;;  %v15834_v14 = vor.u32 %v19589_v9, %v15833_v8  ;;  %6895 = vmatpush.bf16.msrb.mxu1 %v15322_v13  ;;  %v21092_v8 = vpack.c.b16 %v1688_v55, %v1688_v55  ;;  %v13022_v9 = vor.u32 %v18877_v61, %v13019_v62  ;;  %v18861_v13 = vld [vmem:[%s20909_s24 + $0x284] sm:$0xf] }
 0x166   : > { %v19717_v11 = vld [vmem:[%s20909_s24 + $0x1d3c] sm:$0xf0]  ;;  %v19085_v44 = vld [vmem:[%s20909_s24 + $0x984] sm:$0xf] }
 0x167   : > { %v14745_v15 = vld [vmem:[%s20909_s24 + $0x1080] sm:$0xf]  ;;  %v16346_v18 = vor.u32 %v19717_v11, %v16345_v10  ;;  %6908 = vmatpush.bf16.msrb.mxu2 %v15834_v14  ;;  %v13534_v11 = vor.u32 %v19005_v63, %v13531_v1  ;;  %v12955_v14 = vld [vmem:[%s20909_s24 + $0x2c0] sm:$0xf0] }
 0x168   : > { %v19317_v16 = vld [vmem:[%s20909_s24 + $0x10bc] sm:$0xf0]  ;;  %v13851_v45 = vld [vmem:[%s20909_s24 + $0x9c0] sm:$0xf0] }
 0x169   : > { %v15257_v17 = vld [vmem:[%s20909_s24 + $0x1480] sm:$0xf]  ;;  %v14746_v25 = vor.u32 %v19317_v16, %v14745_v15  ;;  %6921 = vmatpush.bf16.msrb.mxu3 %v16346_v18  ;;  %v18989_v15 = vld [vmem:[%s20909_s24 + $0x684] sm:$0xf]  ;;  %v14558_v16 = vor.u32 %v19261_v5, %v14555_v6  ;;  %v13854_v52 = vor.u32 %v19085_v44, %v13851_v45 }
 0x16a   : > { %v19445_v19 = vld [vmem:[%s20909_s24 + $0x14bc] sm:$0xf0]  ;;  %v19117_v18 = vld [vmem:[%s20909_s24 + $0xa84] sm:$0xf] }
 0x16b   : > { %v15769_v20 = vld [vmem:[%s20909_s24 + $0x1880] sm:$0xf]  ;;  %v15258_v29 = vor.u32 %v19445_v19, %v15257_v17  ;;  %6883 = vmatpush.bf16.msrb.mxu0 %v14746_v25  ;;  %v13467_v17 = vld [vmem:[%s20909_s24 + $0x6c0] sm:$0xf0] }
 0x16c   : > { %v19573_v21 = vld [vmem:[%s20909_s24 + $0x18bc] sm:$0xf0]  ;;  %v13979_v19 = vld [vmem:[%s20909_s24 + $0xac0] sm:$0xf0] }
 0x16d   : > { %v16281_v22 = vld [vmem:[%s20909_s24 + $0x1c80] sm:$0xf]  ;;  %v15770_v30 = vor.u32 %v19573_v21, %v15769_v20  ;;  %6896 = vmatpush.bf16.msrb.mxu1 %v15258_v29  ;;  %v19245_v20 = vld [vmem:[%s20909_s24 + $0xe84] sm:$0xf] }
 0x16e   : > { %v19701_v23 = vld [vmem:[%s20909_s24 + $0x1cbc] sm:$0xf0]  ;;  %v14491_v21 = vld [vmem:[%s20909_s24 + $0xec0] sm:$0xf0] }
 0x16f   : > { %v14681_v24 = vld [vmem:[%s20909_s24 + $0x1000] sm:$0xf]  ;;  %v16282_v35 = vor.u32 %v19701_v23, %v16281_v22  ;;  %6909 = vmatpush.bf16.msrb.mxu2 %v15770_v30  ;;  %v12958_v22 = vor.u32 %v18861_v13, %v12955_v14  ;;  %v13470_v23 = vor.u32 %v18989_v15, %v13467_v17  ;;  %v18845_v25 = vld [vmem:[%s20909_s24 + $0x204] sm:$0xf] }
 0x170   : > { %v19301_v26 = vld [vmem:[%s20909_s24 + $0x103c] sm:$0xf0]  ;;  %v13403_v29 = vld [vmem:[%s20909_s24 + $0x640] sm:$0xf0] }
 0x171   : > { %v15193_v27 = vld [vmem:[%s20909_s24 + $0x1400] sm:$0xf]  ;;  %v14682_v43 = vor.u32 %v19301_v26, %v14681_v24  ;;  %6922 = vmatpush.bf16.msrb.mxu3 %v16282_v35  ;;  %v13982_v24 = vor.u32 %v19117_v18, %v13979_v19  ;;  %v12891_v26 = vld [vmem:[%s20909_s24 + $0x240] sm:$0xf0] }
 0x172   : > { %v19429_v28 = vld [vmem:[%s20909_s24 + $0x143c] sm:$0xf0]  ;;  %v19101_v30 = vld [vmem:[%s20909_s24 + $0xa04] sm:$0xf]  ;;  %v12894_v35 = vor.u32 %v18845_v25, %v12891_v26 }
 0x173   : > { %v15705_v31 = vld [vmem:[%s20909_s24 + $0x1800] sm:$0xf]  ;;  %v15194_v48 = vor.u32 %v19429_v28, %v15193_v27  ;;  %6884 = vmatpush.bf16.msrb.mxu0 %v14682_v43  ;;  %v18973_v27 = vld [vmem:[%s20909_s24 + $0x604] sm:$0xf]  ;;  %v14494_v28 = vor.u32 %v19245_v20, %v14491_v21 }
 0x174   : > { %v19557_v32 = vld [vmem:[%s20909_s24 + $0x183c] sm:$0xf0]  ;;  %v13339_v43 = vld [vmem:[%s20909_s24 + $0x5c0] sm:$0xf0] }
 0x175   : > { %v16217_v37 = vld [vmem:[%s20909_s24 + $0x1c00] sm:$0xf]  ;;  %v15706_v49 = vor.u32 %v19557_v32, %v15705_v31  ;;  %6897 = vmatpush.bf16.msrb.mxu1 %v15194_v48  ;;  %v13915_v31 = vld [vmem:[%s20909_s24 + $0xa40] sm:$0xf0] }
 0x176   : > { %v19685_v38 = vld [vmem:[%s20909_s24 + $0x1c3c] sm:$0xf0]  ;;  %v19229_v32 = vld [vmem:[%s20909_s24 + $0xe04] sm:$0xf] }
 0x177   : > { %v615_v39 = vld [vmem:[#allocation2 + $0x18] sm:$0xff]  ;;  %v16218_v56 = vor.u32 %v19685_v38, %v16217_v37  ;;  %6910 = vmatpush.bf16.msrb.mxu2 %v15706_v49  ;;  %6929 = vmatpush.bf16.msra.mxu0 %v13086_v57  ;;  %v13406_v37 = vor.u32 %v18973_v27, %v13403_v29  ;;  %v13918_v38 = vor.u32 %v19101_v30, %v13915_v31 }
 0x178   : > { %v1685_v54 = vunpack.c.l.b16 %v615_v39  ;;  %v1686_v58 = vunpack.c.h.b16 %v615_v39  ;;  %v18829_v39 = vld [vmem:[%s20909_s24 + $0x184] sm:$0xf]  ;;  %v14430_v42 = vor.u32 %v19229_v32, %v14427_v33  ;;  %v13342_v49 = vor.u32 %v18957_v41, %v13339_v43 }
 0x179   : > { %6923 = vmatpush.bf16.msrb.mxu3 %v16218_v56  ;;  %6942 = vmatpush.bf16.msra.mxu1 %v13598_v59  ;;  %v19213_v46 = vld [vmem:[%s20909_s24 + $0xd84] sm:$0xf]  ;;  %v12830_v48 = vor.u32 %v18829_v39, %v12827_v40 }
 0x17a   : > { %v21090_v7 = vpack.c.b16 %v1685_v54, %v1685_v54  ;;  %v21094_v10 = vpack.c.b16 %v1686_v58, %v1686_v58  ;;  %6911 = vmatmul.bf16.vlgmr.msrb.gmra.mxu2 %v21086_v4  ;;  %v14363_v47 = vld [vmem:[%s20909_s24 + $0xdc0] sm:$0xf0] }
 0x17b   : > { %6955 = vmatpush.bf16.msra.mxu2 %v14110_v60  ;;  %6930 = vmatpush.bf16.msra.mxu0 %v13022_v9  ;;  %v18813_v53 = vld [vmem:[%s20909_s24 + $0x104] sm:$0xf]  ;;  %v14366_v56 = vor.u32 %v19213_v46, %v14363_v47 }
 0x17c   : > { %6885 = vmatmul.bf16.vlgmr.msrb.gmra.mxu0 %v21090_v7  ;;  %6924 = vmatmul.bf16.vlgmr.msrb.gmra.mxu3 %v21092_v8  ;;  %v12763_v54 = vld [vmem:[%s20909_s24 + $0x140] sm:$0xf0] }
 0x17d   : > { %6968 = vmatpush.bf16.msra.mxu3 %v14622_v0  ;;  %6898 = vmatmul.bf16.vlgmr.msrb.gmra.mxu1 %v21094_v10  ;;  %v18941_v55 = vld [vmem:[%s20909_s24 + $0x504] sm:$0xf]  ;;  %v12766_v62 = vor.u32 %v18813_v53, %v12763_v54 }
 0x17e   : > { %6943 = vmatpush.bf16.msra.mxu1 %v13534_v11  ;;  %v13275_v57 = vld [vmem:[%s20909_s24 + $0x540] sm:$0xf0] }
 0x17f   : > { %6956 = vmatpush.bf16.msra.mxu2 %v14046_v12  ;;  %6931 = vmatpush.bf16.msra.mxu0 %v12958_v22  ;;  %v19069_v58 = vld [vmem:[%s20909_s24 + $0x904] sm:$0xf]  ;;  %v13278_v63 = vor.u32 %v18941_v55, %v13275_v57 }
 0x180   : > { %v13787_v59 = vld [vmem:[%s20909_s24 + $0x940] sm:$0xf0] }
 0x181   : > { %6969 = vmatpush.bf16.msra.mxu3 %v14558_v16  ;;  %v19197_v60 = vld [vmem:[%s20909_s24 + $0xd04] sm:$0xf]  ;;  %v13790_v0 = vor.u32 %v19069_v58, %v13787_v59 }
 0x182   : > { %6944 = vmatpush.bf16.msra.mxu1 %v13470_v23  ;;  %v14299_v61 = vld [vmem:[%s20909_s24 + $0xd40] sm:$0xf0] }
 0x183   : > { %6957 = vmatpush.bf16.msra.mxu2 %v13982_v24  ;;  %6932 = vmatpush.bf16.msra.mxu0 %v12894_v35  ;;  %v18797_v1 = vld [vmem:[%s20909_s24 + $0x84] sm:$0xf]  ;;  %v14302_v5 = vor.u32 %v19197_v60, %v14299_v61 }
 0x184   : > { %v12699_v2 = vld [vmem:[%s20909_s24 + $0xc0] sm:$0xf0] }
 0x185   : > { %6970 = vmatpush.bf16.msra.mxu3 %v14494_v28  ;;  %v18925_v3 = vld [vmem:[%s20909_s24 + $0x484] sm:$0xf]  ;;  %v12702_v14 = vor.u32 %v18797_v1, %v12699_v2 }
 0x186   : > { %6945 = vmatpush.bf16.msra.mxu1 %v13406_v37  ;;  %v13211_v6 = vld [vmem:[%s20909_s24 + $0x4c0] sm:$0xf0] }
 0x187   : > { %6958 = vmatpush.bf16.msra.mxu2 %v13918_v38  ;;  %6933 = vmatpush.bf16.msra.mxu0 %v12830_v48  ;;  %v19053_v9 = vld [vmem:[%s20909_s24 + $0x884] sm:$0xf]  ;;  %v13214_v17 = vor.u32 %v18925_v3, %v13211_v6 }
 0x188   : > { %v13723_v11 = vld [vmem:[%s20909_s24 + $0x8c0] sm:$0xf0] }
 0x189   : > { %6971 = vmatpush.bf16.msra.mxu3 %v14430_v42  ;;  %v19181_v12 = vld [vmem:[%s20909_s24 + $0xc84] sm:$0xf]  ;;  %v13726_v18 = vor.u32 %v19053_v9, %v13723_v11 }
 0x18a   : > { %6946 = vmatpush.bf16.msra.mxu1 %v13342_v49  ;;  %v14235_v13 = vld [vmem:[%s20909_s24 + $0xcc0] sm:$0xf0] }
 0x18b   : > { %6959 = vmatpush.bf16.msra.mxu2 %v13854_v52  ;;  %6934 = vmatpush.bf16.msra.mxu0 %v12766_v62  ;;  %v18781_v15 = vld [vmem:[%s20909_s24 + $0x4] sm:$0xf]  ;;  %v14238_v22 = vor.u32 %v19181_v12, %v14235_v13 }
 0x18c   : > { %v12635_v16 = vld [vmem:[%s20909_s24 + $0x40] sm:$0xf0] }
 0x18d   : > { %6972 = vmatpush.bf16.msra.mxu3 %v14366_v56  ;;  %v18909_v19 = vld [vmem:[%s20909_s24 + $0x404] sm:$0xf]  ;;  %v12638_v29 = vor.u32 %v18781_v15, %v12635_v16 }
 0x18e   : > { %6947 = vmatpush.bf16.msra.mxu1 %v13278_v63  ;;  %v13147_v20 = vld [vmem:[%s20909_s24 + $0x440] sm:$0xf0] }
 0x18f   : > { %6960 = vmatpush.bf16.msra.mxu2 %v13790_v0  ;;  %v19037_v21 = vld [vmem:[%s20909_s24 + $0x804] sm:$0xf]  ;;  %6935 = vmatpush.bf16.msra.mxu0 %v12702_v14  ;;  %v13150_v33 = vor.u32 %v18909_v19, %v13147_v20 }
 0x190   : > { %v13659_v23 = vld [vmem:[%s20909_s24 + $0x840] sm:$0xf0] }
 0x191   : > { %6973 = vmatpush.bf16.msra.mxu3 %v14302_v5  ;;  %v19165_v24 = vld [vmem:[%s20909_s24 + $0xc04] sm:$0xf]  ;;  %v13662_v35 = vor.u32 %v19037_v21, %v13659_v23 }
 0x192   : > { %v14171_v25 = vld [vmem:[%s20909_s24 + $0xc40] sm:$0xf0]  ;;  %6948 = vmatpush.bf16.msra.mxu1 %v13214_v17 }
 0x193   : > { %v19405_v26 = vld [vmem:[%s20909_s24 + $0x1384] sm:$0xf]  ;;  %6961 = vmatpush.bf16.msra.mxu2 %v13726_v18  ;;  %v14174_v39 = vor.u32 %v19165_v24, %v14171_v25  ;;  %6936 = vmatpush.bf16.msra.mxu0 %v12638_v29 }
 0x194   : > { %v15131_v27 = vld [vmem:[%s20909_s24 + $0x13c0] sm:$0xf0] }
 0x195   : > { %v19533_v28 = vld [vmem:[%s20909_s24 + $0x1784] sm:$0xf]  ;;  %6974 = vmatpush.bf16.msra.mxu3 %v14238_v22  ;;  %v15134_v40 = vor.u32 %v19405_v26, %v15131_v27 }
 0x196   : > { %v15643_v30 = vld [vmem:[%s20909_s24 + $0x17c0] sm:$0xf0]  ;;  %6949 = vmatpush.bf16.msra.mxu1 %v13150_v33  ;;  %6937 = vmatmul.bf16.vlgmr.msra.gmra.mxu0 %v21033_v50 }
 0x197   : > { %v19661_v31 = vld [vmem:[%s20909_s24 + $0x1b84] sm:$0xf]  ;;  %v15646_v41 = vor.u32 %v19533_v28, %v15643_v30  ;;  %6962 = vmatpush.bf16.msra.mxu2 %v13662_v35  ;;  %6981 = vmatpush.bf16.msrb.mxu0 %v15134_v40 }
 0x198   : > { %v16155_v32 = vld [vmem:[%s20909_s24 + $0x1bc0] sm:$0xf0] }
 0x199   : > { %v19789_v37 = vld [vmem:[%s20909_s24 + $0x1f84] sm:$0xf]  ;;  %v16158_v42 = vor.u32 %v19661_v31, %v16155_v32  ;;  %6975 = vmatpush.bf16.msra.mxu3 %v14174_v39  ;;  %6950 = vmatmul.bf16.vlgmr.msra.gmra.mxu1 %v21036_v51 }
 0x19a   : > { %v16667_v38 = vld [vmem:[%s20909_s24 + $0x1fc0] sm:$0xf0]  ;;  %6994 = vmatpush.bf16.msrb.mxu1 %v15646_v41  ;;  %6963 = vmatmul.bf16.vlgmr.msra.gmra.mxu2 %v21020_v34 }
 0x19b   : > { %v19389_v43 = vld [vmem:[%s20909_s24 + $0x1304] sm:$0xf]  ;;  %v16670_v46 = vor.u32 %v19789_v37, %v16667_v38  ;;  %7007 = vmatpush.bf16.msrb.mxu2 %v16158_v42 }
 0x19c   : > { %v15067_v44 = vld [vmem:[%s20909_s24 + $0x1340] sm:$0xf0]  ;;  %6976 = vmatmul.bf16.vlgmr.msra.gmra.mxu3 %v21022_v36 }
 0x19d   : > { %v19517_v45 = vld [vmem:[%s20909_s24 + $0x1704] sm:$0xf]  ;;  %v15070_v54 = vor.u32 %v19389_v43, %v15067_v44  ;;  %7020 = vmatpush.bf16.msrb.mxu3 %v16670_v46 }
 0x19e   : > { %v15579_v47 = vld [vmem:[%s20909_s24 + $0x1740] sm:$0xf0] }
 0x19f   : > { %v19645_v48 = vld [vmem:[%s20909_s24 + $0x1b04] sm:$0xf]  ;;  %v15582_v55 = vor.u32 %v19517_v45, %v15579_v47  ;;  %6982 = vmatpush.bf16.msrb.mxu0 %v15070_v54 }
 0x1a0   : > { %v16091_v49 = vld [vmem:[%s20909_s24 + $0x1b40] sm:$0xf0] }
 0x1a1   : > { %v19773_v52 = vld [vmem:[%s20909_s24 + $0x1f04] sm:$0xf]  ;;  %v16094_v56 = vor.u32 %v19645_v48, %v16091_v49  ;;  %6995 = vmatpush.bf16.msrb.mxu1 %v15582_v55 }
 0x1a2   : > { %v16603_v53 = vld [vmem:[%s20909_s24 + $0x1f40] sm:$0xf0] }
 0x1a3   : > { %v19373_v57 = vld [vmem:[%s20909_s24 + $0x1284] sm:$0xf]  ;;  %v16606_v60 = vor.u32 %v19773_v52, %v16603_v53  ;;  %7008 = vmatpush.bf16.msrb.mxu2 %v16094_v56 }
 0x1a4   : > { %v15003_v58 = vld [vmem:[%s20909_s24 + $0x12c0] sm:$0xf0] }
 0x1a5   : > { %v19501_v59 = vld [vmem:[%s20909_s24 + $0x1684] sm:$0xf]  ;;  %v15006_v2 = vor.u32 %v19373_v57, %v15003_v58  ;;  %7021 = vmatpush.bf16.msrb.mxu3 %v16606_v60 }
 0x1a6   : > { %v15515_v61 = vld [vmem:[%s20909_s24 + $0x16c0] sm:$0xf0] }
 0x1a7   : > { %v19629_v62 = vld [vmem:[%s20909_s24 + $0x1a84] sm:$0xf]  ;;  %v15518_v3 = vor.u32 %v19501_v59, %v15515_v61  ;;  %6983 = vmatpush.bf16.msrb.mxu0 %v15006_v2 }
 0x1a8   : > { %v16027_v63 = vld [vmem:[%s20909_s24 + $0x1ac0] sm:$0xf0] }
 0x1a9   : > { %v19757_v0 = vld [vmem:[%s20909_s24 + $0x1e84] sm:$0xf]  ;;  %v16030_v5 = vor.u32 %v19629_v62, %v16027_v63  ;;  %6996 = vmatpush.bf16.msrb.mxu1 %v15518_v3 }
 0x1aa   : > { %v16539_v1 = vld [vmem:[%s20909_s24 + $0x1ec0] sm:$0xf0] }
 0x1ab   : > { %v19357_v6 = vld [vmem:[%s20909_s24 + $0x1204] sm:$0xf]  ;;  %v16542_v12 = vor.u32 %v19757_v0, %v16539_v1  ;;  %7009 = vmatpush.bf16.msrb.mxu2 %v16030_v5 }
 0x1ac   : > { %v14939_v9 = vld [vmem:[%s20909_s24 + $0x1240] sm:$0xf0] }
 0x1ad   : > { %v19485_v11 = vld [vmem:[%s20909_s24 + $0x1604] sm:$0xf]  ;;  %v14942_v18 = vor.u32 %v19357_v6, %v14939_v9  ;;  %7022 = vmatpush.bf16.msrb.mxu3 %v16542_v12  ;;  %v13089_v9 = vld [vmem:[%s20909_s24 + $0x388] sm:$0xf] }
 0x1ae   : > { %v15451_v13 = vld [vmem:[%s20909_s24 + $0x1640] sm:$0xf0]  ;;  %v13601_v12 = vld [vmem:[%s20909_s24 + $0x788] sm:$0xf] }
 0x1af   : > { %v19613_v14 = vld [vmem:[%s20909_s24 + $0x1a04] sm:$0xf]  ;;  %v15454_v19 = vor.u32 %v19485_v11, %v15451_v13  ;;  %6984 = vmatpush.bf16.msrb.mxu0 %v14942_v18  ;;  %v18902_v11 = vld [vmem:[%s20909_s24 + $0x3c4] sm:$0xf0] }
 0x1b0   : > { %v15963_v15 = vld [vmem:[%s20909_s24 + $0x1a40] sm:$0xf0] }
 0x1b1   : > { %v19741_v16 = vld [vmem:[%s20909_s24 + $0x1e04] sm:$0xf]  ;;  %v15966_v20 = vor.u32 %v19613_v14, %v15963_v15  ;;  %6997 = vmatpush.bf16.msrb.mxu1 %v15454_v19  ;;  %v19030_v14 = vld [vmem:[%s20909_s24 + $0x7c4] sm:$0xf0] }
 0x1b2   : > { %v16475_v17 = vld [vmem:[%s20909_s24 + $0x1e40] sm:$0xf0]  ;;  %v14113_v15 = vld [vmem:[%s20909_s24 + $0xb88] sm:$0xf] }
 0x1b3   : > { %v19341_v21 = vld [vmem:[%s20909_s24 + $0x1184] sm:$0xf]  ;;  %v16478_v24 = vor.u32 %v19741_v16, %v16475_v17  ;;  %7010 = vmatpush.bf16.msrb.mxu2 %v15966_v20  ;;  %v19158_v16 = vld [vmem:[%s20909_s24 + $0xbc4] sm:$0xf0] }
 0x1b4   : > { %v14875_v22 = vld [vmem:[%s20909_s24 + $0x11c0] sm:$0xf0]  ;;  %v14625_v19 = vld [vmem:[%s20909_s24 + $0xf88] sm:$0xf] }
 0x1b5   : > { %v19469_v23 = vld [vmem:[%s20909_s24 + $0x1584] sm:$0xf]  ;;  %v14878_v30 = vor.u32 %v19341_v21, %v14875_v22  ;;  %7023 = vmatpush.bf16.msrb.mxu3 %v16478_v24  ;;  %v19286_v20 = vld [vmem:[%s20909_s24 + $0xfc4] sm:$0xf0]  ;;  %v13090_v22 = vor.u32 %v18902_v11, %v13089_v9  ;;  %v14114_v24 = vor.u32 %v19158_v16, %v14113_v15 }
 0x1b6   : > { %v15387_v25 = vld [vmem:[%s20909_s24 + $0x15c0] sm:$0xf0]  ;;  %v13857_v9 = vld [vmem:[%s20909_s24 + $0x988] sm:$0xf] }
 0x1b7   : > { %v19597_v26 = vld [vmem:[%s20909_s24 + $0x1984] sm:$0xf]  ;;  %v15390_v31 = vor.u32 %v19469_v23, %v15387_v25  ;;  %6985 = vmatpush.bf16.msrb.mxu0 %v14878_v30  ;;  %v13602_v23 = vor.u32 %v19030_v14, %v13601_v12  ;;  %v13025_v25 = vld [vmem:[%s20909_s24 + $0x308] sm:$0xf] }
 0x1b8   : > { %v15899_v27 = vld [vmem:[%s20909_s24 + $0x19c0] sm:$0xf0]  ;;  %v14049_v30 = vld [vmem:[%s20909_s24 + $0xb08] sm:$0xf] }
 0x1b9   : > { %v19725_v28 = vld [vmem:[%s20909_s24 + $0x1d84] sm:$0xf]  ;;  %v15902_v32 = vor.u32 %v19597_v26, %v15899_v27  ;;  %6998 = vmatpush.bf16.msrb.mxu1 %v15390_v31  ;;  %v18886_v26 = vld [vmem:[%s20909_s24 + $0x344] sm:$0xf0] }
 0x1ba   : > { %v16411_v29 = vld [vmem:[%s20909_s24 + $0x1dc0] sm:$0xf0]  ;;  %v13537_v27 = vld [vmem:[%s20909_s24 + $0x708] sm:$0xf] }
 0x1bb   : > { %v19325_v33 = vld [vmem:[%s20909_s24 + $0x1104] sm:$0xf]  ;;  %v16414_v38 = vor.u32 %v19725_v28, %v16411_v29  ;;  %7011 = vmatpush.bf16.msrb.mxu2 %v15902_v32  ;;  %v14626_v28 = vor.u32 %v19286_v20, %v14625_v19  ;;  %v19014_v29 = vld [vmem:[%s20909_s24 + $0x744] sm:$0xf0] }
 0x1bc   : > { %v14811_v35 = vld [vmem:[%s20909_s24 + $0x1140] sm:$0xf0]  ;;  %v19142_v31 = vld [vmem:[%s20909_s24 + $0xb44] sm:$0xf0] }
 0x1bd   : > { %v19453_v37 = vld [vmem:[%s20909_s24 + $0x1504] sm:$0xf]  ;;  %v14814_v44 = vor.u32 %v19325_v33, %v14811_v35  ;;  %7024 = vmatpush.bf16.msrb.mxu3 %v16414_v38  ;;  %v14561_v32 = vld [vmem:[%s20909_s24 + $0xf08] sm:$0xf]  ;;  %v13026_v35 = vor.u32 %v18886_v26, %v13025_v25  ;;  %v14050_v38 = vor.u32 %v19142_v31, %v14049_v30 }
 0x1be   : > { %v15323_v39 = vld [vmem:[%s20909_s24 + $0x1540] sm:$0xf0]  ;;  %v19270_v33 = vld [vmem:[%s20909_s24 + $0xf44] sm:$0xf0] }
 0x1bf   : > { %v19581_v40 = vld [vmem:[%s20909_s24 + $0x1904] sm:$0xf]  ;;  %v15326_v45 = vor.u32 %v19453_v37, %v15323_v39  ;;  %6986 = vmatpush.bf16.msrb.mxu0 %v14814_v44  ;;  %v13538_v37 = vor.u32 %v19014_v29, %v13537_v27  ;;  %v12961_v39 = vld [vmem:[%s20909_s24 + $0x288] sm:$0xf] }
 0x1c0   : > { %v15835_v41 = vld [vmem:[%s20909_s24 + $0x1940] sm:$0xf0]  ;;  %v13985_v44 = vld [vmem:[%s20909_s24 + $0xa88] sm:$0xf] }
 0x1c1   : > { %v19709_v42 = vld [vmem:[%s20909_s24 + $0x1d04] sm:$0xf]  ;;  %v15838_v46 = vor.u32 %v19581_v40, %v15835_v41  ;;  %6999 = vmatpush.bf16.msrb.mxu1 %v15326_v45  ;;  %v18870_v40 = vld [vmem:[%s20909_s24 + $0x2c4] sm:$0xf0] }
 0x1c2   : > { %v16347_v43 = vld [vmem:[%s20909_s24 + $0x1d40] sm:$0xf0]  ;;  %v13473_v41 = vld [vmem:[%s20909_s24 + $0x688] sm:$0xf] }
 0x1c3   : > { %v19309_v47 = vld [vmem:[%s20909_s24 + $0x1084] sm:$0xf]  ;;  %v16350_v52 = vor.u32 %v19709_v42, %v16347_v43  ;;  %7012 = vmatpush.bf16.msrb.mxu2 %v15838_v46  ;;  %v14562_v42 = vor.u32 %v19270_v33, %v14561_v32  ;;  %v18998_v43 = vld [vmem:[%s20909_s24 + $0x6c4] sm:$0xf0] }
 0x1c4   : > { %v14747_v48 = vld [vmem:[%s20909_s24 + $0x10c0] sm:$0xf0]  ;;  %v19126_v45 = vld [vmem:[%s20909_s24 + $0xac4] sm:$0xf0] }
 0x1c5   : > { %v19437_v49 = vld [vmem:[%s20909_s24 + $0x1484] sm:$0xf]  ;;  %v14750_v58 = vor.u32 %v19309_v47, %v14747_v48  ;;  %7025 = vmatpush.bf16.msrb.mxu3 %v16350_v52  ;;  %v14497_v46 = vld [vmem:[%s20909_s24 + $0xe88] sm:$0xf]  ;;  %v12962_v48 = vor.u32 %v18870_v40, %v12961_v39  ;;  %v13986_v52 = vor.u32 %v19126_v45, %v13985_v44 }
 0x1c6   : > { %v15259_v53 = vld [vmem:[%s20909_s24 + $0x14c0] sm:$0xf0]  ;;  %v19254_v47 = vld [vmem:[%s20909_s24 + $0xec4] sm:$0xf0] }
 0x1c7   : > { %v19565_v54 = vld [vmem:[%s20909_s24 + $0x1884] sm:$0xf]  ;;  %v15262_v61 = vor.u32 %v19437_v49, %v15259_v53  ;;  %6987 = vmatpush.bf16.msrb.mxu0 %v14750_v58  ;;  %v13474_v49 = vor.u32 %v18998_v43, %v13473_v41  ;;  %v12897_v53 = vld [vmem:[%s20909_s24 + $0x208] sm:$0xf] }
 0x1c8   : > { %v15771_v55 = vld [vmem:[%s20909_s24 + $0x18c0] sm:$0xf0]  ;;  %v13921_v58 = vld [vmem:[%s20909_s24 + $0xa08] sm:$0xf] }
 0x1c9   : > { %v19693_v56 = vld [vmem:[%s20909_s24 + $0x1c84] sm:$0xf]  ;;  %v15774_v62 = vor.u32 %v19565_v54, %v15771_v55  ;;  %7000 = vmatpush.bf16.msrb.mxu1 %v15262_v61  ;;  %v18854_v54 = vld [vmem:[%s20909_s24 + $0x244] sm:$0xf0] }
 0x1ca   : > { %v16283_v57 = vld [vmem:[%s20909_s24 + $0x1cc0] sm:$0xf0]  ;;  %v13409_v55 = vld [vmem:[%s20909_s24 + $0x608] sm:$0xf] }
 0x1cb   : > { %v19293_v59 = vld [vmem:[%s20909_s24 + $0x1004] sm:$0xf]  ;;  %v16286_v2 = vor.u32 %v19693_v56, %v16283_v57  ;;  %7013 = vmatpush.bf16.msrb.mxu2 %v15774_v62  ;;  %v14498_v56 = vor.u32 %v19254_v47, %v14497_v46  ;;  %v18982_v57 = vld [vmem:[%s20909_s24 + $0x644] sm:$0xf0]  ;;  %v12898_v62 = vor.u32 %v18854_v54, %v12897_v53 }
 0x1cc   : > { %v14683_v60 = vld [vmem:[%s20909_s24 + $0x1040] sm:$0xf0]  ;;  %v19238_v61 = vld [vmem:[%s20909_s24 + $0xe44] sm:$0xf0] }
 0x1cd   : > { %v19421_v63 = vld [vmem:[%s20909_s24 + $0x1404] sm:$0xf]  ;;  %v14686_v13 = vor.u32 %v19293_v59, %v14683_v60  ;;  %7026 = vmatpush.bf16.msrb.mxu3 %v16286_v2  ;;  %v19110_v59 = vld [vmem:[%s20909_s24 + $0xa44] sm:$0xf0] }
 0x1ce   : > { %v15195_v0 = vld [vmem:[%s20909_s24 + $0x1440] sm:$0xf0]  ;;  %v14433_v60 = vld [vmem:[%s20909_s24 + $0xe08] sm:$0xf] }
 0x1cf   : > { %v19549_v1 = vld [vmem:[%s20909_s24 + $0x1804] sm:$0xf]  ;;  %v15198_v17 = vor.u32 %v19421_v63, %v15195_v0  ;;  %6988 = vmatpush.bf16.msrb.mxu0 %v14686_v13  ;;  %v13410_v63 = vor.u32 %v18982_v57, %v13409_v55  ;;  %v13922_v0 = vor.u32 %v19110_v59, %v13921_v58  ;;  %v18838_v2 = vld [vmem:[%s20909_s24 + $0x1c4] sm:$0xf0] }
 0x1d0   : > { %v15707_v3 = vld [vmem:[%s20909_s24 + $0x1840] sm:$0xf0]  ;;  %v19094_v11 = vld [vmem:[%s20909_s24 + $0x9c4] sm:$0xf0] }
 0x1d1   : > { %v19677_v5 = vld [vmem:[%s20909_s24 + $0x1c04] sm:$0xf]  ;;  %v15710_v18 = vor.u32 %v19549_v1, %v15707_v3  ;;  %7001 = vmatpush.bf16.msrb.mxu1 %v15198_v17  ;;  %v12833_v1 = vld [vmem:[%s20909_s24 + $0x188] sm:$0xf]  ;;  %v13858_v16 = vor.u32 %v19094_v11, %v13857_v9 }
 0x1d2   : > { %v16219_v6 = vld [vmem:[%s20909_s24 + $0x1c40] sm:$0xf0]  ;;  %6989 = vmatmul.bf16.vlgmr.msrb.gmra.mxu0 %v21090_v7  ;;  %v13345_v3 = vld [vmem:[%s20909_s24 + $0x588] sm:$0xf]  ;;  %v12834_v14 = vor.u32 %v18838_v2, %v12833_v1 }
 0x1d3   : > { %v16222_v21 = vor.u32 %v19677_v5, %v16219_v6  ;;  %7014 = vmatpush.bf16.msrb.mxu2 %v15710_v18  ;;  %7033 = vmatpush.bf16.msra.mxu0 %v13090_v22  ;;  %v14434_v5 = vor.u32 %v19238_v61, %v14433_v60  ;;  %v18966_v6 = vld [vmem:[%s20909_s24 + $0x5c4] sm:$0xf0] }
 0x1d4   : > { %7002 = vmatmul.bf16.vlgmr.msrb.gmra.mxu1 %v21094_v10  ;;  %v14369_v12 = vld [vmem:[%s20909_s24 + $0xd88] sm:$0xf]  ;;  %v13346_v15 = vor.u32 %v18966_v6, %v13345_v3 }
 0x1d5   : > { %7027 = vmatpush.bf16.msrb.mxu3 %v16222_v21  ;;  %7046 = vmatpush.bf16.msra.mxu1 %v13602_v23  ;;  %v19222_v13 = vld [vmem:[%s20909_s24 + $0xdc4] sm:$0xf0] }
 0x1d6   : > { %7015 = vmatmul.bf16.vlgmr.msrb.gmra.mxu2 %v21086_v4  ;;  %v12769_v17 = vld [vmem:[%s20909_s24 + $0x108] sm:$0xf]  ;;  %v14370_v20 = vor.u32 %v19222_v13, %v14369_v12 }
 0x1d7   : > { %7059 = vmatpush.bf16.msra.mxu2 %v14114_v24  ;;  %7034 = vmatpush.bf16.msra.mxu0 %v13026_v35  ;;  %v18822_v18 = vld [vmem:[%s20909_s24 + $0x144] sm:$0xf0] }
 0x1d8   : > { %7028 = vmatmul.bf16.vlgmr.msrb.gmra.mxu3 %v21092_v8  ;;  %v13281_v19 = vld [vmem:[%s20909_s24 + $0x508] sm:$0xf]  ;;  %v12770_v26 = vor.u32 %v18822_v18, %v12769_v17 }
 0x1d9   : > { %7072 = vmatpush.bf16.msra.mxu3 %v14626_v28  ;;  %7047 = vmatpush.bf16.msra.mxu1 %v13538_v37  ;;  %v18950_v21 = vld [vmem:[%s20909_s24 + $0x544] sm:$0xf0] }
 0x1da   : > { %v13793_v22 = vld [vmem:[%s20909_s24 + $0x908] sm:$0xf]  ;;  %v13282_v27 = vor.u32 %v18950_v21, %v13281_v19 }
 0x1db   : > { %7060 = vmatpush.bf16.msra.mxu2 %v14050_v38  ;;  %7035 = vmatpush.bf16.msra.mxu0 %v12962_v48  ;;  %v19078_v23 = vld [vmem:[%s20909_s24 + $0x944] sm:$0xf0] }
 0x1dc   : > { %v14305_v24 = vld [vmem:[%s20909_s24 + $0xd08] sm:$0xf]  ;;  %v13794_v28 = vor.u32 %v19078_v23, %v13793_v22 }
 0x1dd   : > { %7073 = vmatpush.bf16.msra.mxu3 %v14562_v42  ;;  %7048 = vmatpush.bf16.msra.mxu1 %v13474_v49  ;;  %v19206_v25 = vld [vmem:[%s20909_s24 + $0xd44] sm:$0xf0] }
 0x1de   : > { %v12705_v29 = vld [vmem:[%s20909_s24 + $0x88] sm:$0xf]  ;;  %v14306_v32 = vor.u32 %v19206_v25, %v14305_v24 }
 0x1df   : > { %7061 = vmatpush.bf16.msra.mxu2 %v13986_v52  ;;  %7036 = vmatpush.bf16.msra.mxu0 %v12898_v62  ;;  %v18806_v30 = vld [vmem:[%s20909_s24 + $0xc4] sm:$0xf0] }
 0x1e0   : > { %v13217_v31 = vld [vmem:[%s20909_s24 + $0x488] sm:$0xf]  ;;  %v12706_v40 = vor.u32 %v18806_v30, %v12705_v29 }
 0x1e1   : > { %7074 = vmatpush.bf16.msra.mxu3 %v14498_v56  ;;  %7049 = vmatpush.bf16.msra.mxu1 %v13410_v63  ;;  %v18934_v33 = vld [vmem:[%s20909_s24 + $0x4c4] sm:$0xf0] }
 0x1e2   : > { %v13729_v35 = vld [vmem:[%s20909_s24 + $0x888] sm:$0xf]  ;;  %v13218_v43 = vor.u32 %v18934_v33, %v13217_v31 }
 0x1e3   : > { %7062 = vmatpush.bf16.msra.mxu2 %v13922_v0  ;;  %7037 = vmatpush.bf16.msra.mxu0 %v12834_v14  ;;  %v19062_v37 = vld [vmem:[%s20909_s24 + $0x8c4] sm:$0xf0] }
 0x1e4   : > { %v14241_v38 = vld [vmem:[%s20909_s24 + $0xc88] sm:$0xf]  ;;  %v13730_v44 = vor.u32 %v19062_v37, %v13729_v35 }
 0x1e5   : > { %7075 = vmatpush.bf16.msra.mxu3 %v14434_v5  ;;  %7050 = vmatpush.bf16.msra.mxu1 %v13346_v15  ;;  %v19190_v39 = vld [vmem:[%s20909_s24 + $0xcc4] sm:$0xf0] }
 0x1e6   : > { %v12641_v41 = vld [vmem:[%s20909_s24 + $0x8] sm:$0xf]  ;;  %v14242_v48 = vor.u32 %v19190_v39, %v14241_v38 }
 0x1e7   : > { %7063 = vmatpush.bf16.msra.mxu2 %v13858_v16  ;;  %7038 = vmatpush.bf16.msra.mxu0 %v12770_v26  ;;  %v18790_v42 = vld [vmem:[%s20909_s24 + $0x44] sm:$0xf0] }
 0x1e8   : > { %v13153_v45 = vld [vmem:[%s20909_s24 + $0x408] sm:$0xf]  ;;  %v12642_v57 = vor.u32 %v18790_v42, %v12641_v41 }
 0x1e9   : > { %7076 = vmatpush.bf16.msra.mxu3 %v14370_v20  ;;  %7051 = vmatpush.bf16.msra.mxu1 %v13282_v27  ;;  %v18918_v46 = vld [vmem:[%s20909_s24 + $0x444] sm:$0xf0] }
 0x1ea   : > { %v13665_v47 = vld [vmem:[%s20909_s24 + $0x808] sm:$0xf]  ;;  %v13154_v61 = vor.u32 %v18918_v46, %v13153_v45 }
 0x1eb   : > { %7064 = vmatpush.bf16.msra.mxu2 %v13794_v28  ;;  %v19046_v49 = vld [vmem:[%s20909_s24 + $0x844] sm:$0xf0]  ;;  %7039 = vmatpush.bf16.msra.mxu0 %v12706_v40 }
 0x1ec   : > { %v14177_v52 = vld [vmem:[%s20909_s24 + $0xc08] sm:$0xf]  ;;  %v13666_v62 = vor.u32 %v19046_v49, %v13665_v47 }
 0x1ed   : > { %7077 = vmatpush.bf16.msra.mxu3 %v14306_v32  ;;  %v19174_v53 = vld [vmem:[%s20909_s24 + $0xc44] sm:$0xf0]  ;;  %7052 = vmatpush.bf16.msra.mxu1 %v13218_v43 }
 0x1ee   : > { %v15137_v54 = vld [vmem:[%s20909_s24 + $0x1388] sm:$0xf]  ;;  %v14178_v1 = vor.u32 %v19174_v53, %v14177_v52  ;;  %v21324_v52 = vld [vmem:[%s20915_s17] sm:$0xff] }
 0x1ef   : > { %v19414_v55 = vld [vmem:[%s20909_s24 + $0x13c4] sm:$0xf0]  ;;  %7065 = vmatpush.bf16.msra.mxu2 %v13730_v44  ;;  %7040 = vmatpush.bf16.msra.mxu0 %v12642_v57 }
 0x1f0   : > { %v15649_v56 = vld [vmem:[%s20909_s24 + $0x1788] sm:$0xf]  ;;  %v15138_v2 = vor.u32 %v19414_v55, %v15137_v54 }
 0x1f1   : > { %v19542_v58 = vld [vmem:[%s20909_s24 + $0x17c4] sm:$0xf0]  ;;  %7078 = vmatpush.bf16.msra.mxu3 %v14242_v48  ;;  %7053 = vmatpush.bf16.msra.mxu1 %v13154_v61 }
 0x1f2   : > { %v16161_v59 = vld [vmem:[%s20909_s24 + $0x1b88] sm:$0xf]  ;;  %v15650_v3 = vor.u32 %v19542_v58, %v15649_v56  ;;  %7041 = vmatmul.bf16.vlgmr.msra.gmra.mxu0 %v21033_v50 }
 0x1f3   : > { %v19670_v60 = vld [vmem:[%s20909_s24 + $0x1bc4] sm:$0xf0]  ;;  %7066 = vmatpush.bf16.msra.mxu2 %v13666_v62  ;;  %7085 = vmatpush.bf16.msrb.mxu0 %v15138_v2 }
 0x1f4   : > { %v16673_v63 = vld [vmem:[%s20909_s24 + $0x1f88] sm:$0xf]  ;;  %v16162_v5 = vor.u32 %v19670_v60, %v16161_v59  ;;  %7054 = vmatmul.bf16.vlgmr.msra.gmra.mxu1 %v21036_v51  ;;  %v1645_v60 = vperm.slane %v21324_v52, 0 }
 0x1f5   : > { %v19798_v0 = vld [vmem:[%s20909_s24 + $0x1fc4] sm:$0xf0]  ;;  %7079 = vmatpush.bf16.msra.mxu3 %v14178_v1  ;;  %7098 = vmatpush.bf16.msrb.mxu1 %v15650_v3 }
 0x1f6   : > { %v15073_v6 = vld [vmem:[%s20909_s24 + $0x1308] sm:$0xf]  ;;  %v16674_v12 = vor.u32 %v19798_v0, %v16673_v63  ;;  %7067 = vmatmul.bf16.vlgmr.msra.gmra.mxu2 %v21020_v34 }
 0x1f7   : > { %v19398_v9 = vld [vmem:[%s20909_s24 + $0x1344] sm:$0xf0]  ;;  %7111 = vmatpush.bf16.msrb.mxu2 %v16162_v5 }
 0x1f8   : > { %v15585_v11 = vld [vmem:[%s20909_s24 + $0x1708] sm:$0xf]  ;;  %v15074_v18 = vor.u32 %v19398_v9, %v15073_v6  ;;  %7080 = vmatmul.bf16.vlgmr.msra.gmra.mxu3 %v21022_v36 }
 0x1f9   : > { %v19526_v13 = vld [vmem:[%s20909_s24 + $0x1744] sm:$0xf0]  ;;  %7124 = vmatpush.bf16.msrb.mxu3 %v16674_v12  ;;  %v6834_v12 = vpop.f32.mrf.mxu0 }
 0x1fa   : > { %v16097_v14 = vld [vmem:[%s20909_s24 + $0x1b08] sm:$0xf]  ;;  %v15586_v19 = vor.u32 %v19526_v13, %v15585_v11  ;;  %7086 = vmatpush.bf16.msrb.mxu0 %v15074_v18 }
 0x1fb   : > { %v19654_v15 = vld [vmem:[%s20909_s24 + $0x1b44] sm:$0xf0] }
 0x1fc   : > { %v16609_v16 = vld [vmem:[%s20909_s24 + $0x1f08] sm:$0xf]  ;;  %v16098_v20 = vor.u32 %v19654_v15, %v16097_v14  ;;  %7099 = vmatpush.bf16.msrb.mxu1 %v15586_v19  ;;  %v6835_v14 = vadd.f32 %v6834_v12, %v1645_v60  ;;  %v6847_v15 = vpop.f32.mrf.mxu1  ;;  %v19278_v60 = vld [vmem:[%s20909_s24 + $0xf8c] sm:$0xf] }
 0x1fd   : > { %v19782_v17 = vld [vmem:[%s20909_s24 + $0x1f44] sm:$0xf0]  ;;  %v13539_v12 = vld [vmem:[%s20909_s24 + $0x748] sm:$0xf0] }
 0x1fe   : > { %v15009_v21 = vld [vmem:[%s20909_s24 + $0x1288] sm:$0xf]  ;;  %v16610_v24 = vor.u32 %v19782_v17, %v16609_v16  ;;  %7112 = vmatpush.bf16.msrb.mxu2 %v16098_v20 }
 0x1ff   : > { %v19382_v22 = vld [vmem:[%s20909_s24 + $0x12c4] sm:$0xf0] }
 0x200   : > { %v15521_v23 = vld [vmem:[%s20909_s24 + $0x1688] sm:$0xf]  ;;  %v15010_v30 = vor.u32 %v19382_v22, %v15009_v21  ;;  %7125 = vmatpush.bf16.msrb.mxu3 %v16610_v24  ;;  %v6860_v21 = vpop.f32.mrf.mxu2 }
 0x201   : > { %v19510_v25 = vld [vmem:[%s20909_s24 + $0x16c4] sm:$0xf0] }
 0x202   : > { %v16033_v26 = vld [vmem:[%s20909_s24 + $0x1a88] sm:$0xf]  ;;  %v15522_v31 = vor.u32 %v19510_v25, %v15521_v23  ;;  %7087 = vmatpush.bf16.msrb.mxu0 %v15010_v30 }
 0x203   : > { %v19638_v27 = vld [vmem:[%s20909_s24 + $0x1ac4] sm:$0xf0] }
 0x204   : > { %v16545_v28 = vld [vmem:[%s20909_s24 + $0x1e88] sm:$0xf]  ;;  %v16034_v32 = vor.u32 %v19638_v27, %v16033_v26  ;;  %7100 = vmatpush.bf16.msrb.mxu1 %v15522_v31  ;;  %v6848_v26 = vadd.f32 %v6847_v15, %v6835_v14  ;;  %v6873_v27 = vpop.f32.mrf.mxu3  ;;  %v14051_v14 = vld [vmem:[%s20909_s24 + $0xb48] sm:$0xf0] }
 0x205   : > { %v19766_v29 = vld [vmem:[%s20909_s24 + $0x1ec4] sm:$0xf0]  ;;  %v19262_v15 = vld [vmem:[%s20909_s24 + $0xf0c] sm:$0xf] }
 0x206   : > { %v14945_v33 = vld [vmem:[%s20909_s24 + $0x1208] sm:$0xf]  ;;  %v16546_v38 = vor.u32 %v19766_v29, %v16545_v28  ;;  %7113 = vmatpush.bf16.msrb.mxu2 %v16034_v32 }
 0x207   : > { %v19366_v35 = vld [vmem:[%s20909_s24 + $0x1244] sm:$0xf0] }
 0x208   : > { %v15457_v37 = vld [vmem:[%s20909_s24 + $0x1608] sm:$0xf]  ;;  %v14946_v44 = vor.u32 %v19366_v35, %v14945_v33  ;;  %7126 = vmatpush.bf16.msrb.mxu3 %v16546_v38  ;;  %v6861_v33 = vadd.f32 %v6860_v21, %v6848_v26  ;;  %v12963_v21 = vld [vmem:[%s20909_s24 + $0x2c8] sm:$0xf0] }
 0x209   : > { %v19494_v39 = vld [vmem:[%s20909_s24 + $0x1644] sm:$0xf0]  ;;  %v13987_v26 = vld [vmem:[%s20909_s24 + $0xac8] sm:$0xf0] }
 0x20a   : > { %v15969_v40 = vld [vmem:[%s20909_s24 + $0x1a08] sm:$0xf]  ;;  %v15458_v46 = vor.u32 %v19494_v39, %v15457_v37  ;;  %7088 = vmatpush.bf16.msrb.mxu0 %v14946_v44 }
 0x20b   : > { %v19622_v41 = vld [vmem:[%s20909_s24 + $0x1a44] sm:$0xf0] }
 0x20c   : > { %v16481_v42 = vld [vmem:[%s20909_s24 + $0x1e08] sm:$0xf]  ;;  %v15970_v47 = vor.u32 %v19622_v41, %v15969_v40  ;;  %7101 = vmatpush.bf16.msrb.mxu1 %v15458_v46  ;;  %v18894_v46 = vld [vmem:[%s20909_s24 + $0x38c] sm:$0xf] }
 0x20d   : > { %v19750_v43 = vld [vmem:[%s20909_s24 + $0x1e44] sm:$0xf0] }
 0x20e   : > { %v14881_v45 = vld [vmem:[%s20909_s24 + $0x1188] sm:$0xf]  ;;  %v16482_v53 = vor.u32 %v19750_v43, %v16481_v42  ;;  %7114 = vmatpush.bf16.msrb.mxu2 %v15970_v47  ;;  %v13091_v47 = vld [vmem:[%s20909_s24 + $0x3c8] sm:$0xf0] }
 0x20f   : > { %v19350_v48 = vld [vmem:[%s20909_s24 + $0x11c4] sm:$0xf0] }
 0x210   : > { %v15393_v49 = vld [vmem:[%s20909_s24 + $0x1588] sm:$0xf]  ;;  %v14882_v59 = vor.u32 %v19350_v48, %v14881_v45  ;;  %7127 = vmatpush.bf16.msrb.mxu3 %v16482_v53  ;;  %v21356_v45 = vadd.f32 %v6873_v27, %v6861_v33  ;;  %v19022_v48 = vld [vmem:[%s20909_s24 + $0x78c] sm:$0xf] }
 0x211   : > { %v19478_v54 = vld [vmem:[%s20909_s24 + $0x15c4] sm:$0xf0]  ;;  %v19246_v27 = vld [vmem:[%s20909_s24 + $0xe8c] sm:$0xf] }
 0x212   : > { %v15905_v55 = vld [vmem:[%s20909_s24 + $0x1988] sm:$0xf]  ;;  %v15394_v61 = vor.u32 %v19478_v54, %v15393_v49  ;;  %7089 = vmatpush.bf16.msrb.mxu0 %v14882_v59  ;;  %v6836_v49 = vpop.f32.mrf.mxu0  ;;  %v13603_v54 = vld [vmem:[%s20909_s24 + $0x7c8] sm:$0xf0] }
 0x213   : > { %v19606_v56 = vld [vmem:[%s20909_s24 + $0x19c4] sm:$0xf0]  ;;  %v12899_v33 = vld [vmem:[%s20909_s24 + $0x248] sm:$0xf0] }
 0x214   : > { %v16417_v57 = vld [vmem:[%s20909_s24 + $0x1d88] sm:$0xf]  ;;  %v15906_v62 = vor.u32 %v19606_v56, %v15905_v55  ;;  %7102 = vmatpush.bf16.msrb.mxu1 %v15394_v61  ;;  %v19150_v55 = vld [vmem:[%s20909_s24 + $0xb8c] sm:$0xf] }
 0x215   : > { %v19734_v58 = vld [vmem:[%s20909_s24 + $0x1dc4] sm:$0xf0]  ;;  %v14115_v56 = vld [vmem:[%s20909_s24 + $0xbc8] sm:$0xf0] }
 0x216   : > { %v14817_v63 = vld [vmem:[%s20909_s24 + $0x1108] sm:$0xf]  ;;  %v16418_v2 = vor.u32 %v19734_v58, %v16417_v57  ;;  %7115 = vmatpush.bf16.msrb.mxu2 %v15906_v62  ;;  %v6849_v57 = vpop.f32.mrf.mxu1  ;;  %v14627_v61 = vld [vmem:[%s20909_s24 + $0xfc8] sm:$0xf0]  ;;  %v6862_v62 = vpop.f32.mrf.mxu2 }
 0x217   : > { %v19334_v0 = vld [vmem:[%s20909_s24 + $0x1144] sm:$0xf0]  ;;  %v12835_v49 = vld [vmem:[%s20909_s24 + $0x1c8] sm:$0xf0] }
 0x218   : > { %v15329_v1 = vld [vmem:[%s20909_s24 + $0x1508] sm:$0xf]  ;;  %v14818_v13 = vor.u32 %v19334_v0, %v14817_v63  ;;  %7128 = vmatpush.bf16.msrb.mxu3 %v16418_v2  ;;  %v13094_v0 = vor.u32 %v18894_v46, %v13091_v47  ;;  %v13606_v2 = vor.u32 %v19022_v48, %v13603_v54  ;;  %v18830_v48 = vld [vmem:[%s20909_s24 + $0x18c] sm:$0xf] }
 0x219   : > { %v19462_v3 = vld [vmem:[%s20909_s24 + $0x1544] sm:$0xf0]  ;;  %v13347_v57 = vld [vmem:[%s20909_s24 + $0x5c8] sm:$0xf0] }
 0x21a   : > { %v15841_v5 = vld [vmem:[%s20909_s24 + $0x1908] sm:$0xf]  ;;  %v15330_v16 = vor.u32 %v19462_v3, %v15329_v1  ;;  %7090 = vmatpush.bf16.msrb.mxu0 %v14818_v13  ;;  %v6875_v1 = vpop.f32.mrf.mxu3  ;;  %v14118_v3 = vor.u32 %v19150_v55, %v14115_v56  ;;  %v19134_v13 = vld [vmem:[%s20909_s24 + $0xb0c] sm:$0xf] }
 0x21b   : > { %v19590_v6 = vld [vmem:[%s20909_s24 + $0x1944] sm:$0xf0]  ;;  %v18814_v1 = vld [vmem:[%s20909_s24 + $0x10c] sm:$0xf] }
 0x21c   : > { %v16353_v9 = vld [vmem:[%s20909_s24 + $0x1d08] sm:$0xf]  ;;  %v15842_v17 = vor.u32 %v19590_v6, %v15841_v5  ;;  %7103 = vmatpush.bf16.msrb.mxu1 %v15330_v16  ;;  %v18878_v5 = vld [vmem:[%s20909_s24 + $0x30c] sm:$0xf] }
 0x21d   : > { %v19718_v11 = vld [vmem:[%s20909_s24 + $0x1d44] sm:$0xf0]  ;;  %v13027_v6 = vld [vmem:[%s20909_s24 + $0x348] sm:$0xf0] }
 0x21e   : > { %v14753_v18 = vld [vmem:[%s20909_s24 + $0x1088] sm:$0xf]  ;;  %v16354_v22 = vor.u32 %v19718_v11, %v16353_v9  ;;  %7116 = vmatpush.bf16.msrb.mxu2 %v15842_v17  ;;  %v19006_v9 = vld [vmem:[%s20909_s24 + $0x70c] sm:$0xf]  ;;  %v14630_v11 = vor.u32 %v19278_v60, %v14627_v61  ;;  %v13030_v17 = vor.u32 %v18878_v5, %v13027_v6  ;;  %v6899_v55 = vpop.f32.mrf.mxu1  ;;  %v6912_v5 = vpop.f32.mrf.mxu2 }
 0x21f   : > { %v19318_v19 = vld [vmem:[%s20909_s24 + $0x10c4] sm:$0xf0]  ;;  %v14563_v16 = vld [vmem:[%s20909_s24 + $0xf48] sm:$0xf0] }
 0x220   : > { %v15265_v20 = vld [vmem:[%s20909_s24 + $0x1488] sm:$0xf]  ;;  %v14754_v30 = vor.u32 %v19318_v19, %v14753_v18  ;;  %7129 = vmatpush.bf16.msrb.mxu3 %v16354_v22  ;;  %v13542_v18 = vor.u32 %v19006_v9, %v13539_v12  ;;  %v14054_v19 = vor.u32 %v19134_v13, %v14051_v14  ;;  %v18990_v22 = vld [vmem:[%s20909_s24 + $0x68c] sm:$0xf] }
 0x221   : > { %v19446_v23 = vld [vmem:[%s20909_s24 + $0x14c4] sm:$0xf0]  ;;  %v19214_v60 = vld [vmem:[%s20909_s24 + $0xd8c] sm:$0xf] }
 0x222   : > { %v15777_v24 = vld [vmem:[%s20909_s24 + $0x1888] sm:$0xf]  ;;  %v15266_v35 = vor.u32 %v19446_v23, %v15265_v20  ;;  %7091 = vmatpush.bf16.msrb.mxu0 %v14754_v30  ;;  %v18862_v20 = vld [vmem:[%s20909_s24 + $0x28c] sm:$0xf]  ;;  %v14566_v23 = vor.u32 %v19262_v15, %v14563_v16  ;;  %v6925_v14 = vpop.f32.mrf.mxu3 }
 0x223   : > { %v19574_v25 = vld [vmem:[%s20909_s24 + $0x18c4] sm:$0xf0]  ;;  %v14371_v61 = vld [vmem:[%s20909_s24 + $0xdc8] sm:$0xf0] }
 0x224   : > { %v16289_v28 = vld [vmem:[%s20909_s24 + $0x1c88] sm:$0xf]  ;;  %v15778_v37 = vor.u32 %v19574_v25, %v15777_v24  ;;  %7104 = vmatpush.bf16.msrb.mxu1 %v15266_v35  ;;  %v13475_v24 = vld [vmem:[%s20909_s24 + $0x6c8] sm:$0xf0]  ;;  %v14374_v6 = vor.u32 %v19214_v60, %v14371_v61 }
 0x225   : > { %v19702_v29 = vld [vmem:[%s20909_s24 + $0x1cc4] sm:$0xf0]  ;;  %v19118_v25 = vld [vmem:[%s20909_s24 + $0xa8c] sm:$0xf]  ;;  %v13478_v30 = vor.u32 %v18990_v22, %v13475_v24 }
 0x226   : > { %v14689_v31 = vld [vmem:[%s20909_s24 + $0x1008] sm:$0xf]  ;;  %v16290_v41 = vor.u32 %v19702_v29, %v16289_v28  ;;  %7117 = vmatpush.bf16.msrb.mxu2 %v15778_v37  ;;  %v14499_v28 = vld [vmem:[%s20909_s24 + $0xec8] sm:$0xf0]  ;;  %v12966_v29 = vor.u32 %v18862_v20, %v12963_v21 }
 0x227   : > { %v19302_v32 = vld [vmem:[%s20909_s24 + $0x1044] sm:$0xf0]  ;;  %v18974_v35 = vld [vmem:[%s20909_s24 + $0x60c] sm:$0xf]  ;;  %v14502_v37 = vor.u32 %v19246_v27, %v14499_v28 }
 0x228   : > { %v15201_v38 = vld [vmem:[%s20909_s24 + $0x1408] sm:$0xf]  ;;  %v14690_v53 = vor.u32 %v19302_v32, %v14689_v31  ;;  %7130 = vmatpush.bf16.msrb.mxu3 %v16290_v41  ;;  %v13990_v31 = vor.u32 %v19118_v25, %v13987_v26  ;;  %v18846_v32 = vld [vmem:[%s20909_s24 + $0x20c] sm:$0xf]  ;;  %v6901_v25 = vpop.f32.mrf.mxu1 }
 0x229   : > { %v19430_v39 = vld [vmem:[%s20909_s24 + $0x1444] sm:$0xf0]  ;;  %v19230_v41 = vld [vmem:[%s20909_s24 + $0xe0c] sm:$0xf] }
 0x22a   : > { %v15713_v40 = vld [vmem:[%s20909_s24 + $0x1808] sm:$0xf]  ;;  %v15202_v58 = vor.u32 %v19430_v39, %v15201_v38  ;;  %7092 = vmatpush.bf16.msrb.mxu0 %v14690_v53  ;;  %v13411_v38 = vld [vmem:[%s20909_s24 + $0x648] sm:$0xf0] }
 0x22b   : > { %v19558_v42 = vld [vmem:[%s20909_s24 + $0x1844] sm:$0xf0]  ;;  %v19102_v39 = vld [vmem:[%s20909_s24 + $0xa0c] sm:$0xf]  ;;  %v13414_v46 = vor.u32 %v18974_v35, %v13411_v38 }
 0x22c   : > { %v16225_v43 = vld [vmem:[%s20909_s24 + $0x1c08] sm:$0xf]  ;;  %v15714_v59 = vor.u32 %v19558_v42, %v15713_v40  ;;  %7105 = vmatpush.bf16.msrb.mxu1 %v15202_v58  ;;  %v13923_v40 = vld [vmem:[%s20909_s24 + $0xa48] sm:$0xf0] }
 0x22d   : > { %v19686_v44 = vld [vmem:[%s20909_s24 + $0x1c44] sm:$0xf0]  ;;  %7093 = vmatmul.bf16.vlgmr.msrb.gmra.mxu0 %v21090_v7  ;;  %v14435_v42 = vld [vmem:[%s20909_s24 + $0xe48] sm:$0xf0]  ;;  %v13926_v47 = vor.u32 %v19102_v39, %v13923_v40 }
 0x22e   : > { %v16226_v63 = vor.u32 %v19686_v44, %v16225_v43  ;;  %7118 = vmatpush.bf16.msrb.mxu2 %v15714_v59  ;;  %7137 = vmatpush.bf16.msra.mxu0 %v13094_v0  ;;  %v12902_v43 = vor.u32 %v18846_v32, %v12899_v33  ;;  %v6886_v44 = vpop.f32.mrf.mxu0  ;;  %v18958_v53 = vld [vmem:[%s20909_s24 + $0x58c] sm:$0xf]  ;;  %v14438_v56 = vor.u32 %v19230_v41, %v14435_v42  ;;  %v6914_v42 = vpop.f32.mrf.mxu2 }
 0x22f   : > { %7106 = vmatmul.bf16.vlgmr.msrb.gmra.mxu1 %v21094_v10  ;;  %v6887_v54 = vadd.f32 %v6886_v44, %v21356_v45  ;;  %v19086_v58 = vld [vmem:[%s20909_s24 + $0x98c] sm:$0xf]  ;;  %v13350_v45 = vor.u32 %v18958_v53, %v13347_v57 }
 0x230   : > { %7131 = vmatpush.bf16.msrb.mxu3 %v16226_v63  ;;  %7150 = vmatpush.bf16.msra.mxu1 %v13606_v2  ;;  %v13859_v59 = vld [vmem:[%s20909_s24 + $0x9c8] sm:$0xf0]  ;;  %v12838_v63 = vor.u32 %v18830_v48, %v12835_v49  ;;  %v6927_v48 = vpop.f32.mrf.mxu3 }
 0x231   : > { %7119 = vmatmul.bf16.vlgmr.msrb.gmra.mxu2 %v21086_v4  ;;  %v6900_v62 = vadd.f32 %v6899_v55, %v6887_v54  ;;  %v13862_v0 = vor.u32 %v19086_v58, %v13859_v59  ;;  %v12771_v2 = vld [vmem:[%s20909_s24 + $0x148] sm:$0xf0] }
 0x232   : > { %7163 = vmatpush.bf16.msra.mxu2 %v14118_v3  ;;  %7138 = vmatpush.bf16.msra.mxu0 %v13030_v17  ;;  %v18942_v3 = vld [vmem:[%s20909_s24 + $0x50c] sm:$0xf]  ;;  %v12774_v17 = vor.u32 %v18814_v1, %v12771_v2 }
 0x233   : > { %7132 = vmatmul.bf16.vlgmr.msrb.gmra.mxu3 %v21092_v8  ;;  %v13283_v9 = vld [vmem:[%s20909_s24 + $0x548] sm:$0xf0]  ;;  %v6913_v13 = vadd.f32 %v6912_v5, %v6900_v62 }
 0x234   : > { %7176 = vmatpush.bf16.msra.mxu3 %v14630_v11  ;;  %7151 = vmatpush.bf16.msra.mxu1 %v13542_v18  ;;  %v19070_v11 = vld [vmem:[%s20909_s24 + $0x90c] sm:$0xf]  ;;  %v13286_v20 = vor.u32 %v18942_v3, %v13283_v9 }
 0x235   : > { %v13795_v12 = vld [vmem:[%s20909_s24 + $0x948] sm:$0xf0]  ;;  %v21411_v18 = vadd.f32 %v6925_v14, %v6913_v13 }
 0x236   : > { %7164 = vmatpush.bf16.msra.mxu2 %v14054_v19  ;;  %7139 = vmatpush.bf16.msra.mxu0 %v12966_v29  ;;  %v19198_v15 = vld [vmem:[%s20909_s24 + $0xd0c] sm:$0xf]  ;;  %v6888_v19 = vpop.f32.mrf.mxu0  ;;  %v13798_v21 = vor.u32 %v19070_v11, %v13795_v12 }
 0x237   : > { %v14307_v16 = vld [vmem:[%s20909_s24 + $0xd48] sm:$0xf0] }
 0x238   : > { %7177 = vmatpush.bf16.msra.mxu3 %v14566_v23  ;;  %7152 = vmatpush.bf16.msra.mxu1 %v13478_v30  ;;  %v18798_v22 = vld [vmem:[%s20909_s24 + $0x8c] sm:$0xf]  ;;  %v14310_v26 = vor.u32 %v19198_v15, %v14307_v16 }
 0x239   : > { %v12707_v23 = vld [vmem:[%s20909_s24 + $0xc8] sm:$0xf0] }
 0x23a   : > { %7165 = vmatpush.bf16.msra.mxu2 %v13990_v31  ;;  %7140 = vmatpush.bf16.msra.mxu0 %v12902_v43  ;;  %v18926_v24 = vld [vmem:[%s20909_s24 + $0x48c] sm:$0xf]  ;;  %v12710_v32 = vor.u32 %v18798_v22, %v12707_v23 }
 0x23b   : > { %v13219_v27 = vld [vmem:[%s20909_s24 + $0x4c8] sm:$0xf0] }
 0x23c   : > { %7178 = vmatpush.bf16.msra.mxu3 %v14502_v37  ;;  %7153 = vmatpush.bf16.msra.mxu1 %v13414_v46  ;;  %v19054_v28 = vld [vmem:[%s20909_s24 + $0x88c] sm:$0xf]  ;;  %v13222_v37 = vor.u32 %v18926_v24, %v13219_v27 }
 0x23d   : > { %v13731_v29 = vld [vmem:[%s20909_s24 + $0x8c8] sm:$0xf0] }
 0x23e   : > { %7166 = vmatpush.bf16.msra.mxu2 %v13926_v47  ;;  %7141 = vmatpush.bf16.msra.mxu0 %v12838_v63  ;;  %v19182_v30 = vld [vmem:[%s20909_s24 + $0xc8c] sm:$0xf]  ;;  %v13734_v38 = vor.u32 %v19054_v28, %v13731_v29 }
 0x23f   : > { %v14243_v31 = vld [vmem:[%s20909_s24 + $0xcc8] sm:$0xf0] }
 0x240   : > { %7179 = vmatpush.bf16.msra.mxu3 %v14438_v56  ;;  %7154 = vmatpush.bf16.msra.mxu1 %v13350_v45  ;;  %v18782_v33 = vld [vmem:[%s20909_s24 + $0xc] sm:$0xf]  ;;  %v14246_v43 = vor.u32 %v19182_v30, %v14243_v31 }
 0x241   : > { %v12643_v35 = vld [vmem:[%s20909_s24 + $0x48] sm:$0xf0] }
 0x242   : > { %7167 = vmatpush.bf16.msra.mxu2 %v13862_v0  ;;  %7142 = vmatpush.bf16.msra.mxu0 %v12774_v17  ;;  %v18910_v39 = vld [vmem:[%s20909_s24 + $0x40c] sm:$0xf]  ;;  %v12646_v55 = vor.u32 %v18782_v33, %v12643_v35  ;;  %v1646_v35 = vperm.slane %v21324_v52, 1 }
 0x243   : > { %v13155_v40 = vld [vmem:[%s20909_s24 + $0x448] sm:$0xf0] }
 0x244   : > { %7180 = vmatpush.bf16.msra.mxu3 %v14374_v6  ;;  %7155 = vmatpush.bf16.msra.mxu1 %v13286_v20  ;;  %v19038_v41 = vld [vmem:[%s20909_s24 + $0x80c] sm:$0xf]  ;;  %v13158_v59 = vor.u32 %v18910_v39, %v13155_v40 }
 0x245   : > { %v13667_v44 = vld [vmem:[%s20909_s24 + $0x848] sm:$0xf0] }
 0x246   : > { %7168 = vmatpush.bf16.msra.mxu2 %v13798_v21  ;;  %v19166_v46 = vld [vmem:[%s20909_s24 + $0xc0c] sm:$0xf]  ;;  %7143 = vmatpush.bf16.msra.mxu0 %v12710_v32  ;;  %v13670_v60 = vor.u32 %v19038_v41, %v13667_v44  ;;  %v6938_v44 = vpop.f32.mrf.mxu0 }
 0x247   : > { %v14179_v47 = vld [vmem:[%s20909_s24 + $0xc48] sm:$0xf0] }
 0x248   : > { %7181 = vmatpush.bf16.msra.mxu3 %v14310_v26  ;;  %v19406_v49 = vld [vmem:[%s20909_s24 + $0x138c] sm:$0xf]  ;;  %7156 = vmatpush.bf16.msra.mxu1 %v13222_v37  ;;  %v14182_v63 = vor.u32 %v19166_v46, %v14179_v47 }
 0x249   : > { %v15139_v53 = vld [vmem:[%s20909_s24 + $0x13c8] sm:$0xf0] }
 0x24a   : > { %v19534_v54 = vld [vmem:[%s20909_s24 + $0x178c] sm:$0xf]  ;;  %7169 = vmatpush.bf16.msra.mxu2 %v13734_v38  ;;  %v15142_v45 = vor.u32 %v19406_v49, %v15139_v53  ;;  %7144 = vmatpush.bf16.msra.mxu0 %v12646_v55  ;;  %v6939_v53 = vadd.f32 %v6938_v44, %v1646_v35 }
 0x24b   : > { %v15651_v56 = vld [vmem:[%s20909_s24 + $0x17c8] sm:$0xf0] }
 0x24c   : > { %v19662_v57 = vld [vmem:[%s20909_s24 + $0x1b8c] sm:$0xf]  ;;  %7182 = vmatpush.bf16.msra.mxu3 %v14246_v43  ;;  %v15654_v0 = vor.u32 %v19534_v54, %v15651_v56  ;;  %7157 = vmatpush.bf16.msra.mxu1 %v13158_v59  ;;  %v6951_v54 = vpop.f32.mrf.mxu1 }
 0x24d   : > { %v16163_v58 = vld [vmem:[%s20909_s24 + $0x1bc8] sm:$0xf0]  ;;  %7145 = vmatmul.bf16.vlgmr.msra.gmra.mxu0 %v21033_v50 }
 0x24e   : > { %v19790_v61 = vld [vmem:[%s20909_s24 + $0x1f8c] sm:$0xf]  ;;  %v16166_v1 = vor.u32 %v19662_v57, %v16163_v58  ;;  %7170 = vmatpush.bf16.msra.mxu2 %v13670_v60  ;;  %7189 = vmatpush.bf16.msrb.mxu0 %v15142_v45 }
 0x24f   : > { %v16675_v62 = vld [vmem:[%s20909_s24 + $0x1fc8] sm:$0xf0]  ;;  %7158 = vmatmul.bf16.vlgmr.msra.gmra.mxu1 %v21036_v51 }
 0x250   : > { %v19390_v2 = vld [vmem:[%s20909_s24 + $0x130c] sm:$0xf]  ;;  %v16678_v6 = vor.u32 %v19790_v61, %v16675_v62  ;;  %7183 = vmatpush.bf16.msra.mxu3 %v14182_v63  ;;  %7202 = vmatpush.bf16.msrb.mxu1 %v15654_v0  ;;  %v6952_v61 = vadd.f32 %v6951_v54, %v6939_v53  ;;  %v13609_v53 = vld [vmem:[%s20909_s24 + $0x790] sm:$0xf] }
 0x251   : > { %v15075_v3 = vld [vmem:[%s20909_s24 + $0x1348] sm:$0xf0]  ;;  %7171 = vmatmul.bf16.vlgmr.msra.gmra.mxu2 %v21020_v34 }
 0x252   : > { %v19518_v5 = vld [vmem:[%s20909_s24 + $0x170c] sm:$0xf]  ;;  %v15078_v15 = vor.u32 %v19390_v2, %v15075_v3  ;;  %7215 = vmatpush.bf16.msrb.mxu2 %v16166_v1  ;;  %v6964_v3 = vpop.f32.mrf.mxu2 }
 0x253   : > { %v15587_v9 = vld [vmem:[%s20909_s24 + $0x1748] sm:$0xf0]  ;;  %7184 = vmatmul.bf16.vlgmr.msra.gmra.mxu3 %v21022_v36 }
 0x254   : > { %v19646_v11 = vld [vmem:[%s20909_s24 + $0x1b0c] sm:$0xf]  ;;  %v15590_v16 = vor.u32 %v19518_v5, %v15587_v9  ;;  %7228 = vmatpush.bf16.msrb.mxu3 %v16678_v6  ;;  %7190 = vmatpush.bf16.msrb.mxu0 %v15078_v15 }
 0x255   : > { %v16099_v12 = vld [vmem:[%s20909_s24 + $0x1b48] sm:$0xf0] }
 0x256   : > { %v19774_v13 = vld [vmem:[%s20909_s24 + $0x1f0c] sm:$0xf]  ;;  %v16102_v17 = vor.u32 %v19646_v11, %v16099_v12  ;;  %7203 = vmatpush.bf16.msrb.mxu1 %v15590_v16  ;;  %v6965_v12 = vadd.f32 %v6964_v3, %v6952_v61  ;;  %v19287_v61 = vld [vmem:[%s20909_s24 + $0xfcc] sm:$0xf0] }
 0x257   : > { %v16611_v14 = vld [vmem:[%s20909_s24 + $0x1f48] sm:$0xf0]  ;;  %v13545_v3 = vld [vmem:[%s20909_s24 + $0x710] sm:$0xf] }
 0x258   : > { %v19374_v19 = vld [vmem:[%s20909_s24 + $0x128c] sm:$0xf]  ;;  %v16614_v22 = vor.u32 %v19774_v13, %v16611_v14  ;;  %7216 = vmatpush.bf16.msrb.mxu2 %v16102_v17  ;;  %v6977_v13 = vpop.f32.mrf.mxu3 }
 0x259   : > { %v15011_v20 = vld [vmem:[%s20909_s24 + $0x12c8] sm:$0xf0]  ;;  %v21482_v17 = vadd.f32 %v6977_v13, %v6965_v12  ;;  %v14569_v12 = vld [vmem:[%s20909_s24 + $0xf10] sm:$0xf] }
 0x25a   : > { %v19502_v21 = vld [vmem:[%s20909_s24 + $0x168c] sm:$0xf]  ;;  %v15014_v28 = vor.u32 %v19374_v19, %v15011_v20  ;;  %7229 = vmatpush.bf16.msrb.mxu3 %v16614_v22  ;;  %v6940_v19 = vpop.f32.mrf.mxu0  ;;  %v19271_v13 = vld [vmem:[%s20909_s24 + $0xf4c] sm:$0xf0] }
 0x25b   : > { %v15523_v23 = vld [vmem:[%s20909_s24 + $0x16c8] sm:$0xf0]  ;;  %v12969_v19 = vld [vmem:[%s20909_s24 + $0x290] sm:$0xf] }
 0x25c   : > { %v19630_v24 = vld [vmem:[%s20909_s24 + $0x1a8c] sm:$0xf]  ;;  %v15526_v30 = vor.u32 %v19502_v21, %v15523_v23  ;;  %7191 = vmatpush.bf16.msrb.mxu0 %v15014_v28 }
 0x25d   : > { %v16035_v25 = vld [vmem:[%s20909_s24 + $0x1ac8] sm:$0xf0] }
 0x25e   : > { %v19758_v26 = vld [vmem:[%s20909_s24 + $0x1e8c] sm:$0xf]  ;;  %v16038_v31 = vor.u32 %v19630_v24, %v16035_v25  ;;  %7204 = vmatpush.bf16.msrb.mxu1 %v15526_v30  ;;  %v6953_v25 = vpop.f32.mrf.mxu1 }
 0x25f   : > { %v16547_v27 = vld [vmem:[%s20909_s24 + $0x1ec8] sm:$0xf0]  ;;  %v19127_v25 = vld [vmem:[%s20909_s24 + $0xacc] sm:$0xf0] }
 0x260   : > { %v19358_v29 = vld [vmem:[%s20909_s24 + $0x120c] sm:$0xf]  ;;  %v16550_v37 = vor.u32 %v19758_v26, %v16547_v27  ;;  %7217 = vmatpush.bf16.msrb.mxu2 %v16038_v31 }
 0x261   : > { %v14947_v32 = vld [vmem:[%s20909_s24 + $0x1248] sm:$0xf0] }
 0x262   : > { %v19486_v33 = vld [vmem:[%s20909_s24 + $0x160c] sm:$0xf]  ;;  %v14950_v43 = vor.u32 %v19358_v29, %v14947_v32  ;;  %7230 = vmatpush.bf16.msrb.mxu3 %v16550_v37 }
 0x263   : > { %v15459_v38 = vld [vmem:[%s20909_s24 + $0x1648] sm:$0xf0] }
 0x264   : > { %v19614_v39 = vld [vmem:[%s20909_s24 + $0x1a0c] sm:$0xf]  ;;  %v15462_v52 = vor.u32 %v19486_v33, %v15459_v38  ;;  %7192 = vmatpush.bf16.msrb.mxu0 %v14950_v43 }
 0x265   : > { %v15971_v40 = vld [vmem:[%s20909_s24 + $0x1a48] sm:$0xf0] }
 0x266   : > { %v19742_v41 = vld [vmem:[%s20909_s24 + $0x1e0c] sm:$0xf]  ;;  %v15974_v46 = vor.u32 %v19614_v39, %v15971_v40  ;;  %7205 = vmatpush.bf16.msrb.mxu1 %v15462_v52 }
 0x267   : > { %v16483_v42 = vld [vmem:[%s20909_s24 + $0x1e48] sm:$0xf0] }
 0x268   : > { %v19342_v47 = vld [vmem:[%s20909_s24 + $0x118c] sm:$0xf]  ;;  %v16486_v55 = vor.u32 %v19742_v41, %v16483_v42  ;;  %7218 = vmatpush.bf16.msrb.mxu2 %v15974_v46  ;;  %v6966_v42 = vpop.f32.mrf.mxu2 }
 0x269   : > { %v14883_v48 = vld [vmem:[%s20909_s24 + $0x11c8] sm:$0xf0] }
 0x26a   : > { %v19470_v49 = vld [vmem:[%s20909_s24 + $0x158c] sm:$0xf]  ;;  %v14886_v62 = vor.u32 %v19342_v47, %v14883_v48  ;;  %7231 = vmatpush.bf16.msrb.mxu3 %v16486_v55  ;;  %v6979_v47 = vpop.f32.mrf.mxu3  ;;  %v13097_v48 = vld [vmem:[%s20909_s24 + $0x390] sm:$0xf] }
 0x26b   : > { %v15395_v56 = vld [vmem:[%s20909_s24 + $0x15c8] sm:$0xf0]  ;;  %v19031_v55 = vld [vmem:[%s20909_s24 + $0x7cc] sm:$0xf0] }
 0x26c   : > { %v19598_v57 = vld [vmem:[%s20909_s24 + $0x198c] sm:$0xf]  ;;  %v15398_v63 = vor.u32 %v19470_v49, %v15395_v56  ;;  %7193 = vmatpush.bf16.msrb.mxu0 %v14886_v62  ;;  %v18903_v49 = vld [vmem:[%s20909_s24 + $0x3cc] sm:$0xf0] }
 0x26d   : > { %v15907_v58 = vld [vmem:[%s20909_s24 + $0x19c8] sm:$0xf0]  ;;  %v14121_v56 = vld [vmem:[%s20909_s24 + $0xb90] sm:$0xf] }
 0x26e   : > { %v19726_v59 = vld [vmem:[%s20909_s24 + $0x1d8c] sm:$0xf]  ;;  %v15910_v45 = vor.u32 %v19598_v57, %v15907_v58  ;;  %7206 = vmatpush.bf16.msrb.mxu1 %v15398_v63  ;;  %v19159_v57 = vld [vmem:[%s20909_s24 + $0xbcc] sm:$0xf0]  ;;  %v13098_v63 = vor.u32 %v18903_v49, %v13097_v48 }
 0x26f   : > { %v16419_v60 = vld [vmem:[%s20909_s24 + $0x1dc8] sm:$0xf0]  ;;  %v18839_v47 = vld [vmem:[%s20909_s24 + $0x1cc] sm:$0xf0] }
 0x270   : > { %v19326_v0 = vld [vmem:[%s20909_s24 + $0x110c] sm:$0xf]  ;;  %v16422_v5 = vor.u32 %v19726_v59, %v16419_v60  ;;  %7219 = vmatpush.bf16.msrb.mxu2 %v15910_v45  ;;  %v14633_v60 = vld [vmem:[%s20909_s24 + $0xf90] sm:$0xf]  ;;  %v13610_v45 = vor.u32 %v19031_v55, %v13609_v53  ;;  %v7003_v53 = vpop.f32.mrf.mxu1 }
 0x271   : > { %v14819_v1 = vld [vmem:[%s20909_s24 + $0x1148] sm:$0xf0]  ;;  %v13353_v48 = vld [vmem:[%s20909_s24 + $0x590] sm:$0xf] }
 0x272   : > { %v19454_v2 = vld [vmem:[%s20909_s24 + $0x150c] sm:$0xf]  ;;  %v14822_v16 = vor.u32 %v19326_v0, %v14819_v1  ;;  %7232 = vmatpush.bf16.msrb.mxu3 %v16422_v5  ;;  %v14122_v0 = vor.u32 %v19159_v57, %v14121_v56  ;;  %v13033_v1 = vld [vmem:[%s20909_s24 + $0x310] sm:$0xf]  ;;  %v14634_v5 = vor.u32 %v19287_v61, %v14633_v60 }
 0x273   : > { %v15331_v6 = vld [vmem:[%s20909_s24 + $0x1548] sm:$0xf0]  ;;  %v18967_v55 = vld [vmem:[%s20909_s24 + $0x5cc] sm:$0xf0] }
 0x274   : > { %v19582_v9 = vld [vmem:[%s20909_s24 + $0x190c] sm:$0xf]  ;;  %v15334_v20 = vor.u32 %v19454_v2, %v15331_v6  ;;  %7194 = vmatpush.bf16.msrb.mxu0 %v14822_v16  ;;  %v18887_v2 = vld [vmem:[%s20909_s24 + $0x34c] sm:$0xf0] }
 0x275   : > { %v15843_v11 = vld [vmem:[%s20909_s24 + $0x1948] sm:$0xf0]  ;;  %v19015_v6 = vld [vmem:[%s20909_s24 + $0x74c] sm:$0xf0] }
 0x276   : > { %v19710_v14 = vld [vmem:[%s20909_s24 + $0x1d0c] sm:$0xf]  ;;  %v15846_v21 = vor.u32 %v19582_v9, %v15843_v11  ;;  %7207 = vmatpush.bf16.msrb.mxu1 %v15334_v20  ;;  %v14057_v9 = vld [vmem:[%s20909_s24 + $0xb10] sm:$0xf] }
 0x277   : > { %v16355_v15 = vld [vmem:[%s20909_s24 + $0x1d48] sm:$0xf0]  ;;  %v19143_v11 = vld [vmem:[%s20909_s24 + $0xb4c] sm:$0xf0] }
 0x278   : > { %v19310_v22 = vld [vmem:[%s20909_s24 + $0x108c] sm:$0xf]  ;;  %v16358_v26 = vor.u32 %v19710_v14, %v16355_v15  ;;  %7220 = vmatpush.bf16.msrb.mxu2 %v15846_v21  ;;  %v13034_v14 = vor.u32 %v18887_v2, %v13033_v1  ;;  %v13546_v15 = vor.u32 %v19015_v6, %v13545_v3  ;;  %v14058_v16 = vor.u32 %v19143_v11, %v14057_v9  ;;  %v18871_v20 = vld [vmem:[%s20909_s24 + $0x2cc] sm:$0xf0]  ;;  %v7016_v1 = vpop.f32.mrf.mxu2  ;;  %v7029_v11 = vpop.f32.mrf.mxu3 }
 0x279   : > { %v14755_v23 = vld [vmem:[%s20909_s24 + $0x10c8] sm:$0xf0]  ;;  %v13481_v21 = vld [vmem:[%s20909_s24 + $0x690] sm:$0xf] }
 0x27a   : > { %v19438_v24 = vld [vmem:[%s20909_s24 + $0x148c] sm:$0xf]  ;;  %v14758_v32 = vor.u32 %v19310_v22, %v14755_v23  ;;  %7233 = vmatpush.bf16.msrb.mxu3 %v16358_v26  ;;  %v14570_v22 = vor.u32 %v19271_v13, %v14569_v12  ;;  %v18999_v23 = vld [vmem:[%s20909_s24 + $0x6cc] sm:$0xf0] }
 0x27b   : > { %v15267_v27 = vld [vmem:[%s20909_s24 + $0x14c8] sm:$0xf0]  ;;  %v14505_v26 = vld [vmem:[%s20909_s24 + $0xe90] sm:$0xf] }
 0x27c   : > { %v19566_v28 = vld [vmem:[%s20909_s24 + $0x188c] sm:$0xf]  ;;  %v15270_v37 = vor.u32 %v19438_v24, %v15267_v27  ;;  %7195 = vmatpush.bf16.msrb.mxu0 %v14758_v32  ;;  %v13993_v24 = vld [vmem:[%s20909_s24 + $0xa90] sm:$0xf] }
 0x27d   : > { %v15779_v29 = vld [vmem:[%s20909_s24 + $0x18c8] sm:$0xf0]  ;;  %v19255_v27 = vld [vmem:[%s20909_s24 + $0xecc] sm:$0xf0] }
 0x27e   : > { %v19694_v30 = vld [vmem:[%s20909_s24 + $0x1c8c] sm:$0xf]  ;;  %v15782_v38 = vor.u32 %v19566_v28, %v15779_v29  ;;  %7208 = vmatpush.bf16.msrb.mxu1 %v15270_v37  ;;  %v12970_v28 = vor.u32 %v18871_v20, %v12969_v19  ;;  %v13482_v29 = vor.u32 %v18999_v23, %v13481_v21  ;;  %v18855_v32 = vld [vmem:[%s20909_s24 + $0x24c] sm:$0xf0] }
 0x27f   : > { %v16291_v31 = vld [vmem:[%s20909_s24 + $0x1cc8] sm:$0xf0]  ;;  %v18983_v37 = vld [vmem:[%s20909_s24 + $0x64c] sm:$0xf0] }
 0x280   : > { %v19294_v33 = vld [vmem:[%s20909_s24 + $0x100c] sm:$0xf]  ;;  %v16294_v43 = vor.u32 %v19694_v30, %v16291_v31  ;;  %7221 = vmatpush.bf16.msrb.mxu2 %v15782_v38  ;;  %v13994_v30 = vor.u32 %v19127_v25, %v13993_v24  ;;  %v12905_v31 = vld [vmem:[%s20909_s24 + $0x210] sm:$0xf]  ;;  %v7005_v24 = vpop.f32.mrf.mxu1 }
 0x281   : > { %v14691_v35 = vld [vmem:[%s20909_s24 + $0x1048] sm:$0xf0]  ;;  %v13929_v38 = vld [vmem:[%s20909_s24 + $0xa10] sm:$0xf]  ;;  %v12906_v42 = vor.u32 %v18855_v32, %v12905_v31 }
 0x282   : > { %v19422_v39 = vld [vmem:[%s20909_s24 + $0x140c] sm:$0xf]  ;;  %v14694_v54 = vor.u32 %v19294_v33, %v14691_v35  ;;  %7234 = vmatpush.bf16.msrb.mxu3 %v16294_v43  ;;  %v13417_v33 = vld [vmem:[%s20909_s24 + $0x610] sm:$0xf]  ;;  %v14506_v35 = vor.u32 %v19255_v27, %v14505_v26  ;;  %v6990_v43 = vpop.f32.mrf.mxu0 }
 0x283   : > { %v15203_v40 = vld [vmem:[%s20909_s24 + $0x1448] sm:$0xf0]  ;;  %v6991_v49 = vadd.f32 %v6990_v43, %v21482_v17  ;;  %v13865_v56 = vld [vmem:[%s20909_s24 + $0x990] sm:$0xf]  ;;  %v13354_v17 = vor.u32 %v18967_v55, %v13353_v48 }
 0x284   : > { %v19550_v41 = vld [vmem:[%s20909_s24 + $0x180c] sm:$0xf]  ;;  %v15206_v58 = vor.u32 %v19422_v39, %v15203_v40  ;;  %7196 = vmatpush.bf16.msrb.mxu0 %v14694_v54  ;;  %v19111_v39 = vld [vmem:[%s20909_s24 + $0xa4c] sm:$0xf0] }
 0x285   : > { %v15715_v44 = vld [vmem:[%s20909_s24 + $0x1848] sm:$0xf0]  ;;  %v14441_v40 = vld [vmem:[%s20909_s24 + $0xe10] sm:$0xf]  ;;  %v7004_v60 = vadd.f32 %v7003_v53, %v6991_v49 }
 0x286   : > { %v19678_v52 = vld [vmem:[%s20909_s24 + $0x1c0c] sm:$0xf]  ;;  %v15718_v59 = vor.u32 %v19550_v41, %v15715_v44  ;;  %7209 = vmatpush.bf16.msrb.mxu1 %v15206_v58  ;;  %v19239_v41 = vld [vmem:[%s20909_s24 + $0xe4c] sm:$0xf0]  ;;  %v13418_v44 = vor.u32 %v18983_v37, %v13417_v33 }
 0x287   : > { %v16227_v46 = vld [vmem:[%s20909_s24 + $0x1c48] sm:$0xf0]  ;;  %7197 = vmatmul.bf16.vlgmr.msrb.gmra.mxu0 %v21090_v7  ;;  %v14442_v54 = vor.u32 %v19239_v41, %v14441_v40  ;;  %v19095_v57 = vld [vmem:[%s20909_s24 + $0x9cc] sm:$0xf0]  ;;  %v7017_v9 = vadd.f32 %v7016_v1, %v7004_v60  ;;  %v7018_v41 = vpop.f32.mrf.mxu2 }
 0x288   : > { %v16230_v62 = vor.u32 %v19678_v52, %v16227_v46  ;;  %7222 = vmatpush.bf16.msrb.mxu2 %v15718_v59  ;;  %7241 = vmatpush.bf16.msra.mxu0 %v13098_v63  ;;  %v13930_v52 = vor.u32 %v19111_v39, %v13929_v38  ;;  %v12841_v46 = vld [vmem:[%s20909_s24 + $0x190] sm:$0xf] }
 0x289   : > { %7210 = vmatmul.bf16.vlgmr.msrb.gmra.mxu1 %v21094_v10  ;;  %v14377_v58 = vld [vmem:[%s20909_s24 + $0xd90] sm:$0xf]  ;;  %v12842_v61 = vor.u32 %v18839_v47, %v12841_v46  ;;  %v7031_v46 = vpop.f32.mrf.mxu3 }
 0x28a   : > { %7235 = vmatpush.bf16.msrb.mxu3 %v16230_v62  ;;  %7254 = vmatpush.bf16.msra.mxu1 %v13610_v45  ;;  %v19223_v59 = vld [vmem:[%s20909_s24 + $0xdcc] sm:$0xf0]  ;;  %v13866_v62 = vor.u32 %v19095_v57, %v13865_v56 }
 0x28b   : > { %7223 = vmatmul.bf16.vlgmr.msrb.gmra.mxu2 %v21086_v4  ;;  %v12777_v63 = vld [vmem:[%s20909_s24 + $0x110] sm:$0xf]  ;;  %v14378_v2 = vor.u32 %v19223_v59, %v14377_v58 }
 0x28c   : > { %7267 = vmatpush.bf16.msra.mxu2 %v14122_v0  ;;  %7242 = vmatpush.bf16.msra.mxu0 %v13034_v14  ;;  %v18823_v45 = vld [vmem:[%s20909_s24 + $0x14c] sm:$0xf0] }
 0x28d   : > { %7236 = vmatmul.bf16.vlgmr.msrb.gmra.mxu3 %v21092_v8  ;;  %v13289_v0 = vld [vmem:[%s20909_s24 + $0x510] sm:$0xf]  ;;  %v12778_v14 = vor.u32 %v18823_v45, %v12777_v63 }
 0x28e   : > { %7280 = vmatpush.bf16.msra.mxu3 %v14634_v5  ;;  %7255 = vmatpush.bf16.msra.mxu1 %v13546_v15  ;;  %v18951_v3 = vld [vmem:[%s20909_s24 + $0x54c] sm:$0xf0]  ;;  %v21553_v15 = vadd.f32 %v7029_v11, %v7017_v9 }
 0x28f   : > { %v13801_v5 = vld [vmem:[%s20909_s24 + $0x910] sm:$0xf]  ;;  %v13290_v19 = vor.u32 %v18951_v3, %v13289_v0 }
 0x290   : > { %7268 = vmatpush.bf16.msra.mxu2 %v14058_v16  ;;  %7243 = vmatpush.bf16.msra.mxu0 %v12970_v28  ;;  %v19079_v6 = vld [vmem:[%s20909_s24 + $0x94c] sm:$0xf0]  ;;  %v6992_v16 = vpop.f32.mrf.mxu0 }
 0x291   : > { %v14313_v12 = vld [vmem:[%s20909_s24 + $0xd10] sm:$0xf]  ;;  %v13802_v20 = vor.u32 %v19079_v6, %v13801_v5 }
 0x292   : > { %7281 = vmatpush.bf16.msra.mxu3 %v14570_v22  ;;  %7256 = vmatpush.bf16.msra.mxu1 %v13482_v29  ;;  %v19207_v13 = vld [vmem:[%s20909_s24 + $0xd4c] sm:$0xf0] }
 0x293   : > { %v12713_v21 = vld [vmem:[%s20909_s24 + $0x90] sm:$0xf]  ;;  %v14314_v25 = vor.u32 %v19207_v13, %v14313_v12 }
 0x294   : > { %7269 = vmatpush.bf16.msra.mxu2 %v13994_v30  ;;  %7244 = vmatpush.bf16.msra.mxu0 %v12906_v42  ;;  %v18807_v22 = vld [vmem:[%s20909_s24 + $0xcc] sm:$0xf0] }
 0x295   : > { %v13225_v23 = vld [vmem:[%s20909_s24 + $0x490] sm:$0xf]  ;;  %v12714_v31 = vor.u32 %v18807_v22, %v12713_v21 }
 0x296   : > { %7282 = vmatpush.bf16.msra.mxu3 %v14506_v35  ;;  %7257 = vmatpush.bf16.msra.mxu1 %v13418_v44  ;;  %v18935_v26 = vld [vmem:[%s20909_s24 + $0x4cc] sm:$0xf0] }
 0x297   : > { %v13737_v27 = vld [vmem:[%s20909_s24 + $0x890] sm:$0xf]  ;;  %v13226_v35 = vor.u32 %v18935_v26, %v13225_v23 }
 0x298   : > { %7270 = vmatpush.bf16.msra.mxu2 %v13930_v52  ;;  %7245 = vmatpush.bf16.msra.mxu0 %v12842_v61  ;;  %v19063_v28 = vld [vmem:[%s20909_s24 + $0x8cc] sm:$0xf0] }
 0x299   : > { %v14249_v29 = vld [vmem:[%s20909_s24 + $0xc90] sm:$0xf]  ;;  %v13738_v37 = vor.u32 %v19063_v28, %v13737_v27 }
 0x29a   : > { %7283 = vmatpush.bf16.msra.mxu3 %v14442_v54  ;;  %7258 = vmatpush.bf16.msra.mxu1 %v13354_v17  ;;  %v19191_v30 = vld [vmem:[%s20909_s24 + $0xccc] sm:$0xf0] }
 0x29b   : > { %v12649_v32 = vld [vmem:[%s20909_s24 + $0x10] sm:$0xf]  ;;  %v14250_v42 = vor.u32 %v19191_v30, %v14249_v29 }
 0x29c   : > { %7271 = vmatpush.bf16.msra.mxu2 %v13866_v62  ;;  %7246 = vmatpush.bf16.msra.mxu0 %v12778_v14  ;;  %v18791_v33 = vld [vmem:[%s20909_s24 + $0x4c] sm:$0xf0] }
 0x29d   : > { %v13161_v38 = vld [vmem:[%s20909_s24 + $0x410] sm:$0xf]  ;;  %v12650_v53 = vor.u32 %v18791_v33, %v12649_v32 }
 0x29e   : > { %7284 = vmatpush.bf16.msra.mxu3 %v14378_v2  ;;  %7259 = vmatpush.bf16.msra.mxu1 %v13290_v19  ;;  %v18919_v39 = vld [vmem:[%s20909_s24 + $0x44c] sm:$0xf0] }
 0x29f   : > { %v13673_v40 = vld [vmem:[%s20909_s24 + $0x810] sm:$0xf]  ;;  %v13162_v57 = vor.u32 %v18919_v39, %v13161_v38 }
 0x2a0   : > { %7272 = vmatpush.bf16.msra.mxu2 %v13802_v20  ;;  %v19047_v43 = vld [vmem:[%s20909_s24 + $0x84c] sm:$0xf0]  ;;  %7247 = vmatpush.bf16.msra.mxu0 %v12714_v31 }
 0x2a1   : > { %v14185_v44 = vld [vmem:[%s20909_s24 + $0xc10] sm:$0xf]  ;;  %v13674_v58 = vor.u32 %v19047_v43, %v13673_v40 }
 0x2a2   : > { %7285 = vmatpush.bf16.msra.mxu3 %v14314_v25  ;;  %v19175_v52 = vld [vmem:[%s20909_s24 + $0xc4c] sm:$0xf0]  ;;  %7260 = vmatpush.bf16.msra.mxu1 %v13226_v35 }
 0x2a3   : > { %v15145_v47 = vld [vmem:[%s20909_s24 + $0x1390] sm:$0xf]  ;;  %v14186_v61 = vor.u32 %v19175_v52, %v14185_v44  ;;  %v7042_v44 = vpop.f32.mrf.mxu0 }
 0x2a4   : > { %v19415_v48 = vld [vmem:[%s20909_s24 + $0x13cc] sm:$0xf0]  ;;  %7273 = vmatpush.bf16.msra.mxu2 %v13738_v37  ;;  %7248 = vmatpush.bf16.msra.mxu0 %v12650_v53 }
 0x2a5   : > { %v15657_v49 = vld [vmem:[%s20909_s24 + $0x1790] sm:$0xf]  ;;  %v15146_v17 = vor.u32 %v19415_v48, %v15145_v47 }
 0x2a6   : > { %v19543_v54 = vld [vmem:[%s20909_s24 + $0x17cc] sm:$0xf0]  ;;  %7286 = vmatpush.bf16.msra.mxu3 %v14250_v42  ;;  %7261 = vmatpush.bf16.msra.mxu1 %v13162_v57 }
 0x2a7   : > { %v16169_v55 = vld [vmem:[%s20909_s24 + $0x1b90] sm:$0xf]  ;;  %v15658_v62 = vor.u32 %v19543_v54, %v15657_v49  ;;  %7249 = vmatmul.bf16.vlgmr.msra.gmra.mxu0 %v21033_v50  ;;  %v7055_v54 = vpop.f32.mrf.mxu1 }
 0x2a8   : > { %v19671_v56 = vld [vmem:[%s20909_s24 + $0x1bcc] sm:$0xf0]  ;;  %7274 = vmatpush.bf16.msra.mxu2 %v13674_v58  ;;  %7293 = vmatpush.bf16.msrb.mxu0 %v15146_v17 }
 0x2a9   : > { %v16681_v59 = vld [vmem:[%s20909_s24 + $0x1f90] sm:$0xf]  ;;  %v16170_v63 = vor.u32 %v19671_v56, %v16169_v55  ;;  %7262 = vmatmul.bf16.vlgmr.msra.gmra.mxu1 %v21036_v51 }
 0x2aa   : > { %v19799_v60 = vld [vmem:[%s20909_s24 + $0x1fcc] sm:$0xf0]  ;;  %7287 = vmatpush.bf16.msra.mxu3 %v14186_v61  ;;  %7306 = vmatpush.bf16.msrb.mxu1 %v15658_v62 }
 0x2ab   : > { %v15081_v45 = vld [vmem:[%s20909_s24 + $0x1310] sm:$0xf]  ;;  %v16682_v2 = vor.u32 %v19799_v60, %v16681_v59  ;;  %7275 = vmatmul.bf16.vlgmr.msra.gmra.mxu2 %v21020_v34 }
 0x2ac   : > { %v19399_v0 = vld [vmem:[%s20909_s24 + $0x134c] sm:$0xf0]  ;;  %7319 = vmatpush.bf16.msrb.mxu2 %v16170_v63 }
 0x2ad   : > { %v15593_v1 = vld [vmem:[%s20909_s24 + $0x1710] sm:$0xf]  ;;  %v15082_v12 = vor.u32 %v19399_v0, %v15081_v45  ;;  %7288 = vmatmul.bf16.vlgmr.msra.gmra.mxu3 %v21022_v36 }
 0x2ae   : > { %v19527_v3 = vld [vmem:[%s20909_s24 + $0x174c] sm:$0xf0]  ;;  %7332 = vmatpush.bf16.msrb.mxu3 %v16682_v2  ;;  %v7068_v2 = vpop.f32.mrf.mxu2 }
 0x2af   : > { %v16105_v5 = vld [vmem:[%s20909_s24 + $0x1b10] sm:$0xf]  ;;  %v15594_v13 = vor.u32 %v19527_v3, %v15593_v1  ;;  %7294 = vmatpush.bf16.msrb.mxu0 %v15082_v12  ;;  %v7081_v12 = vpop.f32.mrf.mxu3 }
 0x2b0   : > { %v19655_v6 = vld [vmem:[%s20909_s24 + $0x1b4c] sm:$0xf0] }
 0x2b1   : > { %v16617_v9 = vld [vmem:[%s20909_s24 + $0x1f10] sm:$0xf]  ;;  %v16106_v14 = vor.u32 %v19655_v6, %v16105_v5  ;;  %7307 = vmatpush.bf16.msrb.mxu1 %v15594_v13 }
 0x2b2   : > { %v19783_v11 = vld [vmem:[%s20909_s24 + $0x1f4c] sm:$0xf0] }
 0x2b3   : > { %v15017_v16 = vld [vmem:[%s20909_s24 + $0x1290] sm:$0xf]  ;;  %v16618_v21 = vor.u32 %v19783_v11, %v16617_v9  ;;  %7320 = vmatpush.bf16.msrb.mxu2 %v16106_v14 }
 0x2b4   : > { %v19383_v19 = vld [vmem:[%s20909_s24 + $0x12cc] sm:$0xf0] }
 0x2b5   : > { %v15529_v20 = vld [vmem:[%s20909_s24 + $0x1690] sm:$0xf]  ;;  %v15018_v27 = vor.u32 %v19383_v19, %v15017_v16  ;;  %7333 = vmatpush.bf16.msrb.mxu3 %v16618_v21 }
 0x2b6   : > { %v19511_v22 = vld [vmem:[%s20909_s24 + $0x16cc] sm:$0xf0] }
 0x2b7   : > { %v16041_v23 = vld [vmem:[%s20909_s24 + $0x1a90] sm:$0xf]  ;;  %v15530_v29 = vor.u32 %v19511_v22, %v15529_v20  ;;  %7295 = vmatpush.bf16.msrb.mxu0 %v15018_v27  ;;  %v7044_v20 = vpop.f32.mrf.mxu0 }
 0x2b8   : > { %v19639_v24 = vld [vmem:[%s20909_s24 + $0x1acc] sm:$0xf0] }
 0x2b9   : > { %v16553_v25 = vld [vmem:[%s20909_s24 + $0x1e90] sm:$0xf]  ;;  %v16042_v30 = vor.u32 %v19639_v24, %v16041_v23  ;;  %7308 = vmatpush.bf16.msrb.mxu1 %v15530_v29 }
 0x2ba   : > { %v19767_v26 = vld [vmem:[%s20909_s24 + $0x1ecc] sm:$0xf0] }
 0x2bb   : > { %v14953_v28 = vld [vmem:[%s20909_s24 + $0x1210] sm:$0xf]  ;;  %v16554_v37 = vor.u32 %v19767_v26, %v16553_v25  ;;  %7321 = vmatpush.bf16.msrb.mxu2 %v16042_v30  ;;  %v7057_v26 = vpop.f32.mrf.mxu1 }
 0x2bc   : > { %v19367_v31 = vld [vmem:[%s20909_s24 + $0x124c] sm:$0xf0]  ;;  %v13483_v26 = vld [vmem:[%s20909_s24 + $0x6d0] sm:$0xf0] }
 0x2bd   : > { %v15465_v32 = vld [vmem:[%s20909_s24 + $0x1610] sm:$0xf]  ;;  %v14954_v43 = vor.u32 %v19367_v31, %v14953_v28  ;;  %7334 = vmatpush.bf16.msrb.mxu3 %v16554_v37 }
 0x2be   : > { %v21603_v33 = vld [vmem:[%s20915_s17] sm:$0xff] }
 0x2bf   : > { %v1647_v35 = vperm.slane %v21603_v33, 2  ;;  %v19495_v38 = vld [vmem:[%s20909_s24 + $0x164c] sm:$0xf0]  ;;  %7296 = vmatpush.bf16.msrb.mxu0 %v14954_v43 }
 0x2c0   : > { %v15977_v39 = vld [vmem:[%s20909_s24 + $0x1a10] sm:$0xf]  ;;  %v15466_v52 = vor.u32 %v19495_v38, %v15465_v32 }
 0x2c1   : > { %v19623_v40 = vld [vmem:[%s20909_s24 + $0x1a4c] sm:$0xf0]  ;;  %v7043_v53 = vadd.f32 %v7042_v44, %v1647_v35  ;;  %v7070_v44 = vpop.f32.mrf.mxu2 }
 0x2c2   : > { %v16489_v41 = vld [vmem:[%s20909_s24 + $0x1e10] sm:$0xf]  ;;  %v15978_v46 = vor.u32 %v19623_v40, %v15977_v39  ;;  %7309 = vmatpush.bf16.msrb.mxu1 %v15466_v52  ;;  %v19231_v44 = vld [vmem:[%s20909_s24 + $0xe14] sm:$0xf] }
 0x2c3   : > { %v19751_v42 = vld [vmem:[%s20909_s24 + $0x1e4c] sm:$0xf0]  ;;  %v7056_v61 = vadd.f32 %v7055_v54, %v7043_v53  ;;  %v18895_v53 = vld [vmem:[%s20909_s24 + $0x394] sm:$0xf] }
 0x2c4   : > { %v14889_v47 = vld [vmem:[%s20909_s24 + $0x1190] sm:$0xf]  ;;  %v16490_v55 = vor.u32 %v19751_v42, %v16489_v41  ;;  %7322 = vmatpush.bf16.msrb.mxu2 %v15978_v46  ;;  %v13099_v54 = vld [vmem:[%s20909_s24 + $0x3d0] sm:$0xf0] }
 0x2c5   : > { %v19351_v48 = vld [vmem:[%s20909_s24 + $0x11cc] sm:$0xf0]  ;;  %v7069_v11 = vadd.f32 %v7068_v2, %v7056_v61  ;;  %v18879_v2 = vld [vmem:[%s20909_s24 + $0x314] sm:$0xf] }
 0x2c6   : > { %v15401_v49 = vld [vmem:[%s20909_s24 + $0x1590] sm:$0xf]  ;;  %v14890_v17 = vor.u32 %v19351_v48, %v14889_v47  ;;  %7335 = vmatpush.bf16.msrb.mxu3 %v16490_v55  ;;  %v19023_v55 = vld [vmem:[%s20909_s24 + $0x794] sm:$0xf] }
 0x2c7   : > { %v19479_v56 = vld [vmem:[%s20909_s24 + $0x15cc] sm:$0xf0]  ;;  %v21627_v19 = vadd.f32 %v7081_v12, %v7069_v11  ;;  %v19135_v11 = vld [vmem:[%s20909_s24 + $0xb14] sm:$0xf] }
 0x2c8   : > { %v15913_v57 = vld [vmem:[%s20909_s24 + $0x1990] sm:$0xf]  ;;  %v15402_v62 = vor.u32 %v19479_v56, %v15401_v49  ;;  %7297 = vmatpush.bf16.msrb.mxu0 %v14890_v17  ;;  %v7083_v49 = vpop.f32.mrf.mxu3  ;;  %v19279_v17 = vld [vmem:[%s20909_s24 + $0xf94] sm:$0xf] }
 0x2c9   : > { %v19607_v58 = vld [vmem:[%s20909_s24 + $0x19cc] sm:$0xf0]  ;;  %v14059_v12 = vld [vmem:[%s20909_s24 + $0xb50] sm:$0xf0] }
 0x2ca   : > { %v16425_v59 = vld [vmem:[%s20909_s24 + $0x1d90] sm:$0xf]  ;;  %v15914_v63 = vor.u32 %v19607_v58, %v15913_v57  ;;  %7310 = vmatpush.bf16.msrb.mxu1 %v15402_v62  ;;  %v13611_v57 = vld [vmem:[%s20909_s24 + $0x7d0] sm:$0xf0] }
 0x2cb   : > { %v19735_v60 = vld [vmem:[%s20909_s24 + $0x1dcc] sm:$0xf0]  ;;  %v19151_v58 = vld [vmem:[%s20909_s24 + $0xb94] sm:$0xf] }
 0x2cc   : > { %v14825_v45 = vld [vmem:[%s20909_s24 + $0x1110] sm:$0xf]  ;;  %v16426_v3 = vor.u32 %v19735_v60, %v16425_v59  ;;  %7323 = vmatpush.bf16.msrb.mxu2 %v15914_v63  ;;  %v14123_v59 = vld [vmem:[%s20909_s24 + $0xbd0] sm:$0xf0] }
 0x2cd   : > { %v19335_v0 = vld [vmem:[%s20909_s24 + $0x114c] sm:$0xf0]  ;;  %v14635_v62 = vld [vmem:[%s20909_s24 + $0xfd0] sm:$0xf0] }
 0x2ce   : > { %v15337_v1 = vld [vmem:[%s20909_s24 + $0x1510] sm:$0xf]  ;;  %v14826_v16 = vor.u32 %v19335_v0, %v14825_v45  ;;  %7336 = vmatpush.bf16.msrb.mxu3 %v16426_v3  ;;  %v13102_v45 = vor.u32 %v18895_v53, %v13099_v54  ;;  %v13614_v0 = vor.u32 %v19023_v55, %v13611_v57  ;;  %v13035_v3 = vld [vmem:[%s20909_s24 + $0x350] sm:$0xf0]  ;;  %v7107_v57 = vpop.f32.mrf.mxu1 }
 0x2cf   : > { %v19463_v5 = vld [vmem:[%s20909_s24 + $0x154c] sm:$0xf0]  ;;  %v18831_v53 = vld [vmem:[%s20909_s24 + $0x194] sm:$0xf] }
 0x2d0   : > { %v15849_v6 = vld [vmem:[%s20909_s24 + $0x1910] sm:$0xf]  ;;  %v15338_v21 = vor.u32 %v19463_v5, %v15337_v1  ;;  %7298 = vmatpush.bf16.msrb.mxu0 %v14826_v16  ;;  %v14126_v1 = vor.u32 %v19151_v58, %v14123_v59  ;;  %v19007_v5 = vld [vmem:[%s20909_s24 + $0x714] sm:$0xf]  ;;  %v13038_v16 = vor.u32 %v18879_v2, %v13035_v3 }
 0x2d1   : > { %v19591_v9 = vld [vmem:[%s20909_s24 + $0x194c] sm:$0xf0]  ;;  %v12843_v54 = vld [vmem:[%s20909_s24 + $0x1d0] sm:$0xf0] }
 0x2d2   : > { %v16361_v13 = vld [vmem:[%s20909_s24 + $0x1d10] sm:$0xf]  ;;  %v15850_v22 = vor.u32 %v19591_v9, %v15849_v6  ;;  %7311 = vmatpush.bf16.msrb.mxu1 %v15338_v21  ;;  %v14638_v6 = vor.u32 %v19279_v17, %v14635_v62  ;;  %v13547_v9 = vld [vmem:[%s20909_s24 + $0x750] sm:$0xf0]  ;;  %v14062_v21 = vor.u32 %v19135_v11, %v14059_v12 }
 0x2d3   : > { %v19719_v14 = vld [vmem:[%s20909_s24 + $0x1d4c] sm:$0xf0]  ;;  %v13550_v20 = vor.u32 %v19007_v5, %v13547_v9  ;;  %v18959_v55 = vld [vmem:[%s20909_s24 + $0x594] sm:$0xf]  ;;  %v7120_v5 = vpop.f32.mrf.mxu2 }
 0x2d4   : > { %v14761_v23 = vld [vmem:[%s20909_s24 + $0x1090] sm:$0xf]  ;;  %v16362_v27 = vor.u32 %v19719_v14, %v16361_v13  ;;  %7324 = vmatpush.bf16.msrb.mxu2 %v15850_v22  ;;  %v19263_v13 = vld [vmem:[%s20909_s24 + $0xf14] sm:$0xf] }
 0x2d5   : > { %v19319_v24 = vld [vmem:[%s20909_s24 + $0x10cc] sm:$0xf0]  ;;  %v14571_v14 = vld [vmem:[%s20909_s24 + $0xf50] sm:$0xf0] }
 0x2d6   : > { %v15273_v25 = vld [vmem:[%s20909_s24 + $0x1490] sm:$0xf]  ;;  %v14762_v35 = vor.u32 %v19319_v24, %v14761_v23  ;;  %7337 = vmatpush.bf16.msrb.mxu3 %v16362_v27  ;;  %v18863_v22 = vld [vmem:[%s20909_s24 + $0x294] sm:$0xf] }
 0x2d7   : > { %v19447_v28 = vld [vmem:[%s20909_s24 + $0x14cc] sm:$0xf0]  ;;  %v12971_v23 = vld [vmem:[%s20909_s24 + $0x2d0] sm:$0xf0] }
 0x2d8   : > { %v15785_v29 = vld [vmem:[%s20909_s24 + $0x1890] sm:$0xf]  ;;  %v15274_v39 = vor.u32 %v19447_v28, %v15273_v25  ;;  %7299 = vmatpush.bf16.msrb.mxu0 %v14762_v35  ;;  %v18991_v24 = vld [vmem:[%s20909_s24 + $0x694] sm:$0xf]  ;;  %v14574_v25 = vor.u32 %v19263_v13, %v14571_v14  ;;  %v7133_v14 = vpop.f32.mrf.mxu3 }
 0x2d9   : > { %v19575_v30 = vld [vmem:[%s20909_s24 + $0x18cc] sm:$0xf0]  ;;  %v19119_v27 = vld [vmem:[%s20909_s24 + $0xa94] sm:$0xf] }
 0x2da   : > { %v16297_v31 = vld [vmem:[%s20909_s24 + $0x1c90] sm:$0xf]  ;;  %v15786_v40 = vor.u32 %v19575_v30, %v15785_v29  ;;  %7312 = vmatpush.bf16.msrb.mxu1 %v15274_v39  ;;  %v13995_v28 = vld [vmem:[%s20909_s24 + $0xad0] sm:$0xf0] }
 0x2db   : > { %v19703_v32 = vld [vmem:[%s20909_s24 + $0x1ccc] sm:$0xf0]  ;;  %v19247_v29 = vld [vmem:[%s20909_s24 + $0xe94] sm:$0xf]  ;;  %v13998_v35 = vor.u32 %v19119_v27, %v13995_v28 }
 0x2dc   : > { %v14697_v37 = vld [vmem:[%s20909_s24 + $0x1010] sm:$0xf]  ;;  %v16298_v52 = vor.u32 %v19703_v32, %v16297_v31  ;;  %7325 = vmatpush.bf16.msrb.mxu2 %v15786_v40  ;;  %v14507_v30 = vld [vmem:[%s20909_s24 + $0xed0] sm:$0xf0]  ;;  %v12974_v31 = vor.u32 %v18863_v22, %v12971_v23  ;;  %v13486_v32 = vor.u32 %v18991_v24, %v13483_v26 }
 0x2dd   : > { %v19303_v38 = vld [vmem:[%s20909_s24 + $0x104c] sm:$0xf0]  ;;  %v18975_v39 = vld [vmem:[%s20909_s24 + $0x614] sm:$0xf]  ;;  %v14510_v40 = vor.u32 %v19247_v29, %v14507_v30  ;;  %v7109_v29 = vpop.f32.mrf.mxu1 }
 0x2de   : > { %v15209_v41 = vld [vmem:[%s20909_s24 + $0x1410] sm:$0xf]  ;;  %v14698_v56 = vor.u32 %v19303_v38, %v14697_v37  ;;  %7338 = vmatpush.bf16.msrb.mxu3 %v16298_v52  ;;  %v18847_v37 = vld [vmem:[%s20909_s24 + $0x214] sm:$0xf] }
 0x2df   : > { %v19431_v42 = vld [vmem:[%s20909_s24 + $0x144c] sm:$0xf0]  ;;  %v12907_v38 = vld [vmem:[%s20909_s24 + $0x250] sm:$0xf0] }
 0x2e0   : > { %v15721_v43 = vld [vmem:[%s20909_s24 + $0x1810] sm:$0xf]  ;;  %v15210_v60 = vor.u32 %v19431_v42, %v15209_v41  ;;  %7300 = vmatpush.bf16.msrb.mxu0 %v14698_v56  ;;  %v13419_v41 = vld [vmem:[%s20909_s24 + $0x650] sm:$0xf0] }
 0x2e1   : > { %v19559_v46 = vld [vmem:[%s20909_s24 + $0x184c] sm:$0xf0]  ;;  %v19103_v42 = vld [vmem:[%s20909_s24 + $0xa14] sm:$0xf] }
 0x2e2   : > { %v16233_v47 = vld [vmem:[%s20909_s24 + $0x1c10] sm:$0xf]  ;;  %v15722_v61 = vor.u32 %v19559_v46, %v15721_v43  ;;  %7313 = vmatpush.bf16.msrb.mxu1 %v15210_v60  ;;  %v13931_v43 = vld [vmem:[%s20909_s24 + $0xa50] sm:$0xf0]  ;;  %v12910_v46 = vor.u32 %v18847_v37, %v12907_v38 }
 0x2e3   : > { %v19687_v48 = vld [vmem:[%s20909_s24 + $0x1c4c] sm:$0xf0]  ;;  %7301 = vmatmul.bf16.vlgmr.msrb.gmra.mxu0 %v21090_v7  ;;  %v14443_v52 = vld [vmem:[%s20909_s24 + $0xe50] sm:$0xf0]  ;;  %v13934_v49 = vor.u32 %v19103_v42, %v13931_v43 }
 0x2e4   : > { %v16234_v63 = vor.u32 %v19687_v48, %v16233_v47  ;;  %7326 = vmatpush.bf16.msrb.mxu2 %v15722_v61  ;;  %7345 = vmatpush.bf16.msra.mxu0 %v13102_v45  ;;  %v7094_v47 = vpop.f32.mrf.mxu0  ;;  %v13422_v48 = vor.u32 %v18975_v39, %v13419_v41  ;;  %v14446_v58 = vor.u32 %v19231_v44, %v14443_v52  ;;  %v13355_v59 = vld [vmem:[%s20909_s24 + $0x5d0] sm:$0xf0] }
 0x2e5   : > { %7314 = vmatmul.bf16.vlgmr.msrb.gmra.mxu1 %v21094_v10  ;;  %v7095_v56 = vadd.f32 %v7094_v47, %v21627_v19  ;;  %v19087_v60 = vld [vmem:[%s20909_s24 + $0x994] sm:$0xf]  ;;  %v12846_v45 = vor.u32 %v18831_v53, %v12843_v54  ;;  %v13358_v19 = vor.u32 %v18959_v55, %v13355_v59  ;;  %v7122_v47 = vpop.f32.mrf.mxu2  ;;  %v7135_v55 = vpop.f32.mrf.mxu3 }
 0x2e6   : > { %7339 = vmatpush.bf16.msrb.mxu3 %v16234_v63  ;;  %7358 = vmatpush.bf16.msra.mxu1 %v13614_v0  ;;  %v13867_v61 = vld [vmem:[%s20909_s24 + $0x9d0] sm:$0xf0] }
 0x2e7   : > { %7327 = vmatmul.bf16.vlgmr.msrb.gmra.mxu2 %v21086_v4  ;;  %v19215_v17 = vld [vmem:[%s20909_s24 + $0xd94] sm:$0xf]  ;;  %v7108_v63 = vadd.f32 %v7107_v57, %v7095_v56  ;;  %v13870_v0 = vor.u32 %v19087_v60, %v13867_v61 }
 0x2e8   : > { %7371 = vmatpush.bf16.msra.mxu2 %v14126_v1  ;;  %7346 = vmatpush.bf16.msra.mxu0 %v13038_v16  ;;  %v14379_v62 = vld [vmem:[%s20909_s24 + $0xdd0] sm:$0xf0] }
 0x2e9   : > { %7340 = vmatmul.bf16.vlgmr.msrb.gmra.mxu3 %v21092_v8  ;;  %v18815_v1 = vld [vmem:[%s20909_s24 + $0x114] sm:$0xf]  ;;  %v7121_v13 = vadd.f32 %v7120_v5, %v7108_v63 }
 0x2ea   : > { %7384 = vmatpush.bf16.msra.mxu3 %v14638_v6  ;;  %7359 = vmatpush.bf16.msra.mxu1 %v13550_v20  ;;  %v12779_v2 = vld [vmem:[%s20909_s24 + $0x150] sm:$0xf0]  ;;  %v14382_v6 = vor.u32 %v19215_v17, %v14379_v62 }
 0x2eb   : > { %v18943_v3 = vld [vmem:[%s20909_s24 + $0x514] sm:$0xf]  ;;  %v21698_v22 = vadd.f32 %v7133_v14, %v7121_v13 }
 0x2ec   : > { %7372 = vmatpush.bf16.msra.mxu2 %v14062_v21  ;;  %7347 = vmatpush.bf16.msra.mxu0 %v12974_v31  ;;  %v13291_v9 = vld [vmem:[%s20909_s24 + $0x550] sm:$0xf0]  ;;  %v12782_v21 = vor.u32 %v18815_v1, %v12779_v2  ;;  %v7096_v23 = vpop.f32.mrf.mxu0 }
 0x2ed   : > { %v19071_v11 = vld [vmem:[%s20909_s24 + $0x914] sm:$0xf]  ;;  %v13294_v24 = vor.u32 %v18943_v3, %v13291_v9 }
 0x2ee   : > { %7385 = vmatpush.bf16.msra.mxu3 %v14574_v25  ;;  %7360 = vmatpush.bf16.msra.mxu1 %v13486_v32  ;;  %v13803_v12 = vld [vmem:[%s20909_s24 + $0x950] sm:$0xf0] }
 0x2ef   : > { %v19199_v16 = vld [vmem:[%s20909_s24 + $0xd14] sm:$0xf]  ;;  %v13806_v25 = vor.u32 %v19071_v11, %v13803_v12 }
 0x2f0   : > { %7373 = vmatpush.bf16.msra.mxu2 %v13998_v35  ;;  %7348 = vmatpush.bf16.msra.mxu0 %v12910_v46  ;;  %v14315_v20 = vld [vmem:[%s20909_s24 + $0xd50] sm:$0xf0] }
 0x2f1   : > { %v18799_v26 = vld [vmem:[%s20909_s24 + $0x94] sm:$0xf]  ;;  %v14318_v30 = vor.u32 %v19199_v16, %v14315_v20 }
 0x2f2   : > { %7386 = vmatpush.bf16.msra.mxu3 %v14510_v40  ;;  %7361 = vmatpush.bf16.msra.mxu1 %v13422_v48  ;;  %v12715_v27 = vld [vmem:[%s20909_s24 + $0xd0] sm:$0xf0] }
 0x2f3   : > { %v18927_v28 = vld [vmem:[%s20909_s24 + $0x494] sm:$0xf]  ;;  %v12718_v39 = vor.u32 %v18799_v26, %v12715_v27 }
 0x2f4   : > { %7374 = vmatpush.bf16.msra.mxu2 %v13934_v49  ;;  %7349 = vmatpush.bf16.msra.mxu0 %v12846_v45  ;;  %v13227_v31 = vld [vmem:[%s20909_s24 + $0x4d0] sm:$0xf0] }
 0x2f5   : > { %v19055_v32 = vld [vmem:[%s20909_s24 + $0x894] sm:$0xf]  ;;  %v13230_v42 = vor.u32 %v18927_v28, %v13227_v31 }
 0x2f6   : > { %7387 = vmatpush.bf16.msra.mxu3 %v14446_v58  ;;  %7362 = vmatpush.bf16.msra.mxu1 %v13358_v19  ;;  %v13739_v35 = vld [vmem:[%s20909_s24 + $0x8d0] sm:$0xf0] }
 0x2f7   : > { %v19183_v37 = vld [vmem:[%s20909_s24 + $0xc94] sm:$0xf]  ;;  %v13742_v43 = vor.u32 %v19055_v32, %v13739_v35 }
 0x2f8   : > { %7375 = vmatpush.bf16.msra.mxu2 %v13870_v0  ;;  %v14251_v38 = vld [vmem:[%s20909_s24 + $0xcd0] sm:$0xf0]  ;;  %7350 = vmatpush.bf16.msra.mxu0 %v12782_v21 }
 0x2f9   : > { %v18783_v40 = vld [vmem:[%s20909_s24 + $0x14] sm:$0xf]  ;;  %v14254_v48 = vor.u32 %v19183_v37, %v14251_v38 }
 0x2fa   : > { %7388 = vmatpush.bf16.msra.mxu3 %v14382_v6  ;;  %v12651_v41 = vld [vmem:[%s20909_s24 + $0x50] sm:$0xf0]  ;;  %7363 = vmatpush.bf16.msra.mxu1 %v13294_v24 }
 0x2fb   : > { %v18911_v44 = vld [vmem:[%s20909_s24 + $0x414] sm:$0xf]  ;;  %v12654_v59 = vor.u32 %v18783_v40, %v12651_v41 }
 0x2fc   : > { %7376 = vmatpush.bf16.msra.mxu2 %v13806_v25  ;;  %v13163_v52 = vld [vmem:[%s20909_s24 + $0x450] sm:$0xf0]  ;;  %7351 = vmatpush.bf16.msra.mxu0 %v12718_v39 }
 0x2fd   : > { %v19039_v46 = vld [vmem:[%s20909_s24 + $0x814] sm:$0xf]  ;;  %v13166_v62 = vor.u32 %v18911_v44, %v13163_v52 }
 0x2fe   : > { %7389 = vmatpush.bf16.msra.mxu3 %v14318_v30  ;;  %v13675_v49 = vld [vmem:[%s20909_s24 + $0x850] sm:$0xf0]  ;;  %7364 = vmatpush.bf16.msra.mxu1 %v13230_v42 }
 0x2ff   : > { %v19167_v53 = vld [vmem:[%s20909_s24 + $0xc14] sm:$0xf]  ;;  %v13678_v63 = vor.u32 %v19039_v46, %v13675_v49 }
 0x300   : > { %v14187_v54 = vld [vmem:[%s20909_s24 + $0xc50] sm:$0xf0]  ;;  %7377 = vmatpush.bf16.msra.mxu2 %v13742_v43  ;;  %7352 = vmatpush.bf16.msra.mxu0 %v12654_v59  ;;  %v1648_v43 = vperm.slane %v21603_v33, 3 }
 0x301   : > { %v19407_v56 = vld [vmem:[%s20909_s24 + $0x1394] sm:$0xf]  ;;  %v14190_v0 = vor.u32 %v19167_v53, %v14187_v54  ;;  %v7146_v54 = vpop.f32.mrf.mxu0 }
 0x302   : > { %v15147_v57 = vld [vmem:[%s20909_s24 + $0x13d0] sm:$0xf0]  ;;  %7390 = vmatpush.bf16.msra.mxu3 %v14254_v48  ;;  %7365 = vmatpush.bf16.msra.mxu1 %v13166_v62  ;;  %v7147_v59 = vadd.f32 %v7146_v54, %v1648_v43 }
 0x303   : > { %v19535_v58 = vld [vmem:[%s20909_s24 + $0x1794] sm:$0xf]  ;;  %v15150_v1 = vor.u32 %v19407_v56, %v15147_v57  ;;  %7353 = vmatmul.bf16.vlgmr.msra.gmra.mxu0 %v21033_v50 }
 0x304   : > { %v15659_v60 = vld [vmem:[%s20909_s24 + $0x17d0] sm:$0xf0]  ;;  %7378 = vmatpush.bf16.msra.mxu2 %v13678_v63 }
 0x305   : > { %v19663_v61 = vld [vmem:[%s20909_s24 + $0x1b94] sm:$0xf]  ;;  %v15662_v2 = vor.u32 %v19535_v58, %v15659_v60  ;;  %7397 = vmatpush.bf16.msrb.mxu0 %v15150_v1  ;;  %7366 = vmatmul.bf16.vlgmr.msra.gmra.mxu1 %v21036_v51  ;;  %v7159_v60 = vpop.f32.mrf.mxu1 }
 0x306   : > { %v16171_v17 = vld [vmem:[%s20909_s24 + $0x1bd0] sm:$0xf0]  ;;  %7391 = vmatpush.bf16.msra.mxu3 %v14190_v0  ;;  %v7160_v0 = vadd.f32 %v7159_v60, %v7147_v59  ;;  %v13105_v59 = vld [vmem:[%s20909_s24 + $0x398] sm:$0xf] }
 0x307   : > { %v19791_v45 = vld [vmem:[%s20909_s24 + $0x1f94] sm:$0xf]  ;;  %v16174_v3 = vor.u32 %v19663_v61, %v16171_v17  ;;  %7410 = vmatpush.bf16.msrb.mxu1 %v15662_v2  ;;  %7379 = vmatmul.bf16.vlgmr.msra.gmra.mxu2 %v21020_v34  ;;  %v18904_v60 = vld [vmem:[%s20909_s24 + $0x3d4] sm:$0xf0] }
 0x308   : > { %v16683_v19 = vld [vmem:[%s20909_s24 + $0x1fd0] sm:$0xf0] }
 0x309   : > { %v19391_v5 = vld [vmem:[%s20909_s24 + $0x1314] sm:$0xf]  ;;  %v16686_v11 = vor.u32 %v19791_v45, %v16683_v19  ;;  %7423 = vmatpush.bf16.msrb.mxu2 %v16174_v3  ;;  %7392 = vmatmul.bf16.vlgmr.msra.gmra.mxu3 %v21022_v36 }
 0x30a   : > { %v15083_v6 = vld [vmem:[%s20909_s24 + $0x1350] sm:$0xf0] }
 0x30b   : > { %v19519_v9 = vld [vmem:[%s20909_s24 + $0x1714] sm:$0xf]  ;;  %v15086_v21 = vor.u32 %v19391_v5, %v15083_v6  ;;  %7436 = vmatpush.bf16.msrb.mxu3 %v16686_v11  ;;  %v7172_v11 = vpop.f32.mrf.mxu2 }
 0x30c   : > { %v15595_v12 = vld [vmem:[%s20909_s24 + $0x1750] sm:$0xf0] }
 0x30d   : > { %v19647_v13 = vld [vmem:[%s20909_s24 + $0x1b14] sm:$0xf]  ;;  %v15598_v23 = vor.u32 %v19519_v9, %v15595_v12  ;;  %7398 = vmatpush.bf16.msrb.mxu0 %v15086_v21  ;;  %v7185_v21 = vpop.f32.mrf.mxu3 }
 0x30e   : > { %v16107_v14 = vld [vmem:[%s20909_s24 + $0x1b50] sm:$0xf0] }
 0x30f   : > { %v19775_v16 = vld [vmem:[%s20909_s24 + $0x1f14] sm:$0xf]  ;;  %v16110_v24 = vor.u32 %v19647_v13, %v16107_v14  ;;  %7411 = vmatpush.bf16.msrb.mxu1 %v15598_v23 }
 0x310   : > { %v16619_v20 = vld [vmem:[%s20909_s24 + $0x1f50] sm:$0xf0] }
 0x311   : > { %v19375_v25 = vld [vmem:[%s20909_s24 + $0x1294] sm:$0xf]  ;;  %v16622_v28 = vor.u32 %v19775_v16, %v16619_v20  ;;  %7424 = vmatpush.bf16.msrb.mxu2 %v16110_v24  ;;  %v7173_v20 = vadd.f32 %v7172_v11, %v7160_v0  ;;  %v13041_v11 = vld [vmem:[%s20909_s24 + $0x318] sm:$0xf] }
 0x312   : > { %v15019_v26 = vld [vmem:[%s20909_s24 + $0x12d0] sm:$0xf0] }
 0x313   : > { %v19503_v27 = vld [vmem:[%s20909_s24 + $0x1694] sm:$0xf]  ;;  %v15022_v37 = vor.u32 %v19375_v25, %v15019_v26  ;;  %7437 = vmatpush.bf16.msrb.mxu3 %v16622_v28  ;;  %v21769_v26 = vadd.f32 %v7185_v21, %v7173_v20  ;;  %v7174_v54 = vpop.f32.mrf.mxu2  ;;  %v14065_v20 = vld [vmem:[%s20909_s24 + $0xb18] sm:$0xf] }
 0x314   : > { %v15531_v29 = vld [vmem:[%s20909_s24 + $0x16d0] sm:$0xf0]  ;;  %v19144_v21 = vld [vmem:[%s20909_s24 + $0xb54] sm:$0xf0] }
 0x315   : > { %v19631_v30 = vld [vmem:[%s20909_s24 + $0x1a94] sm:$0xf]  ;;  %v15534_v39 = vor.u32 %v19503_v27, %v15531_v29  ;;  %7399 = vmatpush.bf16.msrb.mxu0 %v15022_v37  ;;  %v7148_v27 = vpop.f32.mrf.mxu0  ;;  %v14449_v54 = vld [vmem:[%s20909_s24 + $0xe18] sm:$0xf] }
 0x316   : > { %v16043_v31 = vld [vmem:[%s20909_s24 + $0x1ad0] sm:$0xf0] }
 0x317   : > { %v19759_v32 = vld [vmem:[%s20909_s24 + $0x1e94] sm:$0xf]  ;;  %v16046_v40 = vor.u32 %v19631_v30, %v16043_v31  ;;  %7412 = vmatpush.bf16.msrb.mxu1 %v15534_v39 }
 0x318   : > { %v16555_v35 = vld [vmem:[%s20909_s24 + $0x1ed0] sm:$0xf0] }
 0x319   : > { %v19359_v38 = vld [vmem:[%s20909_s24 + $0x1214] sm:$0xf]  ;;  %v16558_v44 = vor.u32 %v19759_v32, %v16555_v35  ;;  %7425 = vmatpush.bf16.msrb.mxu2 %v16046_v40  ;;  %v7161_v35 = vpop.f32.mrf.mxu1 }
 0x31a   : > { %v14955_v41 = vld [vmem:[%s20909_s24 + $0x1250] sm:$0xf0]  ;;  %v19000_v35 = vld [vmem:[%s20909_s24 + $0x6d4] sm:$0xf0] }
 0x31b   : > { %v19487_v42 = vld [vmem:[%s20909_s24 + $0x1614] sm:$0xf]  ;;  %v14958_v53 = vor.u32 %v19359_v38, %v14955_v41  ;;  %7438 = vmatpush.bf16.msrb.mxu3 %v16558_v44 }
 0x31c   : > { %v15467_v52 = vld [vmem:[%s20909_s24 + $0x1650] sm:$0xf0] }
 0x31d   : > { %v19615_v46 = vld [vmem:[%s20909_s24 + $0x1a14] sm:$0xf]  ;;  %v15470_v33 = vor.u32 %v19487_v42, %v15467_v52  ;;  %7400 = vmatpush.bf16.msrb.mxu0 %v14958_v53 }
 0x31e   : > { %v15979_v47 = vld [vmem:[%s20909_s24 + $0x1a50] sm:$0xf0] }
 0x31f   : > { %v19743_v48 = vld [vmem:[%s20909_s24 + $0x1e14] sm:$0xf]  ;;  %v15982_v55 = vor.u32 %v19615_v46, %v15979_v47  ;;  %7413 = vmatpush.bf16.msrb.mxu1 %v15470_v33 }
 0x320   : > { %v16491_v49 = vld [vmem:[%s20909_s24 + $0x1e50] sm:$0xf0] }
 0x321   : > { %v19343_v56 = vld [vmem:[%s20909_s24 + $0x1194] sm:$0xf]  ;;  %v16494_v61 = vor.u32 %v19743_v48, %v16491_v49  ;;  %7426 = vmatpush.bf16.msrb.mxu2 %v15982_v55 }
 0x322   : > { %v14891_v57 = vld [vmem:[%s20909_s24 + $0x11d0] sm:$0xf0] }
 0x323   : > { %v19471_v58 = vld [vmem:[%s20909_s24 + $0x1594] sm:$0xf]  ;;  %v14894_v1 = vor.u32 %v19343_v56, %v14891_v57  ;;  %7439 = vmatpush.bf16.msrb.mxu3 %v16494_v61  ;;  %v13617_v61 = vld [vmem:[%s20909_s24 + $0x798] sm:$0xf] }
 0x324   : > { %v15403_v17 = vld [vmem:[%s20909_s24 + $0x15d0] sm:$0xf0] }
 0x325   : > { %v19599_v62 = vld [vmem:[%s20909_s24 + $0x1994] sm:$0xf]  ;;  %v15406_v2 = vor.u32 %v19471_v58, %v15403_v17  ;;  %7401 = vmatpush.bf16.msrb.mxu0 %v14894_v1  ;;  %v7187_v58 = vpop.f32.mrf.mxu3  ;;  %v14641_v1 = vld [vmem:[%s20909_s24 + $0xf98] sm:$0xf] }
 0x326   : > { %v15915_v63 = vld [vmem:[%s20909_s24 + $0x19d0] sm:$0xf0] }
 0x327   : > { %v19727_v45 = vld [vmem:[%s20909_s24 + $0x1d94] sm:$0xf]  ;;  %v15918_v3 = vor.u32 %v19599_v62, %v15915_v63  ;;  %7414 = vmatpush.bf16.msrb.mxu1 %v15406_v2  ;;  %v19032_v62 = vld [vmem:[%s20909_s24 + $0x7d4] sm:$0xf0] }
 0x328   : > { %v16427_v19 = vld [vmem:[%s20909_s24 + $0x1dd0] sm:$0xf0]  ;;  %v14129_v63 = vld [vmem:[%s20909_s24 + $0xb98] sm:$0xf] }
 0x329   : > { %v19327_v5 = vld [vmem:[%s20909_s24 + $0x1114] sm:$0xf]  ;;  %v16430_v12 = vor.u32 %v19727_v45, %v16427_v19  ;;  %7427 = vmatpush.bf16.msrb.mxu2 %v15918_v3  ;;  %v19160_v45 = vld [vmem:[%s20909_s24 + $0xbd4] sm:$0xf0] }
 0x32a   : > { %v14827_v6 = vld [vmem:[%s20909_s24 + $0x1150] sm:$0xf0]  ;;  %v19288_v2 = vld [vmem:[%s20909_s24 + $0xfd4] sm:$0xf0] }
 0x32b   : > { %v19455_v9 = vld [vmem:[%s20909_s24 + $0x1514] sm:$0xf]  ;;  %v14830_v25 = vor.u32 %v19327_v5, %v14827_v6  ;;  %7440 = vmatpush.bf16.msrb.mxu3 %v16430_v12  ;;  %v13106_v5 = vor.u32 %v18904_v60, %v13105_v59  ;;  %v13618_v6 = vor.u32 %v19032_v62, %v13617_v61  ;;  %v18888_v12 = vld [vmem:[%s20909_s24 + $0x354] sm:$0xf0]  ;;  %v7211_v62 = vpop.f32.mrf.mxu1 }
 0x32c   : > { %v15339_v13 = vld [vmem:[%s20909_s24 + $0x1550] sm:$0xf0]  ;;  %v12849_v59 = vld [vmem:[%s20909_s24 + $0x198] sm:$0xf] }
 0x32d   : > { %v19583_v14 = vld [vmem:[%s20909_s24 + $0x1914] sm:$0xf]  ;;  %v15342_v28 = vor.u32 %v19455_v9, %v15339_v13  ;;  %7402 = vmatpush.bf16.msrb.mxu0 %v14830_v25  ;;  %v14130_v9 = vor.u32 %v19160_v45, %v14129_v63  ;;  %v13553_v13 = vld [vmem:[%s20909_s24 + $0x718] sm:$0xf]  ;;  %v13042_v25 = vor.u32 %v18888_v12, %v13041_v11 }
 0x32e   : > { %v15851_v16 = vld [vmem:[%s20909_s24 + $0x1950] sm:$0xf0]  ;;  %v18840_v60 = vld [vmem:[%s20909_s24 + $0x1d4] sm:$0xf0] }
 0x32f   : > { %v19711_v23 = vld [vmem:[%s20909_s24 + $0x1d14] sm:$0xf]  ;;  %v15854_v29 = vor.u32 %v19583_v14, %v15851_v16  ;;  %7415 = vmatpush.bf16.msrb.mxu1 %v15342_v28  ;;  %v14642_v14 = vor.u32 %v19288_v2, %v14641_v1  ;;  %v19016_v16 = vld [vmem:[%s20909_s24 + $0x754] sm:$0xf0]  ;;  %v14066_v28 = vor.u32 %v19144_v21, %v14065_v20 }
 0x330   : > { %v16363_v24 = vld [vmem:[%s20909_s24 + $0x1d50] sm:$0xf0]  ;;  %v13554_v27 = vor.u32 %v19016_v16, %v13553_v13  ;;  %v13361_v61 = vld [vmem:[%s20909_s24 + $0x598] sm:$0xf]  ;;  %v7224_v13 = vpop.f32.mrf.mxu2 }
 0x331   : > { %v19311_v30 = vld [vmem:[%s20909_s24 + $0x1094] sm:$0xf]  ;;  %v16366_v37 = vor.u32 %v19711_v23, %v16363_v24  ;;  %7428 = vmatpush.bf16.msrb.mxu2 %v15854_v29  ;;  %v14577_v23 = vld [vmem:[%s20909_s24 + $0xf18] sm:$0xf] }
 0x332   : > { %v14763_v31 = vld [vmem:[%s20909_s24 + $0x10d0] sm:$0xf0]  ;;  %v19272_v24 = vld [vmem:[%s20909_s24 + $0xf54] sm:$0xf0] }
 0x333   : > { %v19439_v32 = vld [vmem:[%s20909_s24 + $0x1494] sm:$0xf]  ;;  %v14766_v43 = vor.u32 %v19311_v30, %v14763_v31  ;;  %7441 = vmatpush.bf16.msrb.mxu3 %v16366_v37  ;;  %v12977_v29 = vld [vmem:[%s20909_s24 + $0x298] sm:$0xf] }
 0x334   : > { %v15275_v38 = vld [vmem:[%s20909_s24 + $0x14d0] sm:$0xf0]  ;;  %v18872_v30 = vld [vmem:[%s20909_s24 + $0x2d4] sm:$0xf0] }
 0x335   : > { %v19567_v39 = vld [vmem:[%s20909_s24 + $0x1894] sm:$0xf]  ;;  %v15278_v46 = vor.u32 %v19439_v32, %v15275_v38  ;;  %7403 = vmatpush.bf16.msrb.mxu0 %v14766_v43  ;;  %v13489_v31 = vld [vmem:[%s20909_s24 + $0x698] sm:$0xf]  ;;  %v14578_v32 = vor.u32 %v19272_v24, %v14577_v23  ;;  %v7237_v24 = vpop.f32.mrf.mxu3 }
 0x336   : > { %v15787_v40 = vld [vmem:[%s20909_s24 + $0x18d0] sm:$0xf0]  ;;  %v14001_v37 = vld [vmem:[%s20909_s24 + $0xa98] sm:$0xf] }
 0x337   : > { %v19695_v41 = vld [vmem:[%s20909_s24 + $0x1c94] sm:$0xf]  ;;  %v15790_v47 = vor.u32 %v19567_v39, %v15787_v40  ;;  %7416 = vmatpush.bf16.msrb.mxu1 %v15278_v46  ;;  %v19128_v38 = vld [vmem:[%s20909_s24 + $0xad4] sm:$0xf0] }
 0x338   : > { %v16299_v42 = vld [vmem:[%s20909_s24 + $0x1cd0] sm:$0xf0]  ;;  %v14513_v39 = vld [vmem:[%s20909_s24 + $0xe98] sm:$0xf]  ;;  %v14002_v43 = vor.u32 %v19128_v38, %v14001_v37 }
 0x339   : > { %v19295_v44 = vld [vmem:[%s20909_s24 + $0x1014] sm:$0xf]  ;;  %v16302_v33 = vor.u32 %v19695_v41, %v16299_v42  ;;  %7429 = vmatpush.bf16.msrb.mxu2 %v15790_v47  ;;  %v19256_v40 = vld [vmem:[%s20909_s24 + $0xed4] sm:$0xf0]  ;;  %v12978_v41 = vor.u32 %v18872_v30, %v12977_v29  ;;  %v13490_v42 = vor.u32 %v19000_v35, %v13489_v31 }
 0x33a   : > { %v14699_v52 = vld [vmem:[%s20909_s24 + $0x1050] sm:$0xf0]  ;;  %v13425_v46 = vld [vmem:[%s20909_s24 + $0x618] sm:$0xf]  ;;  %v14514_v47 = vor.u32 %v19256_v40, %v14513_v39  ;;  %v7213_v39 = vpop.f32.mrf.mxu1 }
 0x33b   : > { %v19423_v48 = vld [vmem:[%s20909_s24 + $0x1414] sm:$0xf]  ;;  %v14702_v17 = vor.u32 %v19295_v44, %v14699_v52  ;;  %7442 = vmatpush.bf16.msrb.mxu3 %v16302_v33  ;;  %v12913_v44 = vld [vmem:[%s20909_s24 + $0x218] sm:$0xf] }
 0x33c   : > { %v15211_v49 = vld [vmem:[%s20909_s24 + $0x1450] sm:$0xf0]  ;;  %v18856_v52 = vld [vmem:[%s20909_s24 + $0x254] sm:$0xf0] }
 0x33d   : > { %v19551_v53 = vld [vmem:[%s20909_s24 + $0x1814] sm:$0xf]  ;;  %v15214_v19 = vor.u32 %v19423_v48, %v15211_v49  ;;  %7404 = vmatpush.bf16.msrb.mxu0 %v14702_v17  ;;  %v18984_v48 = vld [vmem:[%s20909_s24 + $0x654] sm:$0xf0] }
 0x33e   : > { %v15723_v55 = vld [vmem:[%s20909_s24 + $0x1850] sm:$0xf0]  ;;  %v13937_v49 = vld [vmem:[%s20909_s24 + $0xa18] sm:$0xf] }
 0x33f   : > { %v19679_v56 = vld [vmem:[%s20909_s24 + $0x1c14] sm:$0xf]  ;;  %v15726_v0 = vor.u32 %v19551_v53, %v15723_v55  ;;  %7417 = vmatpush.bf16.msrb.mxu1 %v15214_v19  ;;  %v19112_v53 = vld [vmem:[%s20909_s24 + $0xa54] sm:$0xf0]  ;;  %v12914_v55 = vor.u32 %v18856_v52, %v12913_v44 }
 0x340   : > { %v16235_v57 = vld [vmem:[%s20909_s24 + $0x1c50] sm:$0xf0]  ;;  %7405 = vmatmul.bf16.vlgmr.msrb.gmra.mxu0 %v21090_v7  ;;  %v19240_v33 = vld [vmem:[%s20909_s24 + $0xe54] sm:$0xf0]  ;;  %v13938_v58 = vor.u32 %v19112_v53, %v13937_v49 }
 0x341   : > { %v16238_v3 = vor.u32 %v19679_v56, %v16235_v57  ;;  %7430 = vmatpush.bf16.msrb.mxu2 %v15726_v0  ;;  %7449 = vmatpush.bf16.msra.mxu0 %v13106_v5  ;;  %v7198_v56 = vpop.f32.mrf.mxu0  ;;  %v13426_v57 = vor.u32 %v18984_v48, %v13425_v46  ;;  %v14450_v63 = vor.u32 %v19240_v33, %v14449_v54  ;;  %v18968_v45 = vld [vmem:[%s20909_s24 + $0x5d4] sm:$0xf0] }
 0x342   : > { %7418 = vmatmul.bf16.vlgmr.msrb.gmra.mxu1 %v21094_v10  ;;  %v7199_v17 = vadd.f32 %v7198_v56, %v21769_v26  ;;  %v13873_v19 = vld [vmem:[%s20909_s24 + $0x998] sm:$0xf]  ;;  %v12850_v5 = vor.u32 %v18840_v60, %v12849_v59  ;;  %v13362_v26 = vor.u32 %v18968_v45, %v13361_v61  ;;  %v7226_v56 = vpop.f32.mrf.mxu2  ;;  %v7239_v61 = vpop.f32.mrf.mxu3 }
 0x343   : > { %7443 = vmatpush.bf16.msrb.mxu3 %v16238_v3  ;;  %7462 = vmatpush.bf16.msra.mxu1 %v13618_v6  ;;  %v19096_v0 = vld [vmem:[%s20909_s24 + $0x9d4] sm:$0xf0] }
 0x344   : > { %7431 = vmatmul.bf16.vlgmr.msrb.gmra.mxu2 %v21086_v4  ;;  %v14385_v1 = vld [vmem:[%s20909_s24 + $0xd98] sm:$0xf]  ;;  %v7212_v3 = vadd.f32 %v7211_v62, %v7199_v17  ;;  %v13874_v6 = vor.u32 %v19096_v0, %v13873_v19 }
 0x345   : > { %7475 = vmatpush.bf16.msra.mxu2 %v14130_v9  ;;  %7450 = vmatpush.bf16.msra.mxu0 %v13042_v25  ;;  %v19224_v2 = vld [vmem:[%s20909_s24 + $0xdd4] sm:$0xf0] }
 0x346   : > { %7444 = vmatmul.bf16.vlgmr.msrb.gmra.mxu3 %v21092_v8  ;;  %v12785_v9 = vld [vmem:[%s20909_s24 + $0x118] sm:$0xf]  ;;  %v7225_v23 = vadd.f32 %v7224_v13, %v7212_v3 }
 0x347   : > { %7488 = vmatpush.bf16.msra.mxu3 %v14642_v14  ;;  %7463 = vmatpush.bf16.msra.mxu1 %v13554_v27  ;;  %v18824_v11 = vld [vmem:[%s20909_s24 + $0x154] sm:$0xf0]  ;;  %v14386_v14 = vor.u32 %v19224_v2, %v14385_v1 }
 0x348   : > { %v13297_v12 = vld [vmem:[%s20909_s24 + $0x518] sm:$0xf]  ;;  %v21840_v29 = vadd.f32 %v7237_v24, %v7225_v23 }
 0x349   : > { %7476 = vmatpush.bf16.msra.mxu2 %v14066_v28  ;;  %7451 = vmatpush.bf16.msra.mxu0 %v12978_v41  ;;  %v18952_v16 = vld [vmem:[%s20909_s24 + $0x554] sm:$0xf0]  ;;  %v12786_v28 = vor.u32 %v18824_v11, %v12785_v9  ;;  %v7200_v30 = vpop.f32.mrf.mxu0 }
 0x34a   : > { %v13809_v20 = vld [vmem:[%s20909_s24 + $0x918] sm:$0xf]  ;;  %v13298_v31 = vor.u32 %v18952_v16, %v13297_v12 }
 0x34b   : > { %7489 = vmatpush.bf16.msra.mxu3 %v14578_v32  ;;  %7464 = vmatpush.bf16.msra.mxu1 %v13490_v42  ;;  %v19080_v21 = vld [vmem:[%s20909_s24 + $0x954] sm:$0xf0] }
 0x34c   : > { %v14321_v25 = vld [vmem:[%s20909_s24 + $0xd18] sm:$0xf]  ;;  %v13810_v32 = vor.u32 %v19080_v21, %v13809_v20 }
 0x34d   : > { %7477 = vmatpush.bf16.msra.mxu2 %v14002_v43  ;;  %7452 = vmatpush.bf16.msra.mxu0 %v12914_v55  ;;  %v19208_v27 = vld [vmem:[%s20909_s24 + $0xd54] sm:$0xf0] }
 0x34e   : > { %v12721_v35 = vld [vmem:[%s20909_s24 + $0x98] sm:$0xf]  ;;  %v14322_v40 = vor.u32 %v19208_v27, %v14321_v25 }
 0x34f   : > { %7490 = vmatpush.bf16.msra.mxu3 %v14514_v47  ;;  %7465 = vmatpush.bf16.msra.mxu1 %v13426_v57  ;;  %v18808_v37 = vld [vmem:[%s20909_s24 + $0xd4] sm:$0xf0] }
 0x350   : > { %v13233_v38 = vld [vmem:[%s20909_s24 + $0x498] sm:$0xf]  ;;  %v12722_v46 = vor.u32 %v18808_v37, %v12721_v35 }
 0x351   : > { %7478 = vmatpush.bf16.msra.mxu2 %v13938_v58  ;;  %7453 = vmatpush.bf16.msra.mxu0 %v12850_v5  ;;  %v18936_v41 = vld [vmem:[%s20909_s24 + $0x4d4] sm:$0xf0]  ;;  %v7250_v61 = vpop.f32.mrf.mxu0 }
 0x352   : > { %v13745_v42 = vld [vmem:[%s20909_s24 + $0x898] sm:$0xf]  ;;  %v13234_v49 = vor.u32 %v18936_v41, %v13233_v38 }
 0x353   : > { %7491 = vmatpush.bf16.msra.mxu3 %v14450_v63  ;;  %7466 = vmatpush.bf16.msra.mxu1 %v13362_v26  ;;  %v19064_v43 = vld [vmem:[%s20909_s24 + $0x8d4] sm:$0xf0] }
 0x354   : > { %v14257_v44 = vld [vmem:[%s20909_s24 + $0xc98] sm:$0xf]  ;;  %v13746_v53 = vor.u32 %v19064_v43, %v13745_v42 }
 0x355   : > { %7479 = vmatpush.bf16.msra.mxu2 %v13874_v6  ;;  %v19192_v52 = vld [vmem:[%s20909_s24 + $0xcd4] sm:$0xf0]  ;;  %7454 = vmatpush.bf16.msra.mxu0 %v12786_v28 }
 0x356   : > { %v12657_v47 = vld [vmem:[%s20909_s24 + $0x18] sm:$0xf]  ;;  %v14258_v57 = vor.u32 %v19192_v52, %v14257_v44 }
 0x357   : > { %7492 = vmatpush.bf16.msra.mxu3 %v14386_v14  ;;  %v18792_v48 = vld [vmem:[%s20909_s24 + $0x54] sm:$0xf0]  ;;  %7467 = vmatpush.bf16.msra.mxu1 %v13298_v31 }
 0x358   : > { %v13169_v54 = vld [vmem:[%s20909_s24 + $0x418] sm:$0xf]  ;;  %v12658_v45 = vor.u32 %v18792_v48, %v12657_v47 }
 0x359   : > { %7480 = vmatpush.bf16.msra.mxu2 %v13810_v32  ;;  %v18920_v33 = vld [vmem:[%s20909_s24 + $0x454] sm:$0xf0]  ;;  %7455 = vmatpush.bf16.msra.mxu0 %v12722_v46 }
 0x35a   : > { %v13681_v55 = vld [vmem:[%s20909_s24 + $0x818] sm:$0xf]  ;;  %v13170_v2 = vor.u32 %v18920_v33, %v13169_v54 }
 0x35b   : > { %7493 = vmatpush.bf16.msra.mxu3 %v14322_v40  ;;  %v19048_v58 = vld [vmem:[%s20909_s24 + $0x854] sm:$0xf0]  ;;  %7468 = vmatpush.bf16.msra.mxu1 %v13234_v49 }
 0x35c   : > { %v14193_v59 = vld [vmem:[%s20909_s24 + $0xc18] sm:$0xf]  ;;  %v13682_v3 = vor.u32 %v19048_v58, %v13681_v55 }
 0x35d   : > { %v19176_v60 = vld [vmem:[%s20909_s24 + $0xc54] sm:$0xf0]  ;;  %7481 = vmatpush.bf16.msra.mxu2 %v13746_v53  ;;  %7456 = vmatpush.bf16.msra.mxu0 %v12658_v45  ;;  %v21890_v53 = vld [vmem:[%s20915_s17] sm:$0xff] }
 0x35e   : > { %v15153_v17 = vld [vmem:[%s20909_s24 + $0x1398] sm:$0xf]  ;;  %v14194_v6 = vor.u32 %v19176_v60, %v14193_v59  ;;  %v1649_v54 = vperm.slane %v21890_v53, 4 }
 0x35f   : > { %v19416_v62 = vld [vmem:[%s20909_s24 + $0x13d4] sm:$0xf0]  ;;  %7494 = vmatpush.bf16.msra.mxu3 %v14258_v57  ;;  %7469 = vmatpush.bf16.msra.mxu1 %v13170_v2 }
 0x360   : > { %v15665_v63 = vld [vmem:[%s20909_s24 + $0x1798] sm:$0xf]  ;;  %v15154_v9 = vor.u32 %v19416_v62, %v15153_v17  ;;  %7457 = vmatmul.bf16.vlgmr.msra.gmra.mxu0 %v21033_v50 }
 0x361   : > { %v19544_v19 = vld [vmem:[%s20909_s24 + $0x17d4] sm:$0xf0]  ;;  %7482 = vmatpush.bf16.msra.mxu2 %v13682_v3 }
 0x362   : > { %v16177_v0 = vld [vmem:[%s20909_s24 + $0x1b98] sm:$0xf]  ;;  %v15666_v11 = vor.u32 %v19544_v19, %v15665_v63  ;;  %7501 = vmatpush.bf16.msrb.mxu0 %v15154_v9  ;;  %7470 = vmatmul.bf16.vlgmr.msra.gmra.mxu1 %v21036_v51 }
 0x363   : > { %v19672_v1 = vld [vmem:[%s20909_s24 + $0x1bd4] sm:$0xf0]  ;;  %7495 = vmatpush.bf16.msra.mxu3 %v14194_v6 }
 0x364   : > { %v16689_v5 = vld [vmem:[%s20909_s24 + $0x1f98] sm:$0xf]  ;;  %v16178_v12 = vor.u32 %v19672_v1, %v16177_v0  ;;  %7514 = vmatpush.bf16.msrb.mxu1 %v15666_v11  ;;  %7483 = vmatmul.bf16.vlgmr.msra.gmra.mxu2 %v21020_v34  ;;  %v7251_v0 = vadd.f32 %v7250_v61, %v1649_v54  ;;  %v7263_v1 = vpop.f32.mrf.mxu1 }
 0x365   : > { %v19800_v26 = vld [vmem:[%s20909_s24 + $0x1fd4] sm:$0xf0] }
 0x366   : > { %v15089_v13 = vld [vmem:[%s20909_s24 + $0x1318] sm:$0xf]  ;;  %v16690_v20 = vor.u32 %v19800_v26, %v16689_v5  ;;  %7527 = vmatpush.bf16.msrb.mxu2 %v16178_v12  ;;  %7496 = vmatmul.bf16.vlgmr.msra.gmra.mxu3 %v21022_v36  ;;  %v7264_v11 = vadd.f32 %v7263_v1, %v7251_v0 }
 0x367   : > { %v19400_v14 = vld [vmem:[%s20909_s24 + $0x1354] sm:$0xf0] }
 0x368   : > { %v15601_v16 = vld [vmem:[%s20909_s24 + $0x1718] sm:$0xf]  ;;  %v15090_v28 = vor.u32 %v19400_v14, %v15089_v13  ;;  %7540 = vmatpush.bf16.msrb.mxu3 %v16690_v20 }
 0x369   : > { %v19528_v21 = vld [vmem:[%s20909_s24 + $0x1754] sm:$0xf0] }
 0x36a   : > { %v16113_v23 = vld [vmem:[%s20909_s24 + $0x1b18] sm:$0xf]  ;;  %v15602_v30 = vor.u32 %v19528_v21, %v15601_v16  ;;  %7502 = vmatpush.bf16.msrb.mxu0 %v15090_v28 }
 0x36b   : > { %v19656_v24 = vld [vmem:[%s20909_s24 + $0x1b54] sm:$0xf0] }
 0x36c   : > { %v16625_v25 = vld [vmem:[%s20909_s24 + $0x1f18] sm:$0xf]  ;;  %v16114_v31 = vor.u32 %v19656_v24, %v16113_v23  ;;  %7515 = vmatpush.bf16.msrb.mxu1 %v15602_v30  ;;  %v7276_v23 = vpop.f32.mrf.mxu2 }
 0x36d   : > { %v19784_v27 = vld [vmem:[%s20909_s24 + $0x1f54] sm:$0xf0]  ;;  %v7277_v30 = vadd.f32 %v7276_v23, %v7264_v11  ;;  %v14131_v11 = vld [vmem:[%s20909_s24 + $0xbd8] sm:$0xf0] }
 0x36e   : > { %v15025_v32 = vld [vmem:[%s20909_s24 + $0x1298] sm:$0xf]  ;;  %v16626_v38 = vor.u32 %v19784_v27, %v16625_v25  ;;  %7528 = vmatpush.bf16.msrb.mxu2 %v16114_v31  ;;  %v7289_v31 = vpop.f32.mrf.mxu3 }
 0x36f   : > { %v19384_v35 = vld [vmem:[%s20909_s24 + $0x12d4] sm:$0xf0] }
 0x370   : > { %v15537_v37 = vld [vmem:[%s20909_s24 + $0x1698] sm:$0xf]  ;;  %v15026_v44 = vor.u32 %v19384_v35, %v15025_v32  ;;  %7541 = vmatpush.bf16.msrb.mxu3 %v16626_v38  ;;  %v21914_v38 = vadd.f32 %v7289_v31, %v7277_v30  ;;  %v13555_v31 = vld [vmem:[%s20909_s24 + $0x758] sm:$0xf0] }
 0x371   : > { %v19512_v39 = vld [vmem:[%s20909_s24 + $0x16d4] sm:$0xf0] }
 0x372   : > { %v16049_v40 = vld [vmem:[%s20909_s24 + $0x1a98] sm:$0xf]  ;;  %v15538_v46 = vor.u32 %v19512_v39, %v15537_v37  ;;  %7503 = vmatpush.bf16.msrb.mxu0 %v15026_v44  ;;  %v7252_v39 = vpop.f32.mrf.mxu0 }
 0x373   : > { %v19640_v41 = vld [vmem:[%s20909_s24 + $0x1ad4] sm:$0xf0]  ;;  %v14579_v39 = vld [vmem:[%s20909_s24 + $0xf58] sm:$0xf0] }
 0x374   : > { %v16561_v42 = vld [vmem:[%s20909_s24 + $0x1e98] sm:$0xf]  ;;  %v16050_v47 = vor.u32 %v19640_v41, %v16049_v40  ;;  %7516 = vmatpush.bf16.msrb.mxu1 %v15538_v46 }
 0x375   : > { %v19768_v43 = vld [vmem:[%s20909_s24 + $0x1ed4] sm:$0xf0] }
 0x376   : > { %v14961_v52 = vld [vmem:[%s20909_s24 + $0x1218] sm:$0xf]  ;;  %v16562_v33 = vor.u32 %v19768_v43, %v16561_v42  ;;  %7529 = vmatpush.bf16.msrb.mxu2 %v16050_v47  ;;  %v7291_v1 = vpop.f32.mrf.mxu3 }
 0x377   : > { %v19368_v48 = vld [vmem:[%s20909_s24 + $0x1254] sm:$0xf0] }
 0x378   : > { %v15473_v49 = vld [vmem:[%s20909_s24 + $0x1618] sm:$0xf]  ;;  %v14962_v60 = vor.u32 %v19368_v48, %v14961_v52  ;;  %7542 = vmatpush.bf16.msrb.mxu3 %v16562_v33  ;;  %v7265_v52 = vpop.f32.mrf.mxu1 }
 0x379   : > { %v19496_v55 = vld [vmem:[%s20909_s24 + $0x1654] sm:$0xf0]  ;;  %v18992_v52 = vld [vmem:[%s20909_s24 + $0x69c] sm:$0xf] }
 0x37a   : > { %v15985_v56 = vld [vmem:[%s20909_s24 + $0x1a18] sm:$0xf]  ;;  %v15474_v17 = vor.u32 %v19496_v55, %v15473_v49  ;;  %7504 = vmatpush.bf16.msrb.mxu0 %v14962_v60  ;;  %v7302_v1 = vpop.f32.mrf.mxu0 }
 0x37b   : > { %v19624_v57 = vld [vmem:[%s20909_s24 + $0x1a54] sm:$0xf0] }
 0x37c   : > { %v16497_v58 = vld [vmem:[%s20909_s24 + $0x1e18] sm:$0xf]  ;;  %v15986_v62 = vor.u32 %v19624_v57, %v15985_v56  ;;  %7517 = vmatpush.bf16.msrb.mxu1 %v15474_v17 }
 0x37d   : > { %v19752_v59 = vld [vmem:[%s20909_s24 + $0x1e54] sm:$0xf0] }
 0x37e   : > { %v14897_v63 = vld [vmem:[%s20909_s24 + $0x1198] sm:$0xf]  ;;  %v16498_v2 = vor.u32 %v19752_v59, %v16497_v58  ;;  %7530 = vmatpush.bf16.msrb.mxu2 %v15986_v62  ;;  %v7278_v62 = vpop.f32.mrf.mxu2 }
 0x37f   : > { %v19352_v45 = vld [vmem:[%s20909_s24 + $0x11d4] sm:$0xf0]  ;;  %v19104_v62 = vld [vmem:[%s20909_s24 + $0xa1c] sm:$0xf] }
 0x380   : > { %v15409_v19 = vld [vmem:[%s20909_s24 + $0x1598] sm:$0xf]  ;;  %v14898_v12 = vor.u32 %v19352_v45, %v14897_v63  ;;  %7543 = vmatpush.bf16.msrb.mxu3 %v16498_v2  ;;  %v18896_v2 = vld [vmem:[%s20909_s24 + $0x39c] sm:$0xf] }
 0x381   : > { %v19480_v3 = vld [vmem:[%s20909_s24 + $0x15d4] sm:$0xf0] }
 0x382   : > { %v15921_v5 = vld [vmem:[%s20909_s24 + $0x1998] sm:$0xf]  ;;  %v15410_v13 = vor.u32 %v19480_v3, %v15409_v19  ;;  %7505 = vmatpush.bf16.msrb.mxu0 %v14898_v12  ;;  %v13107_v3 = vld [vmem:[%s20909_s24 + $0x3d8] sm:$0xf0] }
 0x383   : > { %v19608_v26 = vld [vmem:[%s20909_s24 + $0x19d4] sm:$0xf0] }
 0x384   : > { %v16433_v6 = vld [vmem:[%s20909_s24 + $0x1d98] sm:$0xf]  ;;  %v15922_v14 = vor.u32 %v19608_v26, %v15921_v5  ;;  %7518 = vmatpush.bf16.msrb.mxu1 %v15410_v13  ;;  %v19024_v5 = vld [vmem:[%s20909_s24 + $0x79c] sm:$0xf] }
 0x385   : > { %v19736_v9 = vld [vmem:[%s20909_s24 + $0x1dd4] sm:$0xf0] }
 0x386   : > { %v14833_v16 = vld [vmem:[%s20909_s24 + $0x1118] sm:$0xf]  ;;  %v16434_v24 = vor.u32 %v19736_v9, %v16433_v6  ;;  %7531 = vmatpush.bf16.msrb.mxu2 %v15922_v14  ;;  %v13619_v6 = vld [vmem:[%s20909_s24 + $0x7d8] sm:$0xf0] }
 0x387   : > { %v19336_v20 = vld [vmem:[%s20909_s24 + $0x1154] sm:$0xf0]  ;;  %v19152_v9 = vld [vmem:[%s20909_s24 + $0xb9c] sm:$0xf]  ;;  %v13622_v23 = vor.u32 %v19024_v5, %v13619_v6 }
 0x388   : > { %v15345_v21 = vld [vmem:[%s20909_s24 + $0x1518] sm:$0xf]  ;;  %v14834_v37 = vor.u32 %v19336_v20, %v14833_v16  ;;  %7544 = vmatpush.bf16.msrb.mxu3 %v16434_v24  ;;  %v19280_v14 = vld [vmem:[%s20909_s24 + $0xf9c] sm:$0xf]  ;;  %v14134_v24 = vor.u32 %v19152_v9, %v14131_v11  ;;  %v7303_v9 = vadd.f32 %v7302_v1, %v21914_v38  ;;  %v7315_v11 = vpop.f32.mrf.mxu1 }
 0x389   : > { %v19464_v25 = vld [vmem:[%s20909_s24 + $0x1554] sm:$0xf0]  ;;  %v14643_v16 = vld [vmem:[%s20909_s24 + $0xfd8] sm:$0xf0] }
 0x38a   : > { %v15857_v27 = vld [vmem:[%s20909_s24 + $0x1918] sm:$0xf]  ;;  %v15346_v40 = vor.u32 %v19464_v25, %v15345_v21  ;;  %7506 = vmatpush.bf16.msrb.mxu0 %v14834_v37  ;;  %v13110_v21 = vor.u32 %v18896_v2, %v13107_v3  ;;  %v18880_v25 = vld [vmem:[%s20909_s24 + $0x31c] sm:$0xf]  ;;  %v14646_v30 = vor.u32 %v19280_v14, %v14643_v16 }
 0x38b   : > { %v19592_v28 = vld [vmem:[%s20909_s24 + $0x1954] sm:$0xf0]  ;;  %v19264_v37 = vld [vmem:[%s20909_s24 + $0xf1c] sm:$0xf] }
 0x38c   : > { %v16369_v32 = vld [vmem:[%s20909_s24 + $0x1d18] sm:$0xf]  ;;  %v15858_v41 = vor.u32 %v19592_v28, %v15857_v27  ;;  %7519 = vmatpush.bf16.msrb.mxu1 %v15346_v40  ;;  %v13043_v27 = vld [vmem:[%s20909_s24 + $0x358] sm:$0xf0] }
 0x38d   : > { %v19720_v35 = vld [vmem:[%s20909_s24 + $0x1d54] sm:$0xf0]  ;;  %v19008_v28 = vld [vmem:[%s20909_s24 + $0x71c] sm:$0xf]  ;;  %v13046_v40 = vor.u32 %v18880_v25, %v13043_v27 }
 0x38e   : > { %v14769_v42 = vld [vmem:[%s20909_s24 + $0x1098] sm:$0xf]  ;;  %v16370_v46 = vor.u32 %v19720_v35, %v16369_v32  ;;  %7532 = vmatpush.bf16.msrb.mxu2 %v15858_v41  ;;  %v19136_v32 = vld [vmem:[%s20909_s24 + $0xb1c] sm:$0xf]  ;;  %v13558_v41 = vor.u32 %v19008_v28, %v13555_v31  ;;  %v7328_v31 = vpop.f32.mrf.mxu2 }
 0x38f   : > { %v19320_v43 = vld [vmem:[%s20909_s24 + $0x10d4] sm:$0xf0]  ;;  %v14067_v35 = vld [vmem:[%s20909_s24 + $0xb58] sm:$0xf0] }
 0x390   : > { %v15281_v44 = vld [vmem:[%s20909_s24 + $0x1498] sm:$0xf]  ;;  %v14770_v55 = vor.u32 %v19320_v43, %v14769_v42  ;;  %7545 = vmatpush.bf16.msrb.mxu3 %v16370_v46  ;;  %v14070_v42 = vor.u32 %v19136_v32, %v14067_v35  ;;  %v18864_v43 = vld [vmem:[%s20909_s24 + $0x29c] sm:$0xf]  ;;  %v14582_v46 = vor.u32 %v19264_v37, %v14579_v39 }
 0x391   : > { %v19448_v47 = vld [vmem:[%s20909_s24 + $0x14d4] sm:$0xf0]  ;;  %v18832_v5 = vld [vmem:[%s20909_s24 + $0x19c] sm:$0xf] }
 0x392   : > { %v15793_v48 = vld [vmem:[%s20909_s24 + $0x1898] sm:$0xf]  ;;  %v15282_v58 = vor.u32 %v19448_v47, %v15281_v44  ;;  %7507 = vmatpush.bf16.msrb.mxu0 %v14770_v55  ;;  %v12979_v44 = vld [vmem:[%s20909_s24 + $0x2d8] sm:$0xf0] }
 0x393   : > { %v19576_v49 = vld [vmem:[%s20909_s24 + $0x18d4] sm:$0xf0]  ;;  %v13491_v47 = vld [vmem:[%s20909_s24 + $0x6d8] sm:$0xf0]  ;;  %v12982_v55 = vor.u32 %v18864_v43, %v12979_v44 }
 0x394   : > { %v16305_v54 = vld [vmem:[%s20909_s24 + $0x1c98] sm:$0xf]  ;;  %v15794_v59 = vor.u32 %v19576_v49, %v15793_v48  ;;  %7520 = vmatpush.bf16.msrb.mxu1 %v15282_v58  ;;  %v19120_v48 = vld [vmem:[%s20909_s24 + $0xa9c] sm:$0xf] }
 0x395   : > { %v19704_v33 = vld [vmem:[%s20909_s24 + $0x1cd4] sm:$0xf0]  ;;  %v14003_v49 = vld [vmem:[%s20909_s24 + $0xad8] sm:$0xf0] }
 0x396   : > { %v14705_v56 = vld [vmem:[%s20909_s24 + $0x1018] sm:$0xf]  ;;  %v16306_v63 = vor.u32 %v19704_v33, %v16305_v54  ;;  %7533 = vmatpush.bf16.msrb.mxu2 %v15794_v59  ;;  %v19248_v54 = vld [vmem:[%s20909_s24 + $0xe9c] sm:$0xf] }
 0x397   : > { %v19304_v57 = vld [vmem:[%s20909_s24 + $0x1054] sm:$0xf0]  ;;  %v14515_v33 = vld [vmem:[%s20909_s24 + $0xed8] sm:$0xf0] }
 0x398   : > { %v15217_v60 = vld [vmem:[%s20909_s24 + $0x1418] sm:$0xf]  ;;  %v14706_v26 = vor.u32 %v19304_v57, %v14705_v56  ;;  %7546 = vmatpush.bf16.msrb.mxu3 %v16306_v63  ;;  %v13494_v56 = vor.u32 %v18992_v52, %v13491_v47  ;;  %v14006_v57 = vor.u32 %v19120_v48, %v14003_v49  ;;  %v18848_v58 = vld [vmem:[%s20909_s24 + $0x21c] sm:$0xf] }
 0x399   : > { %v19432_v61 = vld [vmem:[%s20909_s24 + $0x1454] sm:$0xf0]  ;;  %v12915_v59 = vld [vmem:[%s20909_s24 + $0x258] sm:$0xf0] }
 0x39a   : > { %v15729_v17 = vld [vmem:[%s20909_s24 + $0x1818] sm:$0xf]  ;;  %v15218_v12 = vor.u32 %v19432_v61, %v15217_v60  ;;  %7508 = vmatpush.bf16.msrb.mxu0 %v14706_v26  ;;  %v18976_v60 = vld [vmem:[%s20909_s24 + $0x61c] sm:$0xf]  ;;  %v14518_v61 = vor.u32 %v19248_v54, %v14515_v33 }
 0x39b   : > { %v19560_v45 = vld [vmem:[%s20909_s24 + $0x1854] sm:$0xf0]  ;;  %v13939_v63 = vld [vmem:[%s20909_s24 + $0xa58] sm:$0xf0] }
 0x39c   : > { %v16241_v19 = vld [vmem:[%s20909_s24 + $0x1c18] sm:$0xf]  ;;  %v15730_v13 = vor.u32 %v19560_v45, %v15729_v17  ;;  %7521 = vmatpush.bf16.msrb.mxu1 %v15218_v12  ;;  %v13427_v17 = vld [vmem:[%s20909_s24 + $0x658] sm:$0xf0]  ;;  %v13942_v3 = vor.u32 %v19104_v62, %v13939_v63 }
 0x39d   : > { %v19688_v0 = vld [vmem:[%s20909_s24 + $0x1c54] sm:$0xf0]  ;;  %7509 = vmatmul.bf16.vlgmr.msrb.gmra.mxu0 %v21090_v7  ;;  %v19232_v45 = vld [vmem:[%s20909_s24 + $0xe1c] sm:$0xf]  ;;  %v13430_v2 = vor.u32 %v18976_v60, %v13427_v17 }
 0x39e   : > { %v16242_v20 = vor.u32 %v19688_v0, %v16241_v19  ;;  %7534 = vmatpush.bf16.msrb.mxu2 %v15730_v13  ;;  %7553 = vmatpush.bf16.msra.mxu0 %v13110_v21  ;;  %v14451_v19 = vld [vmem:[%s20909_s24 + $0xe58] sm:$0xf0]  ;;  %v12918_v0 = vor.u32 %v18848_v58, %v12915_v59 }
 0x39f   : > { %7522 = vmatmul.bf16.vlgmr.msrb.gmra.mxu1 %v21094_v10  ;;  %v12851_v26 = vld [vmem:[%s20909_s24 + $0x1d8] sm:$0xf0]  ;;  %v14454_v12 = vor.u32 %v19232_v45, %v14451_v19 }
 0x3a0   : > { %7547 = vmatpush.bf16.msrb.mxu3 %v16242_v20  ;;  %7566 = vmatpush.bf16.msra.mxu1 %v13622_v23  ;;  %v18960_v6 = vld [vmem:[%s20909_s24 + $0x59c] sm:$0xf]  ;;  %v7316_v23 = vadd.f32 %v7315_v11, %v7303_v9 }
 0x3a1   : > { %7535 = vmatmul.bf16.vlgmr.msrb.gmra.mxu2 %v21086_v4  ;;  %v13363_v13 = vld [vmem:[%s20909_s24 + $0x5d8] sm:$0xf0] }
 0x3a2   : > { %7579 = vmatpush.bf16.msra.mxu2 %v14134_v24  ;;  %7554 = vmatpush.bf16.msra.mxu0 %v13046_v40  ;;  %v19088_v14 = vld [vmem:[%s20909_s24 + $0x99c] sm:$0xf]  ;;  %v12854_v24 = vor.u32 %v18832_v5, %v12851_v26  ;;  %v13366_v38 = vor.u32 %v18960_v6, %v13363_v13  ;;  %v7329_v40 = vadd.f32 %v7328_v31, %v7316_v23 }
 0x3a3   : > { %7548 = vmatmul.bf16.vlgmr.msrb.gmra.mxu3 %v21092_v8  ;;  %v13875_v16 = vld [vmem:[%s20909_s24 + $0x9d8] sm:$0xf0] }
 0x3a4   : > { %7592 = vmatpush.bf16.msra.mxu3 %v14646_v30  ;;  %7567 = vmatpush.bf16.msra.mxu1 %v13558_v41  ;;  %v19216_v20 = vld [vmem:[%s20909_s24 + $0xd9c] sm:$0xf]  ;;  %v13878_v25 = vor.u32 %v19088_v14, %v13875_v16  ;;  %v7341_v41 = vpop.f32.mrf.mxu3 }
 0x3a5   : > { %v14387_v21 = vld [vmem:[%s20909_s24 + $0xdd8] sm:$0xf0]  ;;  %v21985_v52 = vadd.f32 %v7341_v41, %v7329_v40 }
 0x3a6   : > { %7580 = vmatpush.bf16.msra.mxu2 %v14070_v42  ;;  %7555 = vmatpush.bf16.msra.mxu0 %v12982_v55  ;;  %v18816_v27 = vld [vmem:[%s20909_s24 + $0x11c] sm:$0xf]  ;;  %v14390_v32 = vor.u32 %v19216_v20, %v14387_v21  ;;  %v7317_v55 = vpop.f32.mrf.mxu1 }
 0x3a7   : > { %v12787_v28 = vld [vmem:[%s20909_s24 + $0x158] sm:$0xf0] }
 0x3a8   : > { %7593 = vmatpush.bf16.msra.mxu3 %v14582_v46  ;;  %7568 = vmatpush.bf16.msra.mxu1 %v13494_v56  ;;  %v18944_v30 = vld [vmem:[%s20909_s24 + $0x51c] sm:$0xf]  ;;  %v12790_v44 = vor.u32 %v18816_v27, %v12787_v28  ;;  %v7304_v46 = vpop.f32.mrf.mxu0 }
 0x3a9   : > { %v13299_v35 = vld [vmem:[%s20909_s24 + $0x558] sm:$0xf0] }
 0x3aa   : > { %7581 = vmatpush.bf16.msra.mxu2 %v14006_v57  ;;  %7556 = vmatpush.bf16.msra.mxu0 %v12918_v0  ;;  %v19072_v37 = vld [vmem:[%s20909_s24 + $0x91c] sm:$0xf]  ;;  %v13302_v47 = vor.u32 %v18944_v30, %v13299_v35 }
 0x3ab   : > { %v13811_v39 = vld [vmem:[%s20909_s24 + $0x958] sm:$0xf0] }
 0x3ac   : > { %7594 = vmatpush.bf16.msra.mxu3 %v14518_v61  ;;  %7569 = vmatpush.bf16.msra.mxu1 %v13430_v2  ;;  %v19200_v42 = vld [vmem:[%s20909_s24 + $0xd1c] sm:$0xf]  ;;  %v13814_v48 = vor.u32 %v19072_v37, %v13811_v39  ;;  %v7343_v11 = vpop.f32.mrf.mxu3 }
 0x3ad   : > { %v14323_v43 = vld [vmem:[%s20909_s24 + $0xd58] sm:$0xf0] }
 0x3ae   : > { %7582 = vmatpush.bf16.msra.mxu2 %v13942_v3  ;;  %7557 = vmatpush.bf16.msra.mxu0 %v12854_v24  ;;  %v18800_v49 = vld [vmem:[%s20909_s24 + $0x9c] sm:$0xf]  ;;  %v14326_v56 = vor.u32 %v19200_v42, %v14323_v43  ;;  %v7330_v3 = vpop.f32.mrf.mxu2 }
 0x3af   : > { %v12723_v54 = vld [vmem:[%s20909_s24 + $0xd8] sm:$0xf0] }
 0x3b0   : > { %7595 = vmatpush.bf16.msra.mxu3 %v14454_v12  ;;  %7570 = vmatpush.bf16.msra.mxu1 %v13366_v38  ;;  %v18928_v33 = vld [vmem:[%s20909_s24 + $0x49c] sm:$0xf]  ;;  %v12726_v17 = vor.u32 %v18800_v49, %v12723_v54 }
 0x3b1   : > { %v13235_v57 = vld [vmem:[%s20909_s24 + $0x4d8] sm:$0xf0] }
 0x3b2   : > { %7583 = vmatpush.bf16.msra.mxu2 %v13878_v25  ;;  %v19056_v58 = vld [vmem:[%s20909_s24 + $0x89c] sm:$0xf]  ;;  %7558 = vmatpush.bf16.msra.mxu0 %v12790_v44  ;;  %v13238_v45 = vor.u32 %v18928_v33, %v13235_v57 }
 0x3b3   : > { %v13747_v59 = vld [vmem:[%s20909_s24 + $0x8d8] sm:$0xf0] }
 0x3b4   : > { %7596 = vmatpush.bf16.msra.mxu3 %v14390_v32  ;;  %v19184_v60 = vld [vmem:[%s20909_s24 + $0xc9c] sm:$0xf]  ;;  %7571 = vmatpush.bf16.msra.mxu1 %v13302_v47  ;;  %v13750_v19 = vor.u32 %v19056_v58, %v13747_v59 }
 0x3b5   : > { %v14259_v61 = vld [vmem:[%s20909_s24 + $0xcd8] sm:$0xf0] }
 0x3b6   : > { %v18784_v62 = vld [vmem:[%s20909_s24 + $0x1c] sm:$0xf]  ;;  %7584 = vmatpush.bf16.msra.mxu2 %v13814_v48  ;;  %v14262_v5 = vor.u32 %v19184_v60, %v14259_v61  ;;  %7559 = vmatpush.bf16.msra.mxu0 %v12726_v17 }
 0x3b7   : > { %v12659_v63 = vld [vmem:[%s20909_s24 + $0x58] sm:$0xf0] }
 0x3b8   : > { %v18912_v0 = vld [vmem:[%s20909_s24 + $0x41c] sm:$0xf]  ;;  %7597 = vmatpush.bf16.msra.mxu3 %v14326_v56  ;;  %v12662_v16 = vor.u32 %v18784_v62, %v12659_v63  ;;  %7572 = vmatpush.bf16.msra.mxu1 %v13238_v45 }
 0x3b9   : > { %v13171_v1 = vld [vmem:[%s20909_s24 + $0x458] sm:$0xf0] }
 0x3ba   : > { %v19040_v2 = vld [vmem:[%s20909_s24 + $0x81c] sm:$0xf]  ;;  %7585 = vmatpush.bf16.msra.mxu2 %v13750_v19  ;;  %v13174_v24 = vor.u32 %v18912_v0, %v13171_v1  ;;  %7560 = vmatpush.bf16.msra.mxu0 %v12662_v16  ;;  %v1650_v1 = vperm.slane %v21890_v53, 5 }
 0x3bb   : > { %v13683_v26 = vld [vmem:[%s20909_s24 + $0x858] sm:$0xf0] }
 0x3bc   : > { %v19168_v6 = vld [vmem:[%s20909_s24 + $0xc1c] sm:$0xf]  ;;  %v13686_v38 = vor.u32 %v19040_v2, %v13683_v26  ;;  %7598 = vmatpush.bf16.msra.mxu3 %v14262_v5  ;;  %7573 = vmatpush.bf16.msra.mxu1 %v13174_v24 }
 0x3bd   : > { %v14195_v9 = vld [vmem:[%s20909_s24 + $0xc58] sm:$0xf0]  ;;  %7561 = vmatmul.bf16.vlgmr.msra.gmra.mxu0 %v21033_v50 }
 0x3be   : > { %v19408_v12 = vld [vmem:[%s20909_s24 + $0x139c] sm:$0xf]  ;;  %v14198_v28 = vor.u32 %v19168_v6, %v14195_v9  ;;  %7586 = vmatpush.bf16.msra.mxu2 %v13686_v38 }
 0x3bf   : > { %v15155_v13 = vld [vmem:[%s20909_s24 + $0x13d8] sm:$0xf0]  ;;  %7574 = vmatmul.bf16.vlgmr.msra.gmra.mxu1 %v21036_v51 }
 0x3c0   : > { %v19536_v14 = vld [vmem:[%s20909_s24 + $0x179c] sm:$0xf]  ;;  %v15158_v30 = vor.u32 %v19408_v12, %v15155_v13  ;;  %7599 = vmatpush.bf16.msra.mxu3 %v14198_v28  ;;  %v7354_v12 = vpop.f32.mrf.mxu0 }
 0x3c1   : > { %v15667_v20 = vld [vmem:[%s20909_s24 + $0x17d8] sm:$0xf0]  ;;  %7587 = vmatmul.bf16.vlgmr.msra.gmra.mxu2 %v21020_v34 }
 0x3c2   : > { %v19664_v21 = vld [vmem:[%s20909_s24 + $0x1b9c] sm:$0xf]  ;;  %v15670_v31 = vor.u32 %v19536_v14, %v15667_v20  ;;  %7605 = vmatpush.bf16.msrb.mxu0 %v15158_v30 }
 0x3c3   : > { %v16179_v23 = vld [vmem:[%s20909_s24 + $0x1bd8] sm:$0xf0]  ;;  %7600 = vmatmul.bf16.vlgmr.msra.gmra.mxu3 %v21022_v36 }
 0x3c4   : > { %v19792_v25 = vld [vmem:[%s20909_s24 + $0x1f9c] sm:$0xf]  ;;  %v16182_v32 = vor.u32 %v19664_v21, %v16179_v23  ;;  %7618 = vmatpush.bf16.msrb.mxu1 %v15670_v31  ;;  %v7355_v21 = vadd.f32 %v7354_v12, %v1650_v1  ;;  %v7367_v23 = vpop.f32.mrf.mxu1 }
 0x3c5   : > { %v16691_v27 = vld [vmem:[%s20909_s24 + $0x1fd8] sm:$0xf0] }
 0x3c6   : > { %v19392_v35 = vld [vmem:[%s20909_s24 + $0x131c] sm:$0xf]  ;;  %v16694_v40 = vor.u32 %v19792_v25, %v16691_v27  ;;  %7631 = vmatpush.bf16.msrb.mxu2 %v16182_v32  ;;  %v7368_v31 = vadd.f32 %v7367_v23, %v7355_v21 }
 0x3c7   : > { %v15091_v37 = vld [vmem:[%s20909_s24 + $0x1358] sm:$0xf0] }
 0x3c8   : > { %v19520_v39 = vld [vmem:[%s20909_s24 + $0x171c] sm:$0xf]  ;;  %v15094_v47 = vor.u32 %v19392_v35, %v15091_v37  ;;  %7644 = vmatpush.bf16.msrb.mxu3 %v16694_v40 }
 0x3c9   : > { %v15603_v41 = vld [vmem:[%s20909_s24 + $0x1758] sm:$0xf0] }
 0x3ca   : > { %v19648_v42 = vld [vmem:[%s20909_s24 + $0x1b1c] sm:$0xf]  ;;  %v15606_v48 = vor.u32 %v19520_v39, %v15603_v41  ;;  %7606 = vmatpush.bf16.msrb.mxu0 %v15094_v47 }
 0x3cb   : > { %v16115_v43 = vld [vmem:[%s20909_s24 + $0x1b58] sm:$0xf0] }
 0x3cc   : > { %v19776_v44 = vld [vmem:[%s20909_s24 + $0x1f1c] sm:$0xf]  ;;  %v16118_v49 = vor.u32 %v19648_v42, %v16115_v43  ;;  %7619 = vmatpush.bf16.msrb.mxu1 %v15606_v48  ;;  %v7380_v42 = vpop.f32.mrf.mxu2 }
 0x3cd   : > { %v16627_v46 = vld [vmem:[%s20909_s24 + $0x1f58] sm:$0xf0]  ;;  %v7381_v48 = vadd.f32 %v7380_v42, %v7368_v31  ;;  %v19161_v31 = vld [vmem:[%s20909_s24 + $0xbdc] sm:$0xf0] }
 0x3ce   : > { %v19376_v54 = vld [vmem:[%s20909_s24 + $0x129c] sm:$0xf]  ;;  %v16630_v56 = vor.u32 %v19776_v44, %v16627_v46  ;;  %7632 = vmatpush.bf16.msrb.mxu2 %v16118_v49  ;;  %v7393_v49 = vpop.f32.mrf.mxu3 }
 0x3cf   : > { %v15027_v33 = vld [vmem:[%s20909_s24 + $0x12d8] sm:$0xf0] }
 0x3d0   : > { %v19504_v55 = vld [vmem:[%s20909_s24 + $0x169c] sm:$0xf]  ;;  %v15030_v17 = vor.u32 %v19376_v54, %v15027_v33  ;;  %7645 = vmatpush.bf16.msrb.mxu3 %v16630_v56  ;;  %v22056_v56 = vadd.f32 %v7393_v49, %v7381_v48  ;;  %v19017_v49 = vld [vmem:[%s20909_s24 + $0x75c] sm:$0xf0] }
 0x3d1   : > { %v15539_v57 = vld [vmem:[%s20909_s24 + $0x16d8] sm:$0xf0] }
 0x3d2   : > { %v19632_v58 = vld [vmem:[%s20909_s24 + $0x1a9c] sm:$0xf]  ;;  %v15542_v63 = vor.u32 %v19504_v55, %v15539_v57  ;;  %7607 = vmatpush.bf16.msrb.mxu0 %v15030_v17  ;;  %v7356_v57 = vpop.f32.mrf.mxu0 }
 0x3d3   : > { %v16051_v59 = vld [vmem:[%s20909_s24 + $0x1ad8] sm:$0xf0]  ;;  %v19273_v57 = vld [vmem:[%s20909_s24 + $0xf5c] sm:$0xf0] }
 0x3d4   : > { %v19760_v60 = vld [vmem:[%s20909_s24 + $0x1e9c] sm:$0xf]  ;;  %v16054_v45 = vor.u32 %v19632_v58, %v16051_v59  ;;  %7620 = vmatpush.bf16.msrb.mxu1 %v15542_v63 }
 0x3d5   : > { %v16563_v61 = vld [vmem:[%s20909_s24 + $0x1ed8] sm:$0xf0] }
 0x3d6   : > { %v19360_v62 = vld [vmem:[%s20909_s24 + $0x121c] sm:$0xf]  ;;  %v16566_v2 = vor.u32 %v19760_v60, %v16563_v61  ;;  %7633 = vmatpush.bf16.msrb.mxu2 %v16054_v45  ;;  %v7395_v23 = vpop.f32.mrf.mxu3 }
 0x3d7   : > { %v14963_v19 = vld [vmem:[%s20909_s24 + $0x1258] sm:$0xf0] }
 0x3d8   : > { %v19488_v0 = vld [vmem:[%s20909_s24 + $0x161c] sm:$0xf]  ;;  %v14966_v11 = vor.u32 %v19360_v62, %v14963_v19  ;;  %7646 = vmatpush.bf16.msrb.mxu3 %v16566_v2  ;;  %v7369_v62 = vpop.f32.mrf.mxu1 }
 0x3d9   : > { %v15475_v3 = vld [vmem:[%s20909_s24 + $0x1658] sm:$0xf0]  ;;  %v13497_v62 = vld [vmem:[%s20909_s24 + $0x6a0] sm:$0xf] }
 0x3da   : > { %v19616_v5 = vld [vmem:[%s20909_s24 + $0x1a1c] sm:$0xf]  ;;  %v15478_v53 = vor.u32 %v19488_v0, %v15475_v3  ;;  %7608 = vmatpush.bf16.msrb.mxu0 %v14966_v11  ;;  %v7406_v23 = vpop.f32.mrf.mxu0 }
 0x3db   : > { %v15987_v26 = vld [vmem:[%s20909_s24 + $0x1a58] sm:$0xf0] }
 0x3dc   : > { %v19744_v6 = vld [vmem:[%s20909_s24 + $0x1e1c] sm:$0xf]  ;;  %v15990_v13 = vor.u32 %v19616_v5, %v15987_v26  ;;  %7621 = vmatpush.bf16.msrb.mxu1 %v15478_v53 }
 0x3dd   : > { %v16499_v9 = vld [vmem:[%s20909_s24 + $0x1e58] sm:$0xf0] }
 0x3de   : > { %v19344_v14 = vld [vmem:[%s20909_s24 + $0x119c] sm:$0xf]  ;;  %v16502_v24 = vor.u32 %v19744_v6, %v16499_v9  ;;  %7634 = vmatpush.bf16.msrb.mxu2 %v15990_v13  ;;  %v7382_v13 = vpop.f32.mrf.mxu2 }
 0x3df   : > { %v14899_v16 = vld [vmem:[%s20909_s24 + $0x11d8] sm:$0xf0]  ;;  %v13945_v13 = vld [vmem:[%s20909_s24 + $0xa20] sm:$0xf] }
 0x3e0   : > { %v19472_v20 = vld [vmem:[%s20909_s24 + $0x159c] sm:$0xf]  ;;  %v14902_v32 = vor.u32 %v19344_v14, %v14899_v16  ;;  %7647 = vmatpush.bf16.msrb.mxu3 %v16502_v24  ;;  %v13113_v24 = vld [vmem:[%s20909_s24 + $0x3a0] sm:$0xf] }
 0x3e1   : > { %v15411_v38 = vld [vmem:[%s20909_s24 + $0x15d8] sm:$0xf0] }
 0x3e2   : > { %v19600_v25 = vld [vmem:[%s20909_s24 + $0x199c] sm:$0xf]  ;;  %v15414_v35 = vor.u32 %v19472_v20, %v15411_v38  ;;  %7609 = vmatpush.bf16.msrb.mxu0 %v14902_v32  ;;  %v18905_v38 = vld [vmem:[%s20909_s24 + $0x3dc] sm:$0xf0] }
 0x3e3   : > { %v15923_v27 = vld [vmem:[%s20909_s24 + $0x19d8] sm:$0xf0] }
 0x3e4   : > { %v19728_v28 = vld [vmem:[%s20909_s24 + $0x1d9c] sm:$0xf]  ;;  %v15926_v37 = vor.u32 %v19600_v25, %v15923_v27  ;;  %7622 = vmatpush.bf16.msrb.mxu1 %v15414_v35  ;;  %v13625_v25 = vld [vmem:[%s20909_s24 + $0x7a0] sm:$0xf] }
 0x3e5   : > { %v16435_v30 = vld [vmem:[%s20909_s24 + $0x1dd8] sm:$0xf0] }
 0x3e6   : > { %v19328_v39 = vld [vmem:[%s20909_s24 + $0x111c] sm:$0xf]  ;;  %v16438_v43 = vor.u32 %v19728_v28, %v16435_v30  ;;  %7635 = vmatpush.bf16.msrb.mxu2 %v15926_v37  ;;  %v19033_v28 = vld [vmem:[%s20909_s24 + $0x7dc] sm:$0xf0] }
 0x3e7   : > { %v14835_v40 = vld [vmem:[%s20909_s24 + $0x1158] sm:$0xf0]  ;;  %v14137_v30 = vld [vmem:[%s20909_s24 + $0xba0] sm:$0xf]  ;;  %v13626_v42 = vor.u32 %v19033_v28, %v13625_v25 }
 0x3e8   : > { %v19456_v41 = vld [vmem:[%s20909_s24 + $0x151c] sm:$0xf]  ;;  %v14838_v55 = vor.u32 %v19328_v39, %v14835_v40  ;;  %7648 = vmatpush.bf16.msrb.mxu3 %v16438_v43  ;;  %v14649_v37 = vld [vmem:[%s20909_s24 + $0xfa0] sm:$0xf]  ;;  %v14138_v43 = vor.u32 %v19161_v31, %v14137_v30  ;;  %v7407_v30 = vadd.f32 %v7406_v23, %v22056_v56  ;;  %v7419_v31 = vpop.f32.mrf.mxu1 }
 0x3e9   : > { %v15347_v44 = vld [vmem:[%s20909_s24 + $0x1558] sm:$0xf0]  ;;  %v19289_v39 = vld [vmem:[%s20909_s24 + $0xfdc] sm:$0xf0] }
 0x3ea   : > { %v19584_v46 = vld [vmem:[%s20909_s24 + $0x191c] sm:$0xf]  ;;  %v15350_v58 = vor.u32 %v19456_v41, %v15347_v44  ;;  %7610 = vmatpush.bf16.msrb.mxu0 %v14838_v55  ;;  %v13114_v41 = vor.u32 %v18905_v38, %v13113_v24  ;;  %v13049_v44 = vld [vmem:[%s20909_s24 + $0x320] sm:$0xf]  ;;  %v14650_v48 = vor.u32 %v19289_v39, %v14649_v37 }
 0x3eb   : > { %v15859_v47 = vld [vmem:[%s20909_s24 + $0x1958] sm:$0xf0]  ;;  %v14585_v55 = vld [vmem:[%s20909_s24 + $0xf20] sm:$0xf] }
 0x3ec   : > { %v19712_v54 = vld [vmem:[%s20909_s24 + $0x1d1c] sm:$0xf]  ;;  %v15862_v59 = vor.u32 %v19584_v46, %v15859_v47  ;;  %7623 = vmatpush.bf16.msrb.mxu1 %v15350_v58  ;;  %v18889_v46 = vld [vmem:[%s20909_s24 + $0x35c] sm:$0xf0] }
 0x3ed   : > { %v16371_v33 = vld [vmem:[%s20909_s24 + $0x1d58] sm:$0xf0]  ;;  %v13561_v47 = vld [vmem:[%s20909_s24 + $0x720] sm:$0xf]  ;;  %v13050_v58 = vor.u32 %v18889_v46, %v13049_v44 }
 0x3ee   : > { %v19312_v60 = vld [vmem:[%s20909_s24 + $0x109c] sm:$0xf]  ;;  %v16374_v63 = vor.u32 %v19712_v54, %v16371_v33  ;;  %7636 = vmatpush.bf16.msrb.mxu2 %v15862_v59  ;;  %v14073_v54 = vld [vmem:[%s20909_s24 + $0xb20] sm:$0xf]  ;;  %v13562_v59 = vor.u32 %v19017_v49, %v13561_v47  ;;  %v7432_v49 = vpop.f32.mrf.mxu2 }
 0x3ef   : > { %v14771_v61 = vld [vmem:[%s20909_s24 + $0x10d8] sm:$0xf0]  ;;  %v19145_v33 = vld [vmem:[%s20909_s24 + $0xb5c] sm:$0xf0] }
 0x3f0   : > { %v19440_v17 = vld [vmem:[%s20909_s24 + $0x149c] sm:$0xf]  ;;  %v14774_v3 = vor.u32 %v19312_v60, %v14771_v61  ;;  %7649 = vmatpush.bf16.msrb.mxu3 %v16374_v63  ;;  %v14074_v60 = vor.u32 %v19145_v33, %v14073_v54  ;;  %v12985_v61 = vld [vmem:[%s20909_s24 + $0x2a0] sm:$0xf]  ;;  %v14586_v63 = vor.u32 %v19273_v57, %v14585_v55 }
 0x3f1   : > { %v15283_v45 = vld [vmem:[%s20909_s24 + $0x14d8] sm:$0xf0]  ;;  %v12857_v25 = vld [vmem:[%s20909_s24 + $0x1a0] sm:$0xf] }
 0x3f2   : > { %v19568_v19 = vld [vmem:[%s20909_s24 + $0x189c] sm:$0xf]  ;;  %v15286_v6 = vor.u32 %v19440_v17, %v15283_v45  ;;  %7611 = vmatpush.bf16.msrb.mxu0 %v14774_v3  ;;  %v18873_v17 = vld [vmem:[%s20909_s24 + $0x2dc] sm:$0xf0] }
 0x3f3   : > { %v15795_v0 = vld [vmem:[%s20909_s24 + $0x18d8] sm:$0xf0]  ;;  %v19001_v45 = vld [vmem:[%s20909_s24 + $0x6dc] sm:$0xf0]  ;;  %v12986_v3 = vor.u32 %v18873_v17, %v12985_v61 }
 0x3f4   : > { %v19696_v1 = vld [vmem:[%s20909_s24 + $0x1c9c] sm:$0xf]  ;;  %v15798_v9 = vor.u32 %v19568_v19, %v15795_v0  ;;  %7624 = vmatpush.bf16.msrb.mxu1 %v15286_v6  ;;  %v14009_v19 = vld [vmem:[%s20909_s24 + $0xaa0] sm:$0xf] }
 0x3f5   : > { %v16307_v2 = vld [vmem:[%s20909_s24 + $0x1cd8] sm:$0xf0]  ;;  %v19129_v0 = vld [vmem:[%s20909_s24 + $0xadc] sm:$0xf0] }
 0x3f6   : > { %v19296_v5 = vld [vmem:[%s20909_s24 + $0x101c] sm:$0xf]  ;;  %v16310_v14 = vor.u32 %v19696_v1, %v16307_v2  ;;  %7637 = vmatpush.bf16.msrb.mxu2 %v15798_v9  ;;  %v14521_v1 = vld [vmem:[%s20909_s24 + $0xea0] sm:$0xf] }
 0x3f7   : > { %v14707_v26 = vld [vmem:[%s20909_s24 + $0x1058] sm:$0xf0]  ;;  %v19257_v2 = vld [vmem:[%s20909_s24 + $0xedc] sm:$0xf0] }
 0x3f8   : > { %v19424_v11 = vld [vmem:[%s20909_s24 + $0x141c] sm:$0xf]  ;;  %v14710_v27 = vor.u32 %v19296_v5, %v14707_v26  ;;  %7650 = vmatpush.bf16.msrb.mxu3 %v16310_v14  ;;  %v13498_v5 = vor.u32 %v19001_v45, %v13497_v62  ;;  %v14010_v26 = vor.u32 %v19129_v0, %v14009_v19  ;;  %v12921_v6 = vld [vmem:[%s20909_s24 + $0x220] sm:$0xf] }
 0x3f9   : > { %v15219_v12 = vld [vmem:[%s20909_s24 + $0x1458] sm:$0xf0]  ;;  %v18857_v9 = vld [vmem:[%s20909_s24 + $0x25c] sm:$0xf0] }
 0x3fa   : > { %v19552_v53 = vld [vmem:[%s20909_s24 + $0x181c] sm:$0xf]  ;;  %v15222_v32 = vor.u32 %v19424_v11, %v15219_v12  ;;  %7612 = vmatpush.bf16.msrb.mxu0 %v14710_v27  ;;  %v13433_v11 = vld [vmem:[%s20909_s24 + $0x620] sm:$0xf]  ;;  %v14522_v12 = vor.u32 %v19257_v2, %v14521_v1 }
 0x3fb   : > { %v15731_v16 = vld [vmem:[%s20909_s24 + $0x1858] sm:$0xf0]  ;;  %v19113_v14 = vld [vmem:[%s20909_s24 + $0xa5c] sm:$0xf0] }
 0x3fc   : > { %v19680_v20 = vld [vmem:[%s20909_s24 + $0x1c1c] sm:$0xf]  ;;  %v15734_v35 = vor.u32 %v19552_v53, %v15731_v16  ;;  %7625 = vmatpush.bf16.msrb.mxu1 %v15222_v32  ;;  %v18985_v53 = vld [vmem:[%s20909_s24 + $0x65c] sm:$0xf0]  ;;  %v13946_v38 = vor.u32 %v19113_v14, %v13945_v13 }
 0x3fd   : > { %v16243_v21 = vld [vmem:[%s20909_s24 + $0x1c58] sm:$0xf0]  ;;  %7613 = vmatmul.bf16.vlgmr.msrb.gmra.mxu0 %v21090_v7  ;;  %v14457_v16 = vld [vmem:[%s20909_s24 + $0xe20] sm:$0xf]  ;;  %v13434_v24 = vor.u32 %v18985_v53, %v13433_v11 }
 0x3fe   : > { %v16246_v40 = vor.u32 %v19680_v20, %v16243_v21  ;;  %7638 = vmatpush.bf16.msrb.mxu2 %v15734_v35  ;;  %7657 = vmatpush.bf16.msra.mxu0 %v13114_v41  ;;  %v19241_v20 = vld [vmem:[%s20909_s24 + $0xe5c] sm:$0xf0]  ;;  %v12922_v21 = vor.u32 %v18857_v9, %v12921_v6 }
 0x3ff   : > { %7626 = vmatmul.bf16.vlgmr.msrb.gmra.mxu1 %v21094_v10  ;;  %v18841_v27 = vld [vmem:[%s20909_s24 + $0x1dc] sm:$0xf0]  ;;  %v14458_v32 = vor.u32 %v19241_v20, %v14457_v16 }
 0x400   : > { %7651 = vmatpush.bf16.msrb.mxu3 %v16246_v40  ;;  %7670 = vmatpush.bf16.msra.mxu1 %v13626_v42  ;;  %v13369_v28 = vld [vmem:[%s20909_s24 + $0x5a0] sm:$0xf]  ;;  %v7420_v42 = vadd.f32 %v7419_v31, %v7407_v30 }
 0x401   : > { %7639 = vmatmul.bf16.vlgmr.msrb.gmra.mxu2 %v21086_v4  ;;  %v18969_v35 = vld [vmem:[%s20909_s24 + $0x5dc] sm:$0xf0] }
 0x402   : > { %7683 = vmatpush.bf16.msra.mxu2 %v14138_v43  ;;  %7658 = vmatpush.bf16.msra.mxu0 %v13050_v58  ;;  %v13881_v37 = vld [vmem:[%s20909_s24 + $0x9a0] sm:$0xf]  ;;  %v12858_v43 = vor.u32 %v18841_v27, %v12857_v25  ;;  %v13370_v56 = vor.u32 %v18969_v35, %v13369_v28  ;;  %v7433_v58 = vadd.f32 %v7432_v49, %v7420_v42 }
 0x403   : > { %7652 = vmatmul.bf16.vlgmr.msrb.gmra.mxu3 %v21092_v8  ;;  %v19097_v39 = vld [vmem:[%s20909_s24 + $0x9dc] sm:$0xf0] }
 0x404   : > { %7696 = vmatpush.bf16.msra.mxu3 %v14650_v48  ;;  %7671 = vmatpush.bf16.msra.mxu1 %v13562_v59  ;;  %v14393_v40 = vld [vmem:[%s20909_s24 + $0xda0] sm:$0xf]  ;;  %v13882_v44 = vor.u32 %v19097_v39, %v13881_v37  ;;  %v7445_v59 = vpop.f32.mrf.mxu3 }
 0x405   : > { %v19225_v41 = vld [vmem:[%s20909_s24 + $0xddc] sm:$0xf0]  ;;  %v22127_v62 = vadd.f32 %v7445_v59, %v7433_v58 }
 0x406   : > { %7684 = vmatpush.bf16.msra.mxu2 %v14074_v60  ;;  %7659 = vmatpush.bf16.msra.mxu0 %v12986_v3  ;;  %v12793_v46 = vld [vmem:[%s20909_s24 + $0x120] sm:$0xf]  ;;  %v14394_v54 = vor.u32 %v19225_v41, %v14393_v40  ;;  %v7421_v3 = vpop.f32.mrf.mxu1 }
 0x407   : > { %v18825_v47 = vld [vmem:[%s20909_s24 + $0x15c] sm:$0xf0] }
 0x408   : > { %7697 = vmatpush.bf16.msra.mxu3 %v14586_v63  ;;  %7672 = vmatpush.bf16.msra.mxu1 %v13498_v5  ;;  %v13305_v48 = vld [vmem:[%s20909_s24 + $0x520] sm:$0xf]  ;;  %v12794_v17 = vor.u32 %v18825_v47, %v12793_v46  ;;  %v7408_v63 = vpop.f32.mrf.mxu0 }
 0x409   : > { %v18953_v33 = vld [vmem:[%s20909_s24 + $0x55c] sm:$0xf0] }
 0x40a   : > { %7685 = vmatpush.bf16.msra.mxu2 %v14010_v26  ;;  %7660 = vmatpush.bf16.msra.mxu0 %v12922_v21  ;;  %v13817_v55 = vld [vmem:[%s20909_s24 + $0x920] sm:$0xf]  ;;  %v13306_v45 = vor.u32 %v18953_v33, %v13305_v48 }
 0x40b   : > { %v19081_v57 = vld [vmem:[%s20909_s24 + $0x95c] sm:$0xf0] }
 0x40c   : > { %7698 = vmatpush.bf16.msra.mxu3 %v14522_v12  ;;  %7673 = vmatpush.bf16.msra.mxu1 %v13434_v24  ;;  %v14329_v60 = vld [vmem:[%s20909_s24 + $0xd20] sm:$0xf]  ;;  %v13818_v19 = vor.u32 %v19081_v57, %v13817_v55  ;;  %v7447_v31 = vpop.f32.mrf.mxu3 }
 0x40d   : > { %v19209_v61 = vld [vmem:[%s20909_s24 + $0xd5c] sm:$0xf0] }
 0x40e   : > { %7686 = vmatpush.bf16.msra.mxu2 %v13946_v38  ;;  %7661 = vmatpush.bf16.msra.mxu0 %v12858_v43  ;;  %v12729_v0 = vld [vmem:[%s20909_s24 + $0xa0] sm:$0xf]  ;;  %v14330_v5 = vor.u32 %v19209_v61, %v14329_v60  ;;  %v7434_v38 = vpop.f32.mrf.mxu2 }
 0x40f   : > { %v18809_v1 = vld [vmem:[%s20909_s24 + $0xdc] sm:$0xf0] }
 0x410   : > { %7699 = vmatpush.bf16.msra.mxu3 %v14458_v32  ;;  %7674 = vmatpush.bf16.msra.mxu1 %v13370_v56  ;;  %v13241_v2 = vld [vmem:[%s20909_s24 + $0x4a0] sm:$0xf]  ;;  %v12730_v53 = vor.u32 %v18809_v1, %v12729_v0 }
 0x411   : > { %v18937_v26 = vld [vmem:[%s20909_s24 + $0x4dc] sm:$0xf0] }
 0x412   : > { %7687 = vmatpush.bf16.msra.mxu2 %v13882_v44  ;;  %v13753_v6 = vld [vmem:[%s20909_s24 + $0x8a0] sm:$0xf]  ;;  %7662 = vmatpush.bf16.msra.mxu0 %v12794_v17  ;;  %v13242_v16 = vor.u32 %v18937_v26, %v13241_v2 }
 0x413   : > { %v19065_v9 = vld [vmem:[%s20909_s24 + $0x8dc] sm:$0xf0] }
 0x414   : > { %7700 = vmatpush.bf16.msra.mxu3 %v14394_v54  ;;  %v14265_v11 = vld [vmem:[%s20909_s24 + $0xca0] sm:$0xf]  ;;  %7675 = vmatpush.bf16.msra.mxu1 %v13306_v45  ;;  %v13754_v20 = vor.u32 %v19065_v9, %v13753_v6 }
 0x415   : > { %v19193_v12 = vld [vmem:[%s20909_s24 + $0xcdc] sm:$0xf0] }
 0x416   : > { %v12665_v13 = vld [vmem:[%s20909_s24 + $0x20] sm:$0xf]  ;;  %7688 = vmatpush.bf16.msra.mxu2 %v13818_v19  ;;  %v14266_v25 = vor.u32 %v19193_v12, %v14265_v11  ;;  %7663 = vmatpush.bf16.msra.mxu0 %v12730_v53 }
 0x417   : > { %v18793_v14 = vld [vmem:[%s20909_s24 + $0x5c] sm:$0xf0] }
 0x418   : > { %v13177_v21 = vld [vmem:[%s20909_s24 + $0x420] sm:$0xf]  ;;  %7701 = vmatpush.bf16.msra.mxu3 %v14330_v5  ;;  %v12666_v39 = vor.u32 %v18793_v14, %v12665_v13  ;;  %7676 = vmatpush.bf16.msra.mxu1 %v13242_v16 }
 0x419   : > { %v18921_v23 = vld [vmem:[%s20909_s24 + $0x45c] sm:$0xf0] }
 0x41a   : > { %v13689_v24 = vld [vmem:[%s20909_s24 + $0x820] sm:$0xf]  ;;  %7689 = vmatpush.bf16.msra.mxu2 %v13754_v20  ;;  %v13178_v43 = vor.u32 %v18921_v23, %v13177_v21  ;;  %7664 = vmatpush.bf16.msra.mxu0 %v12666_v39 }
 0x41b   : > { %v19049_v27 = vld [vmem:[%s20909_s24 + $0x85c] sm:$0xf0] }
 0x41c   : > { %v14201_v28 = vld [vmem:[%s20909_s24 + $0xc20] sm:$0xf]  ;;  %v13690_v56 = vor.u32 %v19049_v27, %v13689_v24  ;;  %7702 = vmatpush.bf16.msra.mxu3 %v14266_v25  ;;  %7677 = vmatpush.bf16.msra.mxu1 %v13178_v43 }
 0x41d   : > { %v19177_v30 = vld [vmem:[%s20909_s24 + $0xc5c] sm:$0xf0]  ;;  %7665 = vmatmul.bf16.vlgmr.msra.gmra.mxu0 %v21033_v50 }
 0x41e   : > { %v15161_v32 = vld [vmem:[%s20909_s24 + $0x13a0] sm:$0xf]  ;;  %v14202_v47 = vor.u32 %v19177_v30, %v14201_v28  ;;  %7690 = vmatpush.bf16.msra.mxu2 %v13690_v56  ;;  %v7471_v56 = vpop.f32.mrf.mxu1 }
 0x41f   : > { %v19417_v35 = vld [vmem:[%s20909_s24 + $0x13dc] sm:$0xf0]  ;;  %7678 = vmatmul.bf16.vlgmr.msra.gmra.mxu1 %v21036_v51 }
 0x420   : > { %v15673_v37 = vld [vmem:[%s20909_s24 + $0x17a0] sm:$0xf]  ;;  %v15162_v48 = vor.u32 %v19417_v35, %v15161_v32  ;;  %7703 = vmatpush.bf16.msra.mxu3 %v14202_v47  ;;  %v7458_v35 = vpop.f32.mrf.mxu0 }
 0x421   : > { %v19545_v40 = vld [vmem:[%s20909_s24 + $0x17dc] sm:$0xf0]  ;;  %7691 = vmatmul.bf16.vlgmr.msra.gmra.mxu2 %v21020_v34 }
 0x422   : > { %v16185_v41 = vld [vmem:[%s20909_s24 + $0x1ba0] sm:$0xf]  ;;  %v15674_v49 = vor.u32 %v19545_v40, %v15673_v37  ;;  %7709 = vmatpush.bf16.msrb.mxu0 %v15162_v48 }
 0x423   : > { %v19673_v42 = vld [vmem:[%s20909_s24 + $0x1bdc] sm:$0xf0]  ;;  %7704 = vmatmul.bf16.vlgmr.msra.gmra.mxu3 %v21022_v36 }
 0x424   : > { %v16697_v44 = vld [vmem:[%s20909_s24 + $0x1fa0] sm:$0xf]  ;;  %v16186_v54 = vor.u32 %v19673_v42, %v16185_v41  ;;  %7722 = vmatpush.bf16.msrb.mxu1 %v15674_v49 }
 0x425   : > { %v19801_v46 = vld [vmem:[%s20909_s24 + $0x1fdc] sm:$0xf0] }
 0x426   : > { %v15097_v33 = vld [vmem:[%s20909_s24 + $0x1320] sm:$0xf]  ;;  %v16698_v58 = vor.u32 %v19801_v46, %v16697_v44  ;;  %7735 = vmatpush.bf16.msrb.mxu2 %v16186_v54 }
 0x427   : > { %v19401_v55 = vld [vmem:[%s20909_s24 + $0x135c] sm:$0xf0] }
 0x428   : > { %v15609_v57 = vld [vmem:[%s20909_s24 + $0x1720] sm:$0xf]  ;;  %v15098_v45 = vor.u32 %v19401_v55, %v15097_v33  ;;  %7748 = vmatpush.bf16.msrb.mxu3 %v16698_v58 }
 0x429   : > { %v19529_v59 = vld [vmem:[%s20909_s24 + $0x175c] sm:$0xf0] }
 0x42a   : > { %v16121_v60 = vld [vmem:[%s20909_s24 + $0x1b20] sm:$0xf]  ;;  %v15610_v19 = vor.u32 %v19529_v59, %v15609_v57  ;;  %7710 = vmatpush.bf16.msrb.mxu0 %v15098_v45 }
 0x42b   : > { %v19657_v61 = vld [vmem:[%s20909_s24 + $0x1b5c] sm:$0xf0] }
 0x42c   : > { %v16633_v17 = vld [vmem:[%s20909_s24 + $0x1f20] sm:$0xf]  ;;  %v16122_v0 = vor.u32 %v19657_v61, %v16121_v60  ;;  %7723 = vmatpush.bf16.msrb.mxu1 %v15610_v19 }
 0x42d   : > { %v19785_v63 = vld [vmem:[%s20909_s24 + $0x1f5c] sm:$0xf0] }
 0x42e   : > { %v15033_v1 = vld [vmem:[%s20909_s24 + $0x12a0] sm:$0xf]  ;;  %v16634_v5 = vor.u32 %v19785_v63, %v16633_v17  ;;  %7736 = vmatpush.bf16.msrb.mxu2 %v16122_v0  ;;  %v7484_v17 = vpop.f32.mrf.mxu2 }
 0x42f   : > { %v19385_v2 = vld [vmem:[%s20909_s24 + $0x12dc] sm:$0xf0] }
 0x430   : > { %v15545_v3 = vld [vmem:[%s20909_s24 + $0x16a0] sm:$0xf]  ;;  %v15034_v53 = vor.u32 %v19385_v2, %v15033_v1  ;;  %7749 = vmatpush.bf16.msrb.mxu3 %v16634_v5  ;;  %v7497_v2 = vpop.f32.mrf.mxu3 }
 0x431   : > { %v19513_v26 = vld [vmem:[%s20909_s24 + $0x16dc] sm:$0xf0] }
 0x432   : > { %v16057_v6 = vld [vmem:[%s20909_s24 + $0x1aa0] sm:$0xf]  ;;  %v15546_v14 = vor.u32 %v19513_v26, %v15545_v3  ;;  %7711 = vmatpush.bf16.msrb.mxu0 %v15034_v53 }
 0x433   : > { %v19641_v9 = vld [vmem:[%s20909_s24 + $0x1adc] sm:$0xf0] }
 0x434   : > { %v16569_v11 = vld [vmem:[%s20909_s24 + $0x1ea0] sm:$0xf]  ;;  %v16058_v16 = vor.u32 %v19641_v9, %v16057_v6  ;;  %7724 = vmatpush.bf16.msrb.mxu1 %v15546_v14  ;;  %v7460_v9 = vpop.f32.mrf.mxu0 }
 0x435   : > { %v19769_v12 = vld [vmem:[%s20909_s24 + $0x1edc] sm:$0xf0]  ;;  %v14075_v9 = vld [vmem:[%s20909_s24 + $0xb60] sm:$0xf0] }
 0x436   : > { %v14969_v13 = vld [vmem:[%s20909_s24 + $0x1220] sm:$0xf]  ;;  %v16570_v38 = vor.u32 %v19769_v12, %v16569_v11  ;;  %7737 = vmatpush.bf16.msrb.mxu2 %v16058_v16  ;;  %v7473_v16 = vpop.f32.mrf.mxu1 }
 0x437   : > { %v19369_v20 = vld [vmem:[%s20909_s24 + $0x125c] sm:$0xf0]  ;;  %v18865_v16 = vld [vmem:[%s20909_s24 + $0x2a4] sm:$0xf] }
 0x438   : > { %v15481_v21 = vld [vmem:[%s20909_s24 + $0x1620] sm:$0xf]  ;;  %v14970_v32 = vor.u32 %v19369_v20, %v14969_v13  ;;  %7750 = vmatpush.bf16.msrb.mxu3 %v16570_v38 }
 0x439   : > { %v22177_v23 = vld [vmem:[%s20915_s17] sm:$0xff] }
 0x43a   : > { %v1651_v24 = vperm.slane %v22177_v23, 6  ;;  %v19497_v25 = vld [vmem:[%s20909_s24 + $0x165c] sm:$0xf0]  ;;  %7712 = vmatpush.bf16.msrb.mxu0 %v14970_v32 }
 0x43b   : > { %v15993_v27 = vld [vmem:[%s20909_s24 + $0x1a20] sm:$0xf]  ;;  %v15482_v37 = vor.u32 %v19497_v25, %v15481_v21 }
 0x43c   : > { %v19625_v28 = vld [vmem:[%s20909_s24 + $0x1a5c] sm:$0xf0]  ;;  %v7459_v43 = vadd.f32 %v7458_v35, %v1651_v24 }
 0x43d   : > { %v16505_v30 = vld [vmem:[%s20909_s24 + $0x1e20] sm:$0xf]  ;;  %v15994_v39 = vor.u32 %v19625_v28, %v15993_v27  ;;  %7725 = vmatpush.bf16.msrb.mxu1 %v15482_v37 }
 0x43e   : > { %v19753_v31 = vld [vmem:[%s20909_s24 + $0x1e5c] sm:$0xf0]  ;;  %v7472_v33 = vadd.f32 %v7471_v56, %v7459_v43 }
 0x43f   : > { %v14905_v40 = vld [vmem:[%s20909_s24 + $0x11a0] sm:$0xf]  ;;  %v16506_v44 = vor.u32 %v19753_v31, %v16505_v30  ;;  %7738 = vmatpush.bf16.msrb.mxu2 %v15994_v39 }
 0x440   : > { %v19353_v41 = vld [vmem:[%s20909_s24 + $0x11dc] sm:$0xf0]  ;;  %v7485_v1 = vadd.f32 %v7484_v17, %v7472_v33  ;;  %v13627_v33 = vld [vmem:[%s20909_s24 + $0x7e0] sm:$0xf0] }
 0x441   : > { %v15417_v42 = vld [vmem:[%s20909_s24 + $0x15a0] sm:$0xf]  ;;  %v14906_v55 = vor.u32 %v19353_v41, %v14905_v40  ;;  %7751 = vmatpush.bf16.msrb.mxu3 %v16506_v44  ;;  %v7486_v41 = vpop.f32.mrf.mxu2 }
 0x442   : > { %v19481_v46 = vld [vmem:[%s20909_s24 + $0x15dc] sm:$0xf0]  ;;  %v22201_v6 = vadd.f32 %v7497_v2, %v7485_v1  ;;  %v13051_v1 = vld [vmem:[%s20909_s24 + $0x360] sm:$0xf0] }
 0x443   : > { %v15929_v47 = vld [vmem:[%s20909_s24 + $0x19a0] sm:$0xf]  ;;  %v15418_v57 = vor.u32 %v19481_v46, %v15417_v42  ;;  %7713 = vmatpush.bf16.msrb.mxu0 %v14906_v55  ;;  %v7499_v46 = vpop.f32.mrf.mxu3  ;;  %v19153_v55 = vld [vmem:[%s20909_s24 + $0xba4] sm:$0xf] }
 0x444   : > { %v19609_v48 = vld [vmem:[%s20909_s24 + $0x19dc] sm:$0xf0]  ;;  %v19009_v2 = vld [vmem:[%s20909_s24 + $0x724] sm:$0xf] }
 0x445   : > { %v16441_v49 = vld [vmem:[%s20909_s24 + $0x1da0] sm:$0xf]  ;;  %v15930_v58 = vor.u32 %v19609_v48, %v15929_v47  ;;  %7726 = vmatpush.bf16.msrb.mxu1 %v15418_v57  ;;  %v18897_v47 = vld [vmem:[%s20909_s24 + $0x3a4] sm:$0xf] }
 0x446   : > { %v19737_v54 = vld [vmem:[%s20909_s24 + $0x1ddc] sm:$0xf0]  ;;  %v13115_v48 = vld [vmem:[%s20909_s24 + $0x3e0] sm:$0xf0] }
 0x447   : > { %v14841_v59 = vld [vmem:[%s20909_s24 + $0x1120] sm:$0xf]  ;;  %v16442_v63 = vor.u32 %v19737_v54, %v16441_v49  ;;  %7739 = vmatpush.bf16.msrb.mxu2 %v15930_v58  ;;  %v19025_v49 = vld [vmem:[%s20909_s24 + $0x7a4] sm:$0xf] }
 0x448   : > { %v19337_v60 = vld [vmem:[%s20909_s24 + $0x115c] sm:$0xf0]  ;;  %v14139_v57 = vld [vmem:[%s20909_s24 + $0xbe0] sm:$0xf0] }
 0x449   : > { %v15353_v61 = vld [vmem:[%s20909_s24 + $0x1520] sm:$0xf]  ;;  %v14842_v26 = vor.u32 %v19337_v60, %v14841_v59  ;;  %7752 = vmatpush.bf16.msrb.mxu3 %v16442_v63  ;;  %v19281_v60 = vld [vmem:[%s20909_s24 + $0xfa4] sm:$0xf]  ;;  %v13118_v63 = vor.u32 %v18897_v47, %v13115_v48  ;;  %v7510_v48 = vpop.f32.mrf.mxu0 }
 0x44a   : > { %v19465_v45 = vld [vmem:[%s20909_s24 + $0x155c] sm:$0xf0]  ;;  %v14459_v46 = vld [vmem:[%s20909_s24 + $0xe60] sm:$0xf0] }
 0x44b   : > { %v15865_v19 = vld [vmem:[%s20909_s24 + $0x1920] sm:$0xf]  ;;  %v15354_v11 = vor.u32 %v19465_v45, %v15353_v61  ;;  %7714 = vmatpush.bf16.msrb.mxu0 %v14842_v26  ;;  %v14651_v61 = vld [vmem:[%s20909_s24 + $0xfe0] sm:$0xf0]  ;;  %v13630_v45 = vor.u32 %v19025_v49, %v13627_v33 }
 0x44c   : > { %v19593_v0 = vld [vmem:[%s20909_s24 + $0x195c] sm:$0xf0]  ;;  %v19137_v26 = vld [vmem:[%s20909_s24 + $0xb24] sm:$0xf] }
 0x44d   : > { %v16377_v3 = vld [vmem:[%s20909_s24 + $0x1d20] sm:$0xf]  ;;  %v15866_v12 = vor.u32 %v19593_v0, %v15865_v19  ;;  %7727 = vmatpush.bf16.msrb.mxu1 %v15354_v11  ;;  %v14142_v19 = vor.u32 %v19153_v55, %v14139_v57  ;;  %v18881_v0 = vld [vmem:[%s20909_s24 + $0x324] sm:$0xf] }
 0x44e   : > { %v19721_v5 = vld [vmem:[%s20909_s24 + $0x1d5c] sm:$0xf0]  ;;  %v19265_v11 = vld [vmem:[%s20909_s24 + $0xf24] sm:$0xf] }
 0x44f   : > { %v14777_v53 = vld [vmem:[%s20909_s24 + $0x10a0] sm:$0xf]  ;;  %v16378_v20 = vor.u32 %v19721_v5, %v16377_v3  ;;  %7740 = vmatpush.bf16.msrb.mxu2 %v15866_v12  ;;  %v14654_v3 = vor.u32 %v19281_v60, %v14651_v61  ;;  %v13563_v5 = vld [vmem:[%s20909_s24 + $0x760] sm:$0xf0] }
 0x450   : > { %v19321_v13 = vld [vmem:[%s20909_s24 + $0x10dc] sm:$0xf0]  ;;  %v14587_v12 = vld [vmem:[%s20909_s24 + $0xf60] sm:$0xf0] }
 0x451   : > { %v15289_v14 = vld [vmem:[%s20909_s24 + $0x14a0] sm:$0xf]  ;;  %v14778_v28 = vor.u32 %v19321_v13, %v14777_v53  ;;  %7753 = vmatpush.bf16.msrb.mxu3 %v16378_v20  ;;  %v13054_v53 = vor.u32 %v18881_v0, %v13051_v1  ;;  %v13566_v13 = vor.u32 %v19009_v2, %v13563_v5  ;;  %v12987_v20 = vld [vmem:[%s20909_s24 + $0x2e0] sm:$0xf0] }
 0x452   : > { %v19449_v21 = vld [vmem:[%s20909_s24 + $0x14dc] sm:$0xf0]  ;;  %v18833_v33 = vld [vmem:[%s20909_s24 + $0x1a4] sm:$0xf] }
 0x453   : > { %v15801_v24 = vld [vmem:[%s20909_s24 + $0x18a0] sm:$0xf]  ;;  %v15290_v32 = vor.u32 %v19449_v21, %v15289_v14  ;;  %7715 = vmatpush.bf16.msrb.mxu0 %v14778_v28  ;;  %v14078_v14 = vor.u32 %v19137_v26, %v14075_v9  ;;  %v18993_v21 = vld [vmem:[%s20909_s24 + $0x6a4] sm:$0xf]  ;;  %v7536_v9 = vpop.f32.mrf.mxu2 }
 0x454   : > { %v19577_v38 = vld [vmem:[%s20909_s24 + $0x18dc] sm:$0xf0]  ;;  %v19249_v28 = vld [vmem:[%s20909_s24 + $0xea4] sm:$0xf] }
 0x455   : > { %v16313_v25 = vld [vmem:[%s20909_s24 + $0x1ca0] sm:$0xf]  ;;  %v15802_v35 = vor.u32 %v19577_v38, %v15801_v24  ;;  %7728 = vmatpush.bf16.msrb.mxu1 %v15290_v32  ;;  %v14590_v24 = vor.u32 %v19265_v11, %v14587_v12  ;;  %v13499_v38 = vld [vmem:[%s20909_s24 + $0x6e0] sm:$0xf0] }
 0x456   : > { %v19705_v27 = vld [vmem:[%s20909_s24 + $0x1cdc] sm:$0xf0]  ;;  %v13502_v32 = vor.u32 %v18993_v21, %v13499_v38  ;;  %v12859_v55 = vld [vmem:[%s20909_s24 + $0x1e0] sm:$0xf0] }
 0x457   : > { %v14713_v30 = vld [vmem:[%s20909_s24 + $0x1020] sm:$0xf]  ;;  %v16314_v42 = vor.u32 %v19705_v27, %v16313_v25  ;;  %7741 = vmatpush.bf16.msrb.mxu2 %v15802_v35  ;;  %v19121_v25 = vld [vmem:[%s20909_s24 + $0xaa4] sm:$0xf]  ;;  %v12862_v1 = vor.u32 %v18833_v33, %v12859_v55 }
 0x458   : > { %v19305_v31 = vld [vmem:[%s20909_s24 + $0x105c] sm:$0xf0]  ;;  %v14011_v27 = vld [vmem:[%s20909_s24 + $0xae0] sm:$0xf0] }
 0x459   : > { %v15225_v37 = vld [vmem:[%s20909_s24 + $0x1420] sm:$0xf]  ;;  %v14714_v54 = vor.u32 %v19305_v31, %v14713_v30  ;;  %7754 = vmatpush.bf16.msrb.mxu3 %v16314_v42  ;;  %v14523_v30 = vld [vmem:[%s20909_s24 + $0xee0] sm:$0xf0]  ;;  %v12990_v31 = vor.u32 %v18865_v16, %v12987_v20  ;;  %v14014_v35 = vor.u32 %v19121_v25, %v14011_v27  ;;  %v7549_v16 = vpop.f32.mrf.mxu3  ;;  %v7512_v25 = vpop.f32.mrf.mxu0 }
 0x45a   : > { %v19433_v39 = vld [vmem:[%s20909_s24 + $0x145c] sm:$0xf0]  ;;  %v14526_v41 = vor.u32 %v19249_v28, %v14523_v30  ;;  %v13435_v42 = vld [vmem:[%s20909_s24 + $0x660] sm:$0xf0] }
 0x45b   : > { %v15737_v40 = vld [vmem:[%s20909_s24 + $0x1820] sm:$0xf]  ;;  %v15226_v58 = vor.u32 %v19433_v39, %v15225_v37  ;;  %7716 = vmatpush.bf16.msrb.mxu0 %v14714_v54  ;;  %v18849_v37 = vld [vmem:[%s20909_s24 + $0x224] sm:$0xf]  ;;  %v7538_v55 = vpop.f32.mrf.mxu2 }
 0x45c   : > { %v19561_v43 = vld [vmem:[%s20909_s24 + $0x185c] sm:$0xf0]  ;;  %v12923_v39 = vld [vmem:[%s20909_s24 + $0x260] sm:$0xf0]  ;;  %v1652_v55 = vperm.slane %v22177_v23, 7 }
 0x45d   : > { %v16249_v56 = vld [vmem:[%s20909_s24 + $0x1c20] sm:$0xf]  ;;  %v15738_v59 = vor.u32 %v19561_v43, %v15737_v40  ;;  %7729 = vmatpush.bf16.msrb.mxu1 %v15226_v58  ;;  %v18977_v40 = vld [vmem:[%s20909_s24 + $0x624] sm:$0xf]  ;;  %v12926_v47 = vor.u32 %v18849_v37, %v12923_v39  ;;  %v7511_v58 = vadd.f32 %v7510_v48, %v22201_v6 }
 0x45e   : > { %v19689_v44 = vld [vmem:[%s20909_s24 + $0x1c5c] sm:$0xf0]  ;;  %7717 = vmatmul.bf16.vlgmr.msrb.gmra.mxu0 %v21090_v7  ;;  %v19105_v43 = vld [vmem:[%s20909_s24 + $0xa24] sm:$0xf]  ;;  %v13438_v49 = vor.u32 %v18977_v40, %v13435_v42 }
 0x45f   : > { %v16250_v17 = vor.u32 %v19689_v44, %v16249_v56  ;;  %7742 = vmatpush.bf16.msrb.mxu2 %v15738_v59  ;;  %7761 = vmatpush.bf16.msra.mxu0 %v13118_v63  ;;  %v13947_v56 = vld [vmem:[%s20909_s24 + $0xa60] sm:$0xf0]  ;;  %v7523_v59 = vpop.f32.mrf.mxu1 }
 0x460   : > { %7730 = vmatmul.bf16.vlgmr.msrb.gmra.mxu1 %v21094_v10  ;;  %v19233_v44 = vld [vmem:[%s20909_s24 + $0xe24] sm:$0xf]  ;;  %v13950_v54 = vor.u32 %v19105_v43, %v13947_v56  ;;  %v7524_v0 = vadd.f32 %v7523_v59, %v7511_v58 }
 0x461   : > { %7755 = vmatpush.bf16.msrb.mxu3 %v16250_v17  ;;  %7774 = vmatpush.bf16.msra.mxu1 %v13630_v45  ;;  %v18961_v57 = vld [vmem:[%s20909_s24 + $0x5a4] sm:$0xf]  ;;  %v14462_v60 = vor.u32 %v19233_v44, %v14459_v46 }
 0x462   : > { %7743 = vmatmul.bf16.vlgmr.msrb.gmra.mxu2 %v21086_v4  ;;  %v13371_v61 = vld [vmem:[%s20909_s24 + $0x5e0] sm:$0xf0] }
 0x463   : > { %7787 = vmatpush.bf16.msra.mxu2 %v14142_v19  ;;  %7762 = vmatpush.bf16.msra.mxu0 %v13054_v53  ;;  %v19089_v17 = vld [vmem:[%s20909_s24 + $0x9a4] sm:$0xf]  ;;  %v13374_v6 = vor.u32 %v18961_v57, %v13371_v61  ;;  %v7551_v61 = vpop.f32.mrf.mxu3 }
 0x464   : > { %7756 = vmatmul.bf16.vlgmr.msrb.gmra.mxu3 %v21092_v8  ;;  %v13883_v63 = vld [vmem:[%s20909_s24 + $0x9e0] sm:$0xf0] }
 0x465   : > { %7800 = vmatpush.bf16.msra.mxu3 %v14654_v3  ;;  %7775 = vmatpush.bf16.msra.mxu1 %v13566_v13  ;;  %v19217_v45 = vld [vmem:[%s20909_s24 + $0xda4] sm:$0xf]  ;;  %v13886_v2 = vor.u32 %v19089_v17, %v13883_v63 }
 0x466   : > { %v14395_v19 = vld [vmem:[%s20909_s24 + $0xde0] sm:$0xf0] }
 0x467   : > { %7788 = vmatpush.bf16.msra.mxu2 %v14078_v14  ;;  %7763 = vmatpush.bf16.msra.mxu0 %v12990_v31  ;;  %v18817_v3 = vld [vmem:[%s20909_s24 + $0x124] sm:$0xf]  ;;  %v14398_v11 = vor.u32 %v19217_v45, %v14395_v19  ;;  %v7537_v14 = vadd.f32 %v7536_v9, %v7524_v0 }
 0x468   : > { %v12795_v5 = vld [vmem:[%s20909_s24 + $0x160] sm:$0xf0] }
 0x469   : > { %7801 = vmatpush.bf16.msra.mxu3 %v14590_v24  ;;  %7776 = vmatpush.bf16.msra.mxu1 %v13502_v32  ;;  %v18945_v26 = vld [vmem:[%s20909_s24 + $0x524] sm:$0xf]  ;;  %v12798_v24 = vor.u32 %v18817_v3, %v12795_v5  ;;  %v22272_v38 = vadd.f32 %v7549_v16, %v7537_v14 }
 0x46a   : > { %v13307_v12 = vld [vmem:[%s20909_s24 + $0x560] sm:$0xf0] }
 0x46b   : > { %7789 = vmatpush.bf16.msra.mxu2 %v14014_v35  ;;  %7764 = vmatpush.bf16.msra.mxu0 %v12926_v47  ;;  %v19073_v53 = vld [vmem:[%s20909_s24 + $0x924] sm:$0xf]  ;;  %v13310_v27 = vor.u32 %v18945_v26, %v13307_v12  ;;  %v7525_v35 = vpop.f32.mrf.mxu1 }
 0x46c   : > { %v13819_v13 = vld [vmem:[%s20909_s24 + $0x960] sm:$0xf0] }
 0x46d   : > { %7802 = vmatpush.bf16.msra.mxu3 %v14526_v41  ;;  %7777 = vmatpush.bf16.msra.mxu1 %v13438_v49  ;;  %v19201_v20 = vld [vmem:[%s20909_s24 + $0xd24] sm:$0xf]  ;;  %v13822_v28 = vor.u32 %v19073_v53, %v13819_v13 }
 0x46e   : > { %v14331_v21 = vld [vmem:[%s20909_s24 + $0xd60] sm:$0xf0] }
 0x46f   : > { %7790 = vmatpush.bf16.msra.mxu2 %v13950_v54  ;;  %7765 = vmatpush.bf16.msra.mxu0 %v12862_v1  ;;  %v18801_v30 = vld [vmem:[%s20909_s24 + $0xa4] sm:$0xf]  ;;  %v14334_v37 = vor.u32 %v19201_v20, %v14331_v21 }
 0x470   : > { %v12731_v31 = vld [vmem:[%s20909_s24 + $0xe0] sm:$0xf0] }
 0x471   : > { %7803 = vmatpush.bf16.msra.mxu3 %v14462_v60  ;;  %7778 = vmatpush.bf16.msra.mxu1 %v13374_v6  ;;  %v18929_v32 = vld [vmem:[%s20909_s24 + $0x4a4] sm:$0xf]  ;;  %v12734_v56 = vor.u32 %v18801_v30, %v12731_v31 }
 0x472   : > { %v13243_v39 = vld [vmem:[%s20909_s24 + $0x4e0] sm:$0xf0] }
 0x473   : > { %7791 = vmatpush.bf16.msra.mxu2 %v13886_v2  ;;  %v19057_v40 = vld [vmem:[%s20909_s24 + $0x8a4] sm:$0xf]  ;;  %7766 = vmatpush.bf16.msra.mxu0 %v12798_v24  ;;  %v13246_v47 = vor.u32 %v18929_v32, %v13243_v39 }
 0x474   : > { %v13755_v41 = vld [vmem:[%s20909_s24 + $0x8e0] sm:$0xf0] }
 0x475   : > { %7804 = vmatpush.bf16.msra.mxu3 %v14398_v11  ;;  %v19185_v42 = vld [vmem:[%s20909_s24 + $0xca4] sm:$0xf]  ;;  %7779 = vmatpush.bf16.msra.mxu1 %v13310_v27  ;;  %v13758_v48 = vor.u32 %v19057_v40, %v13755_v41 }
 0x476   : > { %v14267_v43 = vld [vmem:[%s20909_s24 + $0xce0] sm:$0xf0] }
 0x477   : > { %v18785_v44 = vld [vmem:[%s20909_s24 + $0x24] sm:$0xf]  ;;  %7792 = vmatpush.bf16.msra.mxu2 %v13822_v28  ;;  %v14270_v57 = vor.u32 %v19185_v42, %v14267_v43  ;;  %7767 = vmatpush.bf16.msra.mxu0 %v12734_v56 }
 0x478   : > { %v12667_v46 = vld [vmem:[%s20909_s24 + $0x60] sm:$0xf0] }
 0x479   : > { %v18913_v49 = vld [vmem:[%s20909_s24 + $0x424] sm:$0xf]  ;;  %7805 = vmatpush.bf16.msra.mxu3 %v14334_v37  ;;  %v12670_v19 = vor.u32 %v18785_v44, %v12667_v46  ;;  %7780 = vmatpush.bf16.msra.mxu1 %v13246_v47 }
 0x47a   : > { %v13179_v54 = vld [vmem:[%s20909_s24 + $0x460] sm:$0xf0] }
 0x47b   : > { %v19041_v33 = vld [vmem:[%s20909_s24 + $0x824] sm:$0xf]  ;;  %7793 = vmatpush.bf16.msra.mxu2 %v13758_v48  ;;  %v13182_v2 = vor.u32 %v18913_v49, %v13179_v54  ;;  %7768 = vmatpush.bf16.msra.mxu0 %v12670_v19 }
 0x47c   : > { %v13691_v58 = vld [vmem:[%s20909_s24 + $0x860] sm:$0xf0] }
 0x47d   : > { %v19169_v59 = vld [vmem:[%s20909_s24 + $0xc24] sm:$0xf]  ;;  %v13694_v3 = vor.u32 %v19041_v33, %v13691_v58  ;;  %7806 = vmatpush.bf16.msra.mxu3 %v14270_v57  ;;  %7781 = vmatpush.bf16.msra.mxu1 %v13182_v2 }
 0x47e   : > { %v14203_v60 = vld [vmem:[%s20909_s24 + $0xc60] sm:$0xf0]  ;;  %7769 = vmatmul.bf16.vlgmr.msra.gmra.mxu0 %v21033_v50 }
 0x47f   : > { %v19409_v17 = vld [vmem:[%s20909_s24 + $0x13a4] sm:$0xf]  ;;  %v14206_v9 = vor.u32 %v19169_v59, %v14203_v60  ;;  %7794 = vmatpush.bf16.msra.mxu2 %v13694_v3  ;;  %v7575_v3 = vpop.f32.mrf.mxu1 }
 0x480   : > { %v15163_v63 = vld [vmem:[%s20909_s24 + $0x13e0] sm:$0xf0]  ;;  %7782 = vmatmul.bf16.vlgmr.msra.gmra.mxu1 %v21036_v51 }
 0x481   : > { %v19537_v45 = vld [vmem:[%s20909_s24 + $0x17a4] sm:$0xf]  ;;  %v15166_v11 = vor.u32 %v19409_v17, %v15163_v63  ;;  %7807 = vmatpush.bf16.msra.mxu3 %v14206_v9 }
 0x482   : > { %v15675_v0 = vld [vmem:[%s20909_s24 + $0x17e0] sm:$0xf0]  ;;  %7795 = vmatmul.bf16.vlgmr.msra.gmra.mxu2 %v21020_v34 }
 0x483   : > { %v19665_v1 = vld [vmem:[%s20909_s24 + $0x1ba4] sm:$0xf]  ;;  %v15678_v12 = vor.u32 %v19537_v45, %v15675_v0  ;;  %7813 = vmatpush.bf16.msrb.mxu0 %v15166_v11  ;;  %v7562_v45 = vpop.f32.mrf.mxu0 }
 0x484   : > { %v16187_v6 = vld [vmem:[%s20909_s24 + $0x1be0] sm:$0xf0]  ;;  %7808 = vmatmul.bf16.vlgmr.msra.gmra.mxu3 %v21022_v36  ;;  %v7563_v2 = vadd.f32 %v7562_v45, %v1652_v55 }
 0x485   : > { %v19793_v5 = vld [vmem:[%s20909_s24 + $0x1fa4] sm:$0xf]  ;;  %v16190_v53 = vor.u32 %v19665_v1, %v16187_v6  ;;  %7826 = vmatpush.bf16.msrb.mxu1 %v15678_v12 }
 0x486   : > { %v16699_v26 = vld [vmem:[%s20909_s24 + $0x1fe0] sm:$0xf0] }
 0x487   : > { %v19393_v13 = vld [vmem:[%s20909_s24 + $0x1324] sm:$0xf]  ;;  %v16702_v20 = vor.u32 %v19793_v5, %v16699_v26  ;;  %7839 = vmatpush.bf16.msrb.mxu2 %v16190_v53 }
 0x488   : > { %v15099_v14 = vld [vmem:[%s20909_s24 + $0x1360] sm:$0xf0] }
 0x489   : > { %v19521_v16 = vld [vmem:[%s20909_s24 + $0x1724] sm:$0xf]  ;;  %v15102_v30 = vor.u32 %v19393_v13, %v15099_v14  ;;  %7852 = vmatpush.bf16.msrb.mxu3 %v16702_v20  ;;  %v7576_v13 = vadd.f32 %v7575_v3, %v7563_v2 }
 0x48a   : > { %v15611_v21 = vld [vmem:[%s20909_s24 + $0x1760] sm:$0xf0] }
 0x48b   : > { %v19649_v24 = vld [vmem:[%s20909_s24 + $0x1b24] sm:$0xf]  ;;  %v15614_v31 = vor.u32 %v19521_v16, %v15611_v21  ;;  %7814 = vmatpush.bf16.msrb.mxu0 %v15102_v30 }
 0x48c   : > { %v16123_v25 = vld [vmem:[%s20909_s24 + $0x1b60] sm:$0xf0] }
 0x48d   : > { %v19777_v27 = vld [vmem:[%s20909_s24 + $0x1f24] sm:$0xf]  ;;  %v16126_v32 = vor.u32 %v19649_v24, %v16123_v25  ;;  %7827 = vmatpush.bf16.msrb.mxu1 %v15614_v31 }
 0x48e   : > { %v16635_v28 = vld [vmem:[%s20909_s24 + $0x1f60] sm:$0xf0] }
 0x48f   : > { %v19377_v35 = vld [vmem:[%s20909_s24 + $0x12a4] sm:$0xf]  ;;  %v16638_v40 = vor.u32 %v19777_v27, %v16635_v28  ;;  %7840 = vmatpush.bf16.msrb.mxu2 %v16126_v32  ;;  %v7588_v27 = vpop.f32.mrf.mxu2 }
 0x490   : > { %v15035_v37 = vld [vmem:[%s20909_s24 + $0x12e0] sm:$0xf0] }
 0x491   : > { %v19505_v39 = vld [vmem:[%s20909_s24 + $0x16a4] sm:$0xf]  ;;  %v15038_v46 = vor.u32 %v19377_v35, %v15035_v37  ;;  %7853 = vmatpush.bf16.msrb.mxu3 %v16638_v40  ;;  %v7589_v35 = vadd.f32 %v7588_v27, %v7576_v13  ;;  %v7601_v37 = vpop.f32.mrf.mxu3  ;;  %v19034_v13 = vld [vmem:[%s20909_s24 + $0x7e4] sm:$0xf0] }
 0x492   : > { %v15547_v41 = vld [vmem:[%s20909_s24 + $0x16e0] sm:$0xf0] }
 0x493   : > { %v19633_v42 = vld [vmem:[%s20909_s24 + $0x1aa4] sm:$0xf]  ;;  %v15550_v48 = vor.u32 %v19505_v39, %v15547_v41  ;;  %7815 = vmatpush.bf16.msrb.mxu0 %v15038_v46 }
 0x494   : > { %v16059_v43 = vld [vmem:[%s20909_s24 + $0x1ae0] sm:$0xf0] }
 0x495   : > { %v19761_v56 = vld [vmem:[%s20909_s24 + $0x1ea4] sm:$0xf]  ;;  %v16062_v49 = vor.u32 %v19633_v42, %v16059_v43  ;;  %7828 = vmatpush.bf16.msrb.mxu1 %v15550_v48  ;;  %v22343_v42 = vadd.f32 %v7601_v37, %v7589_v35  ;;  %v7564_v43 = vpop.f32.mrf.mxu0  ;;  %v18890_v35 = vld [vmem:[%s20909_s24 + $0x364] sm:$0xf0] }
 0x496   : > { %v16571_v44 = vld [vmem:[%s20909_s24 + $0x1ee0] sm:$0xf0]  ;;  %v13569_v37 = vld [vmem:[%s20909_s24 + $0x728] sm:$0xf] }
 0x497   : > { %v19361_v47 = vld [vmem:[%s20909_s24 + $0x1224] sm:$0xf]  ;;  %v16574_v57 = vor.u32 %v19761_v56, %v16571_v44  ;;  %7841 = vmatpush.bf16.msrb.mxu2 %v16062_v49  ;;  %v7577_v49 = vpop.f32.mrf.mxu1  ;;  %v19146_v43 = vld [vmem:[%s20909_s24 + $0xb64] sm:$0xf0] }
 0x498   : > { %v14971_v54 = vld [vmem:[%s20909_s24 + $0x1260] sm:$0xf0]  ;;  %v12993_v49 = vld [vmem:[%s20909_s24 + $0x2a8] sm:$0xf] }
 0x499   : > { %v19489_v33 = vld [vmem:[%s20909_s24 + $0x1624] sm:$0xf]  ;;  %v14974_v63 = vor.u32 %v19361_v47, %v14971_v54  ;;  %7854 = vmatpush.bf16.msrb.mxu3 %v16574_v57 }
 0x49a   : > { %v15483_v58 = vld [vmem:[%s20909_s24 + $0x1660] sm:$0xf0] }
 0x49b   : > { %v19617_v59 = vld [vmem:[%s20909_s24 + $0x1a24] sm:$0xf]  ;;  %v15486_v23 = vor.u32 %v19489_v33, %v15483_v58  ;;  %7816 = vmatpush.bf16.msrb.mxu0 %v14974_v63 }
 0x49c   : > { %v15995_v60 = vld [vmem:[%s20909_s24 + $0x1a60] sm:$0xf0] }
 0x49d   : > { %v19745_v61 = vld [vmem:[%s20909_s24 + $0x1e24] sm:$0xf]  ;;  %v15998_v19 = vor.u32 %v19617_v59, %v15995_v60  ;;  %7829 = vmatpush.bf16.msrb.mxu1 %v15486_v23 }
 0x49e   : > { %v16507_v17 = vld [vmem:[%s20909_s24 + $0x1e60] sm:$0xf0] }
 0x49f   : > { %v19345_v0 = vld [vmem:[%s20909_s24 + $0x11a4] sm:$0xf]  ;;  %v16510_v5 = vor.u32 %v19745_v61, %v16507_v17  ;;  %7842 = vmatpush.bf16.msrb.mxu2 %v15998_v19 }
 0x4a0   : > { %v14907_v1 = vld [vmem:[%s20909_s24 + $0x11e0] sm:$0xf0] }
 0x4a1   : > { %v19473_v6 = vld [vmem:[%s20909_s24 + $0x15a4] sm:$0xf]  ;;  %v14910_v14 = vor.u32 %v19345_v0, %v14907_v1  ;;  %7855 = vmatpush.bf16.msrb.mxu3 %v16510_v5  ;;  %v7590_v1 = vpop.f32.mrf.mxu2 }
 0x4a2   : > { %v15419_v26 = vld [vmem:[%s20909_s24 + $0x15e0] sm:$0xf0] }
 0x4a3   : > { %v19601_v9 = vld [vmem:[%s20909_s24 + $0x19a4] sm:$0xf]  ;;  %v15422_v16 = vor.u32 %v19473_v6, %v15419_v26  ;;  %7817 = vmatpush.bf16.msrb.mxu0 %v14910_v14  ;;  %v7603_v26 = vpop.f32.mrf.mxu3  ;;  %v14145_v14 = vld [vmem:[%s20909_s24 + $0xba8] sm:$0xf] }
 0x4a4   : > { %v15931_v11 = vld [vmem:[%s20909_s24 + $0x19e0] sm:$0xf0]  ;;  %v19242_v26 = vld [vmem:[%s20909_s24 + $0xe64] sm:$0xf0] }
 0x4a5   : > { %v19729_v12 = vld [vmem:[%s20909_s24 + $0x1da4] sm:$0xf]  ;;  %v15934_v20 = vor.u32 %v19601_v9, %v15931_v11  ;;  %7830 = vmatpush.bf16.msrb.mxu1 %v15422_v16  ;;  %v13121_v9 = vld [vmem:[%s20909_s24 + $0x3a8] sm:$0xf] }
 0x4a6   : > { %v16443_v53 = vld [vmem:[%s20909_s24 + $0x1de0] sm:$0xf0]  ;;  %v18906_v11 = vld [vmem:[%s20909_s24 + $0x3e4] sm:$0xf0] }
 0x4a7   : > { %v19329_v21 = vld [vmem:[%s20909_s24 + $0x1124] sm:$0xf]  ;;  %v16446_v28 = vor.u32 %v19729_v12, %v16443_v53  ;;  %7843 = vmatpush.bf16.msrb.mxu2 %v15934_v20  ;;  %v13633_v12 = vld [vmem:[%s20909_s24 + $0x7a8] sm:$0xf] }
 0x4a8   : > { %v14843_v24 = vld [vmem:[%s20909_s24 + $0x1160] sm:$0xf0]  ;;  %v19162_v16 = vld [vmem:[%s20909_s24 + $0xbe4] sm:$0xf0] }
 0x4a9   : > { %v19457_v25 = vld [vmem:[%s20909_s24 + $0x1524] sm:$0xf]  ;;  %v14846_v41 = vor.u32 %v19329_v21, %v14843_v24  ;;  %7856 = vmatpush.bf16.msrb.mxu3 %v16446_v28  ;;  %v14657_v24 = vld [vmem:[%s20909_s24 + $0xfa8] sm:$0xf]  ;;  %v13122_v28 = vor.u32 %v18906_v11, %v13121_v9  ;;  %v7614_v11 = vpop.f32.mrf.mxu0 }
 0x4aa   : > { %v15355_v30 = vld [vmem:[%s20909_s24 + $0x1560] sm:$0xf0] }
 0x4ab   : > { %v19585_v31 = vld [vmem:[%s20909_s24 + $0x1924] sm:$0xf]  ;;  %v15358_v56 = vor.u32 %v19457_v25, %v15355_v30  ;;  %7818 = vmatpush.bf16.msrb.mxu0 %v14846_v41  ;;  %v19290_v25 = vld [vmem:[%s20909_s24 + $0xfe4] sm:$0xf0]  ;;  %v13634_v30 = vor.u32 %v19034_v13, %v13633_v12 }
 0x4ac   : > { %v15867_v32 = vld [vmem:[%s20909_s24 + $0x1960] sm:$0xf0]  ;;  %v14081_v41 = vld [vmem:[%s20909_s24 + $0xb28] sm:$0xf] }
 0x4ad   : > { %v19713_v39 = vld [vmem:[%s20909_s24 + $0x1d24] sm:$0xf]  ;;  %v15870_v44 = vor.u32 %v19585_v31, %v15867_v32  ;;  %7831 = vmatpush.bf16.msrb.mxu1 %v15358_v56  ;;  %v14146_v31 = vor.u32 %v19162_v16, %v14145_v14  ;;  %v13057_v32 = vld [vmem:[%s20909_s24 + $0x328] sm:$0xf] }
 0x4ae   : > { %v16379_v40 = vld [vmem:[%s20909_s24 + $0x1d60] sm:$0xf0]  ;;  %v14593_v56 = vld [vmem:[%s20909_s24 + $0xf28] sm:$0xf] }
 0x4af   : > { %v19313_v46 = vld [vmem:[%s20909_s24 + $0x10a4] sm:$0xf]  ;;  %v16382_v54 = vor.u32 %v19713_v39, %v16379_v40  ;;  %7844 = vmatpush.bf16.msrb.mxu2 %v15870_v44  ;;  %v14658_v39 = vor.u32 %v19290_v25, %v14657_v24  ;;  %v19018_v40 = vld [vmem:[%s20909_s24 + $0x764] sm:$0xf0] }
 0x4b0   : > { %v14779_v47 = vld [vmem:[%s20909_s24 + $0x10e0] sm:$0xf0]  ;;  %v19274_v44 = vld [vmem:[%s20909_s24 + $0xf64] sm:$0xf0] }
 0x4b1   : > { %v19441_v48 = vld [vmem:[%s20909_s24 + $0x14a4] sm:$0xf]  ;;  %v14782_v60 = vor.u32 %v19313_v46, %v14779_v47  ;;  %7857 = vmatpush.bf16.msrb.mxu3 %v16382_v54  ;;  %v13058_v46 = vor.u32 %v18890_v35, %v13057_v32  ;;  %v13570_v47 = vor.u32 %v19018_v40, %v13569_v37  ;;  %v18874_v54 = vld [vmem:[%s20909_s24 + $0x2e4] sm:$0xf0] }
 0x4b2   : > { %v15291_v33 = vld [vmem:[%s20909_s24 + $0x14e0] sm:$0xf0]  ;;  %v12865_v13 = vld [vmem:[%s20909_s24 + $0x1a8] sm:$0xf] }
 0x4b3   : > { %v19569_v55 = vld [vmem:[%s20909_s24 + $0x18a4] sm:$0xf]  ;;  %v15294_v63 = vor.u32 %v19441_v48, %v15291_v33  ;;  %7819 = vmatpush.bf16.msrb.mxu0 %v14782_v60  ;;  %v14082_v48 = vor.u32 %v19146_v43, %v14081_v41  ;;  %v13505_v33 = vld [vmem:[%s20909_s24 + $0x6a8] sm:$0xf]  ;;  %v7640_v43 = vpop.f32.mrf.mxu2 }
 0x4b4   : > { %v15803_v57 = vld [vmem:[%s20909_s24 + $0x18e0] sm:$0xf0]  ;;  %v14529_v60 = vld [vmem:[%s20909_s24 + $0xea8] sm:$0xf] }
 0x4b5   : > { %v19697_v58 = vld [vmem:[%s20909_s24 + $0x1ca4] sm:$0xf]  ;;  %v15806_v45 = vor.u32 %v19569_v55, %v15803_v57  ;;  %7832 = vmatpush.bf16.msrb.mxu1 %v15294_v63  ;;  %v14594_v55 = vor.u32 %v19274_v44, %v14593_v56  ;;  %v19002_v57 = vld [vmem:[%s20909_s24 + $0x6e4] sm:$0xf0] }
 0x4b6   : > { %v16315_v59 = vld [vmem:[%s20909_s24 + $0x1ce0] sm:$0xf0]  ;;  %v13506_v63 = vor.u32 %v19002_v57, %v13505_v33  ;;  %v18842_v14 = vld [vmem:[%s20909_s24 + $0x1e4] sm:$0xf0] }
 0x4b7   : > { %v19297_v61 = vld [vmem:[%s20909_s24 + $0x1024] sm:$0xf]  ;;  %v16318_v6 = vor.u32 %v19697_v58, %v16315_v59  ;;  %7845 = vmatpush.bf16.msrb.mxu2 %v15806_v45  ;;  %v14017_v58 = vld [vmem:[%s20909_s24 + $0xaa8] sm:$0xf]  ;;  %v12866_v35 = vor.u32 %v18842_v14, %v12865_v13 }
 0x4b8   : > { %v14715_v17 = vld [vmem:[%s20909_s24 + $0x1060] sm:$0xf0]  ;;  %v19130_v59 = vld [vmem:[%s20909_s24 + $0xae4] sm:$0xf0] }
 0x4b9   : > { %v19425_v23 = vld [vmem:[%s20909_s24 + $0x1424] sm:$0xf]  ;;  %v14718_v53 = vor.u32 %v19297_v61, %v14715_v17  ;;  %7858 = vmatpush.bf16.msrb.mxu3 %v16318_v6  ;;  %v19258_v61 = vld [vmem:[%s20909_s24 + $0xee4] sm:$0xf0]  ;;  %v12994_v17 = vor.u32 %v18874_v54, %v12993_v49  ;;  %v14018_v45 = vor.u32 %v19130_v59, %v14017_v58  ;;  %v7653_v49 = vpop.f32.mrf.mxu3  ;;  %v7616_v58 = vpop.f32.mrf.mxu0 }
 0x4ba   : > { %v15227_v19 = vld [vmem:[%s20909_s24 + $0x1460] sm:$0xf0]  ;;  %v14530_v1 = vor.u32 %v19258_v61, %v14529_v60  ;;  %v18986_v6 = vld [vmem:[%s20909_s24 + $0x664] sm:$0xf0] }
 0x4bb   : > { %v19553_v0 = vld [vmem:[%s20909_s24 + $0x1824] sm:$0xf]  ;;  %v15230_v20 = vor.u32 %v19425_v23, %v15227_v19  ;;  %7820 = vmatpush.bf16.msrb.mxu0 %v14718_v53  ;;  %v12929_v23 = vld [vmem:[%s20909_s24 + $0x228] sm:$0xf]  ;;  %v7642_v14 = vpop.f32.mrf.mxu2 }
 0x4bc   : > { %v15739_v2 = vld [vmem:[%s20909_s24 + $0x1860] sm:$0xf0]  ;;  %v18858_v19 = vld [vmem:[%s20909_s24 + $0x264] sm:$0xf0] }
 0x4bd   : > { %v19681_v3 = vld [vmem:[%s20909_s24 + $0x1c24] sm:$0xf]  ;;  %v15742_v21 = vor.u32 %v19553_v0, %v15739_v2  ;;  %7833 = vmatpush.bf16.msrb.mxu1 %v15230_v20  ;;  %v13441_v0 = vld [vmem:[%s20909_s24 + $0x628] sm:$0xf]  ;;  %v12930_v9 = vor.u32 %v18858_v19, %v12929_v23  ;;  %v7615_v20 = vadd.f32 %v7614_v11, %v22343_v42 }
 0x4be   : > { %v16251_v5 = vld [vmem:[%s20909_s24 + $0x1c60] sm:$0xf0]  ;;  %7821 = vmatmul.bf16.vlgmr.msrb.gmra.mxu0 %v21090_v7  ;;  %v13953_v2 = vld [vmem:[%s20909_s24 + $0xa28] sm:$0xf]  ;;  %v13442_v12 = vor.u32 %v18986_v6, %v13441_v0 }
 0x4bf   : > { %v16254_v27 = vor.u32 %v19681_v3, %v16251_v5  ;;  %7846 = vmatpush.bf16.msrb.mxu2 %v15742_v21  ;;  %7865 = vmatpush.bf16.msra.mxu0 %v13122_v28  ;;  %v19114_v3 = vld [vmem:[%s20909_s24 + $0xa64] sm:$0xf0]  ;;  %v7627_v21 = vpop.f32.mrf.mxu1 }
 0x4c0   : > { %7834 = vmatmul.bf16.vlgmr.msrb.gmra.mxu1 %v21094_v10  ;;  %v14465_v5 = vld [vmem:[%s20909_s24 + $0xe28] sm:$0xf]  ;;  %v13954_v53 = vor.u32 %v19114_v3, %v13953_v2  ;;  %v7628_v32 = vadd.f32 %v7627_v21, %v7615_v20 }
 0x4c1   : > { %7859 = vmatpush.bf16.msrb.mxu3 %v16254_v27  ;;  %7878 = vmatpush.bf16.msra.mxu1 %v13634_v30  ;;  %v13377_v16 = vld [vmem:[%s20909_s24 + $0x5a8] sm:$0xf]  ;;  %v14466_v24 = vor.u32 %v19242_v26, %v14465_v5 }
 0x4c2   : > { %7847 = vmatmul.bf16.vlgmr.msrb.gmra.mxu2 %v21086_v4  ;;  %v18970_v25 = vld [vmem:[%s20909_s24 + $0x5e4] sm:$0xf0] }
 0x4c3   : > { %7891 = vmatpush.bf16.msra.mxu2 %v14146_v31  ;;  %7866 = vmatpush.bf16.msra.mxu0 %v13058_v46  ;;  %v13889_v27 = vld [vmem:[%s20909_s24 + $0x9a8] sm:$0xf]  ;;  %v13378_v42 = vor.u32 %v18970_v25, %v13377_v16  ;;  %v7655_v25 = vpop.f32.mrf.mxu3 }
 0x4c4   : > { %7860 = vmatmul.bf16.vlgmr.msrb.gmra.mxu3 %v21092_v8  ;;  %v19098_v28 = vld [vmem:[%s20909_s24 + $0x9e4] sm:$0xf0] }
 0x4c5   : > { %7904 = vmatpush.bf16.msra.mxu3 %v14658_v39  ;;  %7879 = vmatpush.bf16.msra.mxu1 %v13570_v47  ;;  %v14401_v30 = vld [vmem:[%s20909_s24 + $0xda8] sm:$0xf]  ;;  %v13890_v37 = vor.u32 %v19098_v28, %v13889_v27 }
 0x4c6   : > { %v19226_v31 = vld [vmem:[%s20909_s24 + $0xde4] sm:$0xf0] }
 0x4c7   : > { %7892 = vmatpush.bf16.msra.mxu2 %v14082_v48  ;;  %7867 = vmatpush.bf16.msra.mxu0 %v12994_v17  ;;  %v12801_v39 = vld [vmem:[%s20909_s24 + $0x128] sm:$0xf]  ;;  %v14402_v56 = vor.u32 %v19226_v31, %v14401_v30  ;;  %v7641_v48 = vadd.f32 %v7640_v43, %v7628_v32 }
 0x4c8   : > { %v18826_v40 = vld [vmem:[%s20909_s24 + $0x164] sm:$0xf0] }
 0x4c9   : > { %7905 = vmatpush.bf16.msra.mxu3 %v14594_v55  ;;  %7880 = vmatpush.bf16.msra.mxu1 %v13506_v63  ;;  %v13313_v41 = vld [vmem:[%s20909_s24 + $0x528] sm:$0xf]  ;;  %v12802_v55 = vor.u32 %v18826_v40, %v12801_v39  ;;  %v22414_v57 = vadd.f32 %v7653_v49, %v7641_v48 }
 0x4ca   : > { %v18954_v44 = vld [vmem:[%s20909_s24 + $0x564] sm:$0xf0] }
 0x4cb   : > { %7893 = vmatpush.bf16.msra.mxu2 %v14018_v45  ;;  %7868 = vmatpush.bf16.msra.mxu0 %v12930_v9  ;;  %v13825_v46 = vld [vmem:[%s20909_s24 + $0x928] sm:$0xf]  ;;  %v13314_v59 = vor.u32 %v18954_v44, %v13313_v41  ;;  %v7629_v45 = vpop.f32.mrf.mxu1 }
 0x4cc   : > { %v19082_v47 = vld [vmem:[%s20909_s24 + $0x964] sm:$0xf0] }
 0x4cd   : > { %7906 = vmatpush.bf16.msra.mxu3 %v14530_v1  ;;  %7881 = vmatpush.bf16.msra.mxu1 %v13442_v12  ;;  %v14337_v54 = vld [vmem:[%s20909_s24 + $0xd28] sm:$0xf]  ;;  %v13826_v60 = vor.u32 %v19082_v47, %v13825_v46 }
 0x4ce   : > { %v19210_v33 = vld [vmem:[%s20909_s24 + $0xd64] sm:$0xf0] }
 0x4cf   : > { %7894 = vmatpush.bf16.msra.mxu2 %v13954_v53  ;;  %7869 = vmatpush.bf16.msra.mxu0 %v12866_v35  ;;  %v12737_v61 = vld [vmem:[%s20909_s24 + $0xa8] sm:$0xf]  ;;  %v14338_v23 = vor.u32 %v19210_v33, %v14337_v54 }
 0x4d0   : > { %v18810_v17 = vld [vmem:[%s20909_s24 + $0xe4] sm:$0xf0] }
 0x4d1   : > { %7907 = vmatpush.bf16.msra.mxu3 %v14466_v24  ;;  %7882 = vmatpush.bf16.msra.mxu1 %v13378_v42  ;;  %v13249_v63 = vld [vmem:[%s20909_s24 + $0x4a8] sm:$0xf]  ;;  %v12738_v3 = vor.u32 %v18810_v17, %v12737_v61 }
 0x4d2   : > { %v18938_v19 = vld [vmem:[%s20909_s24 + $0x4e4] sm:$0xf0] }
 0x4d3   : > { %7895 = vmatpush.bf16.msra.mxu2 %v13890_v37  ;;  %v13761_v0 = vld [vmem:[%s20909_s24 + $0x8a8] sm:$0xf]  ;;  %7870 = vmatpush.bf16.msra.mxu0 %v12802_v55  ;;  %v13250_v9 = vor.u32 %v18938_v19, %v13249_v63 }
 0x4d4   : > { %v19066_v1 = vld [vmem:[%s20909_s24 + $0x8e4] sm:$0xf0] }
 0x4d5   : > { %7908 = vmatpush.bf16.msra.mxu3 %v14402_v56  ;;  %v14273_v6 = vld [vmem:[%s20909_s24 + $0xca8] sm:$0xf]  ;;  %7883 = vmatpush.bf16.msra.mxu1 %v13314_v59  ;;  %v13762_v11 = vor.u32 %v19066_v1, %v13761_v0 }
 0x4d6   : > { %v19194_v2 = vld [vmem:[%s20909_s24 + $0xce4] sm:$0xf0] }
 0x4d7   : > { %v12673_v5 = vld [vmem:[%s20909_s24 + $0x28] sm:$0xf]  ;;  %7896 = vmatpush.bf16.msra.mxu2 %v13826_v60  ;;  %v14274_v16 = vor.u32 %v19194_v2, %v14273_v6  ;;  %7871 = vmatpush.bf16.msra.mxu0 %v12738_v3 }
 0x4d8   : > { %v18794_v26 = vld [vmem:[%s20909_s24 + $0x64] sm:$0xf0] }
 0x4d9   : > { %v13185_v12 = vld [vmem:[%s20909_s24 + $0x428] sm:$0xf]  ;;  %7909 = vmatpush.bf16.msra.mxu3 %v14338_v23  ;;  %v12674_v31 = vor.u32 %v18794_v26, %v12673_v5  ;;  %7884 = vmatpush.bf16.msra.mxu1 %v13250_v9 }
 0x4da   : > { %v18922_v53 = vld [vmem:[%s20909_s24 + $0x464] sm:$0xf0] }
 0x4db   : > { %v13697_v13 = vld [vmem:[%s20909_s24 + $0x828] sm:$0xf]  ;;  %7897 = vmatpush.bf16.msra.mxu2 %v13762_v11  ;;  %v13186_v37 = vor.u32 %v18922_v53, %v13185_v12  ;;  %7872 = vmatpush.bf16.msra.mxu0 %v12674_v31  ;;  %v7666_v31 = vpop.f32.mrf.mxu0 }
 0x4dc   : > { %v19050_v20 = vld [vmem:[%s20909_s24 + $0x864] sm:$0xf0] }
 0x4dd   : > { %v14209_v21 = vld [vmem:[%s20909_s24 + $0xc28] sm:$0xf]  ;;  %v13698_v39 = vor.u32 %v19050_v20, %v13697_v13  ;;  %7910 = vmatpush.bf16.msra.mxu3 %v14274_v16  ;;  %7885 = vmatpush.bf16.msra.mxu1 %v13186_v37 }
 0x4de   : > { %v19178_v24 = vld [vmem:[%s20909_s24 + $0xc64] sm:$0xf0]  ;;  %7873 = vmatmul.bf16.vlgmr.msra.gmra.mxu0 %v21033_v50 }
 0x4df   : > { %v15169_v27 = vld [vmem:[%s20909_s24 + $0x13a8] sm:$0xf]  ;;  %v14210_v43 = vor.u32 %v19178_v24, %v14209_v21  ;;  %7898 = vmatpush.bf16.msra.mxu2 %v13698_v39 }
 0x4e0   : > { %v19418_v28 = vld [vmem:[%s20909_s24 + $0x13e4] sm:$0xf0]  ;;  %7886 = vmatmul.bf16.vlgmr.msra.gmra.mxu1 %v21036_v51 }
 0x4e1   : > { %v15681_v30 = vld [vmem:[%s20909_s24 + $0x17a8] sm:$0xf]  ;;  %v15170_v56 = vor.u32 %v19418_v28, %v15169_v27  ;;  %7911 = vmatpush.bf16.msra.mxu3 %v14210_v43 }
 0x4e2   : > { %v19546_v32 = vld [vmem:[%s20909_s24 + $0x17e4] sm:$0xf0]  ;;  %7899 = vmatmul.bf16.vlgmr.msra.gmra.mxu2 %v21020_v34 }
 0x4e3   : > { %v16193_v35 = vld [vmem:[%s20909_s24 + $0x1ba8] sm:$0xf]  ;;  %v15682_v44 = vor.u32 %v19546_v32, %v15681_v30  ;;  %7917 = vmatpush.bf16.msrb.mxu0 %v15170_v56 }
 0x4e4   : > { %v19674_v42 = vld [vmem:[%s20909_s24 + $0x1be4] sm:$0xf0]  ;;  %7912 = vmatmul.bf16.vlgmr.msra.gmra.mxu3 %v21022_v36 }
 0x4e5   : > { %v16705_v40 = vld [vmem:[%s20909_s24 + $0x1fa8] sm:$0xf]  ;;  %v16194_v46 = vor.u32 %v19674_v42, %v16193_v35  ;;  %7930 = vmatpush.bf16.msrb.mxu1 %v15682_v44 }
 0x4e6   : > { %v19802_v41 = vld [vmem:[%s20909_s24 + $0x1fe4] sm:$0xf0] }
 0x4e7   : > { %v15105_v47 = vld [vmem:[%s20909_s24 + $0x1328] sm:$0xf]  ;;  %v16706_v54 = vor.u32 %v19802_v41, %v16705_v40  ;;  %7943 = vmatpush.bf16.msrb.mxu2 %v16194_v46  ;;  %v7679_v41 = vpop.f32.mrf.mxu1 }
 0x4e8   : > { %v19402_v48 = vld [vmem:[%s20909_s24 + $0x1364] sm:$0xf0] }
 0x4e9   : > { %v15617_v49 = vld [vmem:[%s20909_s24 + $0x1728] sm:$0xf]  ;;  %v15106_v61 = vor.u32 %v19402_v48, %v15105_v47  ;;  %7956 = vmatpush.bf16.msrb.mxu3 %v16706_v54 }
 0x4ea   : > { %v19530_v33 = vld [vmem:[%s20909_s24 + $0x1764] sm:$0xf0] }
 0x4eb   : > { %v16129_v55 = vld [vmem:[%s20909_s24 + $0x1b28] sm:$0xf]  ;;  %v15618_v63 = vor.u32 %v19530_v33, %v15617_v49  ;;  %7918 = vmatpush.bf16.msrb.mxu0 %v15106_v61  ;;  %v7692_v61 = vpop.f32.mrf.mxu2 }
 0x4ec   : > { %v19658_v58 = vld [vmem:[%s20909_s24 + $0x1b64] sm:$0xf0] }
 0x4ed   : > { %v16641_v59 = vld [vmem:[%s20909_s24 + $0x1f28] sm:$0xf]  ;;  %v16130_v45 = vor.u32 %v19658_v58, %v16129_v55  ;;  %7931 = vmatpush.bf16.msrb.mxu1 %v15618_v63 }
 0x4ee   : > { %v19786_v60 = vld [vmem:[%s20909_s24 + $0x1f64] sm:$0xf0] }
 0x4ef   : > { %v15041_v17 = vld [vmem:[%s20909_s24 + $0x12a8] sm:$0xf]  ;;  %v16642_v1 = vor.u32 %v19786_v60, %v16641_v59  ;;  %7944 = vmatpush.bf16.msrb.mxu2 %v16130_v45 }
 0x4f0   : > { %v19386_v23 = vld [vmem:[%s20909_s24 + $0x12e4] sm:$0xf0] }
 0x4f1   : > { %v15553_v19 = vld [vmem:[%s20909_s24 + $0x16a8] sm:$0xf]  ;;  %v15042_v9 = vor.u32 %v19386_v23, %v15041_v17  ;;  %7957 = vmatpush.bf16.msrb.mxu3 %v16642_v1 }
 0x4f2   : > { %v19514_v0 = vld [vmem:[%s20909_s24 + $0x16e4] sm:$0xf0] }
 0x4f3   : > { %v16065_v6 = vld [vmem:[%s20909_s24 + $0x1aa8] sm:$0xf]  ;;  %v15554_v12 = vor.u32 %v19514_v0, %v15553_v19  ;;  %7919 = vmatpush.bf16.msrb.mxu0 %v15042_v9  ;;  %v7705_v0 = vpop.f32.mrf.mxu3 }
 0x4f4   : > { %v19642_v2 = vld [vmem:[%s20909_s24 + $0x1ae4] sm:$0xf0] }
 0x4f5   : > { %v22456_v3 = vld [vmem:[%s20915_s17 + $0x8] sm:$0xff]  ;;  %v16066_v53 = vor.u32 %v19642_v2, %v16065_v6  ;;  %7932 = vmatpush.bf16.msrb.mxu1 %v15554_v12 }
 0x4f6   : > { %v16577_v5 = vld [vmem:[%s20909_s24 + $0x1ea8] sm:$0xf]  ;;  %v1653_v16 = vperm.slane %v22456_v3, 0 }
 0x4f7   : > { %v19770_v26 = vld [vmem:[%s20909_s24 + $0x1ee4] sm:$0xf0]  ;;  %7945 = vmatpush.bf16.msrb.mxu2 %v16066_v53 }
 0x4f8   : > { %v14977_v11 = vld [vmem:[%s20909_s24 + $0x1228] sm:$0xf]  ;;  %v16578_v20 = vor.u32 %v19770_v26, %v16577_v5  ;;  %v7667_v40 = vadd.f32 %v7666_v31, %v1653_v16  ;;  %v7668_v26 = vpop.f32.mrf.mxu0 }
 0x4f9   : > { %v19370_v13 = vld [vmem:[%s20909_s24 + $0x1264] sm:$0xf0]  ;;  %v13571_v26 = vld [vmem:[%s20909_s24 + $0x768] sm:$0xf0] }
 0x4fa   : > { %v15489_v14 = vld [vmem:[%s20909_s24 + $0x1628] sm:$0xf]  ;;  %v14978_v30 = vor.u32 %v19370_v13, %v14977_v11  ;;  %7958 = vmatpush.bf16.msrb.mxu3 %v16578_v20  ;;  %v7680_v49 = vadd.f32 %v7679_v41, %v7667_v40  ;;  %v7694_v40 = vpop.f32.mrf.mxu2 }
 0x4fb   : > { %v19498_v21 = vld [vmem:[%s20909_s24 + $0x1664] sm:$0xf0]  ;;  %v12931_v40 = vld [vmem:[%s20909_s24 + $0x268] sm:$0xf0] }
 0x4fc   : > { %v16001_v24 = vld [vmem:[%s20909_s24 + $0x1a28] sm:$0xf]  ;;  %v15490_v32 = vor.u32 %v19498_v21, %v15489_v14  ;;  %7920 = vmatpush.bf16.msrb.mxu0 %v14978_v30  ;;  %v7693_v19 = vadd.f32 %v7692_v61, %v7680_v49  ;;  %v7681_v14 = vpop.f32.mrf.mxu1  ;;  %v19026_v49 = vld [vmem:[%s20909_s24 + $0x7ac] sm:$0xf] }
 0x4fd   : > { %v19626_v25 = vld [vmem:[%s20909_s24 + $0x1a64] sm:$0xf0]  ;;  %v19282_v61 = vld [vmem:[%s20909_s24 + $0xfac] sm:$0xf] }
 0x4fe   : > { %v16513_v27 = vld [vmem:[%s20909_s24 + $0x1e28] sm:$0xf]  ;;  %v16002_v35 = vor.u32 %v19626_v25, %v16001_v24  ;;  %7933 = vmatpush.bf16.msrb.mxu1 %v15490_v32  ;;  %v22488_v5 = vadd.f32 %v7705_v0, %v7693_v19  ;;  %v18882_v0 = vld [vmem:[%s20909_s24 + $0x32c] sm:$0xf] }
 0x4ff   : > { %v19754_v28 = vld [vmem:[%s20909_s24 + $0x1e64] sm:$0xf0] }
 0x500   : > { %v14913_v42 = vld [vmem:[%s20909_s24 + $0x11a8] sm:$0xf]  ;;  %v16514_v43 = vor.u32 %v19754_v28, %v16513_v27  ;;  %7946 = vmatpush.bf16.msrb.mxu2 %v16002_v35 }
 0x501   : > { %v19354_v37 = vld [vmem:[%s20909_s24 + $0x11e4] sm:$0xf0] }
 0x502   : > { %v15425_v39 = vld [vmem:[%s20909_s24 + $0x15a8] sm:$0xf]  ;;  %v14914_v54 = vor.u32 %v19354_v37, %v14913_v42  ;;  %7959 = vmatpush.bf16.msrb.mxu3 %v16514_v43 }
 0x503   : > { %v19482_v56 = vld [vmem:[%s20909_s24 + $0x15e4] sm:$0xf0] }
 0x504   : > { %v15937_v44 = vld [vmem:[%s20909_s24 + $0x19a8] sm:$0xf]  ;;  %v15426_v33 = vor.u32 %v19482_v56, %v15425_v39  ;;  %7921 = vmatpush.bf16.msrb.mxu0 %v14914_v54 }
 0x505   : > { %v19610_v46 = vld [vmem:[%s20909_s24 + $0x19e4] sm:$0xf0] }
 0x506   : > { %v16449_v47 = vld [vmem:[%s20909_s24 + $0x1da8] sm:$0xf]  ;;  %v15938_v55 = vor.u32 %v19610_v46, %v15937_v44  ;;  %7934 = vmatpush.bf16.msrb.mxu1 %v15426_v33  ;;  %v7707_v46 = vpop.f32.mrf.mxu3  ;;  %v13635_v33 = vld [vmem:[%s20909_s24 + $0x7e8] sm:$0xf0] }
 0x507   : > { %v19738_v48 = vld [vmem:[%s20909_s24 + $0x1de4] sm:$0xf0]  ;;  %v13955_v46 = vld [vmem:[%s20909_s24 + $0xa68] sm:$0xf0] }
 0x508   : > { %v14849_v58 = vld [vmem:[%s20909_s24 + $0x1128] sm:$0xf]  ;;  %v16450_v17 = vor.u32 %v19738_v48, %v16449_v47  ;;  %7947 = vmatpush.bf16.msrb.mxu2 %v15938_v55  ;;  %v18898_v47 = vld [vmem:[%s20909_s24 + $0x3ac] sm:$0xf] }
 0x509   : > { %v19338_v59 = vld [vmem:[%s20909_s24 + $0x1164] sm:$0xf0]  ;;  %v13123_v48 = vld [vmem:[%s20909_s24 + $0x3e8] sm:$0xf0] }
 0x50a   : > { %v15361_v60 = vld [vmem:[%s20909_s24 + $0x1528] sm:$0xf]  ;;  %v14850_v2 = vor.u32 %v19338_v59, %v14849_v58  ;;  %7960 = vmatpush.bf16.msrb.mxu3 %v16450_v17  ;;  %v19154_v55 = vld [vmem:[%s20909_s24 + $0xbac] sm:$0xf] }
 0x50b   : > { %v19466_v63 = vld [vmem:[%s20909_s24 + $0x1564] sm:$0xf0]  ;;  %v14147_v58 = vld [vmem:[%s20909_s24 + $0xbe8] sm:$0xf0] }
 0x50c   : > { %v15873_v45 = vld [vmem:[%s20909_s24 + $0x1928] sm:$0xf]  ;;  %v15362_v9 = vor.u32 %v19466_v63, %v15361_v60  ;;  %7922 = vmatpush.bf16.msrb.mxu0 %v14850_v2  ;;  %v14659_v17 = vld [vmem:[%s20909_s24 + $0xfe8] sm:$0xf0]  ;;  %v14150_v19 = vor.u32 %v19154_v55, %v14147_v58 }
 0x50d   : > { %v19594_v23 = vld [vmem:[%s20909_s24 + $0x1964] sm:$0xf0]  ;;  %v14662_v2 = vor.u32 %v19282_v61, %v14659_v17  ;;  %v18834_v58 = vld [vmem:[%s20909_s24 + $0x1ac] sm:$0xf]  ;;  %v7731_v17 = vpop.f32.mrf.mxu1 }
 0x50e   : > { %v16385_v1 = vld [vmem:[%s20909_s24 + $0x1d28] sm:$0xf]  ;;  %v15874_v11 = vor.u32 %v19594_v23, %v15873_v45  ;;  %7935 = vmatpush.bf16.msrb.mxu1 %v15362_v9  ;;  %v13126_v45 = vor.u32 %v18898_v47, %v13123_v48  ;;  %v13638_v23 = vor.u32 %v19026_v49, %v13635_v33  ;;  %v19138_v9 = vld [vmem:[%s20909_s24 + $0xb2c] sm:$0xf] }
 0x50f   : > { %v19722_v6 = vld [vmem:[%s20909_s24 + $0x1d64] sm:$0xf0]  ;;  %v19234_v47 = vld [vmem:[%s20909_s24 + $0xe2c] sm:$0xf] }
 0x510   : > { %v14785_v12 = vld [vmem:[%s20909_s24 + $0x10a8] sm:$0xf]  ;;  %v16386_v16 = vor.u32 %v19722_v6, %v16385_v1  ;;  %7948 = vmatpush.bf16.msrb.mxu2 %v15874_v11  ;;  %v13059_v1 = vld [vmem:[%s20909_s24 + $0x368] sm:$0xf0] }
 0x511   : > { %v19322_v53 = vld [vmem:[%s20909_s24 + $0x10e4] sm:$0xf0]  ;;  %v19010_v6 = vld [vmem:[%s20909_s24 + $0x72c] sm:$0xf] }
 0x512   : > { %v15297_v13 = vld [vmem:[%s20909_s24 + $0x14a8] sm:$0xf]  ;;  %v14786_v28 = vor.u32 %v19322_v53, %v14785_v12  ;;  %7961 = vmatpush.bf16.msrb.mxu3 %v16386_v16  ;;  %v14083_v11 = vld [vmem:[%s20909_s24 + $0xb68] sm:$0xf0]  ;;  %v13574_v14 = vor.u32 %v19010_v6, %v13571_v26 }
 0x513   : > { %v19450_v20 = vld [vmem:[%s20909_s24 + $0x14e4] sm:$0xf0]  ;;  %v19266_v12 = vld [vmem:[%s20909_s24 + $0xf2c] sm:$0xf]  ;;  %v14086_v16 = vor.u32 %v19138_v9, %v14083_v11 }
 0x514   : > { %v15809_v21 = vld [vmem:[%s20909_s24 + $0x18a8] sm:$0xf]  ;;  %v15298_v32 = vor.u32 %v19450_v20, %v15297_v13  ;;  %7923 = vmatpush.bf16.msrb.mxu0 %v14786_v28  ;;  %v14595_v53 = vld [vmem:[%s20909_s24 + $0xf68] sm:$0xf0]  ;;  %v13062_v13 = vor.u32 %v18882_v0, %v13059_v1 }
 0x515   : > { %v19578_v24 = vld [vmem:[%s20909_s24 + $0x18e4] sm:$0xf0]  ;;  %v18866_v20 = vld [vmem:[%s20909_s24 + $0x2ac] sm:$0xf] }
 0x516   : > { %v16321_v25 = vld [vmem:[%s20909_s24 + $0x1ca8] sm:$0xf]  ;;  %v15810_v35 = vor.u32 %v19578_v24, %v15809_v21  ;;  %7936 = vmatpush.bf16.msrb.mxu1 %v15298_v32  ;;  %v12995_v21 = vld [vmem:[%s20909_s24 + $0x2e8] sm:$0xf0] }
 0x517   : > { %v19706_v27 = vld [vmem:[%s20909_s24 + $0x1ce4] sm:$0xf0]  ;;  %v18994_v24 = vld [vmem:[%s20909_s24 + $0x6ac] sm:$0xf] }
 0x518   : > { %v14721_v30 = vld [vmem:[%s20909_s24 + $0x1028] sm:$0xf]  ;;  %v16322_v41 = vor.u32 %v19706_v27, %v16321_v25  ;;  %7949 = vmatpush.bf16.msrb.mxu2 %v15810_v35  ;;  %v14598_v25 = vor.u32 %v19266_v12, %v14595_v53  ;;  %v13507_v27 = vld [vmem:[%s20909_s24 + $0x6e8] sm:$0xf0]  ;;  %v12998_v35 = vor.u32 %v18866_v20, %v12995_v21  ;;  %v7744_v53 = vpop.f32.mrf.mxu2 }
 0x519   : > { %v19306_v31 = vld [vmem:[%s20909_s24 + $0x1064] sm:$0xf0]  ;;  %v19122_v28 = vld [vmem:[%s20909_s24 + $0xaac] sm:$0xf] }
 0x51a   : > { %v15233_v42 = vld [vmem:[%s20909_s24 + $0x1428] sm:$0xf]  ;;  %v14722_v54 = vor.u32 %v19306_v31, %v14721_v30  ;;  %7962 = vmatpush.bf16.msrb.mxu3 %v16322_v41  ;;  %v14019_v30 = vld [vmem:[%s20909_s24 + $0xae8] sm:$0xf0] }
 0x51b   : > { %v19434_v37 = vld [vmem:[%s20909_s24 + $0x1464] sm:$0xf0]  ;;  %v19250_v31 = vld [vmem:[%s20909_s24 + $0xeac] sm:$0xf] }
 0x51c   : > { %v15745_v39 = vld [vmem:[%s20909_s24 + $0x1828] sm:$0xf]  ;;  %v15234_v59 = vor.u32 %v19434_v37, %v15233_v42  ;;  %7924 = vmatpush.bf16.msrb.mxu0 %v14722_v54  ;;  %v14531_v32 = vld [vmem:[%s20909_s24 + $0xee8] sm:$0xf0]  ;;  %v13510_v42 = vor.u32 %v18994_v24, %v13507_v27  ;;  %v14022_v37 = vor.u32 %v19122_v28, %v14019_v30  ;;  %v7718_v54 = vpop.f32.mrf.mxu0  ;;  %v7757_v24 = vpop.f32.mrf.mxu3 }
 0x51d   : > { %v19562_v43 = vld [vmem:[%s20909_s24 + $0x1864] sm:$0xf0]  ;;  %v18978_v41 = vld [vmem:[%s20909_s24 + $0x62c] sm:$0xf]  ;;  %v7719_v61 = vadd.f32 %v7718_v54, %v22488_v5 }
 0x51e   : > { %v16257_v56 = vld [vmem:[%s20909_s24 + $0x1c28] sm:$0xf]  ;;  %v15746_v60 = vor.u32 %v19562_v43, %v15745_v39  ;;  %7937 = vmatpush.bf16.msrb.mxu1 %v15234_v59  ;;  %v18850_v39 = vld [vmem:[%s20909_s24 + $0x22c] sm:$0xf]  ;;  %v14534_v43 = vor.u32 %v19250_v31, %v14531_v32 }
 0x51f   : > { %v19690_v44 = vld [vmem:[%s20909_s24 + $0x1c64] sm:$0xf0]  ;;  %7925 = vmatmul.bf16.vlgmr.msrb.gmra.mxu0 %v21090_v7  ;;  %v14467_v48 = vld [vmem:[%s20909_s24 + $0xe68] sm:$0xf0]  ;;  %v12934_v49 = vor.u32 %v18850_v39, %v12931_v40  ;;  %v7732_v6 = vadd.f32 %v7731_v17, %v7719_v61  ;;  %v7733_v40 = vpop.f32.mrf.mxu1 }
 0x520   : > { %v16258_v63 = vor.u32 %v19690_v44, %v16257_v56  ;;  %7950 = vmatpush.bf16.msrb.mxu2 %v15746_v60  ;;  %7969 = vmatpush.bf16.msra.mxu0 %v13126_v45  ;;  %v13443_v56 = vld [vmem:[%s20909_s24 + $0x668] sm:$0xf0]  ;;  %v7746_v61 = vpop.f32.mrf.mxu2 }
 0x521   : > { %7938 = vmatmul.bf16.vlgmr.msrb.gmra.mxu1 %v21094_v10  ;;  %v19106_v44 = vld [vmem:[%s20909_s24 + $0xa2c] sm:$0xf]  ;;  %v13446_v33 = vor.u32 %v18978_v41, %v13443_v56  ;;  %v7745_v21 = vadd.f32 %v7744_v53, %v7732_v6 }
 0x522   : > { %7963 = vmatpush.bf16.msrb.mxu3 %v16258_v63  ;;  %7982 = vmatpush.bf16.msra.mxu1 %v13638_v23  ;;  %v13958_v55 = vor.u32 %v19106_v44, %v13955_v46  ;;  %v12867_v59 = vld [vmem:[%s20909_s24 + $0x1e8] sm:$0xf0]  ;;  %v14470_v63 = vor.u32 %v19234_v47, %v14467_v48 }
 0x523   : > { %7951 = vmatmul.bf16.vlgmr.msrb.gmra.mxu2 %v21086_v4  ;;  %v18962_v60 = vld [vmem:[%s20909_s24 + $0x5ac] sm:$0xf]  ;;  %v22559_v30 = vadd.f32 %v7757_v24, %v7745_v21 }
 0x524   : > { %7995 = vmatpush.bf16.msra.mxu2 %v14150_v19  ;;  %7970 = vmatpush.bf16.msra.mxu0 %v13062_v13  ;;  %v13379_v45 = vld [vmem:[%s20909_s24 + $0x5e8] sm:$0xf0]  ;;  %v7720_v31 = vpop.f32.mrf.mxu0 }
 0x525   : > { %7964 = vmatmul.bf16.vlgmr.msrb.gmra.mxu3 %v21092_v8  ;;  %v19090_v23 = vld [vmem:[%s20909_s24 + $0x9ac] sm:$0xf]  ;;  %v13382_v5 = vor.u32 %v18962_v60, %v13379_v45 }
 0x526   : > { %8008 = vmatpush.bf16.msra.mxu3 %v14662_v2  ;;  %7983 = vmatpush.bf16.msra.mxu1 %v13574_v14  ;;  %v13891_v19 = vld [vmem:[%s20909_s24 + $0x9e8] sm:$0xf0]  ;;  %v12870_v2 = vor.u32 %v18834_v58, %v12867_v59 }
 0x527   : > { %v19218_v0 = vld [vmem:[%s20909_s24 + $0xdac] sm:$0xf]  ;;  %v13894_v26 = vor.u32 %v19090_v23, %v13891_v19  ;;  %v7759_v19 = vpop.f32.mrf.mxu3 }
 0x528   : > { %7996 = vmatpush.bf16.msra.mxu2 %v14086_v16  ;;  %7971 = vmatpush.bf16.msra.mxu0 %v12998_v35  ;;  %v14403_v1 = vld [vmem:[%s20909_s24 + $0xde8] sm:$0xf0] }
 0x529   : > { %v18818_v9 = vld [vmem:[%s20909_s24 + $0x12c] sm:$0xf]  ;;  %v14406_v13 = vor.u32 %v19218_v0, %v14403_v1 }
 0x52a   : > { %8009 = vmatpush.bf16.msra.mxu3 %v14598_v25  ;;  %7984 = vmatpush.bf16.msra.mxu1 %v13510_v42  ;;  %v12803_v11 = vld [vmem:[%s20909_s24 + $0x168] sm:$0xf0] }
 0x52b   : > { %v18946_v12 = vld [vmem:[%s20909_s24 + $0x52c] sm:$0xf]  ;;  %v12806_v28 = vor.u32 %v18818_v9, %v12803_v11 }
 0x52c   : > { %7997 = vmatpush.bf16.msra.mxu2 %v14022_v37  ;;  %7972 = vmatpush.bf16.msra.mxu0 %v12934_v49  ;;  %v13315_v14 = vld [vmem:[%s20909_s24 + $0x568] sm:$0xf0] }
 0x52d   : > { %v19074_v16 = vld [vmem:[%s20909_s24 + $0x92c] sm:$0xf]  ;;  %v13318_v32 = vor.u32 %v18946_v12, %v13315_v14 }
 0x52e   : > { %8010 = vmatpush.bf16.msra.mxu3 %v14534_v43  ;;  %7985 = vmatpush.bf16.msra.mxu1 %v13446_v33  ;;  %v13827_v20 = vld [vmem:[%s20909_s24 + $0x968] sm:$0xf0] }
 0x52f   : > { %v19202_v25 = vld [vmem:[%s20909_s24 + $0xd2c] sm:$0xf]  ;;  %v13830_v35 = vor.u32 %v19074_v16, %v13827_v20 }
 0x530   : > { %7998 = vmatpush.bf16.msra.mxu2 %v13958_v55  ;;  %v14339_v27 = vld [vmem:[%s20909_s24 + $0xd68] sm:$0xf0]  ;;  %7973 = vmatpush.bf16.msra.mxu0 %v12870_v2 }
 0x531   : > { %v18802_v42 = vld [vmem:[%s20909_s24 + $0xac] sm:$0xf]  ;;  %v14342_v41 = vor.u32 %v19202_v25, %v14339_v27 }
 0x532   : > { %8011 = vmatpush.bf16.msra.mxu3 %v14470_v63  ;;  %7986 = vmatpush.bf16.msra.mxu1 %v13382_v5  ;;  %v12739_v37 = vld [vmem:[%s20909_s24 + $0xe8] sm:$0xf0] }
 0x533   : > { %v18930_v39 = vld [vmem:[%s20909_s24 + $0x4ac] sm:$0xf]  ;;  %v12742_v48 = vor.u32 %v18802_v42, %v12739_v37 }
 0x534   : > { %7999 = vmatpush.bf16.msra.mxu2 %v13894_v26  ;;  %v13251_v43 = vld [vmem:[%s20909_s24 + $0x4e8] sm:$0xf0]  ;;  %7974 = vmatpush.bf16.msra.mxu0 %v12806_v28 }
 0x535   : > { %v19058_v56 = vld [vmem:[%s20909_s24 + $0x8ac] sm:$0xf]  ;;  %v13254_v33 = vor.u32 %v18930_v39, %v13251_v43 }
 0x536   : > { %8012 = vmatpush.bf16.msra.mxu3 %v14406_v13  ;;  %v13763_v44 = vld [vmem:[%s20909_s24 + $0x8e8] sm:$0xf0]  ;;  %7987 = vmatpush.bf16.msra.mxu1 %v13318_v32 }
 0x537   : > { %v19186_v46 = vld [vmem:[%s20909_s24 + $0xcac] sm:$0xf]  ;;  %v13766_v55 = vor.u32 %v19058_v56, %v13763_v44 }
 0x538   : > { %v14275_v47 = vld [vmem:[%s20909_s24 + $0xce8] sm:$0xf0]  ;;  %8000 = vmatpush.bf16.msra.mxu2 %v13830_v35  ;;  %7975 = vmatpush.bf16.msra.mxu0 %v12742_v48 }
 0x539   : > { %v18786_v49 = vld [vmem:[%s20909_s24 + $0x2c] sm:$0xf]  ;;  %v14278_v17 = vor.u32 %v19186_v46, %v14275_v47 }
 0x53a   : > { %v12675_v54 = vld [vmem:[%s20909_s24 + $0x68] sm:$0xf0]  ;;  %8013 = vmatpush.bf16.msra.mxu3 %v14342_v41  ;;  %7988 = vmatpush.bf16.msra.mxu1 %v13254_v33 }
 0x53b   : > { %v18914_v58 = vld [vmem:[%s20909_s24 + $0x42c] sm:$0xf]  ;;  %v12678_v2 = vor.u32 %v18786_v49, %v12675_v54 }
 0x53c   : > { %v13187_v59 = vld [vmem:[%s20909_s24 + $0x468] sm:$0xf0]  ;;  %8001 = vmatpush.bf16.msra.mxu2 %v13766_v55 }
 0x53d   : > { %v19042_v60 = vld [vmem:[%s20909_s24 + $0x82c] sm:$0xf]  ;;  %v13190_v11 = vor.u32 %v18914_v58, %v13187_v59  ;;  %7976 = vmatpush.bf16.msra.mxu0 %v12678_v2 }
 0x53e   : > { %v13699_v63 = vld [vmem:[%s20909_s24 + $0x868] sm:$0xf0]  ;;  %8014 = vmatpush.bf16.msra.mxu3 %v14278_v17 }
 0x53f   : > { %v19170_v45 = vld [vmem:[%s20909_s24 + $0xc2c] sm:$0xf]  ;;  %v13702_v12 = vor.u32 %v19042_v60, %v13699_v63  ;;  %7989 = vmatpush.bf16.msra.mxu1 %v13190_v11  ;;  %v1654_v63 = vperm.slane %v22456_v3, 1 }
 0x540   : > { %v14211_v23 = vld [vmem:[%s20909_s24 + $0xc68] sm:$0xf0]  ;;  %7977 = vmatmul.bf16.vlgmr.msra.gmra.mxu0 %v21033_v50 }
 0x541   : > { %v19410_v0 = vld [vmem:[%s20909_s24 + $0x13ac] sm:$0xf]  ;;  %v14214_v14 = vor.u32 %v19170_v45, %v14211_v23  ;;  %8002 = vmatpush.bf16.msra.mxu2 %v13702_v12 }
 0x542   : > { %v15171_v1 = vld [vmem:[%s20909_s24 + $0x13e8] sm:$0xf0]  ;;  %7990 = vmatmul.bf16.vlgmr.msra.gmra.mxu1 %v21036_v51 }
 0x543   : > { %v19538_v6 = vld [vmem:[%s20909_s24 + $0x17ac] sm:$0xf]  ;;  %v15174_v16 = vor.u32 %v19410_v0, %v15171_v1  ;;  %8015 = vmatpush.bf16.msra.mxu3 %v14214_v14 }
 0x544   : > { %v15683_v5 = vld [vmem:[%s20909_s24 + $0x17e8] sm:$0xf0]  ;;  %8003 = vmatmul.bf16.vlgmr.msra.gmra.mxu2 %v21020_v34 }
 0x545   : > { %v19666_v26 = vld [vmem:[%s20909_s24 + $0x1bac] sm:$0xf]  ;;  %v15686_v20 = vor.u32 %v19538_v6, %v15683_v5  ;;  %8021 = vmatpush.bf16.msrb.mxu0 %v15174_v16  ;;  %v7770_v5 = vpop.f32.mrf.mxu0 }
 0x546   : > { %v16195_v9 = vld [vmem:[%s20909_s24 + $0x1be8] sm:$0xf0]  ;;  %8016 = vmatmul.bf16.vlgmr.msra.gmra.mxu3 %v21022_v36 }
 0x547   : > { %v19794_v53 = vld [vmem:[%s20909_s24 + $0x1fac] sm:$0xf]  ;;  %v16198_v21 = vor.u32 %v19666_v26, %v16195_v9  ;;  %8034 = vmatpush.bf16.msrb.mxu1 %v15686_v20 }
 0x548   : > { %v16707_v13 = vld [vmem:[%s20909_s24 + $0x1fe8] sm:$0xf0] }
 0x549   : > { %v19394_v24 = vld [vmem:[%s20909_s24 + $0x132c] sm:$0xf]  ;;  %v16710_v28 = vor.u32 %v19794_v53, %v16707_v13  ;;  %8047 = vmatpush.bf16.msrb.mxu2 %v16198_v21  ;;  %v7771_v53 = vadd.f32 %v7770_v5, %v1654_v63  ;;  %v7783_v13 = vpop.f32.mrf.mxu1 }
 0x54a   : > { %v15107_v25 = vld [vmem:[%s20909_s24 + $0x1368] sm:$0xf0] }
 0x54b   : > { %v19522_v27 = vld [vmem:[%s20909_s24 + $0x172c] sm:$0xf]  ;;  %v15110_v39 = vor.u32 %v19394_v24, %v15107_v25  ;;  %8060 = vmatpush.bf16.msrb.mxu3 %v16710_v28 }
 0x54c   : > { %v15619_v31 = vld [vmem:[%s20909_s24 + $0x1768] sm:$0xf0] }
 0x54d   : > { %v19650_v32 = vld [vmem:[%s20909_s24 + $0x1b2c] sm:$0xf]  ;;  %v15622_v40 = vor.u32 %v19522_v27, %v15619_v31  ;;  %8022 = vmatpush.bf16.msrb.mxu0 %v15110_v39  ;;  %v7784_v27 = vadd.f32 %v7783_v13, %v7771_v53  ;;  %v7796_v39 = vpop.f32.mrf.mxu2 }
 0x54e   : > { %v16131_v35 = vld [vmem:[%s20909_s24 + $0x1b68] sm:$0xf0] }
 0x54f   : > { %v19778_v42 = vld [vmem:[%s20909_s24 + $0x1f2c] sm:$0xf]  ;;  %v16134_v41 = vor.u32 %v19650_v32, %v16131_v35  ;;  %8035 = vmatpush.bf16.msrb.mxu1 %v15622_v40 }
 0x550   : > { %v16643_v37 = vld [vmem:[%s20909_s24 + $0x1f68] sm:$0xf0] }
 0x551   : > { %v19378_v43 = vld [vmem:[%s20909_s24 + $0x12ac] sm:$0xf]  ;;  %v16646_v46 = vor.u32 %v19778_v42, %v16643_v37  ;;  %8048 = vmatpush.bf16.msrb.mxu2 %v16134_v41 }
 0x552   : > { %v15043_v56 = vld [vmem:[%s20909_s24 + $0x12e8] sm:$0xf0] }
 0x553   : > { %v19506_v44 = vld [vmem:[%s20909_s24 + $0x16ac] sm:$0xf]  ;;  %v15046_v55 = vor.u32 %v19378_v43, %v15043_v56  ;;  %8061 = vmatpush.bf16.msrb.mxu3 %v16646_v46  ;;  %v7809_v46 = vpop.f32.mrf.mxu3 }
 0x554   : > { %v15555_v47 = vld [vmem:[%s20909_s24 + $0x16e8] sm:$0xf0] }
 0x555   : > { %v19634_v48 = vld [vmem:[%s20909_s24 + $0x1aac] sm:$0xf]  ;;  %v15558_v59 = vor.u32 %v19506_v44, %v15555_v47  ;;  %8023 = vmatpush.bf16.msrb.mxu0 %v15046_v55  ;;  %v7797_v44 = vadd.f32 %v7796_v39, %v7784_v27  ;;  %v7798_v53 = vpop.f32.mrf.mxu2  ;;  %v13641_v27 = vld [vmem:[%s20909_s24 + $0x7b0] sm:$0xf] }
 0x556   : > { %v16067_v49 = vld [vmem:[%s20909_s24 + $0x1ae8] sm:$0xf0]  ;;  %v14665_v39 = vld [vmem:[%s20909_s24 + $0xfb0] sm:$0xf] }
 0x557   : > { %v19762_v54 = vld [vmem:[%s20909_s24 + $0x1eac] sm:$0xf]  ;;  %v16070_v60 = vor.u32 %v19634_v48, %v16067_v49  ;;  %8036 = vmatpush.bf16.msrb.mxu1 %v15558_v59  ;;  %v18859_v53 = vld [vmem:[%s20909_s24 + $0x26c] sm:$0xf0] }
 0x558   : > { %v16579_v33 = vld [vmem:[%s20909_s24 + $0x1ee8] sm:$0xf0] }
 0x559   : > { %v19362_v58 = vld [vmem:[%s20909_s24 + $0x122c] sm:$0xf]  ;;  %v16582_v45 = vor.u32 %v19762_v54, %v16579_v33  ;;  %8049 = vmatpush.bf16.msrb.mxu2 %v16070_v60  ;;  %v22630_v54 = vadd.f32 %v7809_v46, %v7797_v44  ;;  %v7772_v33 = vpop.f32.mrf.mxu0  ;;  %v13065_v46 = vld [vmem:[%s20909_s24 + $0x330] sm:$0xf] }
 0x55a   : > { %v14979_v61 = vld [vmem:[%s20909_s24 + $0x1268] sm:$0xf0]  ;;  %v19019_v33 = vld [vmem:[%s20909_s24 + $0x76c] sm:$0xf0] }
 0x55b   : > { %v19490_v17 = vld [vmem:[%s20909_s24 + $0x162c] sm:$0xf]  ;;  %v14982_v2 = vor.u32 %v19362_v58, %v14979_v61  ;;  %8062 = vmatpush.bf16.msrb.mxu3 %v16582_v45 }
 0x55c   : > { %v15491_v23 = vld [vmem:[%s20909_s24 + $0x1668] sm:$0xf0] }
 0x55d   : > { %v19618_v19 = vld [vmem:[%s20909_s24 + $0x1a2c] sm:$0xf]  ;;  %v15494_v3 = vor.u32 %v19490_v17, %v15491_v23  ;;  %8024 = vmatpush.bf16.msrb.mxu0 %v14982_v2  ;;  %v7785_v17 = vpop.f32.mrf.mxu1 }
 0x55e   : > { %v16003_v0 = vld [vmem:[%s20909_s24 + $0x1a68] sm:$0xf0] }
 0x55f   : > { %v19746_v1 = vld [vmem:[%s20909_s24 + $0x1e2c] sm:$0xf]  ;;  %v16006_v26 = vor.u32 %v19618_v19, %v16003_v0  ;;  %8037 = vmatpush.bf16.msrb.mxu1 %v15494_v3 }
 0x560   : > { %v16515_v6 = vld [vmem:[%s20909_s24 + $0x1e68] sm:$0xf0] }
 0x561   : > { %v19346_v9 = vld [vmem:[%s20909_s24 + $0x11ac] sm:$0xf]  ;;  %v16518_v14 = vor.u32 %v19746_v1, %v16515_v6  ;;  %8050 = vmatpush.bf16.msrb.mxu2 %v16006_v26 }
 0x562   : > { %v14915_v11 = vld [vmem:[%s20909_s24 + $0x11e8] sm:$0xf0] }
 0x563   : > { %v19474_v12 = vld [vmem:[%s20909_s24 + $0x15ac] sm:$0xf]  ;;  %v14918_v28 = vor.u32 %v19346_v9, %v14915_v11  ;;  %8063 = vmatpush.bf16.msrb.mxu3 %v16518_v14 }
 0x564   : > { %v15427_v16 = vld [vmem:[%s20909_s24 + $0x15e8] sm:$0xf0] }
 0x565   : > { %v19602_v20 = vld [vmem:[%s20909_s24 + $0x19ac] sm:$0xf]  ;;  %v15430_v31 = vor.u32 %v19474_v12, %v15427_v16  ;;  %8025 = vmatpush.bf16.msrb.mxu0 %v14918_v28 }
 0x566   : > { %v15939_v21 = vld [vmem:[%s20909_s24 + $0x19e8] sm:$0xf0] }
 0x567   : > { %v19730_v24 = vld [vmem:[%s20909_s24 + $0x1dac] sm:$0xf]  ;;  %v15942_v32 = vor.u32 %v19602_v20, %v15939_v21  ;;  %8038 = vmatpush.bf16.msrb.mxu1 %v15430_v31  ;;  %v7811_v21 = vpop.f32.mrf.mxu3  ;;  %v19035_v31 = vld [vmem:[%s20909_s24 + $0x7ec] sm:$0xf0] }
 0x568   : > { %v16451_v25 = vld [vmem:[%s20909_s24 + $0x1de8] sm:$0xf0]  ;;  %v19115_v21 = vld [vmem:[%s20909_s24 + $0xa6c] sm:$0xf0] }
 0x569   : > { %v19330_v35 = vld [vmem:[%s20909_s24 + $0x112c] sm:$0xf]  ;;  %v16454_v40 = vor.u32 %v19730_v24, %v16451_v25  ;;  %8051 = vmatpush.bf16.msrb.mxu2 %v15942_v32  ;;  %v13129_v24 = vld [vmem:[%s20909_s24 + $0x3b0] sm:$0xf] }
 0x56a   : > { %v14851_v42 = vld [vmem:[%s20909_s24 + $0x1168] sm:$0xf0]  ;;  %v18907_v25 = vld [vmem:[%s20909_s24 + $0x3ec] sm:$0xf0] }
 0x56b   : > { %v19458_v37 = vld [vmem:[%s20909_s24 + $0x152c] sm:$0xf]  ;;  %v14854_v49 = vor.u32 %v19330_v35, %v14851_v42  ;;  %8064 = vmatpush.bf16.msrb.mxu3 %v16454_v40  ;;  %v14153_v32 = vld [vmem:[%s20909_s24 + $0xbb0] sm:$0xf] }
 0x56c   : > { %v15363_v41 = vld [vmem:[%s20909_s24 + $0x1568] sm:$0xf0]  ;;  %v19163_v35 = vld [vmem:[%s20909_s24 + $0xbec] sm:$0xf0] }
 0x56d   : > { %v19586_v43 = vld [vmem:[%s20909_s24 + $0x192c] sm:$0xf]  ;;  %v15366_v55 = vor.u32 %v19458_v37, %v15363_v41  ;;  %8026 = vmatpush.bf16.msrb.mxu0 %v14854_v49  ;;  %v19291_v40 = vld [vmem:[%s20909_s24 + $0xfec] sm:$0xf0]  ;;  %v14154_v44 = vor.u32 %v19163_v35, %v14153_v32 }
 0x56e   : > { %v15875_v56 = vld [vmem:[%s20909_s24 + $0x1968] sm:$0xf0]  ;;  %v14666_v49 = vor.u32 %v19291_v40, %v14665_v39  ;;  %v12873_v35 = vld [vmem:[%s20909_s24 + $0x1b0] sm:$0xf]  ;;  %v7835_v40 = vpop.f32.mrf.mxu1 }
 0x56f   : > { %v19714_v47 = vld [vmem:[%s20909_s24 + $0x1d2c] sm:$0xf]  ;;  %v15878_v58 = vor.u32 %v19586_v43, %v15875_v56  ;;  %8039 = vmatpush.bf16.msrb.mxu1 %v15366_v55  ;;  %v13130_v43 = vor.u32 %v18907_v25, %v13129_v24  ;;  %v13642_v56 = vor.u32 %v19035_v31, %v13641_v27  ;;  %v14089_v55 = vld [vmem:[%s20909_s24 + $0xb30] sm:$0xf] }
 0x570   : > { %v16387_v48 = vld [vmem:[%s20909_s24 + $0x1d68] sm:$0xf0]  ;;  %v14473_v24 = vld [vmem:[%s20909_s24 + $0xe30] sm:$0xf] }
 0x571   : > { %v19314_v59 = vld [vmem:[%s20909_s24 + $0x10ac] sm:$0xf]  ;;  %v16390_v63 = vor.u32 %v19714_v47, %v16387_v48  ;;  %8052 = vmatpush.bf16.msrb.mxu2 %v15878_v58  ;;  %v18891_v47 = vld [vmem:[%s20909_s24 + $0x36c] sm:$0xf0] }
 0x572   : > { %v14787_v60 = vld [vmem:[%s20909_s24 + $0x10e8] sm:$0xf0]  ;;  %v13577_v48 = vld [vmem:[%s20909_s24 + $0x730] sm:$0xf] }
 0x573   : > { %v19442_v61 = vld [vmem:[%s20909_s24 + $0x14ac] sm:$0xf]  ;;  %v14790_v6 = vor.u32 %v19314_v59, %v14787_v60  ;;  %8065 = vmatpush.bf16.msrb.mxu3 %v16390_v63  ;;  %v19147_v58 = vld [vmem:[%s20909_s24 + $0xb6c] sm:$0xf0]  ;;  %v13578_v17 = vor.u32 %v19019_v33, %v13577_v48 }
 0x574   : > { %v15299_v45 = vld [vmem:[%s20909_s24 + $0x14e8] sm:$0xf0]  ;;  %v14601_v59 = vld [vmem:[%s20909_s24 + $0xf30] sm:$0xf]  ;;  %v14090_v63 = vor.u32 %v19147_v58, %v14089_v55 }
 0x575   : > { %v19570_v23 = vld [vmem:[%s20909_s24 + $0x18ac] sm:$0xf]  ;;  %v15302_v3 = vor.u32 %v19442_v61, %v15299_v45  ;;  %8027 = vmatpush.bf16.msrb.mxu0 %v14790_v6  ;;  %v19275_v60 = vld [vmem:[%s20909_s24 + $0xf6c] sm:$0xf0]  ;;  %v13066_v61 = vor.u32 %v18891_v47, %v13065_v46 }
 0x576   : > { %v15811_v19 = vld [vmem:[%s20909_s24 + $0x18e8] sm:$0xf0]  ;;  %v13001_v45 = vld [vmem:[%s20909_s24 + $0x2b0] sm:$0xf] }
 0x577   : > { %v19698_v0 = vld [vmem:[%s20909_s24 + $0x1cac] sm:$0xf]  ;;  %v15814_v26 = vor.u32 %v19570_v23, %v15811_v19  ;;  %8040 = vmatpush.bf16.msrb.mxu1 %v15302_v3  ;;  %v18875_v23 = vld [vmem:[%s20909_s24 + $0x2ec] sm:$0xf0] }
 0x578   : > { %v16323_v1 = vld [vmem:[%s20909_s24 + $0x1ce8] sm:$0xf0]  ;;  %v13513_v19 = vld [vmem:[%s20909_s24 + $0x6b0] sm:$0xf] }
 0x579   : > { %v19298_v2 = vld [vmem:[%s20909_s24 + $0x102c] sm:$0xf]  ;;  %v16326_v13 = vor.u32 %v19698_v0, %v16323_v1  ;;  %8053 = vmatpush.bf16.msrb.mxu2 %v15814_v26  ;;  %v14602_v0 = vor.u32 %v19275_v60, %v14601_v59  ;;  %v19003_v1 = vld [vmem:[%s20909_s24 + $0x6ec] sm:$0xf0]  ;;  %v13002_v26 = vor.u32 %v18875_v23, %v13001_v45  ;;  %v7848_v60 = vpop.f32.mrf.mxu2 }
 0x57a   : > { %v14723_v5 = vld [vmem:[%s20909_s24 + $0x1068] sm:$0xf0]  ;;  %v14025_v6 = vld [vmem:[%s20909_s24 + $0xab0] sm:$0xf] }
 0x57b   : > { %v19426_v9 = vld [vmem:[%s20909_s24 + $0x142c] sm:$0xf]  ;;  %v14726_v28 = vor.u32 %v19298_v2, %v14723_v5  ;;  %8066 = vmatpush.bf16.msrb.mxu3 %v16326_v13  ;;  %v19131_v2 = vld [vmem:[%s20909_s24 + $0xaec] sm:$0xf0] }
 0x57c   : > { %v15235_v11 = vld [vmem:[%s20909_s24 + $0x1468] sm:$0xf0]  ;;  %v14537_v5 = vld [vmem:[%s20909_s24 + $0xeb0] sm:$0xf] }
 0x57d   : > { %v19554_v12 = vld [vmem:[%s20909_s24 + $0x182c] sm:$0xf]  ;;  %v15238_v42 = vor.u32 %v19426_v9, %v15235_v11  ;;  %8028 = vmatpush.bf16.msrb.mxu0 %v14726_v28  ;;  %v19259_v3 = vld [vmem:[%s20909_s24 + $0xeec] sm:$0xf0]  ;;  %v13514_v9 = vor.u32 %v19003_v1, %v13513_v19  ;;  %v14026_v11 = vor.u32 %v19131_v2, %v14025_v6  ;;  %v7822_v28 = vpop.f32.mrf.mxu0  ;;  %v7861_v19 = vpop.f32.mrf.mxu3 }
 0x57e   : > { %v15747_v14 = vld [vmem:[%s20909_s24 + $0x1868] sm:$0xf0]  ;;  %v13449_v13 = vld [vmem:[%s20909_s24 + $0x630] sm:$0xf]  ;;  %v7823_v39 = vadd.f32 %v7822_v28, %v22630_v54 }
 0x57f   : > { %v19682_v16 = vld [vmem:[%s20909_s24 + $0x1c2c] sm:$0xf]  ;;  %v15750_v37 = vor.u32 %v19554_v12, %v15747_v14  ;;  %8041 = vmatpush.bf16.msrb.mxu1 %v15238_v42  ;;  %v12937_v12 = vld [vmem:[%s20909_s24 + $0x230] sm:$0xf]  ;;  %v14538_v14 = vor.u32 %v19259_v3, %v14537_v5 }
 0x580   : > { %v16259_v20 = vld [vmem:[%s20909_s24 + $0x1c68] sm:$0xf0]  ;;  %8029 = vmatmul.bf16.vlgmr.msrb.gmra.mxu0 %v21090_v7  ;;  %v19243_v25 = vld [vmem:[%s20909_s24 + $0xe6c] sm:$0xf0]  ;;  %v12938_v27 = vor.u32 %v18859_v53, %v12937_v12  ;;  %v7836_v48 = vadd.f32 %v7835_v40, %v7823_v39  ;;  %v7837_v53 = vpop.f32.mrf.mxu1 }
 0x581   : > { %v16262_v41 = vor.u32 %v19682_v16, %v16259_v20  ;;  %8054 = vmatpush.bf16.msrb.mxu2 %v15750_v37  ;;  %8073 = vmatpush.bf16.msra.mxu0 %v13130_v43  ;;  %v18987_v16 = vld [vmem:[%s20909_s24 + $0x66c] sm:$0xf0]  ;;  %v7850_v39 = vpop.f32.mrf.mxu2 }
 0x582   : > { %8042 = vmatmul.bf16.vlgmr.msrb.gmra.mxu1 %v21094_v10  ;;  %v13961_v20 = vld [vmem:[%s20909_s24 + $0xa30] sm:$0xf]  ;;  %v13450_v31 = vor.u32 %v18987_v16, %v13449_v13  ;;  %v7849_v23 = vadd.f32 %v7848_v60, %v7836_v48 }
 0x583   : > { %8067 = vmatpush.bf16.msrb.mxu3 %v16262_v41  ;;  %8086 = vmatpush.bf16.msra.mxu1 %v13642_v56  ;;  %v13962_v32 = vor.u32 %v19115_v21, %v13961_v20  ;;  %v18843_v42 = vld [vmem:[%s20909_s24 + $0x1ec] sm:$0xf0]  ;;  %v14474_v41 = vor.u32 %v19243_v25, %v14473_v24 }
 0x584   : > { %8055 = vmatmul.bf16.vlgmr.msrb.gmra.mxu2 %v21086_v4  ;;  %v13385_v37 = vld [vmem:[%s20909_s24 + $0x5b0] sm:$0xf]  ;;  %v22701_v2 = vadd.f32 %v7861_v19, %v7849_v23 }
 0x585   : > { %8099 = vmatpush.bf16.msra.mxu2 %v14154_v44  ;;  %8074 = vmatpush.bf16.msra.mxu0 %v13066_v61  ;;  %v18971_v43 = vld [vmem:[%s20909_s24 + $0x5ec] sm:$0xf0]  ;;  %v7824_v5 = vpop.f32.mrf.mxu0 }
 0x586   : > { %8068 = vmatmul.bf16.vlgmr.msrb.gmra.mxu3 %v21092_v8  ;;  %v13897_v56 = vld [vmem:[%s20909_s24 + $0x9b0] sm:$0xf]  ;;  %v13386_v54 = vor.u32 %v18971_v43, %v13385_v37 }
 0x587   : > { %8112 = vmatpush.bf16.msra.mxu3 %v14666_v49  ;;  %8087 = vmatpush.bf16.msra.mxu1 %v13578_v17  ;;  %v19099_v44 = vld [vmem:[%s20909_s24 + $0x9ec] sm:$0xf0]  ;;  %v12874_v49 = vor.u32 %v18843_v42, %v12873_v35 }
 0x588   : > { %v14409_v46 = vld [vmem:[%s20909_s24 + $0xdb0] sm:$0xf]  ;;  %v13898_v33 = vor.u32 %v19099_v44, %v13897_v56  ;;  %v7863_v44 = vpop.f32.mrf.mxu3 }
 0x589   : > { %8100 = vmatpush.bf16.msra.mxu2 %v14090_v63  ;;  %8075 = vmatpush.bf16.msra.mxu0 %v13002_v26  ;;  %v19227_v47 = vld [vmem:[%s20909_s24 + $0xdec] sm:$0xf0] }
 0x58a   : > { %v12809_v55 = vld [vmem:[%s20909_s24 + $0x130] sm:$0xf]  ;;  %v14410_v61 = vor.u32 %v19227_v47, %v14409_v46 }
 0x58b   : > { %8113 = vmatpush.bf16.msra.mxu3 %v14602_v0  ;;  %8088 = vmatpush.bf16.msra.mxu1 %v13514_v9  ;;  %v18827_v58 = vld [vmem:[%s20909_s24 + $0x16c] sm:$0xf0] }
 0x58c   : > { %v13321_v59 = vld [vmem:[%s20909_s24 + $0x530] sm:$0xf]  ;;  %v12810_v6 = vor.u32 %v18827_v58, %v12809_v55 }
 0x58d   : > { %8101 = vmatpush.bf16.msra.mxu2 %v14026_v11  ;;  %8076 = vmatpush.bf16.msra.mxu0 %v12938_v27  ;;  %v18955_v17 = vld [vmem:[%s20909_s24 + $0x56c] sm:$0xf0] }
 0x58e   : > { %v13833_v63 = vld [vmem:[%s20909_s24 + $0x930] sm:$0xf]  ;;  %v13322_v3 = vor.u32 %v18955_v17, %v13321_v59 }
 0x58f   : > { %8114 = vmatpush.bf16.msra.mxu3 %v14538_v14  ;;  %8089 = vmatpush.bf16.msra.mxu1 %v13450_v31  ;;  %v19083_v45 = vld [vmem:[%s20909_s24 + $0x96c] sm:$0xf0] }
 0x590   : > { %v14345_v0 = vld [vmem:[%s20909_s24 + $0xd30] sm:$0xf]  ;;  %v13834_v26 = vor.u32 %v19083_v45, %v13833_v63 }
 0x591   : > { %8102 = vmatpush.bf16.msra.mxu2 %v13962_v32  ;;  %v19211_v1 = vld [vmem:[%s20909_s24 + $0xd6c] sm:$0xf0]  ;;  %8077 = vmatpush.bf16.msra.mxu0 %v12874_v49 }
 0x592   : > { %v12745_v9 = vld [vmem:[%s20909_s24 + $0xb0] sm:$0xf]  ;;  %v14346_v13 = vor.u32 %v19211_v1, %v14345_v0 }
 0x593   : > { %8115 = vmatpush.bf16.msra.mxu3 %v14474_v41  ;;  %8090 = vmatpush.bf16.msra.mxu1 %v13386_v54  ;;  %v18811_v11 = vld [vmem:[%s20909_s24 + $0xec] sm:$0xf0] }
 0x594   : > { %v13257_v12 = vld [vmem:[%s20909_s24 + $0x4b0] sm:$0xf]  ;;  %v12746_v25 = vor.u32 %v18811_v11, %v12745_v9 }
 0x595   : > { %8103 = vmatpush.bf16.msra.mxu2 %v13898_v33  ;;  %v18939_v14 = vld [vmem:[%s20909_s24 + $0x4ec] sm:$0xf0]  ;;  %8078 = vmatpush.bf16.msra.mxu0 %v12810_v6 }
 0x596   : > { %v13769_v16 = vld [vmem:[%s20909_s24 + $0x8b0] sm:$0xf]  ;;  %v13258_v31 = vor.u32 %v18939_v14, %v13257_v12 }
 0x597   : > { %8116 = vmatpush.bf16.msra.mxu3 %v14410_v61  ;;  %v19067_v20 = vld [vmem:[%s20909_s24 + $0x8ec] sm:$0xf0]  ;;  %8091 = vmatpush.bf16.msra.mxu1 %v13322_v3 }
 0x598   : > { %v14281_v21 = vld [vmem:[%s20909_s24 + $0xcb0] sm:$0xf]  ;;  %v13770_v32 = vor.u32 %v19067_v20, %v13769_v16 }
 0x599   : > { %v19195_v24 = vld [vmem:[%s20909_s24 + $0xcec] sm:$0xf0]  ;;  %8104 = vmatpush.bf16.msra.mxu2 %v13834_v26  ;;  %8079 = vmatpush.bf16.msra.mxu0 %v12746_v25 }
 0x59a   : > { %v12681_v27 = vld [vmem:[%s20909_s24 + $0x30] sm:$0xf]  ;;  %v14282_v40 = vor.u32 %v19195_v24, %v14281_v21 }
 0x59b   : > { %v18795_v28 = vld [vmem:[%s20909_s24 + $0x6c] sm:$0xf0]  ;;  %8117 = vmatpush.bf16.msra.mxu3 %v14346_v13  ;;  %8092 = vmatpush.bf16.msra.mxu1 %v13258_v31 }
 0x59c   : > { %v13193_v35 = vld [vmem:[%s20909_s24 + $0x430] sm:$0xf]  ;;  %v12682_v49 = vor.u32 %v18795_v28, %v12681_v27 }
 0x59d   : > { %v18923_v42 = vld [vmem:[%s20909_s24 + $0x46c] sm:$0xf0]  ;;  %8105 = vmatpush.bf16.msra.mxu2 %v13770_v32 }
 0x59e   : > { %v13705_v37 = vld [vmem:[%s20909_s24 + $0x830] sm:$0xf]  ;;  %v13194_v58 = vor.u32 %v18923_v42, %v13193_v35  ;;  %8080 = vmatpush.bf16.msra.mxu0 %v12682_v49 }
 0x59f   : > { %v19051_v41 = vld [vmem:[%s20909_s24 + $0x86c] sm:$0xf0]  ;;  %8118 = vmatpush.bf16.msra.mxu3 %v14282_v40 }
 0x5a0   : > { %v14217_v43 = vld [vmem:[%s20909_s24 + $0xc30] sm:$0xf]  ;;  %v13706_v59 = vor.u32 %v19051_v41, %v13705_v37  ;;  %8093 = vmatpush.bf16.msra.mxu1 %v13194_v58  ;;  %v22751_v41 = vld [vmem:[%s20915_s17 + $0x8] sm:$0xff] }
 0x5a1   : > { %v19179_v56 = vld [vmem:[%s20909_s24 + $0xc6c] sm:$0xf0]  ;;  %8081 = vmatmul.bf16.vlgmr.msra.gmra.mxu0 %v21033_v50 }
 0x5a2   : > { %v15177_v46 = vld [vmem:[%s20909_s24 + $0x13b0] sm:$0xf]  ;;  %v14218_v17 = vor.u32 %v19179_v56, %v14217_v43  ;;  %8106 = vmatpush.bf16.msra.mxu2 %v13706_v59  ;;  %v1655_v43 = vperm.slane %v22751_v41, 2 }
 0x5a3   : > { %v19419_v47 = vld [vmem:[%s20909_s24 + $0x13ec] sm:$0xf0]  ;;  %8094 = vmatmul.bf16.vlgmr.msra.gmra.mxu1 %v21036_v51 }
 0x5a4   : > { %v15689_v48 = vld [vmem:[%s20909_s24 + $0x17b0] sm:$0xf]  ;;  %v15178_v63 = vor.u32 %v19419_v47, %v15177_v46  ;;  %8119 = vmatpush.bf16.msra.mxu3 %v14218_v17 }
 0x5a5   : > { %v19547_v54 = vld [vmem:[%s20909_s24 + $0x17ec] sm:$0xf0]  ;;  %8107 = vmatmul.bf16.vlgmr.msra.gmra.mxu2 %v21020_v34 }
 0x5a6   : > { %v16201_v33 = vld [vmem:[%s20909_s24 + $0x1bb0] sm:$0xf]  ;;  %v15690_v45 = vor.u32 %v19547_v54, %v15689_v48  ;;  %8125 = vmatpush.bf16.msrb.mxu0 %v15178_v63  ;;  %v7887_v63 = vpop.f32.mrf.mxu1 }
 0x5a7   : > { %v19675_v55 = vld [vmem:[%s20909_s24 + $0x1bec] sm:$0xf0]  ;;  %8120 = vmatmul.bf16.vlgmr.msra.gmra.mxu3 %v21022_v36 }
 0x5a8   : > { %v16713_v60 = vld [vmem:[%s20909_s24 + $0x1fb0] sm:$0xf]  ;;  %v16202_v23 = vor.u32 %v19675_v55, %v16201_v33  ;;  %8138 = vmatpush.bf16.msrb.mxu1 %v15690_v45  ;;  %v7874_v33 = vpop.f32.mrf.mxu0 }
 0x5a9   : > { %v19803_v61 = vld [vmem:[%s20909_s24 + $0x1fec] sm:$0xf0]  ;;  %v7875_v17 = vadd.f32 %v7874_v33, %v1655_v43 }
 0x5aa   : > { %v15113_v19 = vld [vmem:[%s20909_s24 + $0x1330] sm:$0xf]  ;;  %v16714_v6 = vor.u32 %v19803_v61, %v16713_v60  ;;  %8151 = vmatpush.bf16.msrb.mxu2 %v16202_v23 }
 0x5ab   : > { %v19403_v0 = vld [vmem:[%s20909_s24 + $0x136c] sm:$0xf0] }
 0x5ac   : > { %v15625_v1 = vld [vmem:[%s20909_s24 + $0x1730] sm:$0xf]  ;;  %v15114_v12 = vor.u32 %v19403_v0, %v15113_v19  ;;  %8164 = vmatpush.bf16.msrb.mxu3 %v16714_v6 }
 0x5ad   : > { %v19531_v5 = vld [vmem:[%s20909_s24 + $0x176c] sm:$0xf0] }
 0x5ae   : > { %v16137_v3 = vld [vmem:[%s20909_s24 + $0x1b30] sm:$0xf]  ;;  %v15626_v53 = vor.u32 %v19531_v5, %v15625_v1  ;;  %8126 = vmatpush.bf16.msrb.mxu0 %v15114_v12  ;;  %v7888_v5 = vadd.f32 %v7887_v63, %v7875_v17 }
 0x5af   : > { %v19659_v26 = vld [vmem:[%s20909_s24 + $0x1b6c] sm:$0xf0] }
 0x5b0   : > { %v16649_v9 = vld [vmem:[%s20909_s24 + $0x1f30] sm:$0xf]  ;;  %v16138_v13 = vor.u32 %v19659_v26, %v16137_v3  ;;  %8139 = vmatpush.bf16.msrb.mxu1 %v15626_v53 }
 0x5b1   : > { %v19787_v11 = vld [vmem:[%s20909_s24 + $0x1f6c] sm:$0xf0] }
 0x5b2   : > { %v15049_v14 = vld [vmem:[%s20909_s24 + $0x12b0] sm:$0xf]  ;;  %v16650_v21 = vor.u32 %v19787_v11, %v16649_v9  ;;  %8152 = vmatpush.bf16.msrb.mxu2 %v16138_v13  ;;  %v7900_v13 = vpop.f32.mrf.mxu2 }
 0x5b3   : > { %v19387_v16 = vld [vmem:[%s20909_s24 + $0x12ec] sm:$0xf0] }
 0x5b4   : > { %v15561_v20 = vld [vmem:[%s20909_s24 + $0x16b0] sm:$0xf]  ;;  %v15050_v32 = vor.u32 %v19387_v16, %v15049_v14  ;;  %8165 = vmatpush.bf16.msrb.mxu3 %v16650_v21 }
 0x5b5   : > { %v19515_v24 = vld [vmem:[%s20909_s24 + $0x16ec] sm:$0xf0] }
 0x5b6   : > { %v16073_v25 = vld [vmem:[%s20909_s24 + $0x1ab0] sm:$0xf]  ;;  %v15562_v42 = vor.u32 %v19515_v24, %v15561_v20  ;;  %8127 = vmatpush.bf16.msrb.mxu0 %v15050_v32  ;;  %v7901_v24 = vadd.f32 %v7900_v13, %v7888_v5  ;;  %v18899_v5 = vld [vmem:[%s20909_s24 + $0x3b4] sm:$0xf] }
 0x5b7   : > { %v19643_v27 = vld [vmem:[%s20909_s24 + $0x1aec] sm:$0xf0] }
 0x5b8   : > { %v16585_v28 = vld [vmem:[%s20909_s24 + $0x1eb0] sm:$0xf]  ;;  %v16074_v37 = vor.u32 %v19643_v27, %v16073_v25  ;;  %8140 = vmatpush.bf16.msrb.mxu1 %v15562_v42  ;;  %v7913_v25 = vpop.f32.mrf.mxu3 }
 0x5b9   : > { %v19771_v31 = vld [vmem:[%s20909_s24 + $0x1eec] sm:$0xf0]  ;;  %v22775_v32 = vadd.f32 %v7913_v25, %v7901_v24 }
 0x5ba   : > { %v14985_v35 = vld [vmem:[%s20909_s24 + $0x1230] sm:$0xf]  ;;  %v16586_v56 = vor.u32 %v19771_v31, %v16585_v28  ;;  %8153 = vmatpush.bf16.msrb.mxu2 %v16074_v37 }
 0x5bb   : > { %v19371_v39 = vld [vmem:[%s20909_s24 + $0x126c] sm:$0xf0] }
 0x5bc   : > { %v15497_v40 = vld [vmem:[%s20909_s24 + $0x1630] sm:$0xf]  ;;  %v14986_v54 = vor.u32 %v19371_v39, %v14985_v35  ;;  %8166 = vmatpush.bf16.msrb.mxu3 %v16586_v56  ;;  %v7876_v35 = vpop.f32.mrf.mxu0  ;;  %v7889_v56 = vpop.f32.mrf.mxu1 }
 0x5bd   : > { %v19499_v44 = vld [vmem:[%s20909_s24 + $0x166c] sm:$0xf0]  ;;  %v19011_v35 = vld [vmem:[%s20909_s24 + $0x734] sm:$0xf] }
 0x5be   : > { %v16009_v46 = vld [vmem:[%s20909_s24 + $0x1a30] sm:$0xf]  ;;  %v15498_v55 = vor.u32 %v19499_v44, %v15497_v40  ;;  %8128 = vmatpush.bf16.msrb.mxu0 %v14986_v54  ;;  %v14603_v56 = vld [vmem:[%s20909_s24 + $0xf70] sm:$0xf0] }
 0x5bf   : > { %v19627_v47 = vld [vmem:[%s20909_s24 + $0x1a6c] sm:$0xf0] }
 0x5c0   : > { %v16521_v48 = vld [vmem:[%s20909_s24 + $0x1e30] sm:$0xf]  ;;  %v16010_v58 = vor.u32 %v19627_v47, %v16009_v46  ;;  %8141 = vmatpush.bf16.msrb.mxu1 %v15498_v55 }
 0x5c1   : > { %v19755_v49 = vld [vmem:[%s20909_s24 + $0x1e6c] sm:$0xf0] }
 0x5c2   : > { %v14921_v59 = vld [vmem:[%s20909_s24 + $0x11b0] sm:$0xf]  ;;  %v16522_v45 = vor.u32 %v19755_v49, %v16521_v48  ;;  %8154 = vmatpush.bf16.msrb.mxu2 %v16010_v58 }
 0x5c3   : > { %v19355_v60 = vld [vmem:[%s20909_s24 + $0x11ec] sm:$0xf0] }
 0x5c4   : > { %v15433_v61 = vld [vmem:[%s20909_s24 + $0x15b0] sm:$0xf]  ;;  %v14922_v3 = vor.u32 %v19355_v60, %v14921_v59  ;;  %8167 = vmatpush.bf16.msrb.mxu3 %v16522_v45  ;;  %v7902_v45 = vpop.f32.mrf.mxu2 }
 0x5c5   : > { %v19483_v23 = vld [vmem:[%s20909_s24 + $0x15ec] sm:$0xf0] }
 0x5c6   : > { %v15945_v19 = vld [vmem:[%s20909_s24 + $0x19b0] sm:$0xf]  ;;  %v15434_v26 = vor.u32 %v19483_v23, %v15433_v61  ;;  %8129 = vmatpush.bf16.msrb.mxu0 %v14922_v3  ;;  %v13131_v3 = vld [vmem:[%s20909_s24 + $0x3f0] sm:$0xf0] }
 0x5c7   : > { %v19611_v0 = vld [vmem:[%s20909_s24 + $0x19ec] sm:$0xf0]  ;;  %v13134_v24 = vor.u32 %v18899_v5, %v13131_v3  ;;  %v19107_v5 = vld [vmem:[%s20909_s24 + $0xa34] sm:$0xf] }
 0x5c8   : > { %v16457_v1 = vld [vmem:[%s20909_s24 + $0x1db0] sm:$0xf]  ;;  %v15946_v9 = vor.u32 %v19611_v0, %v15945_v19  ;;  %8142 = vmatpush.bf16.msrb.mxu1 %v15434_v26  ;;  %v19027_v26 = vld [vmem:[%s20909_s24 + $0x7b4] sm:$0xf] }
 0x5c9   : > { %v19739_v6 = vld [vmem:[%s20909_s24 + $0x1dec] sm:$0xf0]  ;;  %v13963_v3 = vld [vmem:[%s20909_s24 + $0xa70] sm:$0xf0] }
 0x5ca   : > { %v14857_v11 = vld [vmem:[%s20909_s24 + $0x1130] sm:$0xf]  ;;  %v16458_v14 = vor.u32 %v19739_v6, %v16457_v1  ;;  %8155 = vmatpush.bf16.msrb.mxu2 %v15946_v9  ;;  %v7915_v6 = vpop.f32.mrf.mxu3 }
 0x5cb   : > { %v19339_v12 = vld [vmem:[%s20909_s24 + $0x116c] sm:$0xf0]  ;;  %v13451_v6 = vld [vmem:[%s20909_s24 + $0x670] sm:$0xf0] }
 0x5cc   : > { %v15369_v53 = vld [vmem:[%s20909_s24 + $0x1530] sm:$0xf]  ;;  %v14858_v31 = vor.u32 %v19339_v12, %v14857_v11  ;;  %8168 = vmatpush.bf16.msrb.mxu3 %v16458_v14  ;;  %v13643_v11 = vld [vmem:[%s20909_s24 + $0x7f0] sm:$0xf0] }
 0x5cd   : > { %v19467_v16 = vld [vmem:[%s20909_s24 + $0x156c] sm:$0xf0]  ;;  %v19155_v12 = vld [vmem:[%s20909_s24 + $0xbb4] sm:$0xf]  ;;  %v13646_v25 = vor.u32 %v19027_v26, %v13643_v11 }
 0x5ce   : > { %v15881_v20 = vld [vmem:[%s20909_s24 + $0x1930] sm:$0xf]  ;;  %v15370_v42 = vor.u32 %v19467_v16, %v15369_v53  ;;  %8130 = vmatpush.bf16.msrb.mxu0 %v14858_v31  ;;  %v14155_v53 = vld [vmem:[%s20909_s24 + $0xbf0] sm:$0xf0] }
 0x5cf   : > { %v19595_v21 = vld [vmem:[%s20909_s24 + $0x196c] sm:$0xf0]  ;;  %v19283_v16 = vld [vmem:[%s20909_s24 + $0xfb4] sm:$0xf] }
 0x5d0   : > { %v16393_v27 = vld [vmem:[%s20909_s24 + $0x1d30] sm:$0xf]  ;;  %v15882_v37 = vor.u32 %v19595_v21, %v15881_v20  ;;  %8143 = vmatpush.bf16.msrb.mxu1 %v15370_v42  ;;  %v14667_v20 = vld [vmem:[%s20909_s24 + $0xff0] sm:$0xf0] }
 0x5d1   : > { %v19723_v28 = vld [vmem:[%s20909_s24 + $0x1d6c] sm:$0xf0]  ;;  %v13067_v31 = vld [vmem:[%s20909_s24 + $0x370] sm:$0xf0]  ;;  %v14670_v42 = vor.u32 %v19283_v16, %v14667_v20 }
 0x5d2   : > { %v14793_v39 = vld [vmem:[%s20909_s24 + $0x10b0] sm:$0xf]  ;;  %v16394_v44 = vor.u32 %v19723_v28, %v16393_v27  ;;  %8156 = vmatpush.bf16.msrb.mxu2 %v15882_v37  ;;  %v14158_v27 = vor.u32 %v19155_v12, %v14155_v53  ;;  %v18883_v28 = vld [vmem:[%s20909_s24 + $0x334] sm:$0xf]  ;;  %v7926_v12 = vpop.f32.mrf.mxu0 }
 0x5d3   : > { %v19323_v40 = vld [vmem:[%s20909_s24 + $0x10ec] sm:$0xf0]  ;;  %v13579_v37 = vld [vmem:[%s20909_s24 + $0x770] sm:$0xf0] }
 0x5d4   : > { %v15305_v43 = vld [vmem:[%s20909_s24 + $0x14b0] sm:$0xf]  ;;  %v14794_v33 = vor.u32 %v19323_v40, %v14793_v39  ;;  %8169 = vmatpush.bf16.msrb.mxu3 %v16394_v44  ;;  %v19139_v39 = vld [vmem:[%s20909_s24 + $0xb34] sm:$0xf]  ;;  %v13070_v44 = vor.u32 %v18883_v28, %v13067_v31 }
 0x5d5   : > { %v19451_v46 = vld [vmem:[%s20909_s24 + $0x14ec] sm:$0xf0]  ;;  %v14091_v40 = vld [vmem:[%s20909_s24 + $0xb70] sm:$0xf0] }
 0x5d6   : > { %v15817_v47 = vld [vmem:[%s20909_s24 + $0x18b0] sm:$0xf]  ;;  %v15306_v59 = vor.u32 %v19451_v46, %v15305_v43  ;;  %8131 = vmatpush.bf16.msrb.mxu0 %v14794_v33  ;;  %v19267_v43 = vld [vmem:[%s20909_s24 + $0xf34] sm:$0xf]  ;;  %v13582_v46 = vor.u32 %v19011_v35, %v13579_v37 }
 0x5d7   : > { %v19579_v48 = vld [vmem:[%s20909_s24 + $0x18ec] sm:$0xf0]  ;;  %v14606_v33 = vor.u32 %v19267_v43, %v14603_v56  ;;  %v19235_v26 = vld [vmem:[%s20909_s24 + $0xe34] sm:$0xf] }
 0x5d8   : > { %v16329_v49 = vld [vmem:[%s20909_s24 + $0x1cb0] sm:$0xf]  ;;  %v15818_v60 = vor.u32 %v19579_v48, %v15817_v47  ;;  %8144 = vmatpush.bf16.msrb.mxu1 %v15306_v59  ;;  %v14094_v47 = vor.u32 %v19139_v39, %v14091_v40  ;;  %v18867_v48 = vld [vmem:[%s20909_s24 + $0x2b4] sm:$0xf] }
 0x5d9   : > { %v19707_v54 = vld [vmem:[%s20909_s24 + $0x1cec] sm:$0xf0]  ;;  %v14027_v59 = vld [vmem:[%s20909_s24 + $0xaf0] sm:$0xf0] }
 0x5da   : > { %v14729_v55 = vld [vmem:[%s20909_s24 + $0x1030] sm:$0xf]  ;;  %v16330_v23 = vor.u32 %v19707_v54, %v16329_v49  ;;  %8157 = vmatpush.bf16.msrb.mxu2 %v15818_v60  ;;  %v13003_v49 = vld [vmem:[%s20909_s24 + $0x2f0] sm:$0xf0] }
 0x5db   : > { %v19307_v58 = vld [vmem:[%s20909_s24 + $0x106c] sm:$0xf0]  ;;  %v18995_v54 = vld [vmem:[%s20909_s24 + $0x6b4] sm:$0xf] }
 0x5dc   : > { %v15241_v61 = vld [vmem:[%s20909_s24 + $0x1430] sm:$0xf]  ;;  %v14730_v9 = vor.u32 %v19307_v58, %v14729_v55  ;;  %8170 = vmatpush.bf16.msrb.mxu3 %v16330_v23  ;;  %v13515_v55 = vld [vmem:[%s20909_s24 + $0x6f0] sm:$0xf0] }
 0x5dd   : > { %v19435_v17 = vld [vmem:[%s20909_s24 + $0x146c] sm:$0xf0]  ;;  %v19123_v58 = vld [vmem:[%s20909_s24 + $0xab4] sm:$0xf] }
 0x5de   : > { %v15753_v63 = vld [vmem:[%s20909_s24 + $0x1830] sm:$0xf]  ;;  %v15242_v13 = vor.u32 %v19435_v17, %v15241_v61  ;;  %8132 = vmatpush.bf16.msrb.mxu0 %v14730_v9  ;;  %v19251_v60 = vld [vmem:[%s20909_s24 + $0xeb4] sm:$0xf]  ;;  %v13006_v17 = vor.u32 %v18867_v48, %v13003_v49  ;;  %v14030_v45 = vor.u32 %v19123_v58, %v14027_v59 }
 0x5df   : > { %v19563_v19 = vld [vmem:[%s20909_s24 + $0x186c] sm:$0xf0]  ;;  %v14539_v61 = vld [vmem:[%s20909_s24 + $0xef0] sm:$0xf0] }
 0x5e0   : > { %v16265_v0 = vld [vmem:[%s20909_s24 + $0x1c30] sm:$0xf]  ;;  %v15754_v14 = vor.u32 %v19563_v19, %v15753_v63  ;;  %8145 = vmatpush.bf16.msrb.mxu1 %v15242_v13  ;;  %v13518_v63 = vor.u32 %v18995_v54, %v13515_v55  ;;  %v18851_v23 = vld [vmem:[%s20909_s24 + $0x234] sm:$0xf]  ;;  %v13966_v13 = vor.u32 %v19107_v5, %v13963_v3  ;;  %v7965_v55 = vpop.f32.mrf.mxu3 }
 0x5e1   : > { %v19691_v1 = vld [vmem:[%s20909_s24 + $0x1c6c] sm:$0xf0]  ;;  %8133 = vmatmul.bf16.vlgmr.msrb.gmra.mxu0 %v21090_v7  ;;  %v12939_v19 = vld [vmem:[%s20909_s24 + $0x270] sm:$0xf0] }
 0x5e2   : > { %v16266_v21 = vor.u32 %v19691_v1, %v16265_v0  ;;  %8158 = vmatpush.bf16.msrb.mxu2 %v15754_v14  ;;  %8177 = vmatpush.bf16.msra.mxu0 %v13134_v24  ;;  %v18979_v0 = vld [vmem:[%s20909_s24 + $0x634] sm:$0xf]  ;;  %v14542_v1 = vor.u32 %v19251_v60, %v14539_v61  ;;  %v12942_v11 = vor.u32 %v18851_v23, %v12939_v19  ;;  %v7939_v24 = vpop.f32.mrf.mxu1 }
 0x5e3   : > { %8146 = vmatmul.bf16.vlgmr.msrb.gmra.mxu1 %v21094_v10  ;;  %v14475_v9 = vld [vmem:[%s20909_s24 + $0xe70] sm:$0xf0]  ;;  %v13454_v53 = vor.u32 %v18979_v0, %v13451_v6 }
 0x5e4   : > { %8171 = vmatpush.bf16.msrb.mxu3 %v16266_v21  ;;  %8190 = vmatpush.bf16.msra.mxu1 %v13646_v25  ;;  %v18835_v14 = vld [vmem:[%s20909_s24 + $0x1b4] sm:$0xf]  ;;  %v7927_v21 = vadd.f32 %v7926_v12, %v22775_v32  ;;  %v14478_v25 = vor.u32 %v19235_v26, %v14475_v9 }
 0x5e5   : > { %8159 = vmatmul.bf16.vlgmr.msrb.gmra.mxu2 %v21086_v4  ;;  %v12875_v16 = vld [vmem:[%s20909_s24 + $0x1f0] sm:$0xf0] }
 0x5e6   : > { %8203 = vmatpush.bf16.msra.mxu2 %v14158_v27  ;;  %8178 = vmatpush.bf16.msra.mxu0 %v13070_v44  ;;  %v18963_v20 = vld [vmem:[%s20909_s24 + $0x5b4] sm:$0xf]  ;;  %v7940_v37 = vadd.f32 %v7939_v24, %v7927_v21  ;;  %v12878_v39 = vor.u32 %v18835_v14, %v12875_v16 }
 0x5e7   : > { %8172 = vmatmul.bf16.vlgmr.msrb.gmra.mxu3 %v21092_v8  ;;  %v13387_v27 = vld [vmem:[%s20909_s24 + $0x5f0] sm:$0xf0] }
 0x5e8   : > { %8216 = vmatpush.bf16.msra.mxu3 %v14670_v42  ;;  %8191 = vmatpush.bf16.msra.mxu1 %v13582_v46  ;;  %v19091_v28 = vld [vmem:[%s20909_s24 + $0x9b4] sm:$0xf]  ;;  %v13390_v32 = vor.u32 %v18963_v20, %v13387_v27  ;;  %v7952_v46 = vpop.f32.mrf.mxu2 }
 0x5e9   : > { %v13899_v31 = vld [vmem:[%s20909_s24 + $0x9f0] sm:$0xf0] }
 0x5ea   : > { %8204 = vmatpush.bf16.msra.mxu2 %v14094_v47  ;;  %8179 = vmatpush.bf16.msra.mxu0 %v13006_v17  ;;  %v19219_v35 = vld [vmem:[%s20909_s24 + $0xdb4] sm:$0xf]  ;;  %v13902_v40 = vor.u32 %v19091_v28, %v13899_v31  ;;  %v7928_v17 = vpop.f32.mrf.mxu0 }
 0x5eb   : > { %v14411_v42 = vld [vmem:[%s20909_s24 + $0xdf0] sm:$0xf0] }
 0x5ec   : > { %8217 = vmatpush.bf16.msra.mxu3 %v14606_v33  ;;  %8192 = vmatpush.bf16.msra.mxu1 %v13518_v63  ;;  %v18819_v43 = vld [vmem:[%s20909_s24 + $0x134] sm:$0xf]  ;;  %v14414_v47 = vor.u32 %v19219_v35, %v14411_v42  ;;  %v7953_v33 = vadd.f32 %v7952_v46, %v7940_v37  ;;  %v7967_v42 = vpop.f32.mrf.mxu3 }
 0x5ed   : > { %v12811_v56 = vld [vmem:[%s20909_s24 + $0x170] sm:$0xf0] }
 0x5ee   : > { %8205 = vmatpush.bf16.msra.mxu2 %v14030_v45  ;;  %8180 = vmatpush.bf16.msra.mxu0 %v12942_v11  ;;  %v18947_v44 = vld [vmem:[%s20909_s24 + $0x534] sm:$0xf]  ;;  %v12814_v60 = vor.u32 %v18819_v43, %v12811_v56  ;;  %v22846_v61 = vadd.f32 %v7965_v55, %v7953_v33 }
 0x5ef   : > { %v13323_v48 = vld [vmem:[%s20909_s24 + $0x570] sm:$0xf0] }
 0x5f0   : > { %8218 = vmatpush.bf16.msra.mxu3 %v14542_v1  ;;  %8193 = vmatpush.bf16.msra.mxu1 %v13454_v53  ;;  %v19075_v49 = vld [vmem:[%s20909_s24 + $0x934] sm:$0xf]  ;;  %v13326_v63 = vor.u32 %v18947_v44, %v13323_v48  ;;  %v7941_v1 = vpop.f32.mrf.mxu1 }
 0x5f1   : > { %v13835_v54 = vld [vmem:[%s20909_s24 + $0x970] sm:$0xf0] }
 0x5f2   : > { %8206 = vmatpush.bf16.msra.mxu2 %v13966_v13  ;;  %v19203_v58 = vld [vmem:[%s20909_s24 + $0xd34] sm:$0xf]  ;;  %8181 = vmatpush.bf16.msra.mxu0 %v12878_v39  ;;  %v13838_v45 = vor.u32 %v19075_v49, %v13835_v54 }
 0x5f3   : > { %v14347_v59 = vld [vmem:[%s20909_s24 + $0xd70] sm:$0xf0] }
 0x5f4   : > { %8219 = vmatpush.bf16.msra.mxu3 %v14478_v25  ;;  %8194 = vmatpush.bf16.msra.mxu1 %v13390_v32  ;;  %v18803_v23 = vld [vmem:[%s20909_s24 + $0xb4] sm:$0xf]  ;;  %v14350_v6 = vor.u32 %v19203_v58, %v14347_v59  ;;  %v7954_v25 = vpop.f32.mrf.mxu2 }
 0x5f5   : > { %v12747_v19 = vld [vmem:[%s20909_s24 + $0xf0] sm:$0xf0] }
 0x5f6   : > { %8207 = vmatpush.bf16.msra.mxu2 %v13902_v40  ;;  %v18931_v0 = vld [vmem:[%s20909_s24 + $0x4b4] sm:$0xf]  ;;  %8182 = vmatpush.bf16.msra.mxu0 %v12814_v60  ;;  %v12750_v12 = vor.u32 %v18803_v23, %v12747_v19 }
 0x5f7   : > { %v13259_v5 = vld [vmem:[%s20909_s24 + $0x4f0] sm:$0xf0] }
 0x5f8   : > { %8220 = vmatpush.bf16.msra.mxu3 %v14414_v47  ;;  %v19059_v3 = vld [vmem:[%s20909_s24 + $0x8b4] sm:$0xf]  ;;  %8195 = vmatpush.bf16.msra.mxu1 %v13326_v63  ;;  %v13262_v14 = vor.u32 %v18931_v0, %v13259_v5 }
 0x5f9   : > { %v13771_v26 = vld [vmem:[%s20909_s24 + $0x8f0] sm:$0xf0] }
 0x5fa   : > { %v19187_v9 = vld [vmem:[%s20909_s24 + $0xcb4] sm:$0xf]  ;;  %8208 = vmatpush.bf16.msra.mxu2 %v13838_v45  ;;  %v13774_v16 = vor.u32 %v19059_v3, %v13771_v26  ;;  %8183 = vmatpush.bf16.msra.mxu0 %v12750_v12 }
 0x5fb   : > { %v14283_v11 = vld [vmem:[%s20909_s24 + $0xcf0] sm:$0xf0] }
 0x5fc   : > { %v18787_v53 = vld [vmem:[%s20909_s24 + $0x34] sm:$0xf]  ;;  %8221 = vmatpush.bf16.msra.mxu3 %v14350_v6  ;;  %v14286_v27 = vor.u32 %v19187_v9, %v14283_v11  ;;  %8196 = vmatpush.bf16.msra.mxu1 %v13262_v14 }
 0x5fd   : > { %v12683_v13 = vld [vmem:[%s20909_s24 + $0x70] sm:$0xf0] }
 0x5fe   : > { %v18915_v20 = vld [vmem:[%s20909_s24 + $0x434] sm:$0xf]  ;;  %v12686_v40 = vor.u32 %v18787_v53, %v12683_v13  ;;  %8209 = vmatpush.bf16.msra.mxu2 %v13774_v16 }
 0x5ff   : > { %v13195_v21 = vld [vmem:[%s20909_s24 + $0x470] sm:$0xf0] }
 0x600   : > { %v19043_v24 = vld [vmem:[%s20909_s24 + $0x834] sm:$0xf]  ;;  %v13198_v46 = vor.u32 %v18915_v20, %v13195_v21  ;;  %8222 = vmatpush.bf16.msra.mxu3 %v14286_v27  ;;  %8184 = vmatpush.bf16.msra.mxu0 %v12686_v40 }
 0x601   : > { %v13707_v28 = vld [vmem:[%s20909_s24 + $0x870] sm:$0xf0] }
 0x602   : > { %v19171_v31 = vld [vmem:[%s20909_s24 + $0xc34] sm:$0xf]  ;;  %v13710_v47 = vor.u32 %v19043_v24, %v13707_v28  ;;  %8197 = vmatpush.bf16.msra.mxu1 %v13198_v46 }
 0x603   : > { %v14219_v35 = vld [vmem:[%s20909_s24 + $0xc70] sm:$0xf0]  ;;  %8185 = vmatmul.bf16.vlgmr.msra.gmra.mxu0 %v21033_v50 }
 0x604   : > { %v19411_v37 = vld [vmem:[%s20909_s24 + $0x13b4] sm:$0xf]  ;;  %v14222_v54 = vor.u32 %v19171_v31, %v14219_v35  ;;  %8210 = vmatpush.bf16.msra.mxu2 %v13710_v47  ;;  %v1656_v35 = vperm.slane %v22751_v41, 3 }
 0x605   : > { %v15179_v39 = vld [vmem:[%s20909_s24 + $0x13f0] sm:$0xf0]  ;;  %8198 = vmatmul.bf16.vlgmr.msra.gmra.mxu1 %v21036_v51 }
 0x606   : > { %v19539_v32 = vld [vmem:[%s20909_s24 + $0x17b4] sm:$0xf]  ;;  %v15182_v33 = vor.u32 %v19411_v37, %v15179_v39  ;;  %8223 = vmatpush.bf16.msra.mxu3 %v14222_v54 }
 0x607   : > { %v15691_v43 = vld [vmem:[%s20909_s24 + $0x17f0] sm:$0xf0]  ;;  %8211 = vmatmul.bf16.vlgmr.msra.gmra.mxu2 %v21020_v34 }
 0x608   : > { %v19667_v56 = vld [vmem:[%s20909_s24 + $0x1bb4] sm:$0xf]  ;;  %v15694_v55 = vor.u32 %v19539_v32, %v15691_v43  ;;  %8229 = vmatpush.bf16.msrb.mxu0 %v15182_v33  ;;  %v7991_v33 = vpop.f32.mrf.mxu1 }
 0x609   : > { %v16203_v44 = vld [vmem:[%s20909_s24 + $0x1bf0] sm:$0xf0]  ;;  %8224 = vmatmul.bf16.vlgmr.msra.gmra.mxu3 %v21022_v36 }
 0x60a   : > { %v19795_v48 = vld [vmem:[%s20909_s24 + $0x1fb4] sm:$0xf]  ;;  %v16206_v58 = vor.u32 %v19667_v56, %v16203_v44  ;;  %8242 = vmatpush.bf16.msrb.mxu1 %v15694_v55  ;;  %v7978_v44 = vpop.f32.mrf.mxu0 }
 0x60b   : > { %v16715_v49 = vld [vmem:[%s20909_s24 + $0x1ff0] sm:$0xf0]  ;;  %v7979_v54 = vadd.f32 %v7978_v44, %v1656_v35 }
 0x60c   : > { %v19395_v59 = vld [vmem:[%s20909_s24 + $0x1334] sm:$0xf]  ;;  %v16718_v63 = vor.u32 %v19795_v48, %v16715_v49  ;;  %8255 = vmatpush.bf16.msrb.mxu2 %v16206_v58 }
 0x60d   : > { %v15115_v60 = vld [vmem:[%s20909_s24 + $0x1370] sm:$0xf0] }
 0x60e   : > { %v19523_v17 = vld [vmem:[%s20909_s24 + $0x1734] sm:$0xf]  ;;  %v15118_v6 = vor.u32 %v19395_v59, %v15115_v60  ;;  %8268 = vmatpush.bf16.msrb.mxu3 %v16718_v63 }
 0x60f   : > { %v15627_v45 = vld [vmem:[%s20909_s24 + $0x1770] sm:$0xf0] }
 0x610   : > { %v19651_v23 = vld [vmem:[%s20909_s24 + $0x1b34] sm:$0xf]  ;;  %v15630_v5 = vor.u32 %v19523_v17, %v15627_v45  ;;  %8230 = vmatpush.bf16.msrb.mxu0 %v15118_v6  ;;  %v7992_v45 = vadd.f32 %v7991_v33, %v7979_v54 }
 0x611   : > { %v16139_v19 = vld [vmem:[%s20909_s24 + $0x1b70] sm:$0xf0] }
 0x612   : > { %v19779_v0 = vld [vmem:[%s20909_s24 + $0x1f34] sm:$0xf]  ;;  %v16142_v3 = vor.u32 %v19651_v23, %v16139_v19  ;;  %8243 = vmatpush.bf16.msrb.mxu1 %v15630_v5 }
 0x613   : > { %v16651_v1 = vld [vmem:[%s20909_s24 + $0x1f70] sm:$0xf0] }
 0x614   : > { %v19379_v26 = vld [vmem:[%s20909_s24 + $0x12b4] sm:$0xf]  ;;  %v16654_v12 = vor.u32 %v19779_v0, %v16651_v1  ;;  %8256 = vmatpush.bf16.msrb.mxu2 %v16142_v3  ;;  %v8004_v3 = vpop.f32.mrf.mxu2 }
 0x615   : > { %v15051_v9 = vld [vmem:[%s20909_s24 + $0x12f0] sm:$0xf0] }
 0x616   : > { %v19507_v11 = vld [vmem:[%s20909_s24 + $0x16b4] sm:$0xf]  ;;  %v15054_v21 = vor.u32 %v19379_v26, %v15051_v9  ;;  %8269 = vmatpush.bf16.msrb.mxu3 %v16654_v12 }
 0x617   : > { %v15563_v53 = vld [vmem:[%s20909_s24 + $0x16f0] sm:$0xf0] }
 0x618   : > { %v19635_v13 = vld [vmem:[%s20909_s24 + $0x1ab4] sm:$0xf]  ;;  %v15566_v25 = vor.u32 %v19507_v11, %v15563_v53  ;;  %8231 = vmatpush.bf16.msrb.mxu0 %v15054_v21  ;;  %v8005_v53 = vadd.f32 %v8004_v3, %v7992_v45  ;;  %v13137_v45 = vld [vmem:[%s20909_s24 + $0x3b8] sm:$0xf] }
 0x619   : > { %v16075_v14 = vld [vmem:[%s20909_s24 + $0x1af0] sm:$0xf0] }
 0x61a   : > { %v19763_v16 = vld [vmem:[%s20909_s24 + $0x1eb4] sm:$0xf]  ;;  %v16078_v27 = vor.u32 %v19635_v13, %v16075_v14  ;;  %8244 = vmatpush.bf16.msrb.mxu1 %v15566_v25  ;;  %v8017_v13 = vpop.f32.mrf.mxu3 }
 0x61b   : > { %v16587_v20 = vld [vmem:[%s20909_s24 + $0x1ef0] sm:$0xf0]  ;;  %v22917_v21 = vadd.f32 %v8017_v13, %v8005_v53 }
 0x61c   : > { %v19363_v24 = vld [vmem:[%s20909_s24 + $0x1234] sm:$0xf]  ;;  %v16590_v42 = vor.u32 %v19763_v16, %v16587_v20  ;;  %8257 = vmatpush.bf16.msrb.mxu2 %v16078_v27 }
 0x61d   : > { %v14987_v28 = vld [vmem:[%s20909_s24 + $0x1270] sm:$0xf0] }
 0x61e   : > { %v19491_v31 = vld [vmem:[%s20909_s24 + $0x1634] sm:$0xf]  ;;  %v14990_v56 = vor.u32 %v19363_v24, %v14987_v28  ;;  %8270 = vmatpush.bf16.msrb.mxu3 %v16590_v42  ;;  %v7980_v24 = vpop.f32.mrf.mxu0  ;;  %v7993_v42 = vpop.f32.mrf.mxu1 }
 0x61f   : > { %v15499_v37 = vld [vmem:[%s20909_s24 + $0x1670] sm:$0xf0]  ;;  %v13585_v24 = vld [vmem:[%s20909_s24 + $0x738] sm:$0xf] }
 0x620   : > { %v19619_v39 = vld [vmem:[%s20909_s24 + $0x1a34] sm:$0xf]  ;;  %v15502_v41 = vor.u32 %v19491_v31, %v15499_v37  ;;  %8232 = vmatpush.bf16.msrb.mxu0 %v14990_v56  ;;  %v19276_v42 = vld [vmem:[%s20909_s24 + $0xf74] sm:$0xf0] }
 0x621   : > { %v16011_v32 = vld [vmem:[%s20909_s24 + $0x1a70] sm:$0xf0] }
 0x622   : > { %v19747_v40 = vld [vmem:[%s20909_s24 + $0x1e34] sm:$0xf]  ;;  %v16014_v46 = vor.u32 %v19619_v39, %v16011_v32  ;;  %8245 = vmatpush.bf16.msrb.mxu1 %v15502_v41 }
 0x623   : > { %v16523_v43 = vld [vmem:[%s20909_s24 + $0x1e70] sm:$0xf0] }
 0x624   : > { %v19347_v47 = vld [vmem:[%s20909_s24 + $0x11b4] sm:$0xf]  ;;  %v16526_v55 = vor.u32 %v19747_v40, %v16523_v43  ;;  %8258 = vmatpush.bf16.msrb.mxu2 %v16014_v46 }
 0x625   : > { %v14923_v48 = vld [vmem:[%s20909_s24 + $0x11f0] sm:$0xf0] }
 0x626   : > { %v19475_v49 = vld [vmem:[%s20909_s24 + $0x15b4] sm:$0xf]  ;;  %v14926_v23 = vor.u32 %v19347_v47, %v14923_v48  ;;  %8271 = vmatpush.bf16.msrb.mxu3 %v16526_v55  ;;  %v8006_v55 = vpop.f32.mrf.mxu2 }
 0x627   : > { %v15435_v58 = vld [vmem:[%s20909_s24 + $0x15f0] sm:$0xf0] }
 0x628   : > { %v19603_v59 = vld [vmem:[%s20909_s24 + $0x19b4] sm:$0xf]  ;;  %v15438_v19 = vor.u32 %v19475_v49, %v15435_v58  ;;  %8233 = vmatpush.bf16.msrb.mxu0 %v14926_v23  ;;  %v18908_v23 = vld [vmem:[%s20909_s24 + $0x3f4] sm:$0xf0] }
 0x629   : > { %v15947_v60 = vld [vmem:[%s20909_s24 + $0x19f0] sm:$0xf0]  ;;  %v13138_v53 = vor.u32 %v18908_v23, %v13137_v45  ;;  %v13969_v45 = vld [vmem:[%s20909_s24 + $0xa38] sm:$0xf] }
 0x62a   : > { %v19731_v17 = vld [vmem:[%s20909_s24 + $0x1db4] sm:$0xf]  ;;  %v15950_v0 = vor.u32 %v19603_v59, %v15947_v60  ;;  %8246 = vmatpush.bf16.msrb.mxu1 %v15438_v19  ;;  %v13649_v19 = vld [vmem:[%s20909_s24 + $0x7b8] sm:$0xf] }
 0x62b   : > { %v16459_v63 = vld [vmem:[%s20909_s24 + $0x1df0] sm:$0xf0]  ;;  %v19116_v23 = vld [vmem:[%s20909_s24 + $0xa74] sm:$0xf0] }
 0x62c   : > { %v19331_v1 = vld [vmem:[%s20909_s24 + $0x1134] sm:$0xf]  ;;  %v16462_v26 = vor.u32 %v19731_v17, %v16459_v63  ;;  %8259 = vmatpush.bf16.msrb.mxu2 %v15950_v0  ;;  %v8019_v63 = vpop.f32.mrf.mxu3 }
 0x62d   : > { %v14859_v6 = vld [vmem:[%s20909_s24 + $0x1170] sm:$0xf0]  ;;  %v18988_v63 = vld [vmem:[%s20909_s24 + $0x674] sm:$0xf0] }
 0x62e   : > { %v19459_v5 = vld [vmem:[%s20909_s24 + $0x1534] sm:$0xf]  ;;  %v14862_v20 = vor.u32 %v19331_v1, %v14859_v6  ;;  %8272 = vmatpush.bf16.msrb.mxu3 %v16462_v26  ;;  %v19036_v1 = vld [vmem:[%s20909_s24 + $0x7f4] sm:$0xf0] }
 0x62f   : > { %v15371_v9 = vld [vmem:[%s20909_s24 + $0x1570] sm:$0xf0]  ;;  %v14161_v6 = vld [vmem:[%s20909_s24 + $0xbb8] sm:$0xf]  ;;  %v13650_v13 = vor.u32 %v19036_v1, %v13649_v19 }
 0x630   : > { %v19587_v11 = vld [vmem:[%s20909_s24 + $0x1934] sm:$0xf]  ;;  %v15374_v25 = vor.u32 %v19459_v5, %v15371_v9  ;;  %8234 = vmatpush.bf16.msrb.mxu0 %v14862_v20  ;;  %v19164_v5 = vld [vmem:[%s20909_s24 + $0xbf4] sm:$0xf0] }
 0x631   : > { %v15883_v12 = vld [vmem:[%s20909_s24 + $0x1970] sm:$0xf0]  ;;  %v14673_v9 = vld [vmem:[%s20909_s24 + $0xfb8] sm:$0xf] }
 0x632   : > { %v19715_v14 = vld [vmem:[%s20909_s24 + $0x1d34] sm:$0xf]  ;;  %v15886_v27 = vor.u32 %v19587_v11, %v15883_v12  ;;  %8247 = vmatpush.bf16.msrb.mxu1 %v15374_v25  ;;  %v19292_v11 = vld [vmem:[%s20909_s24 + $0xff4] sm:$0xf0] }
 0x633   : > { %v16395_v16 = vld [vmem:[%s20909_s24 + $0x1d70] sm:$0xf0]  ;;  %v18892_v20 = vld [vmem:[%s20909_s24 + $0x374] sm:$0xf0]  ;;  %v14674_v25 = vor.u32 %v19292_v11, %v14673_v9 }
 0x634   : > { %v19315_v28 = vld [vmem:[%s20909_s24 + $0x10b4] sm:$0xf]  ;;  %v16398_v37 = vor.u32 %v19715_v14, %v16395_v16  ;;  %8260 = vmatpush.bf16.msrb.mxu2 %v15886_v27  ;;  %v14162_v14 = vor.u32 %v19164_v5, %v14161_v6  ;;  %v13073_v16 = vld [vmem:[%s20909_s24 + $0x338] sm:$0xf]  ;;  %v8030_v6 = vpop.f32.mrf.mxu0 }
 0x635   : > { %v14795_v31 = vld [vmem:[%s20909_s24 + $0x10f0] sm:$0xf0]  ;;  %v19020_v27 = vld [vmem:[%s20909_s24 + $0x774] sm:$0xf0] }
 0x636   : > { %v19443_v35 = vld [vmem:[%s20909_s24 + $0x14b4] sm:$0xf]  ;;  %v14798_v44 = vor.u32 %v19315_v28, %v14795_v31  ;;  %8273 = vmatpush.bf16.msrb.mxu3 %v16398_v37  ;;  %v14097_v28 = vld [vmem:[%s20909_s24 + $0xb38] sm:$0xf]  ;;  %v13074_v37 = vor.u32 %v18892_v20, %v13073_v16 }
 0x637   : > { %v15307_v39 = vld [vmem:[%s20909_s24 + $0x14f0] sm:$0xf0]  ;;  %v19148_v31 = vld [vmem:[%s20909_s24 + $0xb74] sm:$0xf0] }
 0x638   : > { %v19571_v32 = vld [vmem:[%s20909_s24 + $0x18b4] sm:$0xf]  ;;  %v15310_v47 = vor.u32 %v19443_v35, %v15307_v39  ;;  %8235 = vmatpush.bf16.msrb.mxu0 %v14798_v44  ;;  %v14609_v35 = vld [vmem:[%s20909_s24 + $0xf38] sm:$0xf]  ;;  %v13586_v39 = vor.u32 %v19020_v27, %v13585_v24 }
 0x639   : > { %v15819_v40 = vld [vmem:[%s20909_s24 + $0x18f0] sm:$0xf0]  ;;  %v14610_v44 = vor.u32 %v19276_v42, %v14609_v35  ;;  %v14481_v19 = vld [vmem:[%s20909_s24 + $0xe38] sm:$0xf] }
 0x63a   : > { %v19699_v43 = vld [vmem:[%s20909_s24 + $0x1cb4] sm:$0xf]  ;;  %v15822_v48 = vor.u32 %v19571_v32, %v15819_v40  ;;  %8248 = vmatpush.bf16.msrb.mxu1 %v15310_v47  ;;  %v14098_v32 = vor.u32 %v19148_v31, %v14097_v28  ;;  %v13009_v40 = vld [vmem:[%s20909_s24 + $0x2b8] sm:$0xf] }
 0x63b   : > { %v16331_v56 = vld [vmem:[%s20909_s24 + $0x1cf0] sm:$0xf0]  ;;  %v19132_v47 = vld [vmem:[%s20909_s24 + $0xaf4] sm:$0xf0] }
 0x63c   : > { %v19299_v41 = vld [vmem:[%s20909_s24 + $0x1034] sm:$0xf]  ;;  %v16334_v58 = vor.u32 %v19699_v43, %v16331_v56  ;;  %8261 = vmatpush.bf16.msrb.mxu2 %v15822_v48  ;;  %v18876_v43 = vld [vmem:[%s20909_s24 + $0x2f4] sm:$0xf0] }
 0x63d   : > { %v14731_v46 = vld [vmem:[%s20909_s24 + $0x1070] sm:$0xf0]  ;;  %v13521_v56 = vld [vmem:[%s20909_s24 + $0x6b8] sm:$0xf] }
 0x63e   : > { %v19427_v49 = vld [vmem:[%s20909_s24 + $0x1434] sm:$0xf]  ;;  %v14734_v0 = vor.u32 %v19299_v41, %v14731_v46  ;;  %8274 = vmatpush.bf16.msrb.mxu3 %v16334_v58  ;;  %v19004_v41 = vld [vmem:[%s20909_s24 + $0x6f4] sm:$0xf0] }
 0x63f   : > { %v15243_v54 = vld [vmem:[%s20909_s24 + $0x1470] sm:$0xf0]  ;;  %v14033_v46 = vld [vmem:[%s20909_s24 + $0xab8] sm:$0xf] }
 0x640   : > { %v19555_v33 = vld [vmem:[%s20909_s24 + $0x1834] sm:$0xf]  ;;  %v15246_v3 = vor.u32 %v19427_v49, %v15243_v54  ;;  %8236 = vmatpush.bf16.msrb.mxu0 %v14734_v0  ;;  %v14545_v48 = vld [vmem:[%s20909_s24 + $0xeb8] sm:$0xf]  ;;  %v13010_v54 = vor.u32 %v18876_v43, %v13009_v40  ;;  %v14034_v55 = vor.u32 %v19132_v47, %v14033_v46 }
 0x641   : > { %v15755_v59 = vld [vmem:[%s20909_s24 + $0x1870] sm:$0xf0]  ;;  %v19260_v49 = vld [vmem:[%s20909_s24 + $0xef4] sm:$0xf0] }
 0x642   : > { %v19683_v60 = vld [vmem:[%s20909_s24 + $0x1c34] sm:$0xf]  ;;  %v15758_v26 = vor.u32 %v19555_v33, %v15755_v59  ;;  %8249 = vmatpush.bf16.msrb.mxu1 %v15246_v3  ;;  %v13522_v33 = vor.u32 %v19004_v41, %v13521_v56  ;;  %v12945_v58 = vld [vmem:[%s20909_s24 + $0x238] sm:$0xf]  ;;  %v13970_v3 = vor.u32 %v19116_v23, %v13969_v45  ;;  %v8069_v41 = vpop.f32.mrf.mxu3 }
 0x643   : > { %v16267_v17 = vld [vmem:[%s20909_s24 + $0x1c70] sm:$0xf0]  ;;  %8237 = vmatmul.bf16.vlgmr.msrb.gmra.mxu0 %v21090_v7  ;;  %v18860_v59 = vld [vmem:[%s20909_s24 + $0x274] sm:$0xf0] }
 0x644   : > { %v16270_v12 = vor.u32 %v19683_v60, %v16267_v17  ;;  %8262 = vmatpush.bf16.msrb.mxu2 %v15758_v26  ;;  %8281 = vmatpush.bf16.msra.mxu0 %v13138_v53  ;;  %v13457_v60 = vld [vmem:[%s20909_s24 + $0x638] sm:$0xf]  ;;  %v14546_v17 = vor.u32 %v19260_v49, %v14545_v48  ;;  %v12946_v1 = vor.u32 %v18860_v59, %v12945_v58  ;;  %v8043_v53 = vpop.f32.mrf.mxu1 }
 0x645   : > { %8250 = vmatmul.bf16.vlgmr.msrb.gmra.mxu1 %v21094_v10  ;;  %v19244_v0 = vld [vmem:[%s20909_s24 + $0xe74] sm:$0xf0]  ;;  %v13458_v5 = vor.u32 %v18988_v63, %v13457_v60 }
 0x646   : > { %8275 = vmatpush.bf16.msrb.mxu3 %v16270_v12  ;;  %8294 = vmatpush.bf16.msra.mxu1 %v13650_v13  ;;  %v12881_v26 = vld [vmem:[%s20909_s24 + $0x1b8] sm:$0xf]  ;;  %v8031_v12 = vadd.f32 %v8030_v6, %v22917_v21  ;;  %v14482_v13 = vor.u32 %v19244_v0, %v14481_v19 }
 0x647   : > { %8263 = vmatmul.bf16.vlgmr.msrb.gmra.mxu2 %v21086_v4  ;;  %v18844_v9 = vld [vmem:[%s20909_s24 + $0x1f4] sm:$0xf0] }
 0x648   : > { %8307 = vmatpush.bf16.msra.mxu2 %v14162_v14  ;;  %8282 = vmatpush.bf16.msra.mxu0 %v13074_v37  ;;  %v13393_v11 = vld [vmem:[%s20909_s24 + $0x5b8] sm:$0xf]  ;;  %v8044_v27 = vadd.f32 %v8043_v53, %v8031_v12  ;;  %v12882_v28 = vor.u32 %v18844_v9, %v12881_v26 }
 0x649   : > { %8276 = vmatmul.bf16.vlgmr.msrb.gmra.mxu3 %v21092_v8  ;;  %v18972_v14 = vld [vmem:[%s20909_s24 + $0x5f4] sm:$0xf0] }
 0x64a   : > { %8320 = vmatpush.bf16.msra.mxu3 %v14674_v25  ;;  %8295 = vmatpush.bf16.msra.mxu1 %v13586_v39  ;;  %v13905_v16 = vld [vmem:[%s20909_s24 + $0x9b8] sm:$0xf]  ;;  %v13394_v21 = vor.u32 %v18972_v14, %v13393_v11  ;;  %v8056_v39 = vpop.f32.mrf.mxu2 }
 0x64b   : > { %v19100_v20 = vld [vmem:[%s20909_s24 + $0x9f4] sm:$0xf0] }
 0x64c   : > { %8308 = vmatpush.bf16.msra.mxu2 %v14098_v32  ;;  %8283 = vmatpush.bf16.msra.mxu0 %v13010_v54  ;;  %v14417_v24 = vld [vmem:[%s20909_s24 + $0xdb8] sm:$0xf]  ;;  %v13906_v31 = vor.u32 %v19100_v20, %v13905_v16  ;;  %v8032_v54 = vpop.f32.mrf.mxu0 }
 0x64d   : > { %v19228_v25 = vld [vmem:[%s20909_s24 + $0xdf4] sm:$0xf0] }
 0x64e   : > { %8321 = vmatpush.bf16.msra.mxu3 %v14610_v44  ;;  %8296 = vmatpush.bf16.msra.mxu1 %v13522_v33  ;;  %v12817_v35 = vld [vmem:[%s20909_s24 + $0x138] sm:$0xf]  ;;  %v14418_v32 = vor.u32 %v19228_v25, %v14417_v24  ;;  %v8057_v44 = vadd.f32 %v8056_v39, %v8044_v27  ;;  %v8071_v25 = vpop.f32.mrf.mxu3 }
 0x64f   : > { %v18828_v42 = vld [vmem:[%s20909_s24 + $0x174] sm:$0xf0] }
 0x650   : > { %8309 = vmatpush.bf16.msra.mxu2 %v14034_v55  ;;  %8284 = vmatpush.bf16.msra.mxu0 %v12946_v1  ;;  %v13329_v37 = vld [vmem:[%s20909_s24 + $0x538] sm:$0xf]  ;;  %v12818_v48 = vor.u32 %v18828_v42, %v12817_v35  ;;  %v22988_v49 = vadd.f32 %v8069_v41, %v8057_v44 }
 0x651   : > { %v18956_v40 = vld [vmem:[%s20909_s24 + $0x574] sm:$0xf0] }
 0x652   : > { %8322 = vmatpush.bf16.msra.mxu3 %v14546_v17  ;;  %8297 = vmatpush.bf16.msra.mxu1 %v13458_v5  ;;  %v13841_v43 = vld [vmem:[%s20909_s24 + $0x938] sm:$0xf]  ;;  %v13330_v33 = vor.u32 %v18956_v40, %v13329_v37  ;;  %v8045_v17 = vpop.f32.mrf.mxu1 }
 0x653   : > { %v19084_v56 = vld [vmem:[%s20909_s24 + $0x974] sm:$0xf0] }
 0x654   : > { %8310 = vmatpush.bf16.msra.mxu2 %v13970_v3  ;;  %v14353_v46 = vld [vmem:[%s20909_s24 + $0xd38] sm:$0xf]  ;;  %8285 = vmatpush.bf16.msra.mxu0 %v12882_v28  ;;  %v13842_v55 = vor.u32 %v19084_v56, %v13841_v43 }
 0x655   : > { %v19212_v47 = vld [vmem:[%s20909_s24 + $0xd74] sm:$0xf0] }
 0x656   : > { %8323 = vmatpush.bf16.msra.mxu3 %v14482_v13  ;;  %8298 = vmatpush.bf16.msra.mxu1 %v13394_v21  ;;  %v12753_v58 = vld [vmem:[%s20909_s24 + $0xb8] sm:$0xf]  ;;  %v14354_v63 = vor.u32 %v19212_v47, %v14353_v46  ;;  %v8058_v13 = vpop.f32.mrf.mxu2 }
 0x657   : > { %v18812_v59 = vld [vmem:[%s20909_s24 + $0xf4] sm:$0xf0] }
 0x658   : > { %8311 = vmatpush.bf16.msra.mxu2 %v13906_v31  ;;  %v13265_v60 = vld [vmem:[%s20909_s24 + $0x4b8] sm:$0xf]  ;;  %8286 = vmatpush.bf16.msra.mxu0 %v12818_v48  ;;  %v12754_v6 = vor.u32 %v18812_v59, %v12753_v58 }
 0x659   : > { %v18940_v45 = vld [vmem:[%s20909_s24 + $0x4f4] sm:$0xf0] }
 0x65a   : > { %8324 = vmatpush.bf16.msra.mxu3 %v14418_v32  ;;  %v13777_v23 = vld [vmem:[%s20909_s24 + $0x8b8] sm:$0xf]  ;;  %8299 = vmatpush.bf16.msra.mxu1 %v13330_v33  ;;  %v13266_v26 = vor.u32 %v18940_v45, %v13265_v60 }
 0x65b   : > { %v19068_v19 = vld [vmem:[%s20909_s24 + $0x8f4] sm:$0xf0] }
 0x65c   : > { %v14289_v0 = vld [vmem:[%s20909_s24 + $0xcb8] sm:$0xf]  ;;  %8312 = vmatpush.bf16.msra.mxu2 %v13842_v55  ;;  %v13778_v9 = vor.u32 %v19068_v19, %v13777_v23  ;;  %8287 = vmatpush.bf16.msra.mxu0 %v12754_v6 }
 0x65d   : > { %v19196_v1 = vld [vmem:[%s20909_s24 + $0xcf4] sm:$0xf0] }
 0x65e   : > { %v12689_v5 = vld [vmem:[%s20909_s24 + $0x38] sm:$0xf]  ;;  %8325 = vmatpush.bf16.msra.mxu3 %v14354_v63  ;;  %v14290_v14 = vor.u32 %v19196_v1, %v14289_v0  ;;  %8300 = vmatpush.bf16.msra.mxu1 %v13266_v26 }
 0x65f   : > { %v18796_v3 = vld [vmem:[%s20909_s24 + $0x74] sm:$0xf0] }
 0x660   : > { %v13201_v11 = vld [vmem:[%s20909_s24 + $0x438] sm:$0xf]  ;;  %v12690_v31 = vor.u32 %v18796_v3, %v12689_v5  ;;  %8313 = vmatpush.bf16.msra.mxu2 %v13778_v9 }
 0x661   : > { %v18924_v12 = vld [vmem:[%s20909_s24 + $0x474] sm:$0xf0] }
 0x662   : > { %v13713_v53 = vld [vmem:[%s20909_s24 + $0x838] sm:$0xf]  ;;  %v13202_v39 = vor.u32 %v18924_v12, %v13201_v11  ;;  %8326 = vmatpush.bf16.msra.mxu3 %v14290_v14  ;;  %8288 = vmatpush.bf16.msra.mxu0 %v12690_v31 }
 0x663   : > { %v19052_v16 = vld [vmem:[%s20909_s24 + $0x874] sm:$0xf0] }
 0x664   : > { %v14225_v20 = vld [vmem:[%s20909_s24 + $0xc38] sm:$0xf]  ;;  %v13714_v32 = vor.u32 %v19052_v16, %v13713_v53  ;;  %8301 = vmatpush.bf16.msra.mxu1 %v13202_v39  ;;  %v8082_v39 = vpop.f32.mrf.mxu0 }
 0x665   : > { %v19180_v24 = vld [vmem:[%s20909_s24 + $0xc74] sm:$0xf0]  ;;  %8289 = vmatmul.bf16.vlgmr.msra.gmra.mxu0 %v21033_v50 }
 0x666   : > { %v15185_v27 = vld [vmem:[%s20909_s24 + $0x13b8] sm:$0xf]  ;;  %v14226_v56 = vor.u32 %v19180_v24, %v14225_v20  ;;  %8314 = vmatpush.bf16.msra.mxu2 %v13714_v32 }
 0x667   : > { %v19420_v28 = vld [vmem:[%s20909_s24 + $0x13f4] sm:$0xf0]  ;;  %8302 = vmatmul.bf16.vlgmr.msra.gmra.mxu1 %v21036_v51 }
 0x668   : > { %v15697_v21 = vld [vmem:[%s20909_s24 + $0x17b8] sm:$0xf]  ;;  %v15186_v44 = vor.u32 %v19420_v28, %v15185_v27  ;;  %8327 = vmatpush.bf16.msra.mxu3 %v14226_v56 }
 0x669   : > { %v19548_v35 = vld [vmem:[%s20909_s24 + $0x17f4] sm:$0xf0]  ;;  %8315 = vmatmul.bf16.vlgmr.msra.gmra.mxu2 %v21020_v34 }
 0x66a   : > { %v16209_v42 = vld [vmem:[%s20909_s24 + $0x1bb8] sm:$0xf]  ;;  %v15698_v41 = vor.u32 %v19548_v35, %v15697_v21  ;;  %8333 = vmatpush.bf16.msrb.mxu0 %v15186_v44 }
 0x66b   : > { %v19676_v37 = vld [vmem:[%s20909_s24 + $0x1bf4] sm:$0xf0]  ;;  %8328 = vmatmul.bf16.vlgmr.msra.gmra.mxu3 %v21022_v36 }
 0x66c   : > { %v16721_v40 = vld [vmem:[%s20909_s24 + $0x1fb8] sm:$0xf]  ;;  %v16210_v46 = vor.u32 %v19676_v37, %v16209_v42  ;;  %8346 = vmatpush.bf16.msrb.mxu1 %v15698_v41 }
 0x66d   : > { %v19804_v43 = vld [vmem:[%s20909_s24 + $0x1ff4] sm:$0xf0] }
 0x66e   : > { %v15121_v47 = vld [vmem:[%s20909_s24 + $0x1338] sm:$0xf]  ;;  %v16722_v33 = vor.u32 %v19804_v43, %v16721_v40  ;;  %8359 = vmatpush.bf16.msrb.mxu2 %v16210_v46  ;;  %v8095_v46 = vpop.f32.mrf.mxu1 }
 0x66f   : > { %v19404_v48 = vld [vmem:[%s20909_s24 + $0x1374] sm:$0xf0] }
 0x670   : > { %v15633_v54 = vld [vmem:[%s20909_s24 + $0x1738] sm:$0xf]  ;;  %v15122_v63 = vor.u32 %v19404_v48, %v15121_v47  ;;  %8372 = vmatpush.bf16.msrb.mxu3 %v16722_v33 }
 0x671   : > { %v19532_v55 = vld [vmem:[%s20909_s24 + $0x1774] sm:$0xf0] }
 0x672   : > { %v16145_v58 = vld [vmem:[%s20909_s24 + $0x1b38] sm:$0xf]  ;;  %v15634_v45 = vor.u32 %v19532_v55, %v15633_v54  ;;  %8334 = vmatpush.bf16.msrb.mxu0 %v15122_v63 }
 0x673   : > { %v19660_v59 = vld [vmem:[%s20909_s24 + $0x1b74] sm:$0xf0] }
 0x674   : > { %v16657_v60 = vld [vmem:[%s20909_s24 + $0x1f38] sm:$0xf]  ;;  %v16146_v23 = vor.u32 %v19660_v59, %v16145_v58  ;;  %8347 = vmatpush.bf16.msrb.mxu1 %v15634_v45 }
 0x675   : > { %v19788_v17 = vld [vmem:[%s20909_s24 + $0x1f74] sm:$0xf0] }
 0x676   : > { %v15057_v19 = vld [vmem:[%s20909_s24 + $0x12b8] sm:$0xf]  ;;  %v16658_v6 = vor.u32 %v19788_v17, %v16657_v60  ;;  %8360 = vmatpush.bf16.msrb.mxu2 %v16146_v23 }
 0x677   : > { %v19388_v0 = vld [vmem:[%s20909_s24 + $0x12f4] sm:$0xf0] }
 0x678   : > { %v15569_v1 = vld [vmem:[%s20909_s24 + $0x16b8] sm:$0xf]  ;;  %v15058_v12 = vor.u32 %v19388_v0, %v15057_v19  ;;  %8373 = vmatpush.bf16.msrb.mxu3 %v16658_v6  ;;  %v8108_v0 = vpop.f32.mrf.mxu2 }
 0x679   : > { %v19516_v5 = vld [vmem:[%s20909_s24 + $0x16f4] sm:$0xf0] }
 0x67a   : > { %v16081_v3 = vld [vmem:[%s20909_s24 + $0x1ab8] sm:$0xf]  ;;  %v15570_v13 = vor.u32 %v19516_v5, %v15569_v1  ;;  %8335 = vmatpush.bf16.msrb.mxu0 %v15058_v12 }
 0x67b   : > { %v19644_v26 = vld [vmem:[%s20909_s24 + $0x1af4] sm:$0xf0] }
 0x67c   : > { %v16593_v9 = vld [vmem:[%s20909_s24 + $0x1eb8] sm:$0xf]  ;;  %v16082_v14 = vor.u32 %v19644_v26, %v16081_v3  ;;  %8348 = vmatpush.bf16.msrb.mxu1 %v15570_v13 }
 0x67d   : > { %v19772_v11 = vld [vmem:[%s20909_s24 + $0x1ef4] sm:$0xf0] }
 0x67e   : > { %v14993_v53 = vld [vmem:[%s20909_s24 + $0x1238] sm:$0xf]  ;;  %v16594_v27 = vor.u32 %v19772_v11, %v16593_v9  ;;  %8361 = vmatpush.bf16.msrb.mxu2 %v16082_v14  ;;  %v8121_v9 = vpop.f32.mrf.mxu3  ;;  %v8084_v14 = vpop.f32.mrf.mxu0 }
 0x67f   : > { %v19372_v16 = vld [vmem:[%s20909_s24 + $0x1274] sm:$0xf0]  ;;  %v18884_v14 = vld [vmem:[%s20909_s24 + $0x33c] sm:$0xf] }
 0x680   : > { %v15505_v20 = vld [vmem:[%s20909_s24 + $0x1638] sm:$0xf]  ;;  %v14994_v37 = vor.u32 %v19372_v16, %v14993_v53  ;;  %8374 = vmatpush.bf16.msrb.mxu3 %v16594_v27 }
 0x681   : > { %v23038_v24 = vld [vmem:[%s20915_s17 + $0x8] sm:$0xff] }
 0x682   : > { %v1657_v25 = vperm.slane %v23038_v24, 4  ;;  %v19500_v28 = vld [vmem:[%s20909_s24 + $0x1674] sm:$0xf0]  ;;  %8336 = vmatpush.bf16.msrb.mxu0 %v14994_v37 }
 0x683   : > { %v16017_v21 = vld [vmem:[%s20909_s24 + $0x1a38] sm:$0xf]  ;;  %v15506_v32 = vor.u32 %v19500_v28, %v15505_v20 }
 0x684   : > { %v19628_v31 = vld [vmem:[%s20909_s24 + $0x1a74] sm:$0xf0]  ;;  %v8083_v41 = vadd.f32 %v8082_v39, %v1657_v25 }
 0x685   : > { %v16529_v35 = vld [vmem:[%s20909_s24 + $0x1e38] sm:$0xf]  ;;  %v16018_v40 = vor.u32 %v19628_v31, %v16017_v21  ;;  %8349 = vmatpush.bf16.msrb.mxu1 %v15506_v32  ;;  %v8097_v21 = vpop.f32.mrf.mxu1 }
 0x686   : > { %v19756_v42 = vld [vmem:[%s20909_s24 + $0x1e74] sm:$0xf0]  ;;  %v8096_v59 = vadd.f32 %v8095_v46, %v8083_v41  ;;  %v14099_v21 = vld [vmem:[%s20909_s24 + $0xb78] sm:$0xf0] }
 0x687   : > { %v14929_v43 = vld [vmem:[%s20909_s24 + $0x11b8] sm:$0xf]  ;;  %v16530_v47 = vor.u32 %v19756_v42, %v16529_v35  ;;  %8362 = vmatpush.bf16.msrb.mxu2 %v16018_v40 }
 0x688   : > { %v19356_v56 = vld [vmem:[%s20909_s24 + $0x11f4] sm:$0xf0]  ;;  %v8109_v26 = vadd.f32 %v8108_v0, %v8096_v59  ;;  %v19156_v0 = vld [vmem:[%s20909_s24 + $0xbbc] sm:$0xf] }
 0x689   : > { %v15441_v44 = vld [vmem:[%s20909_s24 + $0x15b8] sm:$0xf]  ;;  %v14930_v60 = vor.u32 %v19356_v56, %v14929_v43  ;;  %8375 = vmatpush.bf16.msrb.mxu3 %v16530_v47 }
 0x68a   : > { %v19484_v48 = vld [vmem:[%s20909_s24 + $0x15f4] sm:$0xf0]  ;;  %v23062_v13 = vadd.f32 %v8121_v9, %v8109_v26  ;;  %v14675_v26 = vld [vmem:[%s20909_s24 + $0xff8] sm:$0xf0] }
 0x68b   : > { %v15953_v54 = vld [vmem:[%s20909_s24 + $0x19b8] sm:$0xf]  ;;  %v15442_v17 = vor.u32 %v19484_v48, %v15441_v44  ;;  %8337 = vmatpush.bf16.msrb.mxu0 %v14930_v60  ;;  %v8123_v60 = vpop.f32.mrf.mxu3 }
 0x68c   : > { %v19612_v33 = vld [vmem:[%s20909_s24 + $0x19f4] sm:$0xf0]  ;;  %v18980_v60 = vld [vmem:[%s20909_s24 + $0x63c] sm:$0xf] }
 0x68d   : > { %v16465_v55 = vld [vmem:[%s20909_s24 + $0x1db8] sm:$0xf]  ;;  %v15954_v63 = vor.u32 %v19612_v33, %v15953_v54  ;;  %8350 = vmatpush.bf16.msrb.mxu1 %v15442_v17  ;;  %v8110_v54 = vpop.f32.mrf.mxu2  ;;  %v18900_v17 = vld [vmem:[%s20909_s24 + $0x3bc] sm:$0xf] }
 0x68e   : > { %v19740_v58 = vld [vmem:[%s20909_s24 + $0x1df4] sm:$0xf0] }
 0x68f   : > { %v14865_v45 = vld [vmem:[%s20909_s24 + $0x1138] sm:$0xf]  ;;  %v16466_v1 = vor.u32 %v19740_v58, %v16465_v55  ;;  %8363 = vmatpush.bf16.msrb.mxu2 %v15954_v63  ;;  %v13139_v63 = vld [vmem:[%s20909_s24 + $0x3f8] sm:$0xf0] }
 0x690   : > { %v19340_v23 = vld [vmem:[%s20909_s24 + $0x1174] sm:$0xf0] }
 0x691   : > { %v15377_v19 = vld [vmem:[%s20909_s24 + $0x1538] sm:$0xf]  ;;  %v14866_v53 = vor.u32 %v19340_v23, %v14865_v45  ;;  %8376 = vmatpush.bf16.msrb.mxu3 %v16466_v1  ;;  %v19028_v45 = vld [vmem:[%s20909_s24 + $0x7bc] sm:$0xf] }
 0x692   : > { %v19468_v6 = vld [vmem:[%s20909_s24 + $0x1574] sm:$0xf0]  ;;  %v14163_v1 = vld [vmem:[%s20909_s24 + $0xbf8] sm:$0xf0] }
 0x693   : > { %v15889_v5 = vld [vmem:[%s20909_s24 + $0x1938] sm:$0xf]  ;;  %v15378_v16 = vor.u32 %v19468_v6, %v15377_v19  ;;  %8338 = vmatpush.bf16.msrb.mxu0 %v14866_v53  ;;  %v13651_v19 = vld [vmem:[%s20909_s24 + $0x7f8] sm:$0xf0]  ;;  %v14166_v53 = vor.u32 %v19156_v0, %v14163_v1 }
 0x694   : > { %v19596_v3 = vld [vmem:[%s20909_s24 + $0x1974] sm:$0xf0]  ;;  %v14483_v0 = vld [vmem:[%s20909_s24 + $0xe78] sm:$0xf0] }
 0x695   : > { %v16401_v11 = vld [vmem:[%s20909_s24 + $0x1d38] sm:$0xf]  ;;  %v15890_v20 = vor.u32 %v19596_v3, %v15889_v5  ;;  %8351 = vmatpush.bf16.msrb.mxu1 %v15378_v16  ;;  %v19284_v3 = vld [vmem:[%s20909_s24 + $0xfbc] sm:$0xf] }
 0x696   : > { %v19724_v12 = vld [vmem:[%s20909_s24 + $0x1d74] sm:$0xf0]  ;;  %v13075_v16 = vld [vmem:[%s20909_s24 + $0x378] sm:$0xf0] }
 0x697   : > { %v14801_v25 = vld [vmem:[%s20909_s24 + $0x10b8] sm:$0xf]  ;;  %v16402_v31 = vor.u32 %v19724_v12, %v16401_v11  ;;  %8364 = vmatpush.bf16.msrb.mxu2 %v15890_v20  ;;  %v13142_v11 = vor.u32 %v18900_v17, %v13139_v63  ;;  %v13654_v12 = vor.u32 %v19028_v45, %v13651_v19  ;;  %v19012_v20 = vld [vmem:[%s20909_s24 + $0x73c] sm:$0xf] }
 0x698   : > { %v19324_v27 = vld [vmem:[%s20909_s24 + $0x10f4] sm:$0xf0]  ;;  %v13459_v63 = vld [vmem:[%s20909_s24 + $0x678] sm:$0xf0] }
 0x699   : > { %v15313_v28 = vld [vmem:[%s20909_s24 + $0x14b8] sm:$0xf]  ;;  %v14802_v40 = vor.u32 %v19324_v27, %v14801_v25  ;;  %8377 = vmatpush.bf16.msrb.mxu3 %v16402_v31  ;;  %v14678_v25 = vor.u32 %v19284_v3, %v14675_v26  ;;  %v13587_v27 = vld [vmem:[%s20909_s24 + $0x778] sm:$0xf0] }
 0x69a   : > { %v19452_v35 = vld [vmem:[%s20909_s24 + $0x14f4] sm:$0xf0]  ;;  %v19268_v31 = vld [vmem:[%s20909_s24 + $0xf3c] sm:$0xf] }
 0x69b   : > { %v15825_v42 = vld [vmem:[%s20909_s24 + $0x18b8] sm:$0xf]  ;;  %v15314_v44 = vor.u32 %v19452_v35, %v15313_v28  ;;  %8339 = vmatpush.bf16.msrb.mxu0 %v14802_v40  ;;  %v19140_v28 = vld [vmem:[%s20909_s24 + $0xb3c] sm:$0xf] }
 0x69c   : > { %v19580_v37 = vld [vmem:[%s20909_s24 + $0x18f4] sm:$0xf0]  ;;  %v14611_v35 = vld [vmem:[%s20909_s24 + $0xf78] sm:$0xf0] }
 0x69d   : > { %v16337_v39 = vld [vmem:[%s20909_s24 + $0x1cb8] sm:$0xf]  ;;  %v15826_v41 = vor.u32 %v19580_v37, %v15825_v42  ;;  %8352 = vmatpush.bf16.msrb.mxu1 %v15314_v44  ;;  %v13078_v42 = vor.u32 %v18884_v14, %v13075_v16  ;;  %v13590_v37 = vor.u32 %v19012_v20, %v13587_v27  ;;  %v13011_v40 = vld [vmem:[%s20909_s24 + $0x2f8] sm:$0xf0] }
 0x69e   : > { %v19708_v32 = vld [vmem:[%s20909_s24 + $0x1cf4] sm:$0xf0]  ;;  %v13523_v44 = vld [vmem:[%s20909_s24 + $0x6f8] sm:$0xf0] }
 0x69f   : > { %v14737_v43 = vld [vmem:[%s20909_s24 + $0x1038] sm:$0xf]  ;;  %v16338_v33 = vor.u32 %v19708_v32, %v16337_v39  ;;  %8365 = vmatpush.bf16.msrb.mxu2 %v15826_v41  ;;  %v14102_v39 = vor.u32 %v19140_v28, %v14099_v21  ;;  %v18868_v32 = vld [vmem:[%s20909_s24 + $0x2bc] sm:$0xf] }
 0x6a0   : > { %v19308_v56 = vld [vmem:[%s20909_s24 + $0x1074] sm:$0xf0]  ;;  %v19124_v41 = vld [vmem:[%s20909_s24 + $0xabc] sm:$0xf]  ;;  %v13014_v54 = vor.u32 %v18868_v32, %v13011_v40  ;;  %v8160_v32 = vpop.f32.mrf.mxu2 }
 0x6a1   : > { %v15249_v46 = vld [vmem:[%s20909_s24 + $0x1438] sm:$0xf]  ;;  %v14738_v23 = vor.u32 %v19308_v56, %v14737_v43  ;;  %8378 = vmatpush.bf16.msrb.mxu3 %v16338_v33  ;;  %v18996_v43 = vld [vmem:[%s20909_s24 + $0x6bc] sm:$0xf]  ;;  %v14614_v56 = vor.u32 %v19268_v31, %v14611_v35 }
 0x6a2   : > { %v19436_v47 = vld [vmem:[%s20909_s24 + $0x1474] sm:$0xf0]  ;;  %v13526_v33 = vor.u32 %v18996_v43, %v13523_v44  ;;  %v19108_v45 = vld [vmem:[%s20909_s24 + $0xa3c] sm:$0xf] }
 0x6a3   : > { %v15761_v48 = vld [vmem:[%s20909_s24 + $0x1838] sm:$0xf]  ;;  %v15250_v6 = vor.u32 %v19436_v47, %v15249_v46  ;;  %8340 = vmatpush.bf16.msrb.mxu0 %v14738_v23  ;;  %v14035_v46 = vld [vmem:[%s20909_s24 + $0xaf8] sm:$0xf0] }
 0x6a4   : > { %v19564_v55 = vld [vmem:[%s20909_s24 + $0x1874] sm:$0xf0]  ;;  %v19252_v47 = vld [vmem:[%s20909_s24 + $0xebc] sm:$0xf] }
 0x6a5   : > { %v16273_v58 = vld [vmem:[%s20909_s24 + $0x1c38] sm:$0xf]  ;;  %v15762_v5 = vor.u32 %v19564_v55, %v15761_v48  ;;  %8353 = vmatpush.bf16.msrb.mxu1 %v15250_v6  ;;  %v14547_v48 = vld [vmem:[%s20909_s24 + $0xef8] sm:$0xf0]  ;;  %v14038_v55 = vor.u32 %v19124_v41, %v14035_v46  ;;  %v8134_v6 = vpop.f32.mrf.mxu0  ;;  %v8173_v46 = vpop.f32.mrf.mxu3 }
 0x6a6   : > { %v19692_v59 = vld [vmem:[%s20909_s24 + $0x1c74] sm:$0xf0]  ;;  %8341 = vmatmul.bf16.vlgmr.msrb.gmra.mxu0 %v21090_v7  ;;  %v14550_v17 = vor.u32 %v19252_v47, %v14547_v48  ;;  %v13971_v23 = vld [vmem:[%s20909_s24 + $0xa78] sm:$0xf0] }
 0x6a7   : > { %v16274_v9 = vor.u32 %v19692_v59, %v16273_v58  ;;  %8366 = vmatpush.bf16.msrb.mxu2 %v15762_v5  ;;  %8385 = vmatpush.bf16.msra.mxu0 %v13142_v11  ;;  %v18852_v58 = vld [vmem:[%s20909_s24 + $0x23c] sm:$0xf]  ;;  %v13462_v5 = vor.u32 %v18980_v60, %v13459_v63  ;;  %v13974_v3 = vor.u32 %v19108_v45, %v13971_v23 }
 0x6a8   : > { %8354 = vmatmul.bf16.vlgmr.msrb.gmra.mxu1 %v21094_v10  ;;  %v12947_v59 = vld [vmem:[%s20909_s24 + $0x278] sm:$0xf0] }
 0x6a9   : > { %8379 = vmatpush.bf16.msrb.mxu3 %v16274_v9  ;;  %8398 = vmatpush.bf16.msra.mxu1 %v13654_v12  ;;  %v19236_v19 = vld [vmem:[%s20909_s24 + $0xe3c] sm:$0xf]  ;;  %v12950_v1 = vor.u32 %v18852_v58, %v12947_v59  ;;  %v8135_v12 = vadd.f32 %v8134_v6, %v23062_v13 }
 0x6aa   : > { %8367 = vmatmul.bf16.vlgmr.msrb.gmra.mxu2 %v21086_v4  ;;  %v18836_v26 = vld [vmem:[%s20909_s24 + $0x1bc] sm:$0xf]  ;;  %v14486_v14 = vor.u32 %v19236_v19, %v14483_v0 }
 0x6ab   : > { %8411 = vmatpush.bf16.msra.mxu2 %v14166_v53  ;;  %8386 = vmatpush.bf16.msra.mxu0 %v13078_v42  ;;  %v12883_v9 = vld [vmem:[%s20909_s24 + $0x1f8] sm:$0xf0]  ;;  %v8147_v53 = vpop.f32.mrf.mxu1 }
 0x6ac   : > { %8380 = vmatmul.bf16.vlgmr.msrb.gmra.mxu3 %v21092_v8  ;;  %v18964_v11 = vld [vmem:[%s20909_s24 + $0x5bc] sm:$0xf]  ;;  %v8148_v21 = vadd.f32 %v8147_v53, %v8135_v12  ;;  %v12886_v31 = vor.u32 %v18836_v26, %v12883_v9 }
 0x6ad   : > { %8424 = vmatpush.bf16.msra.mxu3 %v14678_v25  ;;  %8399 = vmatpush.bf16.msra.mxu1 %v13590_v37  ;;  %v13395_v16 = vld [vmem:[%s20909_s24 + $0x5f8] sm:$0xf0] }
 0x6ae   : > { %v19092_v20 = vld [vmem:[%s20909_s24 + $0x9bc] sm:$0xf]  ;;  %v13398_v13 = vor.u32 %v18964_v11, %v13395_v16  ;;  %v8161_v41 = vadd.f32 %v8160_v32, %v8148_v21 }
 0x6af   : > { %8412 = vmatpush.bf16.msra.mxu2 %v14102_v39  ;;  %8387 = vmatpush.bf16.msra.mxu0 %v13014_v54  ;;  %v13907_v25 = vld [vmem:[%s20909_s24 + $0x9f8] sm:$0xf0] }
 0x6b0   : > { %v19220_v27 = vld [vmem:[%s20909_s24 + $0xdbc] sm:$0xf]  ;;  %v13910_v35 = vor.u32 %v19092_v20, %v13907_v25  ;;  %v8162_v20 = vpop.f32.mrf.mxu2 }
 0x6b1   : > { %8425 = vmatpush.bf16.msra.mxu3 %v14614_v56  ;;  %8400 = vmatpush.bf16.msra.mxu1 %v13526_v33  ;;  %v14419_v28 = vld [vmem:[%s20909_s24 + $0xdf8] sm:$0xf0]  ;;  %v23133_v33 = vadd.f32 %v8173_v46, %v8161_v41 }
 0x6b2   : > { %v18820_v42 = vld [vmem:[%s20909_s24 + $0x13c] sm:$0xf]  ;;  %v14422_v40 = vor.u32 %v19220_v27, %v14419_v28 }
 0x6b3   : > { %8413 = vmatpush.bf16.msra.mxu2 %v14038_v55  ;;  %8388 = vmatpush.bf16.msra.mxu0 %v12950_v1  ;;  %v12819_v37 = vld [vmem:[%s20909_s24 + $0x178] sm:$0xf0]  ;;  %v8136_v55 = vpop.f32.mrf.mxu0  ;;  %v8149_v45 = vpop.f32.mrf.mxu1 }
 0x6b4   : > { %v18948_v39 = vld [vmem:[%s20909_s24 + $0x53c] sm:$0xf]  ;;  %v12822_v54 = vor.u32 %v18820_v42, %v12819_v37 }
 0x6b5   : > { %8426 = vmatpush.bf16.msra.mxu3 %v14550_v17  ;;  %8401 = vmatpush.bf16.msra.mxu1 %v13462_v5  ;;  %v13331_v43 = vld [vmem:[%s20909_s24 + $0x578] sm:$0xf0] }
 0x6b6   : > { %v19076_v56 = vld [vmem:[%s20909_s24 + $0x93c] sm:$0xf]  ;;  %v13334_v58 = vor.u32 %v18948_v39, %v13331_v43 }
 0x6b7   : > { %8414 = vmatpush.bf16.msra.mxu2 %v13974_v3  ;;  %v13843_v44 = vld [vmem:[%s20909_s24 + $0x978] sm:$0xf0]  ;;  %8389 = vmatpush.bf16.msra.mxu0 %v12886_v31  ;;  %v8175_v31 = vpop.f32.mrf.mxu3 }
 0x6b8   : > { %v19204_v47 = vld [vmem:[%s20909_s24 + $0xd3c] sm:$0xf]  ;;  %v13846_v59 = vor.u32 %v19076_v56, %v13843_v44 }
 0x6b9   : > { %8427 = vmatpush.bf16.msra.mxu3 %v14486_v14  ;;  %v14355_v48 = vld [vmem:[%s20909_s24 + $0xd78] sm:$0xf0]  ;;  %8402 = vmatpush.bf16.msra.mxu1 %v13398_v13 }
 0x6ba   : > { %v18804_v60 = vld [vmem:[%s20909_s24 + $0xbc] sm:$0xf]  ;;  %v14358_v23 = vor.u32 %v19204_v47, %v14355_v48 }
 0x6bb   : > { %8415 = vmatpush.bf16.msra.mxu2 %v13910_v35  ;;  %v12755_v17 = vld [vmem:[%s20909_s24 + $0xf8] sm:$0xf0]  ;;  %8390 = vmatpush.bf16.msra.mxu0 %v12822_v54 }
 0x6bc   : > { %v18932_v63 = vld [vmem:[%s20909_s24 + $0x4bc] sm:$0xf]  ;;  %v12758_v3 = vor.u32 %v18804_v60, %v12755_v17 }
 0x6bd   : > { %8428 = vmatpush.bf16.msra.mxu3 %v14422_v40  ;;  %v13267_v19 = vld [vmem:[%s20909_s24 + $0x4f8] sm:$0xf0]  ;;  %8403 = vmatpush.bf16.msra.mxu1 %v13334_v58 }
 0x6be   : > { %v19060_v0 = vld [vmem:[%s20909_s24 + $0x8bc] sm:$0xf]  ;;  %v13270_v11 = vor.u32 %v18932_v63, %v13267_v19 }
 0x6bf   : > { %v13779_v1 = vld [vmem:[%s20909_s24 + $0x8f8] sm:$0xf0]  ;;  %8416 = vmatpush.bf16.msra.mxu2 %v13846_v59  ;;  %8391 = vmatpush.bf16.msra.mxu0 %v12758_v3 }
 0x6c0   : > { %v19188_v6 = vld [vmem:[%s20909_s24 + $0xcbc] sm:$0xf]  ;;  %v13782_v12 = vor.u32 %v19060_v0, %v13779_v1 }
 0x6c1   : > { %v14291_v5 = vld [vmem:[%s20909_s24 + $0xcf8] sm:$0xf0]  ;;  %8429 = vmatpush.bf16.msra.mxu3 %v14358_v23  ;;  %8404 = vmatpush.bf16.msra.mxu1 %v13270_v11 }
 0x6c2   : > { %v18788_v26 = vld [vmem:[%s20909_s24 + $0x3c] sm:$0xf]  ;;  %v14294_v25 = vor.u32 %v19188_v6, %v14291_v5 }
 0x6c3   : > { %v12691_v9 = vld [vmem:[%s20909_s24 + $0x78] sm:$0xf0]  ;;  %8417 = vmatpush.bf16.msra.mxu2 %v13782_v12 }
 0x6c4   : > { %v18916_v53 = vld [vmem:[%s20909_s24 + $0x43c] sm:$0xf]  ;;  %v12694_v37 = vor.u32 %v18788_v26, %v12691_v9 }
 0x6c5   : > { %v13203_v14 = vld [vmem:[%s20909_s24 + $0x478] sm:$0xf0]  ;;  %8430 = vmatpush.bf16.msra.mxu3 %v14294_v25 }
 0x6c6   : > { %v19044_v16 = vld [vmem:[%s20909_s24 + $0x83c] sm:$0xf]  ;;  %v13206_v43 = vor.u32 %v18916_v53, %v13203_v14  ;;  %8392 = vmatpush.bf16.msra.mxu0 %v12694_v37 }
 0x6c7   : > { %v13715_v27 = vld [vmem:[%s20909_s24 + $0x878] sm:$0xf0] }
 0x6c8   : > { %v19172_v28 = vld [vmem:[%s20909_s24 + $0xc3c] sm:$0xf]  ;;  %v13718_v56 = vor.u32 %v19044_v16, %v13715_v27  ;;  %8405 = vmatpush.bf16.msra.mxu1 %v13206_v43 }
 0x6c9   : > { %v14227_v21 = vld [vmem:[%s20909_s24 + $0xc78] sm:$0xf0]  ;;  %8393 = vmatmul.bf16.vlgmr.msra.gmra.mxu0 %v21033_v50  ;;  %v1658_v50 = vperm.slane %v23038_v24, 5 }
 0x6ca   : > { %v19412_v13 = vld [vmem:[%s20909_s24 + $0x13bc] sm:$0xf]  ;;  %v14230_v46 = vor.u32 %v19172_v28, %v14227_v21  ;;  %8418 = vmatpush.bf16.msra.mxu2 %v13718_v56 }
 0x6cb   : > { %v15187_v35 = vld [vmem:[%s20909_s24 + $0x13f8] sm:$0xf0]  ;;  %8406 = vmatmul.bf16.vlgmr.msra.gmra.mxu1 %v21036_v51 }
 0x6cc   : > { %v19540_v42 = vld [vmem:[%s20909_s24 + $0x17bc] sm:$0xf]  ;;  %v15190_v47 = vor.u32 %v19412_v13, %v15187_v35  ;;  %8431 = vmatpush.bf16.msra.mxu3 %v14230_v46 }
 0x6cd   : > { %v15699_v39 = vld [vmem:[%s20909_s24 + $0x17f8] sm:$0xf0]  ;;  %8419 = vmatmul.bf16.vlgmr.msra.gmra.mxu2 %v21020_v34 }
 0x6ce   : > { %v19668_v32 = vld [vmem:[%s20909_s24 + $0x1bbc] sm:$0xf]  ;;  %v15702_v48 = vor.u32 %v19540_v42, %v15699_v39  ;;  %8437 = vmatpush.bf16.msrb.mxu0 %v15190_v47  ;;  %v8186_v39 = vpop.f32.mrf.mxu0 }
 0x6cf   : > { %v16211_v40 = vld [vmem:[%s20909_s24 + $0x1bf8] sm:$0xf0]  ;;  %8432 = vmatmul.bf16.vlgmr.msra.gmra.mxu3 %v21022_v36 }
 0x6d0   : > { %v19796_v44 = vld [vmem:[%s20909_s24 + $0x1fbc] sm:$0xf]  ;;  %v16214_v54 = vor.u32 %v19668_v32, %v16211_v40  ;;  %8450 = vmatpush.bf16.msrb.mxu1 %v15702_v48 }
 0x6d1   : > { %v16723_v41 = vld [vmem:[%s20909_s24 + $0x1ff8] sm:$0xf0] }
 0x6d2   : > { %v19396_v55 = vld [vmem:[%s20909_s24 + $0x133c] sm:$0xf]  ;;  %v16726_v60 = vor.u32 %v19796_v44, %v16723_v41  ;;  %8463 = vmatpush.bf16.msrb.mxu2 %v16214_v54  ;;  %v8187_v44 = vadd.f32 %v8186_v39, %v1658_v50  ;;  %v8199_v41 = vpop.f32.mrf.mxu1 }
 0x6d3   : > { %v15123_v58 = vld [vmem:[%s20909_s24 + $0x1378] sm:$0xf0] }
 0x6d4   : > { %v19524_v59 = vld [vmem:[%s20909_s24 + $0x173c] sm:$0xf]  ;;  %v15126_v0 = vor.u32 %v19396_v55, %v15123_v58  ;;  %8476 = vmatpush.bf16.msrb.mxu3 %v16726_v60 }
 0x6d5   : > { %v15635_v17 = vld [vmem:[%s20909_s24 + $0x1778] sm:$0xf0] }
 0x6d6   : > { %v19652_v63 = vld [vmem:[%s20909_s24 + $0x1b3c] sm:$0xf]  ;;  %v15638_v1 = vor.u32 %v19524_v59, %v15635_v17  ;;  %8438 = vmatpush.bf16.msrb.mxu0 %v15126_v0  ;;  %v8200_v59 = vadd.f32 %v8199_v41, %v8187_v44  ;;  %v8212_v0 = vpop.f32.mrf.mxu2 }
 0x6d7   : > { %v16147_v45 = vld [vmem:[%s20909_s24 + $0x1b78] sm:$0xf0] }
 0x6d8   : > { %v19780_v23 = vld [vmem:[%s20909_s24 + $0x1f3c] sm:$0xf]  ;;  %v16150_v6 = vor.u32 %v19652_v63, %v16147_v45  ;;  %8451 = vmatpush.bf16.msrb.mxu1 %v15638_v1 }
 0x6d9   : > { %v16659_v19 = vld [vmem:[%s20909_s24 + $0x1f78] sm:$0xf0] }
 0x6da   : > { %v19380_v5 = vld [vmem:[%s20909_s24 + $0x12bc] sm:$0xf]  ;;  %v16662_v9 = vor.u32 %v19780_v23, %v16659_v19  ;;  %8464 = vmatpush.bf16.msrb.mxu2 %v16150_v6 }
 0x6db   : > { %v15059_v3 = vld [vmem:[%s20909_s24 + $0x12f8] sm:$0xf0] }
 0x6dc   : > { %v19508_v26 = vld [vmem:[%s20909_s24 + $0x16bc] sm:$0xf]  ;;  %v15062_v20 = vor.u32 %v19380_v5, %v15059_v3  ;;  %8477 = vmatpush.bf16.msrb.mxu3 %v16662_v9  ;;  %v8225_v9 = vpop.f32.mrf.mxu3 }
 0x6dd   : > { %v15571_v11 = vld [vmem:[%s20909_s24 + $0x16f8] sm:$0xf0] }
 0x6de   : > { %v19636_v12 = vld [vmem:[%s20909_s24 + $0x1abc] sm:$0xf]  ;;  %v15574_v27 = vor.u32 %v19508_v26, %v15571_v11  ;;  %8439 = vmatpush.bf16.msrb.mxu0 %v15062_v20  ;;  %v8213_v26 = vadd.f32 %v8212_v0, %v8200_v59  ;;  %v8214_v44 = vpop.f32.mrf.mxu2  ;;  %v16969_v59 = vld [vmem:[%s20917_s23 + $0x1e0] sm:$0xf] }
 0x6df   : > { %v16083_v53 = vld [vmem:[%s20909_s24 + $0x1af8] sm:$0xf0]  ;;  %v17225_v0 = vld [vmem:[%s20917_s23 + $0x3e0] sm:$0xf]  ;;  %v19855_v44 = vld [vmem:[%s20917_s23 + $0x18c] sm:$0xf0] }
 0x6e0   : > { %v19764_v14 = vld [vmem:[%s20909_s24 + $0x1ebc] sm:$0xf]  ;;  %v16086_v34 = vor.u32 %v19636_v12, %v16083_v53  ;;  %8452 = vmatpush.bf16.msrb.mxu1 %v15574_v27 }
 0x6e1   : > { %v16595_v16 = vld [vmem:[%s20909_s24 + $0x1ef8] sm:$0xf0] }
 0x6e2   : > { %v19364_v25 = vld [vmem:[%s20909_s24 + $0x123c] sm:$0xf]  ;;  %v16598_v36 = vor.u32 %v19764_v14, %v16595_v16  ;;  %8465 = vmatpush.bf16.msrb.mxu2 %v16086_v34  ;;  %v23204_v14 = vadd.f32 %v8225_v9, %v8213_v26  ;;  %v8188_v16 = vpop.f32.mrf.mxu0  ;;  %v16825_v9 = vld [vmem:[%s20917_s23 + $0xc0] sm:$0xf] }
 0x6e3   : > { %v14995_v28 = vld [vmem:[%s20909_s24 + $0x1278] sm:$0xf0]  ;;  %v19863_v16 = vld [vmem:[%s20917_s23 + $0x1cc] sm:$0xf0] }
 0x6e4   : > { %v19492_v21 = vld [vmem:[%s20909_s24 + $0x163c] sm:$0xf]  ;;  %v14998_v51 = vor.u32 %v19364_v25, %v14995_v28  ;;  %8478 = vmatpush.bf16.msrb.mxu3 %v16598_v36 }
 0x6e5   : > { %v15507_v31 = vld [vmem:[%s20909_s24 + $0x1678] sm:$0xf0] }
 0x6e6   : > { %v19620_v13 = vld [vmem:[%s20909_s24 + $0x1a3c] sm:$0xf]  ;;  %v15510_v24 = vor.u32 %v19492_v21, %v15507_v31  ;;  %8440 = vmatpush.bf16.msrb.mxu0 %v14998_v51  ;;  %v8201_v21 = vpop.f32.mrf.mxu1 }
 0x6e7   : > { %v16019_v35 = vld [vmem:[%s20909_s24 + $0x1a78] sm:$0xf0] }
 0x6e8   : > { %v19748_v42 = vld [vmem:[%s20909_s24 + $0x1e3c] sm:$0xf]  ;;  %v16022_v32 = vor.u32 %v19620_v13, %v16019_v35  ;;  %8453 = vmatpush.bf16.msrb.mxu1 %v15510_v24 }
 0x6e9   : > { %v16531_v37 = vld [vmem:[%s20909_s24 + $0x1e78] sm:$0xf0] }
 0x6ea   : > { %v19348_v40 = vld [vmem:[%s20909_s24 + $0x11bc] sm:$0xf]  ;;  %v16534_v46 = vor.u32 %v19748_v42, %v16531_v37  ;;  %8466 = vmatpush.bf16.msrb.mxu2 %v16022_v32 }
 0x6eb   : > { %v14931_v43 = vld [vmem:[%s20909_s24 + $0x11f8] sm:$0xf0] }
 0x6ec   : > { %v19476_v56 = vld [vmem:[%s20909_s24 + $0x15bc] sm:$0xf]  ;;  %v14934_v60 = vor.u32 %v19348_v40, %v14931_v43  ;;  %8479 = vmatpush.bf16.msrb.mxu3 %v16534_v46 }
 0x6ed   : > { %v15443_v47 = vld [vmem:[%s20909_s24 + $0x15f8] sm:$0xf0] }
 0x6ee   : > { %v19604_v48 = vld [vmem:[%s20909_s24 + $0x19bc] sm:$0xf]  ;;  %v15446_v17 = vor.u32 %v19476_v56, %v15443_v47  ;;  %8441 = vmatpush.bf16.msrb.mxu0 %v14934_v60 }
 0x6ef   : > { %v15955_v54 = vld [vmem:[%s20909_s24 + $0x19f8] sm:$0xf0] }
 0x6f0   : > { %v19732_v55 = vld [vmem:[%s20909_s24 + $0x1dbc] sm:$0xf]  ;;  %v15958_v63 = vor.u32 %v19604_v48, %v15955_v54  ;;  %8454 = vmatpush.bf16.msrb.mxu1 %v15446_v17  ;;  %v8227_v54 = vpop.f32.mrf.mxu3  ;;  %v19867_v17 = vld [vmem:[%s20917_s23 + $0x1ec] sm:$0xf0] }
 0x6f1   : > { %v16467_v58 = vld [vmem:[%s20909_s24 + $0x1df8] sm:$0xf0]  ;;  %v8238_v54 = vpop.f32.mrf.mxu0 }
 0x6f2   : > { %v19332_v45 = vld [vmem:[%s20909_s24 + $0x113c] sm:$0xf]  ;;  %v16470_v1 = vor.u32 %v19732_v55, %v16467_v58  ;;  %8467 = vmatpush.bf16.msrb.mxu2 %v15958_v63  ;;  %v16841_v55 = vld [vmem:[%s20917_s23 + $0xe0] sm:$0xf]  ;;  %v19835_v58 = vld [vmem:[%s20917_s23 + $0xec] sm:$0xf0] }
 0x6f3   : > { %v14867_v23 = vld [vmem:[%s20909_s24 + $0x1178] sm:$0xf0]  ;;  %v17097_v63 = vld [vmem:[%s20917_s23 + $0x2e0] sm:$0xf] }
 0x6f4   : > { %v19460_v19 = vld [vmem:[%s20909_s24 + $0x153c] sm:$0xf]  ;;  %v14870_v53 = vor.u32 %v19332_v45, %v14867_v23  ;;  %8480 = vmatpush.bf16.msrb.mxu3 %v16470_v1  ;;  %v19899_v45 = vld [vmem:[%s20917_s23 + $0x2ec] sm:$0xf0] }
 0x6f5   : > { %v15379_v6 = vld [vmem:[%s20909_s24 + $0x1578] sm:$0xf0]  ;;  %v19931_v1 = vld [vmem:[%s20917_s23 + $0x3ec] sm:$0xf0]  ;;  %v17098_v26 = vor.u32 %v19899_v45, %v17097_v63  ;;  %v8239_v63 = vadd.f32 %v8238_v54, %v23204_v14  ;;  %v8251_v45 = vpop.f32.mrf.mxu1 }
 0x6f6   : > { %v19588_v5 = vld [vmem:[%s20909_s24 + $0x193c] sm:$0xf]  ;;  %v15382_v20 = vor.u32 %v19460_v19, %v15379_v6  ;;  %8442 = vmatpush.bf16.msrb.mxu0 %v14870_v53  ;;  %v17226_v53 = vor.u32 %v19931_v1, %v17225_v0  ;;  %v17033_v0 = vld [vmem:[%s20917_s23 + $0x260] sm:$0xf]  ;;  %v19883_v1 = vld [vmem:[%s20917_s23 + $0x26c] sm:$0xf0] }
 0x6f7   : > { %v15891_v3 = vld [vmem:[%s20909_s24 + $0x1978] sm:$0xf0]  ;;  %v19839_v54 = vld [vmem:[%s20917_s23 + $0x10c] sm:$0xf0] }
 0x6f8   : > { %v19716_v11 = vld [vmem:[%s20909_s24 + $0x1d3c] sm:$0xf]  ;;  %v15894_v25 = vor.u32 %v19588_v5, %v15891_v3  ;;  %8455 = vmatpush.bf16.msrb.mxu1 %v15382_v20  ;;  %v16842_v5 = vor.u32 %v19835_v58, %v16841_v55  ;;  %v16970_v3 = vor.u32 %v19867_v17, %v16969_v59  ;;  %v17081_v20 = vld [vmem:[%s20917_s23 + $0x2c0] sm:$0xf] }
 0x6f9   : > { %v16403_v12 = vld [vmem:[%s20909_s24 + $0x1d78] sm:$0xf0]  ;;  %v16777_v59 = vld [vmem:[%s20917_s23 + $0x60] sm:$0xf] }
 0x6fa   : > { %v19316_v27 = vld [vmem:[%s20909_s24 + $0x10bc] sm:$0xf]  ;;  %v16406_v50 = vor.u32 %v19716_v11, %v16403_v12  ;;  %8468 = vmatpush.bf16.msrb.mxu2 %v15894_v25  ;;  %v19831_v11 = vld [vmem:[%s20917_s23 + $0xcc] sm:$0xf0]  ;;  %v16953_v12 = vld [vmem:[%s20917_s23 + $0x1c0] sm:$0xf] }
 0x6fb   : > { %v14803_v34 = vld [vmem:[%s20909_s24 + $0x10f8] sm:$0xf0]  ;;  %v19895_v25 = vld [vmem:[%s20917_s23 + $0x2cc] sm:$0xf0]  ;;  %v16954_v21 = vor.u32 %v19863_v16, %v16953_v12  ;;  %v16905_v17 = vld [vmem:[%s20917_s23 + $0x160] sm:$0xf]  ;;  %v8264_v16 = vpop.f32.mrf.mxu2 }
 0x6fc   : > { %v19444_v28 = vld [vmem:[%s20909_s24 + $0x14bc] sm:$0xf]  ;;  %v14806_v37 = vor.u32 %v19316_v27, %v14803_v34  ;;  %8481 = vmatpush.bf16.msrb.mxu3 %v16406_v50  ;;  %v17209_v27 = vld [vmem:[%s20917_s23 + $0x3c0] sm:$0xf]  ;;  %v19927_v34 = vld [vmem:[%s20917_s23 + $0x3cc] sm:$0xf0]  ;;  %v17082_v50 = vor.u32 %v19895_v25, %v17081_v20 }
 0x6fd   : > { %v15315_v36 = vld [vmem:[%s20909_s24 + $0x14f8] sm:$0xf0]  ;;  %v19815_v12 = vld [vmem:[%s20917_s23 + $0x4c] sm:$0xf0] }
 0x6fe   : > { %v19572_v31 = vld [vmem:[%s20909_s24 + $0x18bc] sm:$0xf]  ;;  %v15318_v24 = vor.u32 %v19444_v28, %v15315_v36  ;;  %8443 = vmatpush.bf16.msrb.mxu0 %v14806_v37  ;;  %v16826_v28 = vor.u32 %v19831_v11, %v16825_v9  ;;  %v16809_v36 = vld [vmem:[%s20917_s23 + $0xa0] sm:$0xf]  ;;  %v17034_v9 = vor.u32 %v19883_v1, %v17033_v0  ;;  %v19847_v25 = vld [vmem:[%s20917_s23 + $0x14c] sm:$0xf0] }
 0x6ff   : > { %v15827_v13 = vld [vmem:[%s20909_s24 + $0x18f8] sm:$0xf0]  ;;  %v17065_v37 = vld [vmem:[%s20917_s23 + $0x2a0] sm:$0xf] }
 0x700   : > { %v19700_v35 = vld [vmem:[%s20909_s24 + $0x1cbc] sm:$0xf]  ;;  %v15830_v32 = vor.u32 %v19572_v31, %v15827_v13  ;;  %8456 = vmatpush.bf16.msrb.mxu1 %v15318_v24  ;;  %v19827_v31 = vld [vmem:[%s20917_s23 + $0xac] sm:$0xf0]  ;;  %v16937_v13 = vld [vmem:[%s20917_s23 + $0x1a0] sm:$0xf] }
 0x701   : > { %v16339_v42 = vld [vmem:[%s20909_s24 + $0x1cf8] sm:$0xf0]  ;;  %v19923_v24 = vld [vmem:[%s20917_s23 + $0x3ac] sm:$0xf0]  ;;  %v16761_v11 = vld [vmem:[%s20917_s23 + $0x40] sm:$0xf] }
 0x702   : > { %v19300_v51 = vld [vmem:[%s20909_s24 + $0x103c] sm:$0xf]  ;;  %v16342_v41 = vor.u32 %v19700_v35, %v16339_v42  ;;  %8469 = vmatpush.bf16.msrb.mxu2 %v15830_v32  ;;  %v17210_v35 = vor.u32 %v19927_v34, %v17209_v27  ;;  %v19859_v42 = vld [vmem:[%s20917_s23 + $0x1ac] sm:$0xf0]  ;;  %v17017_v27 = vld [vmem:[%s20917_s23 + $0x240] sm:$0xf] }
 0x703   : > { %v14739_v39 = vld [vmem:[%s20909_s24 + $0x1078] sm:$0xf0]  ;;  %v16938_v32 = vor.u32 %v19859_v42, %v16937_v13  ;;  %v19879_v34 = vld [vmem:[%s20917_s23 + $0x24c] sm:$0xf0]  ;;  %v17481_v0 = vld [vmem:[%s20917_s23 + $0x5e0] sm:$0xf] }
 0x704   : > { %v19428_v40 = vld [vmem:[%s20909_s24 + $0x143c] sm:$0xf]  ;;  %v14742_v60 = vor.u32 %v19300_v51, %v14739_v39  ;;  %8482 = vmatpush.bf16.msrb.mxu3 %v16342_v41  ;;  %v19891_v51 = vld [vmem:[%s20917_s23 + $0x2ac] sm:$0xf0]  ;;  %v17193_v39 = vld [vmem:[%s20917_s23 + $0x3a0] sm:$0xf] }
 0x705   : > { %v15251_v43 = vld [vmem:[%s20909_s24 + $0x1478] sm:$0xf0]  ;;  %v17049_v41 = vld [vmem:[%s20917_s23 + $0x280] sm:$0xf] }
 0x706   : > { %v19556_v56 = vld [vmem:[%s20909_s24 + $0x183c] sm:$0xf]  ;;  %v15254_v23 = vor.u32 %v19428_v40, %v15251_v43  ;;  %8444 = vmatpush.bf16.msrb.mxu0 %v14742_v60  ;;  %v17066_v40 = vor.u32 %v19891_v51, %v17065_v37  ;;  %v16793_v43 = vld [vmem:[%s20917_s23 + $0x80] sm:$0xf]  ;;  %v19819_v60 = vld [vmem:[%s20917_s23 + $0x6c] sm:$0xf0]  ;;  %v17018_v37 = vor.u32 %v19879_v34, %v17017_v27 }
 0x707   : > { %v15763_v46 = vld [vmem:[%s20909_s24 + $0x1878] sm:$0xf0]  ;;  %v16745_v51 = vld [vmem:[%s20917_s23 + $0x20] sm:$0xf] }
 0x708   : > { %v19684_v47 = vld [vmem:[%s20909_s24 + $0x1c3c] sm:$0xf]  ;;  %v15766_v19 = vor.u32 %v19556_v56, %v15763_v46  ;;  %8457 = vmatpush.bf16.msrb.mxu1 %v15254_v23  ;;  %v19823_v56 = vld [vmem:[%s20917_s23 + $0x8c] sm:$0xf0]  ;;  %v17337_v34 = vld [vmem:[%s20917_s23 + $0x4c0] sm:$0xf] }
 0x709   : > { %v16275_v48 = vld [vmem:[%s20909_s24 + $0x1c78] sm:$0xf0]  ;;  %8445 = vmatmul.bf16.vlgmr.msrb.gmra.mxu0 %v21090_v7  ;;  %v16810_v7 = vor.u32 %v19827_v31, %v16809_v36  ;;  %v19887_v46 = vld [vmem:[%s20917_s23 + $0x28c] sm:$0xf0]  ;;  %v16762_v31 = vor.u32 %v19815_v12, %v16761_v11  ;;  %v17737_v12 = vld [vmem:[%s20917_s23 + $0x7e0] sm:$0xf] }
 0x70a   : > { %v16278_v6 = vor.u32 %v19684_v47, %v16275_v48  ;;  %8470 = vmatpush.bf16.msrb.mxu2 %v15766_v19  ;;  %11597 = vmatpush.bf16.msra.mxu0 %v16842_v5  ;;  %v17177_v47 = vld [vmem:[%s20917_s23 + $0x380] sm:$0xf]  ;;  %v16794_v48 = vor.u32 %v19823_v56, %v16793_v43  ;;  %v17050_v58 = vor.u32 %v19887_v46, %v17049_v41  ;;  %v19851_v19 = vld [vmem:[%s20917_s23 + $0x16c] sm:$0xf0] }
 0x70b   : > { %8458 = vmatmul.bf16.vlgmr.msrb.gmra.mxu1 %v21094_v10  ;;  %v16921_v10 = vld [vmem:[%s20917_s23 + $0x180] sm:$0xf]  ;;  %v19915_v5 = vld [vmem:[%s20917_s23 + $0x36c] sm:$0xf0]  ;;  %v16906_v14 = vor.u32 %v19851_v19, %v16905_v17 }
 0x70c   : > { %8483 = vmatpush.bf16.msrb.mxu3 %v16278_v6  ;;  %11610 = vmatpush.bf16.msra.mxu1 %v16970_v3  ;;  %v16922_v55 = vor.u32 %v19855_v44, %v16921_v10  ;;  %v17161_v6 = vld [vmem:[%s20917_s23 + $0x360] sm:$0xf]  ;;  %v8252_v3 = vadd.f32 %v8251_v45, %v8239_v63  ;;  %v19911_v36 = vld [vmem:[%s20917_s23 + $0x34c] sm:$0xf0] }
 0x70d   : > { %8471 = vmatmul.bf16.vlgmr.msrb.gmra.mxu2 %v21086_v4  ;;  %v17194_v4 = vor.u32 %v19923_v24, %v17193_v39  ;;  %v17162_v20 = vor.u32 %v19915_v5, %v17161_v6  ;;  %v19811_v39 = vld [vmem:[%s20917_s23 + $0x2c] sm:$0xf0]  ;;  %v16873_v24 = vld [vmem:[%s20917_s23 + $0x120] sm:$0xf] }
 0x70e   : > { %11623 = vmatpush.bf16.msra.mxu2 %v17098_v26  ;;  %11598 = vmatpush.bf16.msra.mxu0 %v16826_v28  ;;  %v16778_v26 = vor.u32 %v19819_v60, %v16777_v59  ;;  %v8265_v28 = vadd.f32 %v8264_v16, %v8252_v3  ;;  %v17001_v43 = vld [vmem:[%s20917_s23 + $0x220] sm:$0xf]  ;;  %v19875_v56 = vld [vmem:[%s20917_s23 + $0x22c] sm:$0xf0]  ;;  %v16746_v44 = vor.u32 %v19811_v39, %v16745_v51  ;;  %v8491_v16 = vmax.f32 %v21698_v22, 0.0 }
 0x70f   : > { %8484 = vmatmul.bf16.vlgmr.msrb.gmra.mxu3 %v21092_v8  ;;  %v19919_v8 = vld [vmem:[%s20917_s23 + $0x38c] sm:$0xf0]  ;;  %v17129_v10 = vld [vmem:[%s20917_s23 + $0x320] sm:$0xf] }
 0x710   : > { %11636 = vmatpush.bf16.msra.mxu3 %v17226_v53  ;;  %11611 = vmatpush.bf16.msra.mxu1 %v16954_v21  ;;  %v17178_v23 = vor.u32 %v19919_v8, %v17177_v47  ;;  %v16889_v53 = vld [vmem:[%s20917_s23 + $0x140] sm:$0xf]  ;;  %v8277_v21 = vpop.f32.mrf.mxu3  ;;  %v19807_v46 = vld [vmem:[%s20917_s23 + $0xc] sm:$0xf0]  ;;  %v17002_v8 = vor.u32 %v19875_v56, %v17001_v43  ;;  %v23317_v39 = vpack.c.bf16 %v8491_v16, %v8491_v16 }
 0x711   : > { %v23275_v13 = vadd.f32 %v8277_v21, %v8265_v28  ;;  %v16890_v42 = vor.u32 %v19847_v25, %v16889_v53  ;;  %v16729_v41 = vld [vmem:[%s20917_s23] sm:$0xf]  ;;  %v19871_v60 = vld [vmem:[%s20917_s23 + $0x20c] sm:$0xf0] }
 0x712   : > { %11624 = vmatpush.bf16.msra.mxu2 %v17082_v50  ;;  %11599 = vmatpush.bf16.msra.mxu0 %v16810_v7  ;;  %v17145_v50 = vld [vmem:[%s20917_s23 + $0x340] sm:$0xf]  ;;  %v8253_v7 = vpop.f32.mrf.mxu1  ;;  %v19903_v63 = vld [vmem:[%s20917_s23 + $0x30c] sm:$0xf0]  ;;  %v16730_v1 = vor.u32 %v19807_v46, %v16729_v41 }
 0x713   : > { %v17113_v17 = vld [vmem:[%s20917_s23 + $0x300] sm:$0xf]  ;;  %v19963_v19 = vld [vmem:[%s20917_s23 + $0x4ec] sm:$0xf0] }
 0x714   : > { %11637 = vmatpush.bf16.msra.mxu3 %v17210_v35  ;;  %11612 = vmatpush.bf16.msra.mxu1 %v16938_v32  ;;  %v8240_v35 = vpop.f32.mrf.mxu0  ;;  %v17146_v32 = vor.u32 %v19911_v36, %v17145_v50  ;;  %v19995_v6 = vld [vmem:[%s20917_s23 + $0x5ec] sm:$0xf0]  ;;  %v17609_v5 = vld [vmem:[%s20917_s23 + $0x6e0] sm:$0xf] }
 0x715   : > { %v20027_v3 = vld [vmem:[%s20917_s23 + $0x6ec] sm:$0xf0]  ;;  %v17465_v21 = vld [vmem:[%s20917_s23 + $0x5c0] sm:$0xf] }
 0x716   : > { %11625 = vmatpush.bf16.msra.mxu2 %v17066_v40  ;;  %11600 = vmatpush.bf16.msra.mxu0 %v16794_v48  ;;  %v19843_v40 = vld [vmem:[%s20917_s23 + $0x12c] sm:$0xf0]  ;;  %v16857_v48 = vld [vmem:[%s20917_s23 + $0x100] sm:$0xf]  ;;  %v17610_v27 = vor.u32 %v20027_v3, %v17609_v5 }
 0x717   : > { %v16874_v47 = vor.u32 %v19843_v40, %v16873_v24  ;;  %v20059_v53 = vld [vmem:[%s20917_s23 + $0x7ec] sm:$0xf0]  ;;  %v17721_v22 = vld [vmem:[%s20917_s23 + $0x7c0] sm:$0xf] }
 0x718   : > { %11638 = vmatpush.bf16.msra.mxu3 %v17194_v4  ;;  %11613 = vmatpush.bf16.msra.mxu1 %v16922_v55  ;;  %v19907_v4 = vld [vmem:[%s20917_s23 + $0x32c] sm:$0xf0]  ;;  %v16985_v55 = vld [vmem:[%s20917_s23 + $0x200] sm:$0xf]  ;;  %v8279_v45 = vpop.f32.mrf.mxu3  ;;  %v17738_v50 = vor.u32 %v20059_v53, %v17737_v12 }
 0x719   : > { %v17130_v59 = vor.u32 %v19907_v4, %v17129_v10  ;;  %v16986_v11 = vor.u32 %v19871_v60, %v16985_v55  ;;  %v19959_v28 = vld [vmem:[%s20917_s23 + $0x4cc] sm:$0xf0]  ;;  %v17449_v43 = vld [vmem:[%s20917_s23 + $0x5a0] sm:$0xf]  ;;  %v23337_v60 = vld [vmem:[%s20915_s17 + $0x8] sm:$0xff] }
 0x71a   : > { %11626 = vmatpush.bf16.msra.mxu2 %v17050_v58  ;;  %11601 = vmatpush.bf16.msra.mxu0 %v16778_v26  ;;  %v8266_v58 = vpop.f32.mrf.mxu2  ;;  %v8489_v26 = vmax.f32 %v21411_v18, 0.0  ;;  %v17114_v18 = vor.u32 %v19903_v63, %v17113_v17  ;;  %v19991_v36 = vld [vmem:[%s20917_s23 + $0x5cc] sm:$0xf0]  ;;  %v17338_v51 = vor.u32 %v19959_v28, %v17337_v34  ;;  %v17705_v46 = vld [vmem:[%s20917_s23 + $0x7a0] sm:$0xf]  ;;  %v1659_v17 = vperm.slane %v23337_v60, 6  ;;  %v8303_v53 = vpop.f32.mrf.mxu1 }
 0x71b   : > { %v20023_v35 = vld [vmem:[%s20917_s23 + $0x6cc] sm:$0xf0]  ;;  %v17466_v24 = vor.u32 %v19991_v36, %v17465_v21  ;;  %v17273_v36 = vld [vmem:[%s20917_s23 + $0x440] sm:$0xf] }
 0x71c   : > { %11639 = vmatpush.bf16.msra.mxu3 %v17178_v23  ;;  %11614 = vmatpush.bf16.msra.mxu1 %v16906_v14  ;;  %v17353_v23 = vld [vmem:[%s20917_s23 + $0x4e0] sm:$0xf]  ;;  %v8490_v14 = vmax.f32 %v21553_v15, 0.0  ;;  %v17482_v15 = vor.u32 %v19995_v6, %v17481_v0  ;;  %v19955_v40 = vld [vmem:[%s20917_s23 + $0x4ac] sm:$0xf0]  ;;  %v8290_v5 = vpop.f32.mrf.mxu0 }
 0x71d   : > { %v17354_v25 = vor.u32 %v19963_v19, %v17353_v23  ;;  %v19987_v4 = vld [vmem:[%s20917_s23 + $0x5ac] sm:$0xf0]  ;;  %v17561_v23 = vld [vmem:[%s20917_s23 + $0x680] sm:$0xf]  ;;  %v8291_v12 = vadd.f32 %v8290_v5, %v1659_v17 }
 0x71e   : > { %11627 = vmatpush.bf16.msra.mxu2 %v17034_v9  ;;  %11602 = vmatpush.bf16.msra.mxu0 %v16762_v31  ;;  %v16858_v9 = vor.u32 %v19839_v54, %v16857_v48  ;;  %v17593_v31 = vld [vmem:[%s20917_s23 + $0x6c0] sm:$0xf]  ;;  %v20019_v41 = vld [vmem:[%s20917_s23 + $0x6ac] sm:$0xf0]  ;;  %v17450_v54 = vor.u32 %v19987_v4, %v17449_v43 }
 0x71f   : > { %v17594_v7 = vor.u32 %v20023_v35, %v17593_v31  ;;  %v17305_v48 = vld [vmem:[%s20917_s23 + $0x480] sm:$0xf]  ;;  %v19951_v58 = vld [vmem:[%s20917_s23 + $0x48c] sm:$0xf0]  ;;  %v8304_v34 = vadd.f32 %v8303_v53, %v8291_v12 }
 0x720   : > { %11640 = vmatpush.bf16.msra.mxu3 %v17162_v20  ;;  %11615 = vmatpush.bf16.msra.mxu1 %v16890_v42  ;;  %v8492_v20 = vmax.f32 %v21840_v29, 0.0  ;;  %v20055_v29 = vld [vmem:[%s20917_s23 + $0x7cc] sm:$0xf0]  ;;  %v23313_v42 = vpack.c.bf16 %v8489_v26, %v8489_v26  ;;  %v17689_v0 = vld [vmem:[%s20917_s23 + $0x780] sm:$0xf]  ;;  %v17306_v6 = vor.u32 %v19951_v58, %v17305_v48 }
 0x721   : > { %v17722_v10 = vor.u32 %v20055_v29, %v17721_v22  ;;  %v19983_v45 = vld [vmem:[%s20917_s23 + $0x58c] sm:$0xf0]  ;;  %v17401_v35 = vld [vmem:[%s20917_s23 + $0x540] sm:$0xf] }
 0x722   : > { %11628 = vmatpush.bf16.msra.mxu2 %v17018_v37  ;;  %11603 = vmatpush.bf16.msra.mxu0 %v16746_v44  ;;  %v23315_v37 = vpack.c.bf16 %v8490_v14, %v8490_v14  ;;  %v23322_v56 = vpack.c.bf16 %v8492_v20, %v8492_v20  ;;  %v17577_v44 = vld [vmem:[%s20917_s23 + $0x6a0] sm:$0xf]  ;;  %v20015_v19 = vld [vmem:[%s20917_s23 + $0x68c] sm:$0xf0]  ;;  %v8316_v22 = vpop.f32.mrf.mxu2 }
 0x723   : > { %v17578_v55 = vor.u32 %v20019_v41, %v17577_v44  ;;  %v17562_v26 = vor.u32 %v20015_v19, %v17561_v23  ;;  %v17289_v14 = vld [vmem:[%s20917_s23 + $0x460] sm:$0xf]  ;;  %v19979_v20 = vld [vmem:[%s20917_s23 + $0x56c] sm:$0xf0] }
 0x724   : > { %11641 = vmatpush.bf16.msra.mxu3 %v17146_v32  ;;  %11616 = vmatpush.bf16.msra.mxu1 %v16874_v47  ;;  %v17321_v32 = vld [vmem:[%s20917_s23 + $0x4a0] sm:$0xf]  ;;  %v20051_v47 = vld [vmem:[%s20917_s23 + $0x7ac] sm:$0xf0]  ;;  %v8292_v41 = vpop.f32.mrf.mxu0 }
 0x725   : > { %v17706_v63 = vor.u32 %v20051_v47, %v17705_v46  ;;  %v19943_v31 = vld [vmem:[%s20917_s23 + $0x44c] sm:$0xf0]  ;;  %v17657_v43 = vld [vmem:[%s20917_s23 + $0x740] sm:$0xf] }
 0x726   : > { %11629 = vmatpush.bf16.msra.mxu2 %v17002_v8  ;;  %11604 = vmatpush.bf16.msra.mxu0 %v16730_v1  ;;  %v17322_v8 = vor.u32 %v19955_v40, %v17321_v32  ;;  %v20047_v1 = vld [vmem:[%s20917_s23 + $0x78c] sm:$0xf0]  ;;  %v8317_v32 = vadd.f32 %v8316_v22, %v8304_v34  ;;  %v8329_v40 = vpop.f32.mrf.mxu3  ;;  %v17274_v4 = vor.u32 %v19943_v31, %v17273_v36  ;;  %v17513_v17 = vld [vmem:[%s20917_s23 + $0x620] sm:$0xf]  ;;  %v8494_v36 = vmax.f32 %v22127_v62, 0.0 }
 0x727   : > { %v17690_v16 = vor.u32 %v20047_v1, %v17689_v0  ;;  %v19939_v48 = vld [vmem:[%s20917_s23 + $0x42c] sm:$0xf0]  ;;  %v17241_v0 = vld [vmem:[%s20917_s23 + $0x400] sm:$0xf] }
 0x728   : > { %11642 = vmatpush.bf16.msra.mxu3 %v17130_v59  ;;  %11617 = vmatpush.bf16.msra.mxu1 %v16858_v9  ;;  %v17433_v59 = vld [vmem:[%s20917_s23 + $0x580] sm:$0xf]  ;;  %v19947_v9 = vld [vmem:[%s20917_s23 + $0x46c] sm:$0xf0]  ;;  %v23361_v44 = vadd.f32 %v8329_v40, %v8317_v32 }
 0x729   : > { %11605 = vmatmul.bf16.vlgmr.msra.gmra.mxu0 %v23313_v42  ;;  %v17434_v3 = vor.u32 %v19983_v45, %v17433_v59  ;;  %v17290_v28 = vor.u32 %v19947_v9, %v17289_v14  ;;  %v19971_v59 = vld [vmem:[%s20917_s23 + $0x52c] sm:$0xf0]  ;;  %v17641_v45 = vld [vmem:[%s20917_s23 + $0x720] sm:$0xf] }
 0x72a   : > { %11630 = vmatpush.bf16.msra.mxu2 %v16986_v11  ;;  %11649 = vmatpush.bf16.msrb.mxu0 %v17354_v25  ;;  %v17417_v11 = vld [vmem:[%s20917_s23 + $0x560] sm:$0xf]  ;;  %v20011_v25 = vld [vmem:[%s20917_s23 + $0x66c] sm:$0xf0]  ;;  %v8318_v9 = vpop.f32.mrf.mxu2 }
 0x72b   : > { %11618 = vmatmul.bf16.vlgmr.msra.gmra.mxu1 %v23315_v37  ;;  %v17418_v21 = vor.u32 %v19979_v20, %v17417_v11  ;;  %v20035_v23 = vld [vmem:[%s20917_s23 + $0x72c] sm:$0xf0]  ;;  %v17497_v14 = vld [vmem:[%s20917_s23 + $0x600] sm:$0xf] }
 0x72c   : > { %11643 = vmatpush.bf16.msra.mxu3 %v17114_v18  ;;  %11662 = vmatpush.bf16.msrb.mxu1 %v17482_v15  ;;  %v17545_v18 = vld [vmem:[%s20917_s23 + $0x660] sm:$0xf]  ;;  %v19935_v1 = vld [vmem:[%s20917_s23 + $0x40c] sm:$0xf0]  ;;  %v17642_v11 = vor.u32 %v20035_v23, %v17641_v45 }
 0x72d   : > { %11631 = vmatmul.bf16.vlgmr.msra.gmra.mxu2 %v23317_v39  ;;  %v17673_v15 = vld [vmem:[%s20917_s23 + $0x760] sm:$0xf]  ;;  %v19999_v12 = vld [vmem:[%s20917_s23 + $0x60c] sm:$0xf0] }
 0x72e   : > { %11675 = vmatpush.bf16.msrb.mxu2 %v17610_v27  ;;  %11650 = vmatpush.bf16.msrb.mxu0 %v17338_v51  ;;  %v20043_v27 = vld [vmem:[%s20917_s23 + $0x76c] sm:$0xf0]  ;;  %v17625_v53 = vld [vmem:[%s20917_s23 + $0x700] sm:$0xf]  ;;  %v8331_v20 = vpop.f32.mrf.mxu3 }
 0x72f   : > { %11644 = vmatmul.bf16.vlgmr.msra.gmra.mxu3 %v23322_v56  ;;  %v17674_v29 = vor.u32 %v20043_v27, %v17673_v15  ;;  %v19975_v51 = vld [vmem:[%s20917_s23 + $0x54c] sm:$0xf0]  ;;  %v17993_v15 = vld [vmem:[%s20917_s23 + $0x9e0] sm:$0xf]  ;;  %v17242_v27 = vor.u32 %v19935_v1, %v17241_v0 }
 0x730   : > { %11688 = vmatpush.bf16.msrb.mxu3 %v17738_v50  ;;  %11663 = vmatpush.bf16.msrb.mxu1 %v17466_v24  ;;  %v17546_v50 = vor.u32 %v20011_v25, %v17545_v18  ;;  %v17529_v24 = vld [vmem:[%s20917_s23 + $0x640] sm:$0xf]  ;;  %v17402_v46 = vor.u32 %v19975_v51, %v17401_v35  ;;  %v20091_v25 = vld [vmem:[%s20917_s23 + $0x8ec] sm:$0xf0]  ;;  %v17498_v35 = vor.u32 %v19999_v12, %v17497_v14  ;;  %v8495_v51 = vmax.f32 %v22272_v38, 0.0 }
 0x731   : > { %v17865_v18 = vld [vmem:[%s20917_s23 + $0x8e0] sm:$0xf]  ;;  %v20123_v34 = vld [vmem:[%s20917_s23 + $0x9ec] sm:$0xf0] }
 0x732   : > { %11676 = vmatpush.bf16.msrb.mxu2 %v17594_v7  ;;  %11651 = vmatpush.bf16.msrb.mxu0 %v17322_v8  ;;  %v20007_v7 = vld [vmem:[%s20917_s23 + $0x64c] sm:$0xf0]  ;;  %v17257_v8 = vld [vmem:[%s20917_s23 + $0x420] sm:$0xf]  ;;  %v17994_v62 = vor.u32 %v20123_v34, %v17993_v15 }
 0x733   : > { %v17530_v47 = vor.u32 %v20007_v7, %v17529_v24  ;;  %v17258_v19 = vor.u32 %v19939_v48, %v17257_v8  ;;  %v18249_v22 = vld [vmem:[%s20917_s23 + $0xbe0] sm:$0xf]  ;;  %v8496_v24 = vmax.f32 %v22414_v57, 0.0  ;;  %v17866_v7 = vor.u32 %v20091_v25, %v17865_v18  ;;  %v20119_v41 = vld [vmem:[%s20917_s23 + $0x9cc] sm:$0xf0] }
 0x734   : > { %11689 = vmatpush.bf16.msrb.mxu3 %v17722_v10  ;;  %11664 = vmatpush.bf16.msrb.mxu1 %v17450_v54  ;;  %v20039_v10 = vld [vmem:[%s20917_s23 + $0x74c] sm:$0xf0]  ;;  %v17385_v54 = vld [vmem:[%s20917_s23 + $0x520] sm:$0xf]  ;;  %v23401_v48 = vpack.c.bf16 %v8494_v36, %v8494_v36 }
 0x735   : > { %v17658_v58 = vor.u32 %v20039_v10, %v17657_v43  ;;  %v17849_v40 = vld [vmem:[%s20917_s23 + $0x8c0] sm:$0xf]  ;;  %v20087_v43 = vld [vmem:[%s20917_s23 + $0x8cc] sm:$0xf0]  ;;  %v23408_v23 = vpack.c.bf16 %v8496_v24, %v8496_v24 }
 0x736   : > { %11677 = vmatpush.bf16.msrb.mxu2 %v17578_v55  ;;  %11652 = vmatpush.bf16.msrb.mxu0 %v17306_v6  ;;  %v8305_v55 = vpop.f32.mrf.mxu1  ;;  %v17386_v6 = vor.u32 %v19971_v59, %v17385_v54  ;;  %v17977_v10 = vld [vmem:[%s20917_s23 + $0x9c0] sm:$0xf]  ;;  %v20183_v57 = vld [vmem:[%s20917_s23 + $0xbcc] sm:$0xf0]  ;;  %v17850_v54 = vor.u32 %v20087_v43, %v17849_v40 }
 0x737   : > { %v18233_v38 = vld [vmem:[%s20917_s23 + $0xbc0] sm:$0xf]  ;;  %v23403_v55 = vpack.c.bf16 %v8495_v51, %v8495_v51  ;;  %v20115_v0 = vld [vmem:[%s20917_s23 + $0x9ac] sm:$0xf0] }
 0x738   : > { %11690 = vmatpush.bf16.msrb.mxu3 %v17706_v63  ;;  %11665 = vmatpush.bf16.msrb.mxu1 %v17434_v3  ;;  %v20003_v63 = vld [vmem:[%s20917_s23 + $0x62c] sm:$0xf0]  ;;  %v17369_v3 = vld [vmem:[%s20917_s23 + $0x500] sm:$0xf] }
 0x739   : > { %v17514_v5 = vor.u32 %v20003_v63, %v17513_v17  ;;  %v17833_v17 = vld [vmem:[%s20917_s23 + $0x8a0] sm:$0xf]  ;;  %v20083_v63 = vld [vmem:[%s20917_s23 + $0x8ac] sm:$0xf0] }
 0x73a   : > { %11678 = vmatpush.bf16.msrb.mxu2 %v17562_v26  ;;  %11653 = vmatpush.bf16.msrb.mxu0 %v17290_v28  ;;  %v19967_v26 = vld [vmem:[%s20917_s23 + $0x50c] sm:$0xf0]  ;;  %v18121_v28 = vld [vmem:[%s20917_s23 + $0xae0] sm:$0xf] }
 0x73b   : > { %v17370_v31 = vor.u32 %v19967_v26, %v17369_v3  ;;  %v17961_v45 = vld [vmem:[%s20917_s23 + $0x9a0] sm:$0xf]  ;;  %v20179_v3 = vld [vmem:[%s20917_s23 + $0xbac] sm:$0xf0]  ;;  %v17834_v26 = vor.u32 %v20083_v63, %v17833_v17 }
 0x73c   : > { %11691 = vmatpush.bf16.msrb.mxu3 %v17690_v16  ;;  %11666 = vmatpush.bf16.msrb.mxu1 %v17418_v21  ;;  %v20031_v16 = vld [vmem:[%s20917_s23 + $0x70c] sm:$0xf0]  ;;  %v18089_v1 = vld [vmem:[%s20917_s23 + $0xaa0] sm:$0xf]  ;;  %v17962_v14 = vor.u32 %v20115_v0, %v17961_v45 }
 0x73d   : > { %v20155_v21 = vld [vmem:[%s20917_s23 + $0xaec] sm:$0xf0]  ;;  %v18073_v18 = vld [vmem:[%s20917_s23 + $0xa80] sm:$0xf] }
 0x73e   : > { %11679 = vmatpush.bf16.msrb.mxu2 %v17546_v50  ;;  %11654 = vmatpush.bf16.msrb.mxu0 %v17274_v4  ;;  %v8493_v50 = vmax.f32 %v21985_v52, 0.0  ;;  %v17626_v52 = vor.u32 %v20031_v16, %v17625_v53  ;;  %v18122_v32 = vor.u32 %v20155_v21, %v18121_v28  ;;  %v20079_v12 = vld [vmem:[%s20917_s23 + $0x88c] sm:$0xf0]  ;;  %v17945_v53 = vld [vmem:[%s20917_s23 + $0x980] sm:$0xf]  ;;  %v23427_v28 = vpop.f32.mrf.mxu0 }
 0x73f   : > { %v20111_v20 = vld [vmem:[%s20917_s23 + $0x98c] sm:$0xf0]  ;;  %v18201_v15 = vld [vmem:[%s20917_s23 + $0xb80] sm:$0xf] }
 0x740   : > { %11692 = vmatpush.bf16.msrb.mxu3 %v17674_v29  ;;  %11667 = vmatpush.bf16.msrb.mxu1 %v17402_v46  ;;  %v20187_v29 = vld [vmem:[%s20917_s23 + $0xbec] sm:$0xf0]  ;;  %v18105_v46 = vld [vmem:[%s20917_s23 + $0xac0] sm:$0xf]  ;;  %v23399_v8 = vpack.c.bf16 %v8493_v50, %v8493_v50  ;;  %v17946_v21 = vor.u32 %v20111_v20, %v17945_v53 }
 0x741   : > { %v18250_v4 = vor.u32 %v20187_v29, %v18249_v22  ;;  %v20143_v25 = vld [vmem:[%s20917_s23 + $0xa8c] sm:$0xf0]  ;;  %v17801_v36 = vld [vmem:[%s20917_s23 + $0x860] sm:$0xf]  ;;  %v23432_v22 = vpop.f32.mrf.mxu1 }
 0x742   : > { %11680 = vmatpush.bf16.msrb.mxu2 %v17530_v47  ;;  %11655 = vmatpush.bf16.msrb.mxu0 %v17258_v19  ;;  %v20151_v47 = vld [vmem:[%s20917_s23 + $0xacc] sm:$0xf0]  ;;  %v18234_v19 = vor.u32 %v20183_v57, %v18233_v38  ;;  %v18074_v50 = vor.u32 %v20143_v25, %v18073_v18  ;;  %v18057_v24 = vld [vmem:[%s20917_s23 + $0xa60] sm:$0xf] }
 0x743   : > { %v18106_v59 = vor.u32 %v20151_v47, %v18105_v46  ;;  %v20107_v51 = vld [vmem:[%s20917_s23 + $0x96c] sm:$0xf0]  ;;  %v23442_v46 = vpop.f32.mrf.mxu2  ;;  %v18041_v57 = vld [vmem:[%s20917_s23 + $0xa40] sm:$0xf] }
 0x744   : > { %11693 = vmatpush.bf16.msrb.mxu3 %v17658_v58  ;;  %11668 = vmatpush.bf16.msrb.mxu1 %v17386_v6  ;;  %v17978_v58 = vor.u32 %v20119_v41, %v17977_v10  ;;  %v20147_v6 = vld [vmem:[%s20917_s23 + $0xaac] sm:$0xf0]  ;;  %v17785_v10 = vld [vmem:[%s20917_s23 + $0x840] sm:$0xf] }
 0x745   : > { %v18090_v9 = vor.u32 %v20147_v6, %v18089_v1  ;;  %v17913_v41 = vld [vmem:[%s20917_s23 + $0x940] sm:$0xf]  ;;  %v20103_v38 = vld [vmem:[%s20917_s23 + $0x94c] sm:$0xf0] }
 0x746   : > { %11681 = vmatpush.bf16.msrb.mxu2 %v17514_v5  ;;  %11656 = vmatpush.bf16.msrb.mxu0 %v17242_v27  ;;  %v18217_v5 = vld [vmem:[%s20917_s23 + $0xba0] sm:$0xf]  ;;  %v20175_v27 = vld [vmem:[%s20917_s23 + $0xb8c] sm:$0xf0]  ;;  %v8344_v45 = vpop.f32.mrf.mxu0 }
 0x747   : > { %v18218_v16 = vor.u32 %v20179_v3, %v18217_v5  ;;  %v18202_v29 = vor.u32 %v20175_v27, %v18201_v15  ;;  %v20167_v17 = vld [vmem:[%s20917_s23 + $0xb4c] sm:$0xf0]  ;;  %v17769_v1 = vld [vmem:[%s20917_s23 + $0x820] sm:$0xf] }
 0x748   : > { %11694 = vmatpush.bf16.msrb.mxu3 %v17642_v11  ;;  %11669 = vmatpush.bf16.msrb.mxu1 %v17370_v31  ;;  %v17817_v11 = vld [vmem:[%s20917_s23 + $0x880] sm:$0xf]  ;;  %v20075_v31 = vld [vmem:[%s20917_s23 + $0x86c] sm:$0xf0] }
 0x749   : > { %11657 = vmatmul.bf16.vlgmr.msrb.gmra.mxu0 %v23399_v8  ;;  %v17818_v34 = vor.u32 %v20079_v12, %v17817_v11  ;;  %v20067_v6 = vld [vmem:[%s20917_s23 + $0x82c] sm:$0xf0]  ;;  %v17897_v5 = vld [vmem:[%s20917_s23 + $0x920] sm:$0xf]  ;;  %v8357_v3 = vpop.f32.mrf.mxu1 }
 0x74a   : > { %11682 = vmatpush.bf16.msrb.mxu2 %v17498_v35  ;;  %11701 = vmatpush.bf16.msra.mxu0 %v17866_v7  ;;  %v17929_v35 = vld [vmem:[%s20917_s23 + $0x960] sm:$0xf]  ;;  %v20131_v11 = vld [vmem:[%s20917_s23 + $0xa2c] sm:$0xf0] }
 0x74b   : > { %11670 = vmatmul.bf16.vlgmr.msrb.gmra.mxu1 %v23401_v48  ;;  %v18185_v7 = vld [vmem:[%s20917_s23 + $0xb60] sm:$0xf]  ;;  %v17930_v40 = vor.u32 %v20107_v51, %v17929_v35  ;;  %v20163_v53 = vld [vmem:[%s20917_s23 + $0xb2c] sm:$0xf0] }
 0x74c   : > { %11695 = vmatpush.bf16.msrb.mxu3 %v17626_v52  ;;  %11714 = vmatpush.bf16.msra.mxu1 %v17994_v62  ;;  %v20139_v52 = vld [vmem:[%s20917_s23 + $0xa6c] sm:$0xf0]  ;;  %v18153_v12 = vld [vmem:[%s20917_s23 + $0xb20] sm:$0xf] }
 0x74d   : > { %11683 = vmatmul.bf16.vlgmr.msrb.gmra.mxu2 %v23403_v55  ;;  %v20171_v62 = vld [vmem:[%s20917_s23 + $0xb6c] sm:$0xf0]  ;;  %v18058_v43 = vor.u32 %v20139_v52, %v18057_v24  ;;  %v17753_v20 = vld [vmem:[%s20917_s23 + $0x800] sm:$0xf] }
 0x74e   : > { %11727 = vmatpush.bf16.msra.mxu2 %v18122_v32  ;;  %11702 = vmatpush.bf16.msra.mxu0 %v17850_v54  ;;  %v17802_v32 = vor.u32 %v20075_v31, %v17801_v36  ;;  %v18186_v47 = vor.u32 %v20171_v62, %v18185_v7  ;;  %v20135_v54 = vld [vmem:[%s20917_s23 + $0xa4c] sm:$0xf0]  ;;  %v17881_v27 = vld [vmem:[%s20917_s23 + $0x900] sm:$0xf]  ;;  %v18154_v36 = vor.u32 %v20163_v53, %v18153_v12 }
 0x74f   : > { %11696 = vmatmul.bf16.vlgmr.msrb.gmra.mxu3 %v23408_v23  ;;  %v18042_v0 = vor.u32 %v20135_v54, %v18041_v57  ;;  %v20063_v18 = vld [vmem:[%s20917_s23 + $0x80c] sm:$0xf0]  ;;  %v18137_v35 = vld [vmem:[%s20917_s23 + $0xb00] sm:$0xf]  ;;  %v8499_v54 = vmax.f32 %v22846_v61, 0.0 }
 0x750   : > { %11740 = vmatpush.bf16.msra.mxu3 %v18250_v4  ;;  %11715 = vmatpush.bf16.msra.mxu1 %v17978_v58  ;;  %v20071_v4 = vld [vmem:[%s20917_s23 + $0x84c] sm:$0xf0]  ;;  %v23447_v58 = vpop.f32.mrf.mxu3  ;;  %v18377_v24 = vld [vmem:[%s20917_s23 + $0xce0] sm:$0xf]  ;;  %v17754_v62 = vor.u32 %v20063_v18, %v17753_v20 }
 0x751   : > { %v17786_v63 = vor.u32 %v20071_v4, %v17785_v10  ;;  %v20127_v31 = vld [vmem:[%s20917_s23 + $0xa0c] sm:$0xf0]  ;;  %v18505_v7 = vld [vmem:[%s20917_s23 + $0xde0] sm:$0xf]  ;;  %v8497_v10 = vmax.f32 %v22559_v30, 0.0  ;;  %v8498_v4 = vmax.f32 %v22701_v2, 0.0 }
 0x752   : > { %11728 = vmatpush.bf16.msra.mxu2 %v18106_v59  ;;  %11703 = vmatpush.bf16.msra.mxu0 %v17834_v26  ;;  %v18169_v59 = vld [vmem:[%s20917_s23 + $0xb40] sm:$0xf]  ;;  %v20219_v52 = vld [vmem:[%s20917_s23 + $0xcec] sm:$0xf0] }
 0x753   : > { %v18170_v26 = vor.u32 %v20167_v17, %v18169_v59  ;;  %v20315_v57 = vld [vmem:[%s20917_s23 + $0xfec] sm:$0xf0]  ;;  %v8500_v59 = vmax.f32 %v22988_v49, 0.0  ;;  %v18378_v17 = vor.u32 %v20219_v52, %v18377_v24  ;;  %v18361_v45 = vld [vmem:[%s20917_s23 + $0xcc0] sm:$0xf] }
 0x754   : > { %11741 = vmatpush.bf16.msra.mxu3 %v18234_v19  ;;  %11716 = vmatpush.bf16.msra.mxu1 %v17962_v14  ;;  %v17914_v19 = vor.u32 %v20103_v38, %v17913_v41  ;;  %v20099_v14 = vld [vmem:[%s20917_s23 + $0x92c] sm:$0xf0]  ;;  %v18761_v38 = vld [vmem:[%s20917_s23 + $0xfe0] sm:$0xf] }
 0x755   : > { %v17898_v25 = vor.u32 %v20099_v14, %v17897_v5  ;;  %v18617_v5 = vld [vmem:[%s20917_s23 + $0xec0] sm:$0xf]  ;;  %v20279_v3 = vld [vmem:[%s20917_s23 + $0xecc] sm:$0xf0]  ;;  %v23489_v14 = vpack.c.bf16 %v8498_v4, %v8498_v4 }
 0x756   : > { %11729 = vmatpush.bf16.msra.mxu2 %v18090_v9  ;;  %11704 = vmatpush.bf16.msra.mxu0 %v17818_v34  ;;  %v18025_v9 = vld [vmem:[%s20917_s23 + $0xa20] sm:$0xf]  ;;  %v20095_v34 = vld [vmem:[%s20917_s23 + $0x90c] sm:$0xf0]  ;;  %v18618_v53 = vor.u32 %v20279_v3, %v18617_v5 }
 0x757   : > { %v18026_v15 = vor.u32 %v20131_v11, %v18025_v9  ;;  %v17882_v41 = vor.u32 %v20095_v34, %v17881_v27  ;;  %v18745_v61 = vld [vmem:[%s20917_s23 + $0xfc0] sm:$0xf]  ;;  %v20311_v49 = vld [vmem:[%s20917_s23 + $0xfcc] sm:$0xf0]  ;;  %v23491_v11 = vpack.c.bf16 %v8499_v54, %v8499_v54 }
 0x758   : > { %11742 = vmatpush.bf16.msra.mxu3 %v18218_v16  ;;  %11717 = vmatpush.bf16.msra.mxu1 %v17946_v21  ;;  %v17770_v16 = vor.u32 %v20067_v6, %v17769_v1  ;;  %v18009_v21 = vld [vmem:[%s20917_s23 + $0xa00] sm:$0xf]  ;;  %v8383_v51 = vpop.f32.mrf.mxu3  ;;  %v18762_v1 = vor.u32 %v20315_v57, %v18761_v38  ;;  %v20247_v6 = vld [vmem:[%s20917_s23 + $0xdcc] sm:$0xf0] }
 0x759   : > { %v20211_v20 = vld [vmem:[%s20917_s23 + $0xcac] sm:$0xf0]  ;;  %v18473_v18 = vld [vmem:[%s20917_s23 + $0xda0] sm:$0xf] }
 0x75a   : > { %11730 = vmatpush.bf16.msra.mxu2 %v18074_v50  ;;  %11705 = vmatpush.bf16.msra.mxu0 %v17802_v32  ;;  %v8370_v50 = vpop.f32.mrf.mxu2  ;;  %v20251_v32 = vld [vmem:[%s20917_s23 + $0xdec] sm:$0xf0]  ;;  %v18601_v34 = vld [vmem:[%s20917_s23 + $0xea0] sm:$0xf] }
 0x75b   : > { %v18506_v2 = vor.u32 %v20251_v32, %v18505_v7  ;;  %v20243_v27 = vld [vmem:[%s20917_s23 + $0xdac] sm:$0xf0]  ;;  %v18729_v50 = vld [vmem:[%s20917_s23 + $0xfa0] sm:$0xf] }
 0x75c   : > { %11743 = vmatpush.bf16.msra.mxu3 %v18202_v29  ;;  %11718 = vmatpush.bf16.msra.mxu1 %v17930_v40  ;;  %v20159_v29 = vld [vmem:[%s20917_s23 + $0xb0c] sm:$0xf0]  ;;  %v18633_v40 = vld [vmem:[%s20917_s23 + $0xee0] sm:$0xf] }
 0x75d   : > { %v18138_v30 = vor.u32 %v20159_v29, %v18137_v35  ;;  %v18474_v35 = vor.u32 %v20243_v27, %v18473_v18  ;;  %v18329_v51 = vld [vmem:[%s20917_s23 + $0xc80] sm:$0xf]  ;;  %v20207_v24 = vld [vmem:[%s20917_s23 + $0xc8c] sm:$0xf0] }
 0x75e   : > { %11731 = vmatpush.bf16.msra.mxu2 %v18058_v43  ;;  %11706 = vmatpush.bf16.msra.mxu0 %v17786_v63  ;;  %v20283_v43 = vld [vmem:[%s20917_s23 + $0xeec] sm:$0xf0]  ;;  %v18457_v52 = vld [vmem:[%s20917_s23 + $0xd80] sm:$0xf]  ;;  %v18330_v4 = vor.u32 %v20207_v24, %v18329_v51 }
 0x75f   : > { %v18634_v63 = vor.u32 %v20283_v43, %v18633_v40  ;;  %v18585_v32 = vld [vmem:[%s20917_s23 + $0xe80] sm:$0xf]  ;;  %v20271_v40 = vld [vmem:[%s20917_s23 + $0xe8c] sm:$0xf0] }
 0x760   : > { %11744 = vmatpush.bf16.msra.mxu3 %v18186_v47  ;;  %11719 = vmatpush.bf16.msra.mxu1 %v17914_v19  ;;  %v18010_v47 = vor.u32 %v20127_v31, %v18009_v21  ;;  %v20215_v19 = vld [vmem:[%s20917_s23 + $0xccc] sm:$0xf0]  ;;  %v18713_v43 = vld [vmem:[%s20917_s23 + $0xf80] sm:$0xf]  ;;  %v18586_v38 = vor.u32 %v20271_v40, %v18585_v32  ;;  %v23538_v18 = vpop.f32.mrf.mxu3 }
 0x761   : > { %v18362_v9 = vor.u32 %v20215_v19, %v18361_v45  ;;  %v20275_v21 = vld [vmem:[%s20917_s23 + $0xeac] sm:$0xf0]  ;;  %v18313_v57 = vld [vmem:[%s20917_s23 + $0xc60] sm:$0xf] }
 0x762   : > { %11732 = vmatpush.bf16.msra.mxu2 %v18042_v0  ;;  %11707 = vmatpush.bf16.msra.mxu0 %v17770_v16  ;;  %v18489_v0 = vld [vmem:[%s20917_s23 + $0xdc0] sm:$0xf]  ;;  %v18602_v29 = vor.u32 %v20275_v21, %v18601_v34  ;;  %v20203_v54 = vld [vmem:[%s20917_s23 + $0xc6c] sm:$0xf0] }
 0x763   : > { %v18490_v12 = vor.u32 %v20247_v6, %v18489_v0  ;;  %v18345_v16 = vld [vmem:[%s20917_s23 + $0xca0] sm:$0xf]  ;;  %v20267_v19 = vld [vmem:[%s20917_s23 + $0xe6c] sm:$0xf0]  ;;  %v18314_v6 = vor.u32 %v20203_v54, %v18313_v57 }
 0x764   : > { %11745 = vmatpush.bf16.msra.mxu3 %v18170_v26  ;;  %11720 = vmatpush.bf16.msra.mxu1 %v17898_v25  ;;  %v23487_v26 = vpack.c.bf16 %v8497_v10, %v8497_v10  ;;  %v23496_v25 = vpack.c.bf16 %v8500_v59, %v8500_v59  ;;  %v18346_v31 = vor.u32 %v20211_v20, %v18345_v16  ;;  %v20303_v10 = vld [vmem:[%s20917_s23 + $0xf8c] sm:$0xf0]  ;;  %v18441_v59 = vld [vmem:[%s20917_s23 + $0xd60] sm:$0xf] }
 0x765   : > { %v18569_v45 = vld [vmem:[%s20917_s23 + $0xe60] sm:$0xf]  ;;  %v20263_v20 = vld [vmem:[%s20917_s23 + $0xe4c] sm:$0xf0] }
 0x766   : > { %11733 = vmatpush.bf16.msra.mxu2 %v18026_v15  ;;  %11708 = vmatpush.bf16.msra.mxu0 %v17754_v62  ;;  %v18746_v15 = vor.u32 %v20311_v49, %v18745_v61  ;;  %v20239_v62 = vld [vmem:[%s20917_s23 + $0xd8c] sm:$0xf0]  ;;  %v18697_v0 = vld [vmem:[%s20917_s23 + $0xf60] sm:$0xf]  ;;  %v18570_v3 = vor.u32 %v20267_v19, %v18569_v45  ;;  %v23532_v49 = vpop.f32.mrf.mxu2 }
 0x767   : > { %v18425_v61 = vld [vmem:[%s20917_s23 + $0xd40] sm:$0xf]  ;;  %v20295_v27 = vld [vmem:[%s20917_s23 + $0xf4c] sm:$0xf0] }
 0x768   : > { %11746 = vmatpush.bf16.msra.mxu3 %v18154_v36  ;;  %11721 = vmatpush.bf16.msra.mxu1 %v17882_v41  ;;  %v20307_v36 = vld [vmem:[%s20917_s23 + $0xfac] sm:$0xf0]  ;;  %v23515_v41 = vpop.f32.mrf.mxu0  ;;  %v18553_v16 = vld [vmem:[%s20917_s23 + $0xe40] sm:$0xf] }
 0x769   : > { %11709 = vmatmul.bf16.vlgmr.msra.gmra.mxu0 %v23487_v26  ;;  %v18730_v7 = vor.u32 %v20307_v36, %v18729_v50  ;;  %v18554_v50 = vor.u32 %v20263_v20, %v18553_v16  ;;  %v18281_v36 = vld [vmem:[%s20917_s23 + $0xc20] sm:$0xf]  ;;  %v20291_v40 = vld [vmem:[%s20917_s23 + $0xf2c] sm:$0xf0]  ;;  %v19929_v16 = vld [vmem:[%s20917_s23 + $0x3e4] sm:$0xf] }
 0x76a   : > { %11734 = vmatpush.bf16.msra.mxu2 %v18010_v47  ;;  %11753 = vmatpush.bf16.msrb.mxu0 %v18378_v17  ;;  %v18458_v47 = vor.u32 %v20239_v62, %v18457_v52  ;;  %v8343_v17 = vadd.f32 %v23427_v28, %v23361_v44  ;;  %v18297_v44 = vld [vmem:[%s20917_s23 + $0xc40] sm:$0xf]  ;;  %v20199_v28 = vld [vmem:[%s20917_s23 + $0xc4c] sm:$0xf0]  ;;  %v17227_v20 = vld [vmem:[%s20917_s23 + $0x3f0] sm:$0xf0] }
 0x76b   : > { %11722 = vmatmul.bf16.vlgmr.msra.gmra.mxu1 %v23489_v14  ;;  %v18298_v34 = vor.u32 %v20199_v28, %v18297_v44  ;;  %v20227_v52 = vld [vmem:[%s20917_s23 + $0xd2c] sm:$0xf0]  ;;  %v18665_v32 = vld [vmem:[%s20917_s23 + $0xf20] sm:$0xf]  ;;  %v16971_v44 = vld [vmem:[%s20917_s23 + $0x1f0] sm:$0xf0] }
 0x76c   : > { %11747 = vmatpush.bf16.msra.mxu3 %v18138_v30  ;;  %11766 = vmatpush.bf16.msrb.mxu1 %v18506_v2  ;;  %v23520_v30 = vpop.f32.mrf.mxu1  ;;  %v18714_v2 = vor.u32 %v20303_v10, %v18713_v43  ;;  %v20259_v62 = vld [vmem:[%s20917_s23 + $0xe2c] sm:$0xf0]  ;;  %v1660_v43 = vperm.slane %v23337_v60, 7  ;;  %v18393_v57 = vld [vmem:[%s20917_s23 + $0xd00] sm:$0xf] }
 0x76d   : > { %11735 = vmatmul.bf16.vlgmr.msra.gmra.mxu2 %v23491_v11  ;;  %v20223_v54 = vld [vmem:[%s20917_s23 + $0xd0c] sm:$0xf0]  ;;  %v18649_v45 = vld [vmem:[%s20917_s23 + $0xf00] sm:$0xf]  ;;  %v19897_v28 = vld [vmem:[%s20917_s23 + $0x2e4] sm:$0xf] }
 0x76e   : > { %11779 = vmatpush.bf16.msrb.mxu2 %v18634_v63  ;;  %11754 = vmatpush.bf16.msrb.mxu0 %v18362_v9  ;;  %v20235_v63 = vld [vmem:[%s20917_s23 + $0xd6c] sm:$0xf0]  ;;  %v8356_v9 = vadd.f32 %v23432_v22, %v8343_v17  ;;  %v8422_v17 = vpop.f32.mrf.mxu2 }
 0x76f   : > { %11748 = vmatmul.bf16.vlgmr.msra.gmra.mxu3 %v23496_v25  ;;  %v18442_v5 = vor.u32 %v20235_v63, %v18441_v59  ;;  %v18521_v59 = vld [vmem:[%s20917_s23 + $0xe00] sm:$0xf]  ;;  %v20255_v63 = vld [vmem:[%s20917_s23 + $0xe0c] sm:$0xf0]  ;;  %v19921_v17 = vld [vmem:[%s20917_s23 + $0x3a4] sm:$0xf] }
 0x770   : > { %11792 = vmatpush.bf16.msrb.mxu3 %v18762_v1  ;;  %11767 = vmatpush.bf16.msrb.mxu1 %v18490_v12  ;;  %v20299_v1 = vld [vmem:[%s20917_s23 + $0xf6c] sm:$0xf0]  ;;  %v8396_v21 = vpop.f32.mrf.mxu0  ;;  %v8369_v51 = vadd.f32 %v23442_v46, %v8356_v9  ;;  %v8501_v9 = vmax.f32 %v23133_v33, 0.0 }
 0x771   : > { %v18698_v12 = vor.u32 %v20299_v1, %v18697_v0  ;;  %v20287_v19 = vld [vmem:[%s20917_s23 + $0xf0c] sm:$0xf0]  ;;  %v8435_v0 = vpop.f32.mrf.mxu3  ;;  %v19833_v1 = vld [vmem:[%s20917_s23 + $0xe4] sm:$0xf] }
 0x772   : > { %11780 = vmatpush.bf16.msrb.mxu2 %v18618_v53  ;;  %11755 = vmatpush.bf16.msrb.mxu0 %v18346_v31  ;;  %v20231_v53 = vld [vmem:[%s20917_s23 + $0xd4c] sm:$0xf0]  ;;  %v8382_v60 = vadd.f32 %v23447_v58, %v8369_v51  ;;  %v8395_v58 = vadd.f32 %v23515_v41, %v1660_v43  ;;  %v17083_v51 = vld [vmem:[%s20917_s23 + $0x2d0] sm:$0xf0] }
 0x773   : > { %v18426_v22 = vor.u32 %v20231_v53, %v18425_v61  ;;  %v20195_v31 = vld [vmem:[%s20917_s23 + $0xc2c] sm:$0xf0]  ;;  %v17099_v61 = vld [vmem:[%s20917_s23 + $0x2f0] sm:$0xf0]  ;;  %v18522_v53 = vor.u32 %v20255_v63, %v18521_v59 }
 0x774   : > { %11793 = vmatpush.bf16.msrb.mxu3 %v18746_v15  ;;  %11768 = vmatpush.bf16.msrb.mxu1 %v18474_v35  ;;  %v18681_v15 = vld [vmem:[%s20917_s23 + $0xf40] sm:$0xf]  ;;  %v18282_v10 = vor.u32 %v20195_v31, %v18281_v36  ;;  %v17102_v41 = vor.u32 %v19897_v28, %v17099_v61  ;;  %v19861_v36 = vld [vmem:[%s20917_s23 + $0x1c4] sm:$0xf]  ;;  %v17230_v31 = vor.u32 %v19929_v16, %v17227_v20  ;;  %v16795_v0 = vld [vmem:[%s20917_s23 + $0x90] sm:$0xf0] }
 0x775   : > { %v18409_v35 = vld [vmem:[%s20917_s23 + $0xd20] sm:$0xf]  ;;  %v18682_v24 = vor.u32 %v20295_v27, %v18681_v15  ;;  %v8502_v15 = vmax.f32 %v23275_v13, 0.0  ;;  %v8503_v27 = vmax.f32 %v8382_v60, 0.0  ;;  %v19925_v13 = vld [vmem:[%s20917_s23 + $0x3c4] sm:$0xf] }
 0x776   : > { %11781 = vmatpush.bf16.msrb.mxu2 %v18602_v29  ;;  %11756 = vmatpush.bf16.msrb.mxu0 %v18330_v4  ;;  %v8409_v29 = vpop.f32.mrf.mxu1  ;;  %v18265_v4 = vld [vmem:[%s20917_s23 + $0xc00] sm:$0xf]  ;;  %v18410_v46 = vor.u32 %v20227_v52, %v18409_v35  ;;  %v16955_v35 = vld [vmem:[%s20917_s23 + $0x1d0] sm:$0xf0]  ;;  %v19917_v61 = vld [vmem:[%s20917_s23 + $0x384] sm:$0xf] }
 0x777   : > { %v19893_v29 = vld [vmem:[%s20917_s23 + $0x2c4] sm:$0xf]  ;;  %v17211_v52 = vld [vmem:[%s20917_s23 + $0x3d0] sm:$0xf0] }
 0x778   : > { %11794 = vmatpush.bf16.msrb.mxu3 %v18730_v7  ;;  %11769 = vmatpush.bf16.msrb.mxu1 %v18458_v47  ;;  %v18537_v7 = vld [vmem:[%s20917_s23 + $0xe20] sm:$0xf]  ;;  %v20191_v47 = vld [vmem:[%s20917_s23 + $0xc0c] sm:$0xf0]  ;;  %v17086_v43 = vor.u32 %v19893_v29, %v17083_v51  ;;  %v17195_v60 = vld [vmem:[%s20917_s23 + $0x3b0] sm:$0xf0] }
 0x779   : > { %v19813_v51 = vld [vmem:[%s20917_s23 + $0x44] sm:$0xf] }
 0x77a   : > { %11782 = vmatpush.bf16.msrb.mxu2 %v18586_v38  ;;  %11757 = vmatpush.bf16.msrb.mxu0 %v18314_v6  ;;  %v18538_v38 = vor.u32 %v20259_v62, %v18537_v7  ;;  %v16843_v6 = vld [vmem:[%s20917_s23 + $0xf0] sm:$0xf0]  ;;  %v23581_v7 = vpack.c.bf16 %v8501_v9, %v8501_v9  ;;  %v23583_v62 = vpack.c.bf16 %v8502_v15, %v8502_v15  ;;  %v19817_v15 = vld [vmem:[%s20917_s23 + $0x64] sm:$0xf] }
 0x77b   : > { %v16846_v33 = vor.u32 %v19833_v1, %v16843_v6  ;;  %v17198_v1 = vor.u32 %v19921_v17, %v17195_v60  ;;  %v16923_v6 = vld [vmem:[%s20917_s23 + $0x190] sm:$0xf0] }
 0x77c   : > { %11795 = vmatpush.bf16.msrb.mxu3 %v18714_v2  ;;  %11770 = vmatpush.bf16.msrb.mxu1 %v18442_v5  ;;  %v18666_v2 = vor.u32 %v20291_v40, %v18665_v32  ;;  %v19865_v5 = vld [vmem:[%s20917_s23 + $0x1e4] sm:$0xf]  ;;  %v23585_v40 = vpack.c.bf16 %v8503_v27, %v8503_v27  ;;  %v17179_v9 = vld [vmem:[%s20917_s23 + $0x390] sm:$0xf0] }
 0x77d   : > { %v16974_v21 = vor.u32 %v19865_v5, %v16971_v44  ;;  %v19885_v5 = vld [vmem:[%s20917_s23 + $0x284] sm:$0xf]  ;;  %v16779_v27 = vld [vmem:[%s20917_s23 + $0x70] sm:$0xf0] }
 0x77e   : > { %11783 = vmatpush.bf16.msrb.mxu2 %v18570_v3  ;;  %11758 = vmatpush.bf16.msrb.mxu0 %v18298_v34  ;;  %v18266_v3 = vor.u32 %v20191_v47, %v18265_v4  ;;  %v18650_v34 = vor.u32 %v20287_v19, %v18649_v45  ;;  %v16811_v4 = vld [vmem:[%s20917_s23 + $0xb0] sm:$0xf0]  ;;  %v19857_v47 = vld [vmem:[%s20917_s23 + $0x1a4] sm:$0xf] }
 0x77f   : > { %v19821_v19 = vld [vmem:[%s20917_s23 + $0x84] sm:$0xf] }
 0x780   : > { %11796 = vmatpush.bf16.msrb.mxu3 %v18698_v12  ;;  %11771 = vmatpush.bf16.msrb.mxu1 %v18426_v22  ;;  %v18394_v12 = vor.u32 %v20223_v54, %v18393_v57  ;;  %v19829_v22 = vld [vmem:[%s20917_s23 + $0xc4] sm:$0xf]  ;;  %v17067_v54 = vld [vmem:[%s20917_s23 + $0x2b0] sm:$0xf0] }
 0x781   : > { %v19889_v57 = vld [vmem:[%s20917_s23 + $0x2a4] sm:$0xf] }
 0x782   : > { %11784 = vmatpush.bf16.msrb.mxu2 %v18554_v50  ;;  %11759 = vmatpush.bf16.msrb.mxu0 %v18282_v10  ;;  %v16827_v50 = vld [vmem:[%s20917_s23 + $0xd0] sm:$0xf0]  ;;  %v19825_v10 = vld [vmem:[%s20917_s23 + $0xa4] sm:$0xf]  ;;  %v17070_v45 = vor.u32 %v19889_v57, %v17067_v54 }
 0x783   : > { %v16830_v32 = vor.u32 %v19829_v22, %v16827_v50  ;;  %v19913_v22 = vld [vmem:[%s20917_s23 + $0x364] sm:$0xf]  ;;  %v17163_v50 = vld [vmem:[%s20917_s23 + $0x370] sm:$0xf0] }
 0x784   : > { %11797 = vmatpush.bf16.msrb.mxu3 %v18682_v24  ;;  %11772 = vmatpush.bf16.msrb.mxu1 %v18410_v46  ;;  %v8408_v24 = vadd.f32 %v23520_v30, %v8395_v58  ;;  %v16958_v30 = vor.u32 %v19861_v36, %v16955_v35  ;;  %v17214_v46 = vor.u32 %v19925_v13, %v17211_v52  ;;  %v19845_v13 = vld [vmem:[%s20917_s23 + $0x144] sm:$0xf]  ;;  %v17147_v57 = vld [vmem:[%s20917_s23 + $0x350] sm:$0xf0] }
 0x785   : > { %v16782_v36 = vor.u32 %v19817_v15, %v16779_v27  ;;  %v17166_v52 = vor.u32 %v19913_v22, %v17163_v50  ;;  %v19869_v15 = vld [vmem:[%s20917_s23 + $0x204] sm:$0xf]  ;;  %v17355_v50 = vld [vmem:[%s20917_s23 + $0x4f0] sm:$0xf0] }
 0x786   : > { %11785 = vmatpush.bf16.msrb.mxu2 %v18538_v38  ;;  %11760 = vmatpush.bf16.msrb.mxu0 %v18266_v3  ;;  %v16939_v38 = vld [vmem:[%s20917_s23 + $0x1b0] sm:$0xf0]  ;;  %v8421_v59 = vadd.f32 %v23532_v49, %v8408_v24  ;;  %v19853_v49 = vld [vmem:[%s20917_s23 + $0x184] sm:$0xf]  ;;  %v8446_v28 = vpop.f32.mrf.mxu0 }
 0x787   : > { %v16942_v63 = vor.u32 %v19857_v47, %v16939_v38  ;;  %v17051_v3 = vld [vmem:[%s20917_s23 + $0x290] sm:$0xf0]  ;;  %v16926_v16 = vor.u32 %v19853_v49, %v16923_v6  ;;  %v19909_v38 = vld [vmem:[%s20917_s23 + $0x344] sm:$0xf] }
 0x788   : > { %11798 = vmatpush.bf16.msrb.mxu3 %v18666_v2  ;;  %11773 = vmatpush.bf16.msrb.mxu1 %v18394_v12  ;;  %v16814_v2 = vor.u32 %v19825_v10, %v16811_v4  ;;  %v8434_v44 = vadd.f32 %v23538_v18, %v8421_v59  ;;  %v8459_v58 = vpop.f32.mrf.mxu1  ;;  %v16798_v12 = vor.u32 %v19821_v19, %v16795_v0  ;;  %v19849_v18 = vld [vmem:[%s20917_s23 + $0x164] sm:$0xf]  ;;  %v16763_v24 = vld [vmem:[%s20917_s23 + $0x50] sm:$0xf0] }
 0x789   : > { %11761 = vmatmul.bf16.vlgmr.msrb.gmra.mxu0 %v23581_v7  ;;  %v17054_v20 = vor.u32 %v19885_v5, %v17051_v3  ;;  %v17019_v10 = vld [vmem:[%s20917_s23 + $0x250] sm:$0xf0]  ;;  %v16766_v59 = vor.u32 %v19813_v51, %v16763_v24  ;;  %v19841_v19 = vld [vmem:[%s20917_s23 + $0x124] sm:$0xf]  ;;  %v17150_v0 = vor.u32 %v19909_v38, %v17147_v57 }
 0x78a   : > { %11786 = vmatpush.bf16.msrb.mxu2 %v18522_v53  ;;  %11805 = vmatpush.bf16.msra.mxu0 %v16846_v33  ;;  %v8447_v53 = vadd.f32 %v8446_v28, %v8434_v44  ;;  %v16907_v33 = vld [vmem:[%s20917_s23 + $0x170] sm:$0xf0]  ;;  %v19905_v3 = vld [vmem:[%s20917_s23 + $0x324] sm:$0xf] }
 0x78b   : > { %11774 = vmatmul.bf16.vlgmr.msrb.gmra.mxu1 %v23583_v62  ;;  %v16910_v35 = vor.u32 %v19849_v18, %v16907_v33  ;;  %v16875_v49 = vld [vmem:[%s20917_s23 + $0x130] sm:$0xf0]  ;;  %v19901_v33 = vld [vmem:[%s20917_s23 + $0x304] sm:$0xf] }
 0x78c   : > { %11799 = vmatpush.bf16.msrb.mxu3 %v18650_v34  ;;  %11818 = vmatpush.bf16.msra.mxu1 %v16974_v21  ;;  %v17182_v34 = vor.u32 %v19917_v61, %v17179_v9  ;;  %v19881_v21 = vld [vmem:[%s20917_s23 + $0x264] sm:$0xf]  ;;  %v17003_v6 = vld [vmem:[%s20917_s23 + $0x230] sm:$0xf0] }
 0x78d   : > { %11787 = vmatmul.bf16.vlgmr.msrb.gmra.mxu2 %v23585_v40  ;;  %v17131_v44 = vld [vmem:[%s20917_s23 + $0x330] sm:$0xf0]  ;;  %v19805_v61 = vld [vmem:[%s20917_s23 + $0x4] sm:$0xf] }
 0x78e   : > { %11831 = vmatpush.bf16.msra.mxu2 %v17102_v41  ;;  %11806 = vmatpush.bf16.msra.mxu0 %v16830_v32  ;;  %v17035_v41 = vld [vmem:[%s20917_s23 + $0x270] sm:$0xf0]  ;;  %v17134_v27 = vor.u32 %v19905_v3, %v17131_v44  ;;  %v19961_v22 = vld [vmem:[%s20917_s23 + $0x4e4] sm:$0xf] }
 0x78f   : > { %v17038_v29 = vor.u32 %v19881_v21, %v17035_v41  ;;  %v16731_v9 = vld [vmem:[%s20917_s23 + $0x10] sm:$0xf0]  ;;  %v19989_v38 = vld [vmem:[%s20917_s23 + $0x5c4] sm:$0xf] }
 0x790   : > { %11844 = vmatpush.bf16.msra.mxu3 %v17230_v31  ;;  %11819 = vmatpush.bf16.msra.mxu1 %v16958_v30  ;;  %v8460_v31 = vadd.f32 %v8459_v58, %v8447_v53  ;;  %v8472_v32 = vpop.f32.mrf.mxu2  ;;  %v16891_v30 = vld [vmem:[%s20917_s23 + $0x150] sm:$0xf0]  ;;  %v8461_v54 = vpop.f32.mrf.mxu1  ;;  %v20017_v3 = vld [vmem:[%s20917_s23 + $0x6a4] sm:$0xf] }
 0x791   : > { %v16894_v60 = vor.u32 %v19845_v13, %v16891_v30  ;;  %v17115_v21 = vld [vmem:[%s20917_s23 + $0x310] sm:$0xf0] }
 0x792   : > { %11832 = vmatpush.bf16.msra.mxu2 %v17086_v43  ;;  %11807 = vmatpush.bf16.msra.mxu0 %v16814_v2  ;;  %v19877_v43 = vld [vmem:[%s20917_s23 + $0x244] sm:$0xf]  ;;  %v8473_v4 = vadd.f32 %v8472_v32, %v8460_v31  ;;  %v8485_v47 = vpop.f32.mrf.mxu3  ;;  %v16734_v31 = vor.u32 %v19805_v61, %v16731_v9  ;;  %v17611_v51 = vld [vmem:[%s20917_s23 + $0x6f0] sm:$0xf0]  ;;  %v17118_v30 = vor.u32 %v19901_v33, %v17115_v21 }
 0x793   : > { %v17022_v2 = vor.u32 %v19877_v43, %v17019_v10  ;;  %v17739_v32 = vld [vmem:[%s20917_s23 + $0x7f0] sm:$0xf0]  ;;  %v17358_v43 = vor.u32 %v19961_v22, %v17355_v50 }
 0x794   : > { %11845 = vmatpush.bf16.msra.mxu3 %v17214_v46  ;;  %11820 = vmatpush.bf16.msra.mxu1 %v16942_v63  ;;  %v8448_v46 = vpop.f32.mrf.mxu0  ;;  %v8486_v17 = vadd.f32 %v8485_v47, %v8473_v4  ;;  %v19809_v63 = vld [vmem:[%s20917_s23 + $0x24] sm:$0xf]  ;;  %v17467_v54 = vld [vmem:[%s20917_s23 + $0x5d0] sm:$0xf0] }
 0x795   : > { %v19957_v47 = vld [vmem:[%s20917_s23 + $0x4c4] sm:$0xf]  ;;  %v17339_v46 = vld [vmem:[%s20917_s23 + $0x4d0] sm:$0xf0] }
 0x796   : > { %11833 = vmatpush.bf16.msra.mxu2 %v17070_v45  ;;  %11808 = vmatpush.bf16.msra.mxu0 %v16798_v12  ;;  %v16747_v45 = vld [vmem:[%s20917_s23 + $0x30] sm:$0xf0]  ;;  %v8504_v5 = vmax.f32 %v8486_v17, 0.0  ;;  %v16878_v12 = vor.u32 %v19841_v19, %v16875_v49 }
 0x797   : > { %v16750_v28 = vor.u32 %v19809_v63, %v16747_v45  ;;  %v17595_v17 = vld [vmem:[%s20917_s23 + $0x6d0] sm:$0xf0]  ;;  %v17342_v63 = vor.u32 %v19957_v47, %v17339_v46  ;;  %v17470_v45 = vor.u32 %v19989_v38, %v17467_v54 }
 0x798   : > { %11846 = vmatpush.bf16.msra.mxu3 %v17198_v1  ;;  %11821 = vmatpush.bf16.msra.mxu1 %v16926_v16  ;;  %v19873_v1 = vld [vmem:[%s20917_s23 + $0x224] sm:$0xf]  ;;  %v23634_v58 = vpack.c.bf16 %v8504_v5, %v8504_v5  ;;  %v8474_v18 = vpop.f32.mrf.mxu2  ;;  %v17323_v49 = vld [vmem:[%s20917_s23 + $0x4b0] sm:$0xf0] }
 0x799   : > { %v17006_v53 = vor.u32 %v19873_v1, %v17003_v6  ;;  %v19837_v16 = vld [vmem:[%s20917_s23 + $0x104] sm:$0xf]  ;;  %v17451_v5 = vld [vmem:[%s20917_s23 + $0x5b0] sm:$0xf0] }
 0x79a   : > { %11834 = vmatpush.bf16.msra.mxu2 %v17054_v20  ;;  %11809 = vmatpush.bf16.msra.mxu0 %v16782_v36  ;;  %v16859_v20 = vld [vmem:[%s20917_s23 + $0x110] sm:$0xf0]  ;;  %v8487_v41 = vpop.f32.mrf.mxu3  ;;  %v19993_v36 = vld [vmem:[%s20917_s23 + $0x5e4] sm:$0xf] }
 0x79b   : > { %11800 = vmatmul.bf16.vlgmr.msrb.gmra.mxu3 %v23634_v58  ;;  %v16862_v24 = vor.u32 %v19837_v16, %v16859_v20  ;;  %v19985_v1 = vld [vmem:[%s20917_s23 + $0x5a4] sm:$0xf]  ;;  %v17579_v44 = vld [vmem:[%s20917_s23 + $0x6b0] sm:$0xf0] }
 0x79c   : > { %11847 = vmatpush.bf16.msra.mxu3 %v17182_v34  ;;  %11822 = vmatpush.bf16.msra.mxu1 %v16910_v35  ;;  %v16987_v34 = vld [vmem:[%s20917_s23 + $0x210] sm:$0xf0]  ;;  %v19949_v16 = vld [vmem:[%s20917_s23 + $0x484] sm:$0xf] }
 0x79d   : > { %v17483_v35 = vld [vmem:[%s20917_s23 + $0x5f0] sm:$0xf0]  ;;  %v16990_v13 = vor.u32 %v19869_v15, %v16987_v34  ;;  %v19981_v15 = vld [vmem:[%s20917_s23 + $0x584] sm:$0xf] }
 0x79e   : > { %11835 = vmatpush.bf16.msra.mxu2 %v17038_v29  ;;  %11810 = vmatpush.bf16.msra.mxu0 %v16766_v59  ;;  %v20025_v29 = vld [vmem:[%s20917_s23 + $0x6e4] sm:$0xf]  ;;  %v17486_v10 = vor.u32 %v19993_v36, %v17483_v35  ;;  %v17707_v61 = vld [vmem:[%s20917_s23 + $0x7b0] sm:$0xf0] }
 0x79f   : > { %v17614_v4 = vor.u32 %v20025_v29, %v17611_v51  ;;  %v20021_v59 = vld [vmem:[%s20917_s23 + $0x6c4] sm:$0xf]  ;;  %v17307_v20 = vld [vmem:[%s20917_s23 + $0x490] sm:$0xf0] }
 0x7a0   : > { %11848 = vmatpush.bf16.msra.mxu3 %v17166_v52  ;;  %11823 = vmatpush.bf16.msra.mxu1 %v16894_v60  ;;  %v20057_v52 = vld [vmem:[%s20917_s23 + $0x7e4] sm:$0xf]  ;;  %v17598_v19 = vor.u32 %v20021_v59, %v17595_v17  ;;  %v17435_v18 = vld [vmem:[%s20917_s23 + $0x590] sm:$0xf0]  ;;  %v17310_v36 = vor.u32 %v19949_v16, %v17307_v20 }
 0x7a1   : > { %v17742_v57 = vor.u32 %v20057_v52, %v17739_v32  ;;  %v20053_v60 = vld [vmem:[%s20917_s23 + $0x7c4] sm:$0xf]  ;;  %v17563_v33 = vld [vmem:[%s20917_s23 + $0x690] sm:$0xf0]  ;;  %v17438_v35 = vor.u32 %v19981_v15, %v17435_v18 }
 0x7a2   : > { %11836 = vmatpush.bf16.msra.mxu2 %v17022_v2  ;;  %11811 = vmatpush.bf16.msra.mxu0 %v16750_v28  ;;  %v17723_v2 = vld [vmem:[%s20917_s23 + $0x7d0] sm:$0xf0]  ;;  %v20049_v28 = vld [vmem:[%s20917_s23 + $0x7a4] sm:$0xf] }
 0x7a3   : > { %v17726_v6 = vor.u32 %v20053_v60, %v17723_v2  ;;  %v20013_v34 = vld [vmem:[%s20917_s23 + $0x684] sm:$0xf]  ;;  %v17691_v22 = vld [vmem:[%s20917_s23 + $0x790] sm:$0xf0] }
 0x7a4   : > { %11849 = vmatpush.bf16.msra.mxu3 %v17150_v0  ;;  %11824 = vmatpush.bf16.msra.mxu1 %v16878_v12  ;;  %v19953_v0 = vld [vmem:[%s20917_s23 + $0x4a4] sm:$0xf]  ;;  %v17454_v12 = vor.u32 %v19985_v1, %v17451_v5  ;;  %v17566_v29 = vor.u32 %v20013_v34, %v17563_v33  ;;  %v17419_v32 = vld [vmem:[%s20917_s23 + $0x570] sm:$0xf0] }
 0x7a5   : > { %v17326_v9 = vor.u32 %v19953_v0, %v17323_v49  ;;  %v20045_v41 = vld [vmem:[%s20917_s23 + $0x784] sm:$0xf]  ;;  %v17275_v54 = vld [vmem:[%s20917_s23 + $0x450] sm:$0xf0] }
 0x7a6   : > { %11837 = vmatpush.bf16.msra.mxu2 %v17006_v53  ;;  %11812 = vmatpush.bf16.msra.mxu0 %v16734_v31  ;;  %v17582_v53 = vor.u32 %v20017_v3, %v17579_v44  ;;  %v11606_v21 = vpop.f32.mrf.mxu0  ;;  %v19945_v51 = vld [vmem:[%s20917_s23 + $0x464] sm:$0xf]  ;;  %v17694_v52 = vor.u32 %v20045_v41, %v17691_v22  ;;  %v17403_v2 = vld [vmem:[%s20917_s23 + $0x550] sm:$0xf0] }
 0x7a7   : > { %v19973_v59 = vld [vmem:[%s20917_s23 + $0x544] sm:$0xf]  ;;  %v17387_v20 = vld [vmem:[%s20917_s23 + $0x530] sm:$0xf0] }
 0x7a8   : > { %11850 = vmatpush.bf16.msra.mxu3 %v17134_v27  ;;  %11825 = vmatpush.bf16.msra.mxu1 %v16862_v24  ;;  %v17710_v27 = vor.u32 %v20049_v28, %v17707_v61  ;;  %v11619_v50 = vpop.f32.mrf.mxu1  ;;  %v17291_v24 = vld [vmem:[%s20917_s23 + $0x470] sm:$0xf0]  ;;  %v20037_v1 = vld [vmem:[%s20917_s23 + $0x744] sm:$0xf]  ;;  %v17406_v28 = vor.u32 %v19973_v59, %v17403_v2 }
 0x7a9   : > { %11813 = vmatmul.bf16.vlgmr.msra.gmra.mxu0 %v23313_v42  ;;  %v11620_v31 = vadd.f32 %v11619_v50, %v11606_v21  ;;  %v17294_v47 = vor.u32 %v19945_v51, %v17291_v24  ;;  %v20001_v15 = vld [vmem:[%s20917_s23 + $0x624] sm:$0xf]  ;;  %v17643_v34 = vld [vmem:[%s20917_s23 + $0x730] sm:$0xf0] }
 0x7aa   : > { %11838 = vmatpush.bf16.msra.mxu2 %v16990_v13  ;;  %11857 = vmatpush.bf16.msrb.mxu0 %v17358_v43  ;;  %v19977_v13 = vld [vmem:[%s20917_s23 + $0x564] sm:$0xf]  ;;  %v17547_v43 = vld [vmem:[%s20917_s23 + $0x670] sm:$0xf0] }
 0x7ab   : > { %11826 = vmatmul.bf16.vlgmr.msra.gmra.mxu1 %v23315_v37  ;;  %v17422_v46 = vor.u32 %v19977_v13, %v17419_v32  ;;  %v20033_v18 = vld [vmem:[%s20917_s23 + $0x724] sm:$0xf]  ;;  %v17243_v41 = vld [vmem:[%s20917_s23 + $0x410] sm:$0xf0] }
 0x7ac   : > { %11851 = vmatpush.bf16.msra.mxu3 %v17118_v30  ;;  %11870 = vmatpush.bf16.msrb.mxu1 %v17486_v10  ;;  %v20009_v30 = vld [vmem:[%s20917_s23 + $0x664] sm:$0xf]  ;;  %v17499_v24 = vld [vmem:[%s20917_s23 + $0x610] sm:$0xf0] }
 0x7ad   : > { %11839 = vmatmul.bf16.vlgmr.msra.gmra.mxu2 %v23317_v39  ;;  %v20041_v10 = vld [vmem:[%s20917_s23 + $0x764] sm:$0xf]  ;;  %v17550_v38 = vor.u32 %v20009_v30, %v17547_v43  ;;  %v17867_v43 = vld [vmem:[%s20917_s23 + $0x8f0] sm:$0xf0] }
 0x7ae   : > { %11883 = vmatpush.bf16.msrb.mxu2 %v17614_v4  ;;  %11858 = vmatpush.bf16.msrb.mxu0 %v17342_v63  ;;  %v17675_v4 = vld [vmem:[%s20917_s23 + $0x770] sm:$0xf0]  ;;  %v20005_v63 = vld [vmem:[%s20917_s23 + $0x644] sm:$0xf]  ;;  %v11608_v49 = vpop.f32.mrf.mxu0 }
 0x7af   : > { %11852 = vmatmul.bf16.vlgmr.msra.gmra.mxu3 %v23322_v56  ;;  %v17678_v17 = vor.u32 %v20041_v10, %v17675_v4  ;;  %v19933_v21 = vld [vmem:[%s20917_s23 + $0x404] sm:$0xf] }
 0x7b0   : > { %11896 = vmatpush.bf16.msrb.mxu3 %v17742_v57  ;;  %11871 = vmatpush.bf16.msrb.mxu1 %v17470_v45  ;;  %v19941_v57 = vld [vmem:[%s20917_s23 + $0x444] sm:$0xf]  ;;  %v11632_v60 = vpop.f32.mrf.mxu2  ;;  %v17531_v45 = vld [vmem:[%s20917_s23 + $0x650] sm:$0xf0]  ;;  %v11621_v5 = vpop.f32.mrf.mxu1  ;;  %v17246_v4 = vor.u32 %v19933_v21, %v17243_v41 }
 0x7b1   : > { %v17278_v3 = vor.u32 %v19941_v57, %v17275_v54  ;;  %v17534_v61 = vor.u32 %v20005_v63, %v17531_v45  ;;  %v20029_v13 = vld [vmem:[%s20917_s23 + $0x704] sm:$0xf]  ;;  %v18219_v41 = vld [vmem:[%s20917_s23 + $0xbb0] sm:$0xf0] }
 0x7b2   : > { %11884 = vmatpush.bf16.msrb.mxu2 %v17598_v19  ;;  %11859 = vmatpush.bf16.msrb.mxu0 %v17326_v9  ;;  %v11633_v19 = vadd.f32 %v11632_v60, %v11620_v31  ;;  %v11645_v0 = vpop.f32.mrf.mxu3  ;;  %v19937_v9 = vld [vmem:[%s20917_s23 + $0x424] sm:$0xf]  ;;  %v17371_v31 = vld [vmem:[%s20917_s23 + $0x510] sm:$0xf0] }
 0x7b3   : > { %v20089_v30 = vld [vmem:[%s20917_s23 + $0x8e4] sm:$0xf] }
 0x7b4   : > { %11897 = vmatpush.bf16.msrb.mxu3 %v17726_v6  ;;  %11872 = vmatpush.bf16.msrb.mxu1 %v17454_v12  ;;  %v17659_v6 = vld [vmem:[%s20917_s23 + $0x750] sm:$0xf0]  ;;  %v23695_v44 = vadd.f32 %v11645_v0, %v11633_v19  ;;  %v20121_v10 = vld [vmem:[%s20917_s23 + $0x9e4] sm:$0xf]  ;;  %v17870_v2 = vor.u32 %v20089_v30, %v17867_v43 }
 0x7b5   : > { %v17259_v12 = vld [vmem:[%s20917_s23 + $0x430] sm:$0xf0]  ;;  %v17662_v16 = vor.u32 %v20037_v1, %v17659_v6  ;;  %v20185_v59 = vld [vmem:[%s20917_s23 + $0xbe4] sm:$0xf] }
 0x7b6   : > { %11885 = vmatpush.bf16.msrb.mxu2 %v17582_v53  ;;  %11860 = vmatpush.bf16.msrb.mxu0 %v17310_v36  ;;  %v19969_v53 = vld [vmem:[%s20917_s23 + $0x524] sm:$0xf]  ;;  %v17262_v33 = vor.u32 %v19937_v9, %v17259_v12  ;;  %v17851_v0 = vld [vmem:[%s20917_s23 + $0x8d0] sm:$0xf0] }
 0x7b7   : > { %v17390_v22 = vor.u32 %v19969_v53, %v17387_v20  ;;  %v19965_v36 = vld [vmem:[%s20917_s23 + $0x504] sm:$0xf]  ;;  %v17979_v6 = vld [vmem:[%s20917_s23 + $0x9d0] sm:$0xf0] }
 0x7b8   : > { %11898 = vmatpush.bf16.msrb.mxu3 %v17710_v27  ;;  %11873 = vmatpush.bf16.msrb.mxu1 %v17438_v35  ;;  %v17515_v27 = vld [vmem:[%s20917_s23 + $0x630] sm:$0xf0]  ;;  %v19997_v35 = vld [vmem:[%s20917_s23 + $0x604] sm:$0xf]  ;;  %v11634_v51 = vpop.f32.mrf.mxu2  ;;  %v17374_v57 = vor.u32 %v19965_v36, %v17371_v31 }
 0x7b9   : > { %v17518_v50 = vor.u32 %v20001_v15, %v17515_v27  ;;  %v17502_v54 = vor.u32 %v19997_v35, %v17499_v24  ;;  %v20085_v19 = vld [vmem:[%s20917_s23 + $0x8c4] sm:$0xf]  ;;  %v17835_v20 = vld [vmem:[%s20917_s23 + $0x8b0] sm:$0xf0] }
 0x7ba   : > { %11886 = vmatpush.bf16.msrb.mxu2 %v17566_v29  ;;  %11861 = vmatpush.bf16.msrb.mxu0 %v17294_v47  ;;  %v17646_v29 = vor.u32 %v20033_v18, %v17643_v34  ;;  %v11647_v32 = vpop.f32.mrf.mxu3  ;;  %v17995_v47 = vld [vmem:[%s20917_s23 + $0x9f0] sm:$0xf0]  ;;  %v20117_v49 = vld [vmem:[%s20917_s23 + $0x9c4] sm:$0xf]  ;;  %v17854_v9 = vor.u32 %v20085_v19, %v17851_v0 }
 0x7bb   : > { %v17998_v63 = vor.u32 %v20121_v10, %v17995_v47  ;;  %v20149_v5 = vld [vmem:[%s20917_s23 + $0xac4] sm:$0xf]  ;;  %v17982_v12 = vor.u32 %v20117_v49, %v17979_v6  ;;  %v17963_v18 = vld [vmem:[%s20917_s23 + $0x9b0] sm:$0xf0] }
 0x7bc   : > { %11899 = vmatpush.bf16.msrb.mxu3 %v17694_v52  ;;  %11874 = vmatpush.bf16.msrb.mxu1 %v17422_v46  ;;  %v17627_v52 = vld [vmem:[%s20917_s23 + $0x710] sm:$0xf0]  ;;  %v20153_v46 = vld [vmem:[%s20917_s23 + $0xae4] sm:$0xf] }
 0x7bd   : > { %v17630_v60 = vor.u32 %v20029_v13, %v17627_v52  ;;  %v20113_v15 = vld [vmem:[%s20917_s23 + $0x9a4] sm:$0xf]  ;;  %v17819_v35 = vld [vmem:[%s20917_s23 + $0x890] sm:$0xf0] }
 0x7be   : > { %11887 = vmatpush.bf16.msrb.mxu2 %v17550_v38  ;;  %11862 = vmatpush.bf16.msrb.mxu0 %v17278_v3  ;;  %v18123_v38 = vld [vmem:[%s20917_s23 + $0xaf0] sm:$0xf0]  ;;  %v20145_v34 = vld [vmem:[%s20917_s23 + $0xaa4] sm:$0xf] }
 0x7bf   : > { %v18126_v45 = vor.u32 %v20153_v46, %v18123_v38  ;;  %v18107_v3 = vld [vmem:[%s20917_s23 + $0xad0] sm:$0xf0]  ;;  %v20177_v21 = vld [vmem:[%s20917_s23 + $0xba4] sm:$0xf] }
 0x7c0   : > { %11900 = vmatpush.bf16.msrb.mxu3 %v17678_v17  ;;  %11875 = vmatpush.bf16.msrb.mxu1 %v17406_v28  ;;  %v18251_v17 = vld [vmem:[%s20917_s23 + $0xbf0] sm:$0xf0]  ;;  %v20181_v28 = vld [vmem:[%s20917_s23 + $0xbc4] sm:$0xf]  ;;  %v18110_v53 = vor.u32 %v20149_v5, %v18107_v3  ;;  %v18222_v51 = vor.u32 %v20177_v21, %v18219_v41 }
 0x7c1   : > { %v18254_v1 = vor.u32 %v20185_v59, %v18251_v17  ;;  %v20077_v31 = vld [vmem:[%s20917_s23 + $0x884] sm:$0xf]  ;;  %v17947_v24 = vld [vmem:[%s20917_s23 + $0x990] sm:$0xf0] }
 0x7c2   : > { %11888 = vmatpush.bf16.msrb.mxu2 %v17534_v61  ;;  %11863 = vmatpush.bf16.msrb.mxu0 %v17262_v33  ;;  %v18235_v61 = vld [vmem:[%s20917_s23 + $0xbd0] sm:$0xf0]  ;;  %v20141_v13 = vld [vmem:[%s20917_s23 + $0xa84] sm:$0xf]  ;;  %v17822_v47 = vor.u32 %v20077_v31, %v17819_v35 }
 0x7c3   : > { %v18238_v27 = vor.u32 %v20181_v28, %v18235_v61  ;;  %v18091_v33 = vld [vmem:[%s20917_s23 + $0xab0] sm:$0xf0]  ;;  %v20173_v30 = vld [vmem:[%s20917_s23 + $0xb84] sm:$0xf] }
 0x7c4   : > { %11901 = vmatpush.bf16.msrb.mxu3 %v17662_v16  ;;  %11876 = vmatpush.bf16.msrb.mxu1 %v17390_v22  ;;  %v20081_v16 = vld [vmem:[%s20917_s23 + $0x8a4] sm:$0xf]  ;;  %v18094_v36 = vor.u32 %v20145_v34, %v18091_v33  ;;  %v18075_v52 = vld [vmem:[%s20917_s23 + $0xa90] sm:$0xf0] }
 0x7c5   : > { %v17838_v22 = vor.u32 %v20081_v16, %v17835_v20  ;;  %v18203_v43 = vld [vmem:[%s20917_s23 + $0xb90] sm:$0xf0]  ;;  %v18078_v38 = vor.u32 %v20141_v13, %v18075_v52  ;;  %v20105_v59 = vld [vmem:[%s20917_s23 + $0x964] sm:$0xf] }
 0x7c6   : > { %11889 = vmatpush.bf16.msrb.mxu2 %v17518_v50  ;;  %11864 = vmatpush.bf16.msrb.mxu0 %v17246_v4  ;;  %v17966_v50 = vor.u32 %v20113_v15, %v17963_v18  ;;  %v11658_v32 = vpop.f32.mrf.mxu0  ;;  %v18187_v19 = vld [vmem:[%s20917_s23 + $0xb70] sm:$0xf0]  ;;  %v20069_v6 = vld [vmem:[%s20917_s23 + $0x844] sm:$0xf] }
 0x7c7   : > { %v11659_v10 = vadd.f32 %v11658_v32, %v23695_v44  ;;  %v20137_v44 = vld [vmem:[%s20917_s23 + $0xa64] sm:$0xf]  ;;  %v17787_v5 = vld [vmem:[%s20917_s23 + $0x850] sm:$0xf0] }
 0x7c8   : > { %11902 = vmatpush.bf16.msrb.mxu3 %v17646_v29  ;;  %11877 = vmatpush.bf16.msrb.mxu1 %v17374_v57  ;;  %v20109_v29 = vld [vmem:[%s20917_s23 + $0x984] sm:$0xf]  ;;  %v11671_v4 = vpop.f32.mrf.mxu1  ;;  %v17790_v34 = vor.u32 %v20069_v6, %v17787_v5  ;;  %v17899_v31 = vld [vmem:[%s20917_s23 + $0x930] sm:$0xf0] }
 0x7c9   : > { %11865 = vmatmul.bf16.vlgmr.msrb.gmra.mxu0 %v23399_v8  ;;  %v17950_v46 = vor.u32 %v20109_v29, %v17947_v24  ;;  %v20073_v57 = vld [vmem:[%s20917_s23 + $0x864] sm:$0xf]  ;;  %v23753_v17 = vadd.f32 %v11671_v4, %v11659_v10  ;;  %v18027_v29 = vld [vmem:[%s20917_s23 + $0xa30] sm:$0xf0] }
 0x7ca   : > { %11890 = vmatpush.bf16.msrb.mxu2 %v17502_v54  ;;  %11909 = vmatpush.bf16.msra.mxu0 %v17870_v2  ;;  %v17803_v54 = vld [vmem:[%s20917_s23 + $0x870] sm:$0xf0]  ;;  %v20101_v3 = vld [vmem:[%s20917_s23 + $0x944] sm:$0xf] }
 0x7cb   : > { %11878 = vmatmul.bf16.vlgmr.msrb.gmra.mxu1 %v23401_v48  ;;  %v17931_v2 = vld [vmem:[%s20917_s23 + $0x970] sm:$0xf0]  ;;  %v17806_v0 = vor.u32 %v20073_v57, %v17803_v54  ;;  %v20165_v15 = vld [vmem:[%s20917_s23 + $0xb44] sm:$0xf] }
 0x7cc   : > { %11903 = vmatpush.bf16.msrb.mxu3 %v17630_v60  ;;  %11922 = vmatpush.bf16.msra.mxu1 %v17998_v63  ;;  %v18206_v60 = vor.u32 %v20173_v30, %v18203_v43  ;;  %v18059_v63 = vld [vmem:[%s20917_s23 + $0xa70] sm:$0xf0]  ;;  %v17934_v49 = vor.u32 %v20105_v59, %v17931_v2  ;;  %v20065_v41 = vld [vmem:[%s20917_s23 + $0x824] sm:$0xf] }
 0x7cd   : > { %11891 = vmatmul.bf16.vlgmr.msrb.gmra.mxu2 %v23403_v55  ;;  %v20129_v35 = vld [vmem:[%s20917_s23 + $0xa24] sm:$0xf]  ;;  %v18155_v24 = vld [vmem:[%s20917_s23 + $0xb30] sm:$0xf0] }
 0x7ce   : > { %11935 = vmatpush.bf16.msra.mxu2 %v18126_v45  ;;  %11910 = vmatpush.bf16.msra.mxu0 %v17854_v9  ;;  %v20169_v45 = vld [vmem:[%s20917_s23 + $0xb64] sm:$0xf]  ;;  %v17915_v9 = vld [vmem:[%s20917_s23 + $0x950] sm:$0xf0]  ;;  %v11660_v20 = vpop.f32.mrf.mxu0  ;;  %v18030_v43 = vor.u32 %v20129_v35, %v18027_v29 }
 0x7cf   : > { %11904 = vmatmul.bf16.vlgmr.msrb.gmra.mxu3 %v23408_v23  ;;  %v18190_v28 = vor.u32 %v20169_v45, %v18187_v19  ;;  %v17918_v33 = vor.u32 %v20101_v3, %v17915_v9  ;;  %v20061_v52 = vld [vmem:[%s20917_s23 + $0x804] sm:$0xf]  ;;  %v17755_v32 = vld [vmem:[%s20917_s23 + $0x810] sm:$0xf0] }
 0x7d0   : > { %11948 = vmatpush.bf16.msra.mxu3 %v18254_v1  ;;  %11923 = vmatpush.bf16.msra.mxu1 %v17982_v12  ;;  %v18062_v1 = vor.u32 %v20137_v44, %v18059_v63  ;;  %v23763_v61 = vpop.f32.mrf.mxu2  ;;  %v20133_v12 = vld [vmem:[%s20917_s23 + $0xa44] sm:$0xf]  ;;  %v11673_v18 = vpop.f32.mrf.mxu1  ;;  %v17883_v4 = vld [vmem:[%s20917_s23 + $0x910] sm:$0xf0]  ;;  %v17758_v45 = vor.u32 %v20061_v52, %v17755_v32 }
 0x7d1   : > { %v20093_v10 = vld [vmem:[%s20917_s23 + $0x904] sm:$0xf]  ;;  %v18011_v57 = vld [vmem:[%s20917_s23 + $0xa10] sm:$0xf0] }
 0x7d2   : > { %11936 = vmatpush.bf16.msra.mxu2 %v18110_v53  ;;  %11911 = vmatpush.bf16.msra.mxu0 %v17838_v22  ;;  %v18043_v53 = vld [vmem:[%s20917_s23 + $0xa50] sm:$0xf0]  ;;  %v23768_v16 = vpop.f32.mrf.mxu3  ;;  %v20157_v54 = vld [vmem:[%s20917_s23 + $0xb04] sm:$0xf] }
 0x7d3   : > { %v18046_v21 = vor.u32 %v20133_v12, %v18043_v53  ;;  %v17771_v22 = vld [vmem:[%s20917_s23 + $0x830] sm:$0xf0]  ;;  %v20217_v2 = vld [vmem:[%s20917_s23 + $0xce4] sm:$0xf] }
 0x7d4   : > { %11949 = vmatpush.bf16.msra.mxu3 %v18238_v27  ;;  %11924 = vmatpush.bf16.msra.mxu1 %v17966_v50  ;;  %v18171_v27 = vld [vmem:[%s20917_s23 + $0xb50] sm:$0xf0]  ;;  %v20097_v50 = vld [vmem:[%s20917_s23 + $0x924] sm:$0xf]  ;;  %v17774_v13 = vor.u32 %v20065_v41, %v17771_v22 }
 0x7d5   : > { %v17902_v30 = vor.u32 %v20097_v50, %v17899_v31  ;;  %v18139_v59 = vld [vmem:[%s20917_s23 + $0xb10] sm:$0xf0]  ;;  %v20249_v63 = vld [vmem:[%s20917_s23 + $0xde4] sm:$0xf] }
 0x7d6   : > { %11937 = vmatpush.bf16.msra.mxu2 %v18094_v36  ;;  %11912 = vmatpush.bf16.msra.mxu0 %v17822_v47  ;;  %v18174_v36 = vor.u32 %v20165_v15, %v18171_v27  ;;  %v20125_v47 = vld [vmem:[%s20917_s23 + $0xa04] sm:$0xf]  ;;  %v18379_v44 = vld [vmem:[%s20917_s23 + $0xcf0] sm:$0xf0] }
 0x7d7   : > { %v18507_v19 = vld [vmem:[%s20917_s23 + $0xdf0] sm:$0xf0]  ;;  %v18014_v6 = vor.u32 %v20125_v47, %v18011_v57  ;;  %v20313_v5 = vld [vmem:[%s20917_s23 + $0xfe4] sm:$0xf]  ;;  %v18382_v9 = vor.u32 %v20217_v2, %v18379_v44 }
 0x7d8   : > { %11950 = vmatpush.bf16.msra.mxu3 %v18222_v51  ;;  %11925 = vmatpush.bf16.msra.mxu1 %v17950_v46  ;;  %v20161_v51 = vld [vmem:[%s20917_s23 + $0xb24] sm:$0xf]  ;;  %v18763_v3 = vld [vmem:[%s20917_s23 + $0xff0] sm:$0xf0]  ;;  %v18510_v12 = vor.u32 %v20249_v63, %v18507_v19 }
 0x7d9   : > { %v18158_v46 = vor.u32 %v20161_v51, %v18155_v24  ;;  %v20213_v20 = vld [vmem:[%s20917_s23 + $0xcc4] sm:$0xf]  ;;  %v18363_v15 = vld [vmem:[%s20917_s23 + $0xcd0] sm:$0xf0]  ;;  %v18766_v18 = vor.u32 %v20313_v5, %v18763_v3 }
 0x7da   : > { %11938 = vmatpush.bf16.msra.mxu2 %v18078_v38  ;;  %11913 = vmatpush.bf16.msra.mxu0 %v17806_v0  ;;  %v11686_v38 = vpop.f32.mrf.mxu2  ;;  %v20281_v0 = vld [vmem:[%s20917_s23 + $0xee4] sm:$0xf]  ;;  %v18747_v22 = vld [vmem:[%s20917_s23 + $0xfd0] sm:$0xf0]  ;;  %v18366_v50 = vor.u32 %v20213_v20, %v18363_v15 }
 0x7db   : > { %v20245_v27 = vld [vmem:[%s20917_s23 + $0xdc4] sm:$0xf]  ;;  %v18347_v29 = vld [vmem:[%s20917_s23 + $0xcb0] sm:$0xf0] }
 0x7dc   : > { %11951 = vmatpush.bf16.msra.mxu3 %v18206_v60  ;;  %11926 = vmatpush.bf16.msra.mxu1 %v17934_v49  ;;  %v11699_v60 = vpop.f32.mrf.mxu3  ;;  %v18635_v49 = vld [vmem:[%s20917_s23 + $0xef0] sm:$0xf0]  ;;  %v20309_v41 = vld [vmem:[%s20917_s23 + $0xfc4] sm:$0xf] }
 0x7dd   : > { %v18638_v53 = vor.u32 %v20281_v0, %v18635_v49  ;;  %v20209_v35 = vld [vmem:[%s20917_s23 + $0xca4] sm:$0xf]  ;;  %v18750_v24 = vor.u32 %v20309_v41, %v18747_v22  ;;  %v18603_v32 = vld [vmem:[%s20917_s23 + $0xeb0] sm:$0xf0] }
 0x7de   : > { %11939 = vmatpush.bf16.msra.mxu2 %v18062_v1  ;;  %11914 = vmatpush.bf16.msra.mxu0 %v17790_v34  ;;  %v17886_v1 = vor.u32 %v20093_v10, %v17883_v4  ;;  %v18491_v34 = vld [vmem:[%s20917_s23 + $0xdd0] sm:$0xf0]  ;;  %v20241_v51 = vld [vmem:[%s20917_s23 + $0xda4] sm:$0xf]  ;;  %v18350_v10 = vor.u32 %v20209_v35, %v18347_v29 }
 0x7df   : > { %v20273_v52 = vld [vmem:[%s20917_s23 + $0xea4] sm:$0xf]  ;;  %v18331_v38 = vld [vmem:[%s20917_s23 + $0xc90] sm:$0xf0] }
 0x7e0   : > { %11952 = vmatpush.bf16.msra.mxu3 %v18190_v28  ;;  %11927 = vmatpush.bf16.msra.mxu1 %v17918_v33  ;;  %v18142_v28 = vor.u32 %v20157_v54, %v18139_v59  ;;  %v20277_v33 = vld [vmem:[%s20917_s23 + $0xec4] sm:$0xf]  ;;  %v18606_v47 = vor.u32 %v20273_v52, %v18603_v32  ;;  %v18459_v59 = vld [vmem:[%s20917_s23 + $0xd90] sm:$0xf0] }
 0x7e1   : > { %v20237_v57 = vld [vmem:[%s20917_s23 + $0xd84] sm:$0xf]  ;;  %v18587_v2 = vld [vmem:[%s20917_s23 + $0xe90] sm:$0xf0] }
 0x7e2   : > { %11940 = vmatpush.bf16.msra.mxu2 %v18046_v21  ;;  %11915 = vmatpush.bf16.msra.mxu0 %v17774_v13  ;;  %v18619_v21 = vld [vmem:[%s20917_s23 + $0xed0] sm:$0xf0]  ;;  %v20269_v60 = vld [vmem:[%s20917_s23 + $0xe84] sm:$0xf]  ;;  %v18462_v49 = vor.u32 %v20237_v57, %v18459_v59 }
 0x7e3   : > { %v18622_v31 = vor.u32 %v20277_v33, %v18619_v21  ;;  %v18475_v13 = vld [vmem:[%s20917_s23 + $0xdb0] sm:$0xf0]  ;;  %v20301_v63 = vld [vmem:[%s20917_s23 + $0xf84] sm:$0xf] }
 0x7e4   : > { %11953 = vmatpush.bf16.msra.mxu3 %v18174_v36  ;;  %11928 = vmatpush.bf16.msra.mxu1 %v17902_v30  ;;  %v18494_v36 = vor.u32 %v20245_v27, %v18491_v34  ;;  %v20305_v30 = vld [vmem:[%s20917_s23 + $0xfa4] sm:$0xf]  ;;  %v18478_v4 = vor.u32 %v20241_v51, %v18475_v13  ;;  %v18315_v5 = vld [vmem:[%s20917_s23 + $0xc70] sm:$0xf0] }
 0x7e5   : > { %v20233_v3 = vld [vmem:[%s20917_s23 + $0xd64] sm:$0xf]  ;;  %v18699_v15 = vld [vmem:[%s20917_s23 + $0xf70] sm:$0xf0] }
 0x7e6   : > { %11941 = vmatpush.bf16.msra.mxu2 %v18030_v43  ;;  %11916 = vmatpush.bf16.msra.mxu0 %v17758_v45  ;;  %v18731_v43 = vld [vmem:[%s20917_s23 + $0xfb0] sm:$0xf0]  ;;  %v23822_v44 = vpop.f32.mrf.mxu0  ;;  %v20297_v20 = vld [vmem:[%s20917_s23 + $0xf64] sm:$0xf] }
 0x7e7   : > { %v18734_v54 = vor.u32 %v20305_v30, %v18731_v43  ;;  %v18715_v45 = vld [vmem:[%s20917_s23 + $0xf90] sm:$0xf0]  ;;  %v20197_v33 = vld [vmem:[%s20917_s23 + $0xc44] sm:$0xf]  ;;  %v18702_v22 = vor.u32 %v20297_v20, %v18699_v15  ;;  %v16849_v15 = vld [vmem:[%s20917_s23 + $0xe8] sm:$0xf] }
 0x7e8   : > { %11954 = vmatpush.bf16.msra.mxu3 %v18158_v46  ;;  %11929 = vmatpush.bf16.msra.mxu1 %v17886_v1  ;;  %v20205_v46 = vld [vmem:[%s20917_s23 + $0xc84] sm:$0xf]  ;;  %v23826_v19 = vpop.f32.mrf.mxu1  ;;  %v18590_v1 = vor.u32 %v20269_v60, %v18587_v2  ;;  %v18299_v21 = vld [vmem:[%s20917_s23 + $0xc50] sm:$0xf0] }
 0x7e9   : > { %11917 = vmatmul.bf16.vlgmr.msra.gmra.mxu0 %v23487_v26  ;;  %v18334_v0 = vor.u32 %v20205_v46, %v18331_v38  ;;  %v20229_v41 = vld [vmem:[%s20917_s23 + $0xd44] sm:$0xf]  ;;  %v18555_v35 = vld [vmem:[%s20917_s23 + $0xe50] sm:$0xf0]  ;;  %v18302_v32 = vor.u32 %v20197_v33, %v18299_v21  ;;  %v19868_v33 = vld [vmem:[%s20917_s23 + $0x1f4] sm:$0xf0] }
 0x7ea   : > { %11942 = vmatpush.bf16.msra.mxu2 %v18014_v6  ;;  %11961 = vmatpush.bf16.msrb.mxu0 %v18382_v9  ;;  %v20201_v6 = vld [vmem:[%s20917_s23 + $0xc64] sm:$0xf]  ;;  %v18443_v9 = vld [vmem:[%s20917_s23 + $0xd70] sm:$0xf0]  ;;  %v17105_v21 = vld [vmem:[%s20917_s23 + $0x2e8] sm:$0xf] }
 0x7eb   : > { %11930 = vmatmul.bf16.vlgmr.msra.gmra.mxu1 %v23489_v14  ;;  %v18318_v27 = vor.u32 %v20201_v6, %v18315_v5  ;;  %v18683_v13 = vld [vmem:[%s20917_s23 + $0xf50] sm:$0xf0]  ;;  %v20257_v57 = vld [vmem:[%s20917_s23 + $0xe24] sm:$0xf] }
 0x7ec   : > { %11955 = vmatpush.bf16.msra.mxu3 %v18142_v28  ;;  %11974 = vmatpush.bf16.msrb.mxu1 %v18510_v12  ;;  %v18718_v28 = vor.u32 %v20301_v63, %v18715_v45  ;;  %v20265_v12 = vld [vmem:[%s20917_s23 + $0xe64] sm:$0xf]  ;;  %v18411_v38 = vld [vmem:[%s20917_s23 + $0xd30] sm:$0xf0] }
 0x7ed   : > { %11943 = vmatmul.bf16.vlgmr.msra.gmra.mxu2 %v23491_v11  ;;  %v20289_v59 = vld [vmem:[%s20917_s23 + $0xf24] sm:$0xf]  ;;  %v18667_v60 = vld [vmem:[%s20917_s23 + $0xf30] sm:$0xf0] }
 0x7ee   : > { %11987 = vmatpush.bf16.msrb.mxu2 %v18638_v53  ;;  %11962 = vmatpush.bf16.msrb.mxu0 %v18366_v50  ;;  %v18571_v53 = vld [vmem:[%s20917_s23 + $0xe70] sm:$0xf0]  ;;  %v11712_v51 = vpop.f32.mrf.mxu0  ;;  %v20189_v63 = vld [vmem:[%s20917_s23 + $0xc04] sm:$0xf] }
 0x7ef   : > { %11956 = vmatmul.bf16.vlgmr.msra.gmra.mxu3 %v23496_v25  ;;  %v18574_v34 = vor.u32 %v20265_v12, %v18571_v53  ;;  %v18267_v45 = vld [vmem:[%s20917_s23 + $0xc10] sm:$0xf0]  ;;  %v20253_v5 = vld [vmem:[%s20917_s23 + $0xe04] sm:$0xf] }
 0x7f0   : > { %12000 = vmatpush.bf16.msrb.mxu3 %v18766_v18  ;;  %11975 = vmatpush.bf16.msrb.mxu1 %v18494_v36  ;;  %v18446_v18 = vor.u32 %v20233_v3, %v18443_v9  ;;  %v23839_v50 = vpop.f32.mrf.mxu2  ;;  %v18427_v36 = vld [vmem:[%s20917_s23 + $0xd50] sm:$0xf0]  ;;  %v11725_v52 = vpop.f32.mrf.mxu1  ;;  %v18670_v3 = vor.u32 %v20289_v59, %v18667_v60  ;;  %v20285_v12 = vld [vmem:[%s20917_s23 + $0xf04] sm:$0xf] }
 0x7f1   : > { %v18430_v30 = vor.u32 %v20229_v41, %v18427_v36  ;;  %v18395_v6 = vld [vmem:[%s20917_s23 + $0xd10] sm:$0xf0]  ;;  %v19900_v41 = vld [vmem:[%s20917_s23 + $0x2f4] sm:$0xf0] }
 0x7f2   : > { %11988 = vmatpush.bf16.msrb.mxu2 %v18622_v31  ;;  %11963 = vmatpush.bf16.msrb.mxu0 %v18350_v10  ;;  %v20261_v31 = vld [vmem:[%s20917_s23 + $0xe44] sm:$0xf]  ;;  %v23844_v29 = vpop.f32.mrf.mxu3  ;;  %v18523_v9 = vld [vmem:[%s20917_s23 + $0xe10] sm:$0xf0]  ;;  %v17106_v52 = vor.u32 %v19900_v41, %v17105_v21  ;;  %v17185_v41 = vld [vmem:[%s20917_s23 + $0x388] sm:$0xf] }
 0x7f3   : > { %v18558_v43 = vor.u32 %v20261_v31, %v18555_v35  ;;  %v20193_v10 = vld [vmem:[%s20917_s23 + $0xc24] sm:$0xf]  ;;  %v18651_v53 = vld [vmem:[%s20917_s23 + $0xf10] sm:$0xf0]  ;;  %v18526_v36 = vor.u32 %v20253_v5, %v18523_v9  ;;  %v17233_v31 = vld [vmem:[%s20917_s23 + $0x3e8] sm:$0xf] }
 0x7f4   : > { %12001 = vmatpush.bf16.msrb.mxu3 %v18750_v24  ;;  %11976 = vmatpush.bf16.msrb.mxu1 %v18478_v4  ;;  %v20293_v24 = vld [vmem:[%s20917_s23 + $0xf44] sm:$0xf]  ;;  %v18283_v4 = vld [vmem:[%s20917_s23 + $0xc30] sm:$0xf0]  ;;  %v19932_v35 = vld [vmem:[%s20917_s23 + $0x3f4] sm:$0xf0]  ;;  %v18654_v51 = vor.u32 %v20285_v12, %v18651_v53 }
 0x7f5   : > { %v18686_v46 = vor.u32 %v20293_v24, %v18683_v13  ;;  %v18286_v2 = vor.u32 %v20193_v10, %v18283_v4  ;;  %v17234_v10 = vor.u32 %v19932_v35, %v17233_v31  ;;  %v19864_v4 = vld [vmem:[%s20917_s23 + $0x1d4] sm:$0xf0]  ;;  %v17201_v5 = vld [vmem:[%s20917_s23 + $0x3a8] sm:$0xf]  ;;  %v11685_v35 = vadd.f32 %v23763_v61, %v23753_v17 }
 0x7f6   : > { %11989 = vmatpush.bf16.msrb.mxu2 %v18606_v47  ;;  %11964 = vmatpush.bf16.msrb.mxu0 %v18334_v0  ;;  %v20225_v47 = vld [vmem:[%s20917_s23 + $0xd24] sm:$0xf]  ;;  %v16801_v53 = vld [vmem:[%s20917_s23 + $0x88] sm:$0xf] }
 0x7f7   : > { %v18414_v0 = vor.u32 %v20225_v47, %v18411_v38  ;;  %v17089_v47 = vld [vmem:[%s20917_s23 + $0x2c8] sm:$0xf]  ;;  %v11698_v61 = vadd.f32 %v23768_v16, %v11685_v35 }
 0x7f8   : > { %12002 = vmatpush.bf16.msrb.mxu3 %v18734_v54  ;;  %11977 = vmatpush.bf16.msrb.mxu1 %v18462_v49  ;;  %v18539_v54 = vld [vmem:[%s20917_s23 + $0xe30] sm:$0xf0]  ;;  %v17217_v38 = vld [vmem:[%s20917_s23 + $0x3c8] sm:$0xf] }
 0x7f9   : > { %v18542_v49 = vor.u32 %v20257_v57, %v18539_v54  ;;  %v19928_v57 = vld [vmem:[%s20917_s23 + $0x3d4] sm:$0xf0]  ;;  %v11711_v16 = vadd.f32 %v23822_v44, %v11698_v61  ;;  %v16881_v44 = vld [vmem:[%s20917_s23 + $0x128] sm:$0xf] }
 0x7fa   : > { %11990 = vmatpush.bf16.msrb.mxu2 %v18590_v1  ;;  %11965 = vmatpush.bf16.msrb.mxu0 %v18318_v27  ;;  %v20221_v1 = vld [vmem:[%s20917_s23 + $0xd04] sm:$0xf]  ;;  %v11751_v20 = vpop.f32.mrf.mxu3  ;;  %v19836_v27 = vld [vmem:[%s20917_s23 + $0xf4] sm:$0xf0]  ;;  %v16737_v35 = vld [vmem:[%s20917_s23 + $0x8] sm:$0xf] }
 0x7fb   : > { %v16850_v24 = vor.u32 %v19836_v27, %v16849_v15  ;;  %v19824_v20 = vld [vmem:[%s20917_s23 + $0x94] sm:$0xf0]  ;;  %v16929_v15 = vld [vmem:[%s20917_s23 + $0x188] sm:$0xf] }
 0x7fc   : > { %12003 = vmatpush.bf16.msrb.mxu3 %v18718_v28  ;;  %11978 = vmatpush.bf16.msrb.mxu1 %v18446_v18  ;;  %v11738_v28 = vpop.f32.mrf.mxu2  ;;  %v16977_v18 = vld [vmem:[%s20917_s23 + $0x1e8] sm:$0xf]  ;;  %v16802_v31 = vor.u32 %v19824_v20, %v16801_v53  ;;  %v19812_v20 = vld [vmem:[%s20917_s23 + $0x34] sm:$0xf0] }
 0x7fd   : > { %v16978_v13 = vor.u32 %v19868_v33, %v16977_v18  ;;  %v19856_v18 = vld [vmem:[%s20917_s23 + $0x194] sm:$0xf0]  ;;  %v16753_v53 = vld [vmem:[%s20917_s23 + $0x28] sm:$0xf] }
 0x7fe   : > { %11991 = vmatpush.bf16.msrb.mxu2 %v18574_v34  ;;  %11966 = vmatpush.bf16.msrb.mxu0 %v18302_v32  ;;  %v18270_v34 = vor.u32 %v20189_v63, %v18267_v45  ;;  %v16833_v32 = vld [vmem:[%s20917_s23 + $0xc8] sm:$0xf]  ;;  %v19828_v63 = vld [vmem:[%s20917_s23 + $0xb4] sm:$0xf0] }
 0x7ff   : > { %v16945_v45 = vld [vmem:[%s20917_s23 + $0x1a8] sm:$0xf]  ;;  %v19888_v33 = vld [vmem:[%s20917_s23 + $0x294] sm:$0xf0] }
 0x800   : > { %12004 = vmatpush.bf16.msrb.mxu3 %v18702_v22  ;;  %11979 = vmatpush.bf16.msrb.mxu1 %v18430_v30  ;;  %v18398_v22 = vor.u32 %v20221_v1, %v18395_v6  ;;  %v19832_v30 = vld [vmem:[%s20917_s23 + $0xd4] sm:$0xf0]  ;;  %v17073_v1 = vld [vmem:[%s20917_s23 + $0x2a8] sm:$0xf] }
 0x801   : > { %v16834_v54 = vor.u32 %v19832_v30, %v16833_v32  ;;  %v19892_v6 = vld [vmem:[%s20917_s23 + $0x2b4] sm:$0xf0]  ;;  %v16913_v32 = vld [vmem:[%s20917_s23 + $0x168] sm:$0xf] }
 0x802   : > { %11992 = vmatpush.bf16.msrb.mxu2 %v18558_v43  ;;  %11967 = vmatpush.bf16.msrb.mxu0 %v18286_v2  ;;  %v16961_v43 = vld [vmem:[%s20917_s23 + $0x1c8] sm:$0xf]  ;;  %v17074_v12 = vor.u32 %v19892_v6, %v17073_v1 }
 0x803   : > { %v16962_v59 = vor.u32 %v19864_v4, %v16961_v43  ;;  %v16817_v2 = vld [vmem:[%s20917_s23 + $0xa8] sm:$0xf]  ;;  %v19852_v43 = vld [vmem:[%s20917_s23 + $0x174] sm:$0xf0] }
 0x804   : > { %12005 = vmatpush.bf16.msrb.mxu3 %v18686_v46  ;;  %11980 = vmatpush.bf16.msrb.mxu1 %v18414_v0  ;;  %v19896_v46 = vld [vmem:[%s20917_s23 + $0x2d4] sm:$0xf0]  ;;  %v17218_v0 = vor.u32 %v19928_v57, %v17217_v38  ;;  %v16818_v28 = vor.u32 %v19828_v63, %v16817_v2  ;;  %v16914_v38 = vor.u32 %v19852_v43, %v16913_v32  ;;  %v17153_v6 = vld [vmem:[%s20917_s23 + $0x348] sm:$0xf] }
 0x805   : > { %v17090_v60 = vor.u32 %v19896_v46, %v17089_v47  ;;  %v19884_v4 = vld [vmem:[%s20917_s23 + $0x274] sm:$0xf0]  ;;  %v17169_v47 = vld [vmem:[%s20917_s23 + $0x368] sm:$0xf] }
 0x806   : > { %11993 = vmatpush.bf16.msrb.mxu2 %v18542_v49  ;;  %11968 = vmatpush.bf16.msrb.mxu0 %v18270_v34  ;;  %v19860_v49 = vld [vmem:[%s20917_s23 + $0x1b4] sm:$0xf0]  ;;  %v17057_v34 = vld [vmem:[%s20917_s23 + $0x288] sm:$0xf]  ;;  %v23898_v21 = vpop.f32.mrf.mxu0 }
 0x807   : > { %v16946_v9 = vor.u32 %v19860_v49, %v16945_v45  ;;  %v19916_v46 = vld [vmem:[%s20917_s23 + $0x374] sm:$0xf0]  ;;  %v17489_v61 = vld [vmem:[%s20917_s23 + $0x5e8] sm:$0xf] }
 0x808   : > { %12006 = vmatpush.bf16.msrb.mxu3 %v18670_v3  ;;  %11981 = vmatpush.bf16.msrb.mxu1 %v18398_v22  ;;  %v19924_v3 = vld [vmem:[%s20917_s23 + $0x3b4] sm:$0xf0]  ;;  %v17170_v2 = vor.u32 %v19916_v46, %v17169_v47  ;;  %v17121_v47 = vld [vmem:[%s20917_s23 + $0x308] sm:$0xf] }
 0x809   : > { %11969 = vmatmul.bf16.vlgmr.msrb.gmra.mxu0 %v23581_v7  ;;  %v17202_v27 = vor.u32 %v19924_v3, %v17201_v5  ;;  %v19920_v22 = vld [vmem:[%s20917_s23 + $0x394] sm:$0xf0] }
 0x80a   : > { %11994 = vmatpush.bf16.msrb.mxu2 %v18526_v36  ;;  %12013 = vmatpush.bf16.msra.mxu0 %v16850_v24  ;;  %v23902_v36 = vpop.f32.mrf.mxu1  ;;  %v17058_v24 = vor.u32 %v19888_v33, %v17057_v34  ;;  %v17186_v30 = vor.u32 %v19920_v22, %v17185_v41  ;;  %v19848_v45 = vld [vmem:[%s20917_s23 + $0x154] sm:$0xf0]  ;;  %v11724_v33 = vadd.f32 %v23826_v19, %v11711_v16  ;;  %v17137_v41 = vld [vmem:[%s20917_s23 + $0x328] sm:$0xf] }
 0x80b   : > { %11982 = vmatmul.bf16.vlgmr.msrb.gmra.mxu1 %v23583_v62  ;;  %v19880_v49 = vld [vmem:[%s20917_s23 + $0x254] sm:$0xf0]  ;;  %v16865_v19 = vld [vmem:[%s20917_s23 + $0x108] sm:$0xf] }
 0x80c   : > { %12007 = vmatpush.bf16.msrb.mxu3 %v18654_v51  ;;  %12026 = vmatpush.bf16.msra.mxu1 %v16978_v13  ;;  %v16930_v51 = vor.u32 %v19856_v18, %v16929_v15  ;;  %v16785_v13 = vld [vmem:[%s20917_s23 + $0x68] sm:$0xf]  ;;  %v19912_v5 = vld [vmem:[%s20917_s23 + $0x354] sm:$0xf0] }
 0x80d   : > { %11995 = vmatmul.bf16.vlgmr.msrb.gmra.mxu2 %v23585_v40  ;;  %v17154_v15 = vor.u32 %v19912_v5, %v17153_v6  ;;  %v17009_v18 = vld [vmem:[%s20917_s23 + $0x228] sm:$0xf]  ;;  %v19876_v34 = vld [vmem:[%s20917_s23 + $0x234] sm:$0xf0] }
 0x80e   : > { %12039 = vmatpush.bf16.msra.mxu2 %v17106_v52  ;;  %12014 = vmatpush.bf16.msra.mxu0 %v16834_v54  ;;  %v19820_v52 = vld [vmem:[%s20917_s23 + $0x74] sm:$0xf0]  ;;  %v16769_v54 = vld [vmem:[%s20917_s23 + $0x48] sm:$0xf]  ;;  %v11764_v1 = vpop.f32.mrf.mxu0 }
 0x80f   : > { %12008 = vmatmul.bf16.vlgmr.msrb.gmra.mxu3 %v23634_v58  ;;  %v16786_v17 = vor.u32 %v19820_v52, %v16785_v13  ;;  %v19908_v22 = vld [vmem:[%s20917_s23 + $0x334] sm:$0xf0]  ;;  %v17010_v52 = vor.u32 %v19876_v34, %v17009_v18 }
 0x810   : > { %12052 = vmatpush.bf16.msra.mxu3 %v17234_v10  ;;  %12027 = vmatpush.bf16.msra.mxu1 %v16962_v59  ;;  %v17041_v10 = vld [vmem:[%s20917_s23 + $0x268] sm:$0xf]  ;;  %v19816_v59 = vld [vmem:[%s20917_s23 + $0x54] sm:$0xf0]  ;;  %v23918_v63 = vpop.f32.mrf.mxu2  ;;  %v17138_v43 = vor.u32 %v19908_v22, %v17137_v41 }
 0x811   : > { %v17042_v57 = vor.u32 %v19884_v4, %v17041_v10  ;;  %v19840_v32 = vld [vmem:[%s20917_s23 + $0x114] sm:$0xf0]  ;;  %v17329_v41 = vld [vmem:[%s20917_s23 + $0x4a8] sm:$0xf] }
 0x812   : > { %12040 = vmatpush.bf16.msra.mxu2 %v17090_v60  ;;  %12015 = vmatpush.bf16.msra.mxu0 %v16818_v28  ;;  %v16897_v60 = vld [vmem:[%s20917_s23 + $0x148] sm:$0xf]  ;;  %v11777_v3 = vpop.f32.mrf.mxu1  ;;  %v16770_v28 = vor.u32 %v19816_v59, %v16769_v54  ;;  %v19872_v4 = vld [vmem:[%s20917_s23 + $0x214] sm:$0xf0] }
 0x813   : > { %v19904_v46 = vld [vmem:[%s20917_s23 + $0x314] sm:$0xf0]  ;;  %v17617_v54 = vld [vmem:[%s20917_s23 + $0x6e8] sm:$0xf] }
 0x814   : > { %12053 = vmatpush.bf16.msra.mxu3 %v17218_v0  ;;  %12028 = vmatpush.bf16.msra.mxu1 %v16946_v9  ;;  %v17025_v0 = vld [vmem:[%s20917_s23 + $0x248] sm:$0xf]  ;;  %v16898_v9 = vor.u32 %v19848_v45, %v16897_v60  ;;  %v20028_v59 = vld [vmem:[%s20917_s23 + $0x6f4] sm:$0xf0]  ;;  %v17122_v16 = vor.u32 %v19904_v46, %v17121_v47 }
 0x815   : > { %v17618_v3 = vor.u32 %v20028_v59, %v17617_v54  ;;  %v19956_v22 = vld [vmem:[%s20917_s23 + $0x4b4] sm:$0xf0]  ;;  %v17313_v47 = vld [vmem:[%s20917_s23 + $0x488] sm:$0xf] }
 0x816   : > { %12041 = vmatpush.bf16.msra.mxu2 %v17074_v12  ;;  %12016 = vmatpush.bf16.msra.mxu0 %v16802_v31  ;;  %v17026_v12 = vor.u32 %v19880_v49, %v17025_v0  ;;  %v16754_v31 = vor.u32 %v19812_v20, %v16753_v53  ;;  %v17745_v0 = vld [vmem:[%s20917_s23 + $0x7e8] sm:$0xf]  ;;  %v20060_v49 = vld [vmem:[%s20917_s23 + $0x7f4] sm:$0xf0] }
 0x817   : > { %v19992_v53 = vld [vmem:[%s20917_s23 + $0x5d4] sm:$0xf0]  ;;  %v17601_v20 = vld [vmem:[%s20917_s23 + $0x6c8] sm:$0xf] }
 0x818   : > { %12054 = vmatpush.bf16.msra.mxu3 %v17202_v27  ;;  %12029 = vmatpush.bf16.msra.mxu1 %v16930_v51  ;;  %v19844_v27 = vld [vmem:[%s20917_s23 + $0x134] sm:$0xf0]  ;;  %v11790_v10 = vpop.f32.mrf.mxu2 }
 0x819   : > { %v19808_v51 = vld [vmem:[%s20917_s23 + $0x14] sm:$0xf0]  ;;  %v16882_v13 = vor.u32 %v19844_v27, %v16881_v44 }
 0x81a   : > { %12042 = vmatpush.bf16.msra.mxu2 %v17058_v24  ;;  %12017 = vmatpush.bf16.msra.mxu0 %v16786_v17  ;;  %v11737_v24 = vadd.f32 %v23839_v50, %v11724_v33  ;;  %v17361_v50 = vld [vmem:[%s20917_s23 + $0x4e8] sm:$0xf]  ;;  %v19964_v17 = vld [vmem:[%s20917_s23 + $0x4f4] sm:$0xf0] }
 0x81b   : > { %v17362_v1 = vor.u32 %v19964_v17, %v17361_v50  ;;  %v20024_v44 = vld [vmem:[%s20917_s23 + $0x6d4] sm:$0xf0]  ;;  %v17441_v50 = vld [vmem:[%s20917_s23 + $0x588] sm:$0xf] }
 0x81c   : > { %12055 = vmatpush.bf16.msra.mxu3 %v17186_v30  ;;  %12030 = vmatpush.bf16.msra.mxu1 %v16914_v38  ;;  %v16993_v30 = vld [vmem:[%s20917_s23 + $0x208] sm:$0xf]  ;;  %v16738_v38 = vor.u32 %v19808_v51, %v16737_v35  ;;  %v11750_v60 = vadd.f32 %v23844_v29, %v11737_v24  ;;  %v19960_v29 = vld [vmem:[%s20917_s23 + $0x4d4] sm:$0xf0]  ;;  %v17602_v33 = vor.u32 %v20024_v44, %v17601_v20 }
 0x81d   : > { %v16994_v45 = vor.u32 %v19872_v4, %v16993_v30  ;;  %v20056_v27 = vld [vmem:[%s20917_s23 + $0x7d4] sm:$0xf0]  ;;  %v17585_v24 = vld [vmem:[%s20917_s23 + $0x6a8] sm:$0xf] }
 0x81e   : > { %12043 = vmatpush.bf16.msra.mxu2 %v17042_v57  ;;  %12018 = vmatpush.bf16.msra.mxu0 %v16770_v28  ;;  %v19996_v57 = vld [vmem:[%s20917_s23 + $0x5f4] sm:$0xf0]  ;;  %v11763_v6 = vadd.f32 %v23898_v21, %v11750_v60  ;;  %v17345_v28 = vld [vmem:[%s20917_s23 + $0x4c8] sm:$0xf] }
 0x81f   : > { %v17490_v5 = vor.u32 %v19996_v57, %v17489_v61  ;;  %v17346_v21 = vor.u32 %v19960_v29, %v17345_v28  ;;  %v19988_v51 = vld [vmem:[%s20917_s23 + $0x5b4] sm:$0xf0]  ;;  %v8521_v30 = vld [vmem:[#allocation3] sm:$0xff] }
 0x820   : > { %12056 = vmatpush.bf16.msra.mxu3 %v17170_v2  ;;  %12031 = vmatpush.bf16.msra.mxu1 %v16898_v9  ;;  %v16866_v2 = vor.u32 %v19840_v32, %v16865_v19  ;;  %v17473_v9 = vld [vmem:[%s20917_s23 + $0x5c8] sm:$0xf]  ;;  %v11776_v18 = vadd.f32 %v23902_v36, %v11763_v6  ;;  %v20052_v19 = vld [vmem:[%s20917_s23 + $0x7b4] sm:$0xf0]  ;;  %v17330_v32 = vor.u32 %v19956_v22, %v17329_v41 }
 0x821   : > { %v17474_v34 = vor.u32 %v19992_v53, %v17473_v9  ;;  %v17713_v36 = vld [vmem:[%s20917_s23 + $0x7a8] sm:$0xf]  ;;  %v19952_v46 = vld [vmem:[%s20917_s23 + $0x494] sm:$0xf0] }
 0x822   : > { %12044 = vmatpush.bf16.msra.mxu2 %v17026_v12  ;;  %12019 = vmatpush.bf16.msra.mxu0 %v16754_v31  ;;  %v17746_v12 = vor.u32 %v20060_v49, %v17745_v0  ;;  %v17457_v31 = vld [vmem:[%s20917_s23 + $0x5a8] sm:$0xf]  ;;  %v17714_v17 = vor.u32 %v20052_v19, %v17713_v36  ;;  %v19984_v61 = vld [vmem:[%s20917_s23 + $0x594] sm:$0xf0]  ;;  %v17314_v0 = vor.u32 %v19952_v46, %v17313_v47 }
 0x823   : > { %v20016_v57 = vld [vmem:[%s20917_s23 + $0x694] sm:$0xf0]  ;;  %v17697_v60 = vld [vmem:[%s20917_s23 + $0x788] sm:$0xf] }
 0x824   : > { %12057 = vmatpush.bf16.msra.mxu3 %v17154_v15  ;;  %12032 = vmatpush.bf16.msra.mxu1 %v16882_v13  ;;  %v17729_v15 = vld [vmem:[%s20917_s23 + $0x7c8] sm:$0xf]  ;;  %v20020_v13 = vld [vmem:[%s20917_s23 + $0x6b4] sm:$0xf0] }
 0x825   : > { %v17730_v35 = vor.u32 %v20056_v27, %v17729_v15  ;;  %v17586_v10 = vor.u32 %v20020_v13, %v17585_v24  ;;  %v17297_v49 = vld [vmem:[%s20917_s23 + $0x468] sm:$0xf]  ;;  %v19980_v29 = vld [vmem:[%s20917_s23 + $0x574] sm:$0xf0] }
 0x826   : > { %12045 = vmatpush.bf16.msra.mxu2 %v17010_v52  ;;  %12020 = vmatpush.bf16.msra.mxu0 %v16738_v38  ;;  %v11789_v52 = vadd.f32 %v23918_v63, %v11776_v18  ;;  %v17458_v63 = vor.u32 %v19988_v51, %v17457_v31  ;;  %v17569_v38 = vld [vmem:[%s20917_s23 + $0x688] sm:$0xf]  ;;  %v11814_v54 = vpop.f32.mrf.mxu0  ;;  %v20044_v20 = vld [vmem:[%s20917_s23 + $0x774] sm:$0xf0] }
 0x827   : > { %v17570_v6 = vor.u32 %v20016_v57, %v17569_v38  ;;  %v17553_v9 = vld [vmem:[%s20917_s23 + $0x668] sm:$0xf]  ;;  %v19976_v31 = vld [vmem:[%s20917_s23 + $0x554] sm:$0xf0] }
 0x828   : > { %12058 = vmatpush.bf16.msra.mxu3 %v17138_v43  ;;  %12033 = vmatpush.bf16.msra.mxu1 %v16866_v2  ;;  %v11801_v43 = vpop.f32.mrf.mxu3  ;;  %v20048_v2 = vld [vmem:[%s20917_s23 + $0x794] sm:$0xf0]  ;;  %v17681_v53 = vld [vmem:[%s20917_s23 + $0x768] sm:$0xf] }
 0x829   : > { %12021 = vmatmul.bf16.vlgmr.msra.gmra.mxu0 %v23313_v42  ;;  %v11802_v4 = vadd.f32 %v11801_v43, %v11789_v52  ;;  %v17698_v28 = vor.u32 %v20048_v2, %v17697_v60  ;;  %v17281_v18 = vld [vmem:[%s20917_s23 + $0x448] sm:$0xf]  ;;  %v17682_v41 = vor.u32 %v20044_v20, %v17681_v53  ;;  %v20008_v51 = vld [vmem:[%s20917_s23 + $0x654] sm:$0xf0] }
 0x82a   : > { %12046 = vmatpush.bf16.msra.mxu2 %v16994_v45  ;;  %12065 = vmatpush.bf16.msrb.mxu0 %v17362_v1  ;;  %v11827_v45 = vpop.f32.mrf.mxu1  ;;  %v17442_v1 = vor.u32 %v19984_v61, %v17441_v50  ;;  %v17665_v52 = vld [vmem:[%s20917_s23 + $0x748] sm:$0xf]  ;;  %v20040_v36 = vld [vmem:[%s20917_s23 + $0x754] sm:$0xf0] }
 0x82b   : > { %12034 = vmatmul.bf16.vlgmr.msra.gmra.mxu1 %v23315_v37  ;;  %v12429_v59 = vadd.f32 %v11802_v4, %v8521_v30  ;;  %v17393_v4 = vld [vmem:[%s20917_s23 + $0x528] sm:$0xf]  ;;  %v17666_v47 = vor.u32 %v20040_v36, %v17665_v52  ;;  %v19972_v46 = vld [vmem:[%s20917_s23 + $0x534] sm:$0xf0] }
 0x82c   : > { %12059 = vmatpush.bf16.msra.mxu3 %v17122_v16  ;;  %12078 = vmatpush.bf16.msrb.mxu1 %v17490_v5  ;;  %v11828_v16 = vadd.f32 %v11827_v45, %v11814_v54  ;;  %v19948_v5 = vld [vmem:[%s20917_s23 + $0x474] sm:$0xf0]  ;;  %v17521_v50 = vld [vmem:[%s20917_s23 + $0x628] sm:$0xf]  ;;  %v17394_v60 = vor.u32 %v19972_v46, %v17393_v4 }
 0x82d   : > { %12047 = vmatmul.bf16.vlgmr.msra.gmra.mxu2 %v23317_v39  ;;  %12433 = vst [vmem:[#allocation3] sm:$0xff] %v12429_v59  ;;  %v17298_v44 = vor.u32 %v19948_v5, %v17297_v49  ;;  %v17649_v61 = vld [vmem:[%s20917_s23 + $0x728] sm:$0xf]  ;;  %v20036_v38 = vld [vmem:[%s20917_s23 + $0x734] sm:$0xf0] }
 0x82e   : > { %12091 = vmatpush.bf16.msrb.mxu2 %v17618_v3  ;;  %12066 = vmatpush.bf16.msrb.mxu0 %v17346_v21  ;;  %v17425_v3 = vld [vmem:[%s20917_s23 + $0x568] sm:$0xf]  ;;  %v11816_v13 = vpop.f32.mrf.mxu0  ;;  %v19936_v59 = vld [vmem:[%s20917_s23 + $0x414] sm:$0xf0] }
 0x82f   : > { %12060 = vmatmul.bf16.vlgmr.msra.gmra.mxu3 %v23322_v56  ;;  %v17426_v27 = vor.u32 %v19980_v29, %v17425_v3  ;;  %v17249_v54 = vld [vmem:[%s20917_s23 + $0x408] sm:$0xf]  ;;  %v20000_v5 = vld [vmem:[%s20917_s23 + $0x614] sm:$0xf0] }
 0x830   : > { %12104 = vmatpush.bf16.msrb.mxu3 %v17746_v12  ;;  %12079 = vmatpush.bf16.msrb.mxu1 %v17474_v34  ;;  %v20012_v12 = vld [vmem:[%s20917_s23 + $0x674] sm:$0xf0]  ;;  %v11803_v15 = vpop.f32.mrf.mxu3  ;;  %v11840_v22 = vpop.f32.mrf.mxu2  ;;  %v17377_v45 = vld [vmem:[%s20917_s23 + $0x508] sm:$0xf]  ;;  %v17250_v53 = vor.u32 %v19936_v59, %v17249_v54 }
 0x831   : > { %v17554_v21 = vor.u32 %v20012_v12, %v17553_v9  ;;  %v19944_v34 = vld [vmem:[%s20917_s23 + $0x454] sm:$0xf0]  ;;  %v23998_v24 = vadd.f32 %v11840_v22, %v11828_v16  ;;  %v17505_v49 = vld [vmem:[%s20917_s23 + $0x608] sm:$0xf]  ;;  %v17650_v16 = vor.u32 %v20036_v38, %v17649_v61 }
 0x832   : > { %12092 = vmatpush.bf16.msrb.mxu2 %v17602_v33  ;;  %12067 = vmatpush.bf16.msrb.mxu0 %v17330_v32  ;;  %v17409_v33 = vld [vmem:[%s20917_s23 + $0x548] sm:$0xf]  ;;  %v11829_v19 = vpop.f32.mrf.mxu1  ;;  %v17282_v32 = vor.u32 %v19944_v34, %v17281_v18  ;;  %v20092_v9 = vld [vmem:[%s20917_s23 + $0x8f4] sm:$0xf0] }
 0x833   : > { %v17410_v30 = vor.u32 %v19976_v31, %v17409_v33  ;;  %v17633_v3 = vld [vmem:[%s20917_s23 + $0x708] sm:$0xf]  ;;  %v20124_v20 = vld [vmem:[%s20917_s23 + $0x9f4] sm:$0xf0] }
 0x834   : > { %12105 = vmatpush.bf16.msrb.mxu3 %v17730_v35  ;;  %12080 = vmatpush.bf16.msrb.mxu1 %v17458_v63  ;;  %v17537_v35 = vld [vmem:[%s20917_s23 + $0x648] sm:$0xf]  ;;  %v20156_v15 = vld [vmem:[%s20917_s23 + $0xaf4] sm:$0xf0] }
 0x835   : > { %v17538_v43 = vor.u32 %v20008_v51, %v17537_v35  ;;  %v17265_v63 = vld [vmem:[%s20917_s23 + $0x428] sm:$0xf]  ;;  %v20188_v34 = vld [vmem:[%s20917_s23 + $0xbf4] sm:$0xf0] }
 0x836   : > { %12093 = vmatpush.bf16.msrb.mxu2 %v17586_v10  ;;  %12068 = vmatpush.bf16.msrb.mxu0 %v17314_v0  ;;  %v19940_v10 = vld [vmem:[%s20917_s23 + $0x434] sm:$0xf0]  ;;  %v17873_v29 = vld [vmem:[%s20917_s23 + $0x8e8] sm:$0xf] }
 0x837   : > { %v17266_v57 = vor.u32 %v19940_v10, %v17265_v63  ;;  %v19968_v0 = vld [vmem:[%s20917_s23 + $0x514] sm:$0xf0]  ;;  %v18001_v12 = vld [vmem:[%s20917_s23 + $0x9e8] sm:$0xf] }
 0x838   : > { %12106 = vmatpush.bf16.msrb.mxu3 %v17714_v17  ;;  %12081 = vmatpush.bf16.msrb.mxu1 %v17442_v1  ;;  %v20004_v17 = vld [vmem:[%s20917_s23 + $0x634] sm:$0xf0]  ;;  %v11842_v1 = vpop.f32.mrf.mxu2  ;;  %v18257_v18 = vld [vmem:[%s20917_s23 + $0xbe8] sm:$0xf]  ;;  %v18002_v22 = vor.u32 %v20124_v20, %v18001_v12 }
 0x839   : > { %v17522_v2 = vor.u32 %v20004_v17, %v17521_v50  ;;  %v17857_v35 = vld [vmem:[%s20917_s23 + $0x8c8] sm:$0xf]  ;;  %v20088_v51 = vld [vmem:[%s20917_s23 + $0x8d4] sm:$0xf0]  ;;  %v18258_v52 = vor.u32 %v20188_v34, %v18257_v18 }
 0x83a   : > { %12094 = vmatpush.bf16.msrb.mxu2 %v17570_v6  ;;  %12069 = vmatpush.bf16.msrb.mxu0 %v17298_v44  ;;  %v24015_v6 = vpop.f32.mrf.mxu3  ;;  %v18129_v44 = vld [vmem:[%s20917_s23 + $0xae8] sm:$0xf]  ;;  %v20120_v36 = vld [vmem:[%s20917_s23 + $0x9d4] sm:$0xf0]  ;;  %v17858_v63 = vor.u32 %v20088_v51, %v17857_v35 }
 0x83b   : > { %v18130_v31 = vor.u32 %v20156_v15, %v18129_v44  ;;  %v17985_v13 = vld [vmem:[%s20917_s23 + $0x9c8] sm:$0xf]  ;;  %v20084_v50 = vld [vmem:[%s20917_s23 + $0x8b4] sm:$0xf0] }
 0x83c   : > { %12107 = vmatpush.bf16.msrb.mxu3 %v17698_v28  ;;  %12082 = vmatpush.bf16.msrb.mxu1 %v17426_v27  ;;  %v20032_v28 = vld [vmem:[%s20917_s23 + $0x714] sm:$0xf0]  ;;  %v17378_v27 = vor.u32 %v19968_v0, %v17377_v45  ;;  %v18113_v19 = vld [vmem:[%s20917_s23 + $0xac8] sm:$0xf]  ;;  %v17986_v4 = vor.u32 %v20120_v36, %v17985_v13 }
 0x83d   : > { %v17634_v33 = vor.u32 %v20032_v28, %v17633_v3  ;;  %v17841_v46 = vld [vmem:[%s20917_s23 + $0x8a8] sm:$0xf]  ;;  %v20116_v38 = vld [vmem:[%s20917_s23 + $0x9b4] sm:$0xf0] }
 0x83e   : > { %12095 = vmatpush.bf16.msrb.mxu2 %v17554_v21  ;;  %12070 = vmatpush.bf16.msrb.mxu0 %v17282_v32  ;;  %v17506_v21 = vor.u32 %v20000_v5, %v17505_v49  ;;  %v20152_v32 = vld [vmem:[%s20917_s23 + $0xad4] sm:$0xf0]  ;;  %v17969_v17 = vld [vmem:[%s20917_s23 + $0x9a8] sm:$0xf] }
 0x83f   : > { %v20148_v54 = vld [vmem:[%s20917_s23 + $0xab4] sm:$0xf0]  ;;  %v18225_v59 = vld [vmem:[%s20917_s23 + $0xba8] sm:$0xf]  ;;  %v17970_v45 = vor.u32 %v20116_v38, %v17969_v17 }
 0x840   : > { %12108 = vmatpush.bf16.msrb.mxu3 %v17682_v41  ;;  %12083 = vmatpush.bf16.msrb.mxu1 %v17410_v30  ;;  %v17874_v41 = vor.u32 %v20092_v9, %v17873_v29  ;;  %v18241_v30 = vld [vmem:[%s20917_s23 + $0xbc8] sm:$0xf]  ;;  %v20112_v3 = vld [vmem:[%s20917_s23 + $0x994] sm:$0xf0] }
 0x841   : > { %v17825_v49 = vld [vmem:[%s20917_s23 + $0x888] sm:$0xf]  ;;  %v20144_v29 = vld [vmem:[%s20917_s23 + $0xa94] sm:$0xf0] }
 0x842   : > { %12096 = vmatpush.bf16.msrb.mxu2 %v17538_v43  ;;  %12071 = vmatpush.bf16.msrb.mxu0 %v17266_v57  ;;  %v20184_v43 = vld [vmem:[%s20917_s23 + $0xbd4] sm:$0xf0]  ;;  %v11855_v10 = vpop.f32.mrf.mxu3  ;;  %v18097_v57 = vld [vmem:[%s20917_s23 + $0xaa8] sm:$0xf] }
 0x843   : > { %v18242_v61 = vor.u32 %v20184_v43, %v18241_v30  ;;  %v18098_v0 = vor.u32 %v20148_v54, %v18097_v57  ;;  %v17953_v1 = vld [vmem:[%s20917_s23 + $0x988] sm:$0xf]  ;;  %v20076_v18 = vld [vmem:[%s20917_s23 + $0x874] sm:$0xf0] }
 0x844   : > { %12109 = vmatpush.bf16.msrb.mxu3 %v17666_v47  ;;  %12084 = vmatpush.bf16.msrb.mxu1 %v17394_v60  ;;  %v18114_v47 = vor.u32 %v20152_v32, %v18113_v19  ;;  %v20180_v60 = vld [vmem:[%s20917_s23 + $0xbb4] sm:$0xf0]  ;;  %v18081_v28 = vld [vmem:[%s20917_s23 + $0xa88] sm:$0xf]  ;;  %v17954_v15 = vor.u32 %v20112_v3, %v17953_v1 }
 0x845   : > { %v18226_v5 = vor.u32 %v20180_v60, %v18225_v59  ;;  %v18209_v12 = vld [vmem:[%s20917_s23 + $0xb88] sm:$0xf]  ;;  %v20172_v51 = vld [vmem:[%s20917_s23 + $0xb74] sm:$0xf0] }
 0x846   : > { %12097 = vmatpush.bf16.msrb.mxu2 %v17522_v2  ;;  %12072 = vmatpush.bf16.msrb.mxu0 %v17250_v53  ;;  %v17842_v2 = vor.u32 %v20084_v50, %v17841_v46  ;;  %v24054_v9 = vpop.f32.mrf.mxu0  ;;  %v20176_v53 = vld [vmem:[%s20917_s23 + $0xb94] sm:$0xf0]  ;;  %v17937_v34 = vld [vmem:[%s20917_s23 + $0x968] sm:$0xf] }
 0x847   : > { %v18193_v35 = vld [vmem:[%s20917_s23 + $0xb68] sm:$0xf]  ;;  %v20072_v32 = vld [vmem:[%s20917_s23 + $0x854] sm:$0xf0] }
 0x848   : > { %12110 = vmatpush.bf16.msrb.mxu3 %v17650_v16  ;;  %12085 = vmatpush.bf16.msrb.mxu1 %v17378_v27  ;;  %v20080_v16 = vld [vmem:[%s20917_s23 + $0x894] sm:$0xf0]  ;;  %v24058_v20 = vpop.f32.mrf.mxu1  ;;  %v18082_v27 = vor.u32 %v20144_v29, %v18081_v28  ;;  %v17793_v19 = vld [vmem:[%s20917_s23 + $0x848] sm:$0xf]  ;;  %v18194_v43 = vor.u32 %v20172_v51, %v18193_v35 }
 0x849   : > { %12073 = vmatmul.bf16.vlgmr.msrb.gmra.mxu0 %v23399_v8  ;;  %v17826_v44 = vor.u32 %v20080_v16, %v17825_v49  ;;  %v17921_v30 = vld [vmem:[%s20917_s23 + $0x948] sm:$0xf]  ;;  %v20104_v10 = vld [vmem:[%s20917_s23 + $0x954] sm:$0xf0]  ;;  %v17794_v57 = vor.u32 %v20072_v32, %v17793_v19 }
 0x84a   : > { %12098 = vmatpush.bf16.msrb.mxu2 %v17506_v21  ;;  %12117 = vmatpush.bf16.msra.mxu0 %v17874_v41  ;;  %v17809_v21 = vld [vmem:[%s20917_s23 + $0x868] sm:$0xf]  ;;  %v20108_v41 = vld [vmem:[%s20917_s23 + $0x974] sm:$0xf0]  ;;  %v17922_v54 = vor.u32 %v20104_v10, %v17921_v30 }
 0x84b   : > { %12086 = vmatmul.bf16.vlgmr.msrb.gmra.mxu1 %v23401_v48  ;;  %v17810_v13 = vor.u32 %v20076_v18, %v17809_v21  ;;  %v18177_v17 = vld [vmem:[%s20917_s23 + $0xb48] sm:$0xf]  ;;  %v20100_v49 = vld [vmem:[%s20917_s23 + $0x934] sm:$0xf0] }
 0x84c   : > { %12111 = vmatpush.bf16.msrb.mxu3 %v17634_v33  ;;  %12130 = vmatpush.bf16.msra.mxu1 %v18002_v22  ;;  %v18210_v33 = vor.u32 %v20176_v53, %v18209_v12  ;;  %v18065_v22 = vld [vmem:[%s20917_s23 + $0xa68] sm:$0xf]  ;;  %v20132_v1 = vld [vmem:[%s20917_s23 + $0xa34] sm:$0xf0] }
 0x84d   : > { %12099 = vmatmul.bf16.vlgmr.msrb.gmra.mxu2 %v23403_v55  ;;  %v17777_v60 = vld [vmem:[%s20917_s23 + $0x828] sm:$0xf]  ;;  %v20164_v3 = vld [vmem:[%s20917_s23 + $0xb34] sm:$0xf0] }
 0x84e   : > { %12143 = vmatpush.bf16.msra.mxu2 %v18130_v31  ;;  %12118 = vmatpush.bf16.msra.mxu0 %v17858_v63  ;;  %v20140_v31 = vld [vmem:[%s20917_s23 + $0xa74] sm:$0xf0]  ;;  %v11868_v50 = vpop.f32.mrf.mxu0  ;;  %v18033_v16 = vld [vmem:[%s20917_s23 + $0xa28] sm:$0xf] }
 0x84f   : > { %12112 = vmatmul.bf16.vlgmr.msrb.gmra.mxu3 %v23408_v23  ;;  %v18066_v36 = vor.u32 %v20140_v31, %v18065_v22  ;;  %v17761_v29 = vld [vmem:[%s20917_s23 + $0x808] sm:$0xf]  ;;  %v20064_v12 = vld [vmem:[%s20917_s23 + $0x814] sm:$0xf0] }
 0x850   : > { %12156 = vmatpush.bf16.msra.mxu3 %v18258_v52  ;;  %12131 = vmatpush.bf16.msra.mxu1 %v17986_v4  ;;  %v17938_v52 = vor.u32 %v20108_v41, %v17937_v34  ;;  %v24071_v63 = vpop.f32.mrf.mxu2  ;;  %v18049_v4 = vld [vmem:[%s20917_s23 + $0xa48] sm:$0xf]  ;;  %v11881_v38 = vpop.f32.mrf.mxu1  ;;  %v20160_v22 = vld [vmem:[%s20917_s23 + $0xb14] sm:$0xf0] }
 0x851   : > { %v18017_v21 = vld [vmem:[%s20917_s23 + $0xa08] sm:$0xf]  ;;  %v20220_v51 = vld [vmem:[%s20917_s23 + $0xcf4] sm:$0xf0] }
 0x852   : > { %12144 = vmatpush.bf16.msra.mxu2 %v18114_v47  ;;  %12119 = vmatpush.bf16.msra.mxu0 %v17842_v2  ;;  %v20136_v47 = vld [vmem:[%s20917_s23 + $0xa54] sm:$0xf0]  ;;  %v24076_v46 = vpop.f32.mrf.mxu3  ;;  %v18145_v41 = vld [vmem:[%s20917_s23 + $0xb08] sm:$0xf] }
 0x853   : > { %v18050_v59 = vor.u32 %v20136_v47, %v18049_v4  ;;  %v20068_v2 = vld [vmem:[%s20917_s23 + $0x834] sm:$0xf0]  ;;  %v18385_v35 = vld [vmem:[%s20917_s23 + $0xce8] sm:$0xf]  ;;  %v18146_v47 = vor.u32 %v20160_v22, %v18145_v41 }
 0x854   : > { %12157 = vmatpush.bf16.msra.mxu3 %v18242_v61  ;;  %12132 = vmatpush.bf16.msra.mxu1 %v17970_v45  ;;  %v20168_v61 = vld [vmem:[%s20917_s23 + $0xb54] sm:$0xf0]  ;;  %v17905_v45 = vld [vmem:[%s20917_s23 + $0x928] sm:$0xf]  ;;  %v17778_v28 = vor.u32 %v20068_v2, %v17777_v60  ;;  %v18386_v50 = vor.u32 %v20220_v51, %v18385_v35 }
 0x855   : > { %v17906_v53 = vor.u32 %v20100_v49, %v17905_v45  ;;  %v18641_v19 = vld [vmem:[%s20917_s23 + $0xee8] sm:$0xf]  ;;  %v20284_v32 = vld [vmem:[%s20917_s23 + $0xef4] sm:$0xf0] }
 0x856   : > { %12145 = vmatpush.bf16.msra.mxu2 %v18098_v0  ;;  %12120 = vmatpush.bf16.msra.mxu0 %v17826_v44  ;;  %v18178_v0 = vor.u32 %v20168_v61, %v18177_v17  ;;  %v18034_v44 = vor.u32 %v20132_v1, %v18033_v16  ;;  %v18769_v10 = vld [vmem:[%s20917_s23 + $0xfe8] sm:$0xf]  ;;  %v20316_v4 = vld [vmem:[%s20917_s23 + $0xff4] sm:$0xf0]  ;;  %v18642_v61 = vor.u32 %v20284_v32, %v18641_v19 }
 0x857   : > { %v18369_v38 = vld [vmem:[%s20917_s23 + $0xcc8] sm:$0xf]  ;;  %v20248_v60 = vld [vmem:[%s20917_s23 + $0xdd4] sm:$0xf0] }
 0x858   : > { %12158 = vmatpush.bf16.msra.mxu3 %v18226_v5  ;;  %12133 = vmatpush.bf16.msra.mxu1 %v17954_v15  ;;  %v18161_v5 = vld [vmem:[%s20917_s23 + $0xb28] sm:$0xf]  ;;  %v11894_v34 = vpop.f32.mrf.mxu2  ;;  %v20280_v45 = vld [vmem:[%s20917_s23 + $0xed4] sm:$0xf0] }
 0x859   : > { %v17889_v15 = vld [vmem:[%s20917_s23 + $0x908] sm:$0xf]  ;;  %v18162_v18 = vor.u32 %v20164_v3, %v18161_v5  ;;  %v20312_v49 = vld [vmem:[%s20917_s23 + $0xfd4] sm:$0xf0] }
 0x85a   : > { %12146 = vmatpush.bf16.msra.mxu2 %v18082_v27  ;;  %12121 = vmatpush.bf16.msra.mxu0 %v17810_v13  ;;  %v20096_v27 = vld [vmem:[%s20917_s23 + $0x914] sm:$0xf0]  ;;  %v11907_v31 = vpop.f32.mrf.mxu3  ;;  %v18513_v13 = vld [vmem:[%s20917_s23 + $0xde8] sm:$0xf] }
 0x85b   : > { %v17890_v30 = vor.u32 %v20096_v27, %v17889_v15  ;;  %v18625_v2 = vld [vmem:[%s20917_s23 + $0xec8] sm:$0xf]  ;;  %v20276_v15 = vld [vmem:[%s20917_s23 + $0xeb4] sm:$0xf0] }
 0x85c   : > { %12159 = vmatpush.bf16.msra.mxu3 %v18210_v33  ;;  %12134 = vmatpush.bf16.msra.mxu1 %v17938_v52  ;;  %v20128_v33 = vld [vmem:[%s20917_s23 + $0xa14] sm:$0xf0]  ;;  %v17762_v52 = vor.u32 %v20064_v12, %v17761_v29  ;;  %v18626_v5 = vor.u32 %v20280_v45, %v18625_v2  ;;  %v18353_v3 = vld [vmem:[%s20917_s23 + $0xca8] sm:$0xf]  ;;  %v11854_v45 = vadd.f32 %v24015_v6, %v23998_v24 }
 0x85d   : > { %v18481_v29 = vld [vmem:[%s20917_s23 + $0xda8] sm:$0xf]  ;;  %v20208_v22 = vld [vmem:[%s20917_s23 + $0xc94] sm:$0xf0] }
 0x85e   : > { %12147 = vmatpush.bf16.msra.mxu2 %v18066_v36  ;;  %12122 = vmatpush.bf16.msra.mxu0 %v17794_v57  ;;  %v20252_v36 = vld [vmem:[%s20917_s23 + $0xdf4] sm:$0xf0]  ;;  %v18737_v27 = vld [vmem:[%s20917_s23 + $0xfa8] sm:$0xf]  ;;  %v11867_v24 = vadd.f32 %v24054_v9, %v11854_v45  ;;  %v19834_v45 = vld [vmem:[%s20917_s23 + $0xec] sm:$0xf] }
 0x85f   : > { %v18514_v17 = vor.u32 %v20252_v36, %v18513_v13  ;;  %v20216_v57 = vld [vmem:[%s20917_s23 + $0xcd4] sm:$0xf0]  ;;  %v18337_v41 = vld [vmem:[%s20917_s23 + $0xc88] sm:$0xf] }
 0x860   : > { %12160 = vmatpush.bf16.msra.mxu3 %v18194_v43  ;;  %12135 = vmatpush.bf16.msra.mxu1 %v17922_v54  ;;  %v18018_v43 = vor.u32 %v20128_v33, %v18017_v21  ;;  %v18497_v54 = vld [vmem:[%s20917_s23 + $0xdc8] sm:$0xf]  ;;  %v18370_v16 = vor.u32 %v20216_v57, %v18369_v38  ;;  %v20308_v21 = vld [vmem:[%s20917_s23 + $0xfb4] sm:$0xf0] }
 0x861   : > { %v18498_v1 = vor.u32 %v20248_v60, %v18497_v54  ;;  %v18465_v31 = vld [vmem:[%s20917_s23 + $0xd88] sm:$0xf]  ;;  %v18738_v35 = vor.u32 %v20308_v21, %v18737_v27  ;;  %v20240_v51 = vld [vmem:[%s20917_s23 + $0xd94] sm:$0xf0] }
 0x862   : > { %12148 = vmatpush.bf16.msra.mxu2 %v18050_v59  ;;  %12123 = vmatpush.bf16.msra.mxu0 %v17778_v28  ;;  %v18770_v59 = vor.u32 %v20316_v4, %v18769_v10  ;;  %v20212_v28 = vld [vmem:[%s20917_s23 + $0xcb4] sm:$0xf0]  ;;  %v18593_v13 = vld [vmem:[%s20917_s23 + $0xe88] sm:$0xf]  ;;  %v18466_v10 = vor.u32 %v20240_v51, %v18465_v31 }
 0x863   : > { %v18721_v19 = vld [vmem:[%s20917_s23 + $0xf88] sm:$0xf]  ;;  %v20304_v32 = vld [vmem:[%s20917_s23 + $0xf94] sm:$0xf0] }
 0x864   : > { %12161 = vmatpush.bf16.msra.mxu3 %v18178_v0  ;;  %12136 = vmatpush.bf16.msra.mxu1 %v17906_v53  ;;  %v18753_v0 = vld [vmem:[%s20917_s23 + $0xfc8] sm:$0xf]  ;;  %v20244_v53 = vld [vmem:[%s20917_s23 + $0xdb4] sm:$0xf0] }
 0x865   : > { %v18754_v12 = vor.u32 %v20312_v49, %v18753_v0  ;;  %v18482_v34 = vor.u32 %v20244_v53, %v18481_v29  ;;  %v20236_v38 = vld [vmem:[%s20917_s23 + $0xd74] sm:$0xf0]  ;;  %v18577_v57 = vld [vmem:[%s20917_s23 + $0xe68] sm:$0xf] }
 0x866   : > { %12149 = vmatpush.bf16.msra.mxu2 %v18034_v44  ;;  %12124 = vmatpush.bf16.msra.mxu0 %v17762_v52  ;;  %v18609_v44 = vld [vmem:[%s20917_s23 + $0xea8] sm:$0xf]  ;;  %v20272_v52 = vld [vmem:[%s20917_s23 + $0xe94] sm:$0xf0]  ;;  %v24130_v36 = vpop.f32.mrf.mxu0 }
 0x867   : > { %v18610_v33 = vor.u32 %v20276_v15, %v18609_v44  ;;  %v18594_v4 = vor.u32 %v20272_v52, %v18593_v13  ;;  %v20268_v54 = vld [vmem:[%s20917_s23 + $0xe74] sm:$0xf0]  ;;  %v18689_v15 = vld [vmem:[%s20917_s23 + $0xf48] sm:$0xf]  ;;  %v11880_v52 = vadd.f32 %v24058_v20, %v11867_v24  ;;  %v19930_v24 = vld [vmem:[%s20917_s23 + $0x3ec] sm:$0xf] }
 0x868   : > { %12162 = vmatpush.bf16.msra.mxu3 %v18162_v18  ;;  %12137 = vmatpush.bf16.msra.mxu1 %v17890_v30  ;;  %v18354_v18 = vor.u32 %v20212_v28, %v18353_v3  ;;  %v24134_v30 = vpop.f32.mrf.mxu1  ;;  %v20300_v60 = vld [vmem:[%s20917_s23 + $0xf74] sm:$0xf0]  ;;  %v18578_v49 = vor.u32 %v20268_v54, %v18577_v57  ;;  %v18289_v9 = vld [vmem:[%s20917_s23 + $0xc28] sm:$0xf] }
 0x869   : > { %12125 = vmatmul.bf16.vlgmr.msra.gmra.mxu0 %v23487_v26  ;;  %v20232_v29 = vld [vmem:[%s20917_s23 + $0xd54] sm:$0xf0]  ;;  %v18545_v51 = vld [vmem:[%s20917_s23 + $0xe28] sm:$0xf] }
 0x86a   : > { %12150 = vmatpush.bf16.msra.mxu2 %v18018_v43  ;;  %12169 = vmatpush.bf16.msrb.mxu0 %v18386_v50  ;;  %v18338_v43 = vor.u32 %v20208_v22, %v18337_v41  ;;  %v20204_v50 = vld [vmem:[%s20917_s23 + $0xc74] sm:$0xf0]  ;;  %v18417_v22 = vld [vmem:[%s20917_s23 + $0xd28] sm:$0xf] }
 0x86b   : > { %12138 = vmatmul.bf16.vlgmr.msra.gmra.mxu1 %v23489_v14  ;;  %v20264_v53 = vld [vmem:[%s20917_s23 + $0xe54] sm:$0xf0]  ;;  %v18401_v20 = vld [vmem:[%s20917_s23 + $0xd08] sm:$0xf] }
 0x86c   : > { %12163 = vmatpush.bf16.msra.mxu3 %v18146_v47  ;;  %12182 = vmatpush.bf16.msrb.mxu1 %v18514_v17  ;;  %v18321_v47 = vld [vmem:[%s20917_s23 + $0xc68] sm:$0xf]  ;;  %v20296_v27 = vld [vmem:[%s20917_s23 + $0xf54] sm:$0xf0] }
 0x86d   : > { %12151 = vmatmul.bf16.vlgmr.msra.gmra.mxu2 %v23491_v11  ;;  %v18449_v17 = vld [vmem:[%s20917_s23 + $0xd68] sm:$0xf]  ;;  %v18322_v2 = vor.u32 %v20204_v50, %v18321_v47  ;;  %v20196_v41 = vld [vmem:[%s20917_s23 + $0xc34] sm:$0xf0]  ;;  %v18690_v31 = vor.u32 %v20296_v27, %v18689_v15  ;;  %v11893_v47 = vadd.f32 %v24071_v63, %v11880_v52 }
 0x86e   : > { %12195 = vmatpush.bf16.msrb.mxu2 %v18642_v61  ;;  %12170 = vmatpush.bf16.msrb.mxu0 %v18370_v16  ;;  %v18722_v61 = vor.u32 %v20304_v32, %v18721_v19  ;;  %v18450_v0 = vor.u32 %v20236_v38, %v18449_v17  ;;  %v18305_v16 = vld [vmem:[%s20917_s23 + $0xc48] sm:$0xf]  ;;  %v11920_v44 = vpop.f32.mrf.mxu0  ;;  %v20260_v13 = vld [vmem:[%s20917_s23 + $0xe34] sm:$0xf0] }
 0x86f   : > { %12164 = vmatmul.bf16.vlgmr.msra.gmra.mxu3 %v23496_v25  ;;  %v18673_v19 = vld [vmem:[%s20917_s23 + $0xf28] sm:$0xf]  ;;  %v20292_v32 = vld [vmem:[%s20917_s23 + $0xf34] sm:$0xf0]  ;;  %v18546_v17 = vor.u32 %v20260_v13, %v18545_v51  ;;  %v17235_v44 = vld [vmem:[%s20917_s23 + $0x3f8] sm:$0xf0] }
 0x870   : > { %12208 = vmatpush.bf16.msrb.mxu3 %v18770_v59  ;;  %12183 = vmatpush.bf16.msrb.mxu1 %v18498_v1  ;;  %v18705_v59 = vld [vmem:[%s20917_s23 + $0xf68] sm:$0xf]  ;;  %v20200_v1 = vld [vmem:[%s20917_s23 + $0xc54] sm:$0xf0]  ;;  %v24149_v28 = vpop.f32.mrf.mxu2  ;;  %v11933_v21 = vpop.f32.mrf.mxu1  ;;  %v18674_v57 = vor.u32 %v20292_v32, %v18673_v19  ;;  %v19926_v51 = vld [vmem:[%s20917_s23 + $0x3cc] sm:$0xf] }
 0x871   : > { %v18706_v3 = vor.u32 %v20300_v60, %v18705_v59  ;;  %v18529_v38 = vld [vmem:[%s20917_s23 + $0xe08] sm:$0xf]  ;;  %v20256_v59 = vld [vmem:[%s20917_s23 + $0xe14] sm:$0xf0]  ;;  %v17219_v13 = vld [vmem:[%s20917_s23 + $0x3d8] sm:$0xf0] }
 0x872   : > { %12196 = vmatpush.bf16.msrb.mxu2 %v18626_v5  ;;  %12171 = vmatpush.bf16.msrb.mxu0 %v18354_v18  ;;  %v18433_v5 = vld [vmem:[%s20917_s23 + $0xd48] sm:$0xf]  ;;  %v24155_v6 = vpop.f32.mrf.mxu3  ;;  %v18306_v18 = vor.u32 %v20200_v1, %v18305_v16  ;;  %v16979_v1 = vld [vmem:[%s20917_s23 + $0x1f8] sm:$0xf0] }
 0x873   : > { %v18657_v60 = vld [vmem:[%s20917_s23 + $0xf08] sm:$0xf] }
 0x874   : > { %12209 = vmatpush.bf16.msrb.mxu3 %v18754_v12  ;;  %12184 = vmatpush.bf16.msrb.mxu1 %v18482_v34  ;;  %v18561_v12 = vld [vmem:[%s20917_s23 + $0xe48] sm:$0xf]  ;;  %v18434_v34 = vor.u32 %v20232_v29, %v18433_v5  ;;  %v19898_v5 = vld [vmem:[%s20917_s23 + $0x2ec] sm:$0xf]  ;;  %v11906_v29 = vadd.f32 %v24076_v46, %v11893_v47  ;;  %v16835_v46 = vld [vmem:[%s20917_s23 + $0xd8] sm:$0xf0]  ;;  %v17222_v47 = vor.u32 %v19926_v51, %v17219_v13 }
 0x875   : > { %v19814_v51 = vld [vmem:[%s20917_s23 + $0x4c] sm:$0xf]  ;;  %v16771_v13 = vld [vmem:[%s20917_s23 + $0x58] sm:$0xf0] }
 0x876   : > { %12197 = vmatpush.bf16.msrb.mxu2 %v18610_v33  ;;  %12172 = vmatpush.bf16.msrb.mxu0 %v18338_v43  ;;  %v18562_v33 = vor.u32 %v20264_v53, %v18561_v12  ;;  %v18290_v43 = vor.u32 %v20196_v41, %v18289_v9  ;;  %v18530_v53 = vor.u32 %v20256_v59, %v18529_v38  ;;  %v19862_v9 = vld [vmem:[%s20917_s23 + $0x1cc] sm:$0xf]  ;;  %v17203_v38 = vld [vmem:[%s20917_s23 + $0x3b8] sm:$0xf0] }
 0x877   : > { %v11919_v21 = vadd.f32 %v24130_v36, %v11906_v29  ;;  %v17238_v41 = vor.u32 %v19930_v24, %v17235_v44 }
 0x878   : > { %12210 = vmatpush.bf16.msrb.mxu3 %v18738_v35  ;;  %12185 = vmatpush.bf16.msrb.mxu1 %v18466_v10  ;;  %v20228_v35 = vld [vmem:[%s20917_s23 + $0xd34] sm:$0xf0]  ;;  %v18273_v10 = vld [vmem:[%s20917_s23 + $0xc08] sm:$0xf]  ;;  %v11946_v54 = vpop.f32.mrf.mxu2 }
 0x879   : > { %v18418_v50 = vor.u32 %v20228_v35, %v18417_v22  ;;  %v16963_v22 = vld [vmem:[%s20917_s23 + $0x1d8] sm:$0xf0]  ;;  %v11932_v52 = vadd.f32 %v24134_v30, %v11919_v21 }
 0x87a   : > { %12198 = vmatpush.bf16.msrb.mxu2 %v18594_v4  ;;  %12173 = vmatpush.bf16.msrb.mxu0 %v18322_v2  ;;  %v20192_v4 = vld [vmem:[%s20917_s23 + $0xc14] sm:$0xf0]  ;;  %v11959_v63 = vpop.f32.mrf.mxu3  ;;  %v17091_v35 = vld [vmem:[%s20917_s23 + $0x2d8] sm:$0xf0]  ;;  %v16966_v19 = vor.u32 %v19862_v9, %v16963_v22 }
 0x87b   : > { %v20288_v2 = vld [vmem:[%s20917_s23 + $0xf14] sm:$0xf0]  ;;  %v18274_v16 = vor.u32 %v20192_v4, %v18273_v10  ;;  %v16819_v10 = vld [vmem:[%s20917_s23 + $0xb8] sm:$0xf0]  ;;  %v19858_v4 = vld [vmem:[%s20917_s23 + $0x1ac] sm:$0xf]  ;;  %v11945_v30 = vadd.f32 %v24149_v28, %v11932_v52 }
 0x87c   : > { %12211 = vmatpush.bf16.msrb.mxu3 %v18722_v61  ;;  %12186 = vmatpush.bf16.msrb.mxu1 %v18450_v0  ;;  %v20224_v61 = vld [vmem:[%s20917_s23 + $0xd14] sm:$0xf0]  ;;  %v16851_v0 = vld [vmem:[%s20917_s23 + $0xf8] sm:$0xf0]  ;;  %v18658_v15 = vor.u32 %v20288_v2, %v18657_v60  ;;  %v19822_v28 = vld [vmem:[%s20917_s23 + $0x8c] sm:$0xf] }
 0x87d   : > { %v18402_v12 = vor.u32 %v20224_v61, %v18401_v20  ;;  %v16854_v27 = vor.u32 %v19834_v45, %v16851_v0  ;;  %v17075_v20 = vld [vmem:[%s20917_s23 + $0x2b8] sm:$0xf0]  ;;  %v19922_v61 = vld [vmem:[%s20917_s23 + $0x3ac] sm:$0xf] }
 0x87e   : > { %12199 = vmatpush.bf16.msrb.mxu2 %v18578_v49  ;;  %12174 = vmatpush.bf16.msrb.mxu0 %v18306_v18  ;;  %v19866_v49 = vld [vmem:[%s20917_s23 + $0x1ec] sm:$0xf]  ;;  %v16803_v60 = vld [vmem:[%s20917_s23 + $0x98] sm:$0xf0]  ;;  %v17206_v63 = vor.u32 %v19922_v61, %v17203_v38  ;;  %v16774_v38 = vor.u32 %v19814_v51, %v16771_v13 }
 0x87f   : > { %v16982_v18 = vor.u32 %v19866_v49, %v16979_v1  ;;  %v19854_v2 = vld [vmem:[%s20917_s23 + $0x18c] sm:$0xf]  ;;  %v16931_v45 = vld [vmem:[%s20917_s23 + $0x198] sm:$0xf0] }
 0x880   : > { %12212 = vmatpush.bf16.msrb.mxu3 %v18706_v3  ;;  %12187 = vmatpush.bf16.msrb.mxu1 %v18434_v34  ;;  %v17107_v3 = vld [vmem:[%s20917_s23 + $0x2f8] sm:$0xf0]  ;;  %v19886_v0 = vld [vmem:[%s20917_s23 + $0x28c] sm:$0xf]  ;;  %v16934_v24 = vor.u32 %v19854_v2, %v16931_v45 }
 0x881   : > { %v17110_v34 = vor.u32 %v19898_v5, %v17107_v3  ;;  %v17059_v49 = vld [vmem:[%s20917_s23 + $0x298] sm:$0xf0]  ;;  %v19918_v5 = vld [vmem:[%s20917_s23 + $0x38c] sm:$0xf] }
 0x882   : > { %12200 = vmatpush.bf16.msrb.mxu2 %v18562_v33  ;;  %12175 = vmatpush.bf16.msrb.mxu0 %v18290_v43  ;;  %v19830_v33 = vld [vmem:[%s20917_s23 + $0xcc] sm:$0xf]  ;;  %v17187_v3 = vld [vmem:[%s20917_s23 + $0x398] sm:$0xf0]  ;;  %v17062_v44 = vor.u32 %v19886_v0, %v17059_v49 }
 0x883   : > { %v16838_v36 = vor.u32 %v19830_v33, %v16835_v46  ;;  %v19826_v43 = vld [vmem:[%s20917_s23 + $0xac] sm:$0xf]  ;;  %v17190_v21 = vor.u32 %v19918_v5, %v17187_v3  ;;  %v17043_v33 = vld [vmem:[%s20917_s23 + $0x278] sm:$0xf0] }
 0x884   : > { %12213 = vmatpush.bf16.msrb.mxu3 %v18690_v31  ;;  %12188 = vmatpush.bf16.msrb.mxu1 %v18418_v50  ;;  %v19894_v31 = vld [vmem:[%s20917_s23 + $0x2cc] sm:$0xf]  ;;  %v16947_v50 = vld [vmem:[%s20917_s23 + $0x1b8] sm:$0xf0] }
 0x885   : > { %v17094_v32 = vor.u32 %v19894_v31, %v17091_v35  ;;  %v16950_v54 = vor.u32 %v19858_v4, %v16947_v50  ;;  %v19914_v46 = vld [vmem:[%s20917_s23 + $0x36c] sm:$0xf]  ;;  %v17171_v9 = vld [vmem:[%s20917_s23 + $0x378] sm:$0xf0] }
 0x886   : > { %12201 = vmatpush.bf16.msrb.mxu2 %v18546_v17  ;;  %12176 = vmatpush.bf16.msrb.mxu0 %v18274_v16  ;;  %v19890_v17 = vld [vmem:[%s20917_s23 + $0x2ac] sm:$0xf]  ;;  %v11958_v16 = vadd.f32 %v24155_v6, %v11945_v30  ;;  %v11970_v1 = vpop.f32.mrf.mxu0  ;;  %v17174_v52 = vor.u32 %v19914_v46, %v17171_v9  ;;  %v8522_v30 = vld [vmem:[#allocation3 + $0x18] sm:$0xff] }
 0x887   : > { %v17078_v59 = vor.u32 %v19890_v17, %v17075_v20  ;;  %v19850_v6 = vld [vmem:[%s20917_s23 + $0x16c] sm:$0xf]  ;;  %v17155_v20 = vld [vmem:[%s20917_s23 + $0x358] sm:$0xf0] }
 0x888   : > { %12214 = vmatpush.bf16.msrb.mxu3 %v18674_v57  ;;  %12189 = vmatpush.bf16.msrb.mxu1 %v18402_v12  ;;  %v16822_v57 = vor.u32 %v19826_v43, %v16819_v10  ;;  %v11983_v29 = vpop.f32.mrf.mxu1  ;;  %v16806_v12 = vor.u32 %v19822_v28, %v16803_v60  ;;  %v19878_v43 = vld [vmem:[%s20917_s23 + $0x24c] sm:$0xf]  ;;  %v17027_v10 = vld [vmem:[%s20917_s23 + $0x258] sm:$0xf0] }
 0x889   : > { %12177 = vmatmul.bf16.vlgmr.msrb.gmra.mxu0 %v23581_v7  ;;  %v19910_v17 = vld [vmem:[%s20917_s23 + $0x34c] sm:$0xf]  ;;  %v16755_v60 = vld [vmem:[%s20917_s23 + $0x38] sm:$0xf0] }
 0x88a   : > { %12202 = vmatpush.bf16.msrb.mxu2 %v18530_v53  ;;  %12221 = vmatpush.bf16.msra.mxu0 %v16854_v27  ;;  %v11971_v53 = vadd.f32 %v11970_v1, %v11958_v16  ;;  %v16787_v27 = vld [vmem:[%s20917_s23 + $0x78] sm:$0xf0]  ;;  %v19810_v28 = vld [vmem:[%s20917_s23 + $0x2c] sm:$0xf] }
 0x88b   : > { %12190 = vmatmul.bf16.vlgmr.msrb.gmra.mxu1 %v23583_v62  ;;  %v19842_v2 = vld [vmem:[%s20917_s23 + $0x12c] sm:$0xf]  ;;  %v16883_v45 = vld [vmem:[%s20917_s23 + $0x138] sm:$0xf0]  ;;  %v16758_v3 = vor.u32 %v19810_v28, %v16755_v60 }
 0x88c   : > { %12215 = vmatpush.bf16.msrb.mxu3 %v18658_v15  ;;  %12234 = vmatpush.bf16.msra.mxu1 %v16982_v18  ;;  %v19818_v15 = vld [vmem:[%s20917_s23 + $0x6c] sm:$0xf]  ;;  %v16915_v18 = vld [vmem:[%s20917_s23 + $0x178] sm:$0xf0]  ;;  %v11984_v22 = vadd.f32 %v11983_v29, %v11971_v53 }
 0x88d   : > { %12203 = vmatmul.bf16.vlgmr.msrb.gmra.mxu2 %v23585_v40  ;;  %v16918_v31 = vor.u32 %v19850_v6, %v16915_v18  ;;  %v19874_v0 = vld [vmem:[%s20917_s23 + $0x22c] sm:$0xf]  ;;  %v17011_v49 = vld [vmem:[%s20917_s23 + $0x238] sm:$0xf0] }
 0x88e   : > { %12247 = vmatpush.bf16.msra.mxu2 %v17110_v34  ;;  %12222 = vmatpush.bf16.msra.mxu0 %v16838_v36  ;;  %v19882_v34 = vld [vmem:[%s20917_s23 + $0x26c] sm:$0xf]  ;;  %v11972_v50 = vpop.f32.mrf.mxu0  ;;  %v17139_v5 = vld [vmem:[%s20917_s23 + $0x338] sm:$0xf0] }
 0x88f   : > { %12216 = vmatmul.bf16.vlgmr.msrb.gmra.mxu3 %v23634_v58  ;;  %v17046_v35 = vor.u32 %v19882_v34, %v17043_v33  ;;  %v19846_v36 = vld [vmem:[%s20917_s23 + $0x14c] sm:$0xf]  ;;  %v16995_v18 = vld [vmem:[%s20917_s23 + $0x218] sm:$0xf0] }
 0x890   : > { %12260 = vmatpush.bf16.msra.mxu3 %v17238_v41  ;;  %12235 = vmatpush.bf16.msra.mxu1 %v16966_v19  ;;  %v16790_v41 = vor.u32 %v19818_v15, %v16787_v27  ;;  %v11996_v19 = vpop.f32.mrf.mxu2  ;;  %v11985_v61 = vpop.f32.mrf.mxu1  ;;  %v19906_v1 = vld [vmem:[%s20917_s23 + $0x32c] sm:$0xf]  ;;  %v16867_v15 = vld [vmem:[%s20917_s23 + $0x118] sm:$0xf0] }
 0x891   : > { %v11997_v4 = vadd.f32 %v11996_v19, %v11984_v22  ;;  %v19806_v29 = vld [vmem:[%s20917_s23 + $0xc] sm:$0xf]  ;;  %v17142_v6 = vor.u32 %v19906_v1, %v17139_v5  ;;  %v17123_v33 = vld [vmem:[%s20917_s23 + $0x318] sm:$0xf0] }
 0x892   : > { %12248 = vmatpush.bf16.msra.mxu2 %v17094_v32  ;;  %12223 = vmatpush.bf16.msra.mxu0 %v16822_v57  ;;  %v16899_v32 = vld [vmem:[%s20917_s23 + $0x158] sm:$0xf0]  ;;  %v19838_v53 = vld [vmem:[%s20917_s23 + $0x10c] sm:$0xf] }
 0x893   : > { %v19870_v27 = vld [vmem:[%s20917_s23 + $0x20c] sm:$0xf]  ;;  %v17619_v13 = vld [vmem:[%s20917_s23 + $0x6f8] sm:$0xf0] }
 0x894   : > { %12261 = vmatpush.bf16.msra.mxu3 %v17222_v47  ;;  %12236 = vmatpush.bf16.msra.mxu1 %v16950_v54  ;;  %v12009_v47 = vpop.f32.mrf.mxu3  ;;  %v16902_v54 = vor.u32 %v19846_v36, %v16899_v32  ;;  %v19902_v34 = vld [vmem:[%s20917_s23 + $0x30c] sm:$0xf]  ;;  %v16870_v36 = vor.u32 %v19838_v53, %v16867_v15  ;;  %v17747_v32 = vld [vmem:[%s20917_s23 + $0x7f8] sm:$0xf0] }
 0x895   : > { %v12010_v57 = vadd.f32 %v12009_v47, %v11997_v4  ;;  %v19962_v9 = vld [vmem:[%s20917_s23 + $0x4ec] sm:$0xf]  ;;  %v17475_v61 = vld [vmem:[%s20917_s23 + $0x5d8] sm:$0xf0] }
 0x896   : > { %12249 = vmatpush.bf16.msra.mxu2 %v17078_v59  ;;  %12224 = vmatpush.bf16.msra.mxu0 %v16806_v12  ;;  %v17030_v59 = vor.u32 %v19878_v43, %v17027_v10  ;;  %v16739_v12 = vld [vmem:[%s20917_s23 + $0x18] sm:$0xf0]  ;;  %v19994_v22 = vld [vmem:[%s20917_s23 + $0x5ec] sm:$0xf]  ;;  %v17126_v43 = vor.u32 %v19902_v34, %v17123_v33 }
 0x897   : > { %v12430_v16 = vadd.f32 %v12010_v57, %v8522_v30  ;;  %v20026_v51 = vld [vmem:[%s20917_s23 + $0x6ec] sm:$0xf]  ;;  %v17603_v57 = vld [vmem:[%s20917_s23 + $0x6d8] sm:$0xf0] }
 0x898   : > { %12262 = vmatpush.bf16.msra.mxu3 %v17206_v63  ;;  %12237 = vmatpush.bf16.msra.mxu1 %v16934_v24  ;;  %v17158_v63 = vor.u32 %v19910_v17, %v17155_v20  ;;  %v16886_v24 = vor.u32 %v19842_v2, %v16883_v45  ;;  %v20058_v19 = vld [vmem:[%s20917_s23 + $0x7ec] sm:$0xf]  ;;  %v17622_v47 = vor.u32 %v20026_v51, %v17619_v13  ;;  %v17347_v17 = vld [vmem:[%s20917_s23 + $0x4d8] sm:$0xf0] }
 0x899   : > { %12434 = vst [vmem:[#allocation3 + $0x18] sm:$0xff] %v12430_v16  ;;  %v19958_v50 = vld [vmem:[%s20917_s23 + $0x4cc] sm:$0xf]  ;;  %v17750_v30 = vor.u32 %v20058_v19, %v17747_v32  ;;  %v17331_v45 = vld [vmem:[%s20917_s23 + $0x4b8] sm:$0xf0] }
 0x89a   : > { %12250 = vmatpush.bf16.msra.mxu2 %v17062_v44  ;;  %12225 = vmatpush.bf16.msra.mxu0 %v16790_v41  ;;  %v17014_v44 = vor.u32 %v19874_v0, %v17011_v49  ;;  %v17363_v41 = vld [vmem:[%s20917_s23 + $0x4f8] sm:$0xf0]  ;;  %v19990_v20 = vld [vmem:[%s20917_s23 + $0x5cc] sm:$0xf]  ;;  %v17350_v28 = vor.u32 %v19958_v50, %v17347_v17 }
 0x89b   : > { %v17366_v10 = vor.u32 %v19962_v9, %v17363_v41  ;;  %v17478_v60 = vor.u32 %v19990_v20, %v17475_v61  ;;  %v19986_v0 = vld [vmem:[%s20917_s23 + $0x5ac] sm:$0xf]  ;;  %v17459_v16 = vld [vmem:[%s20917_s23 + $0x5b8] sm:$0xf0] }
 0x89c   : > { %12263 = vmatpush.bf16.msra.mxu3 %v17190_v21  ;;  %12238 = vmatpush.bf16.msra.mxu1 %v16918_v31  ;;  %v11998_v21 = vpop.f32.mrf.mxu2  ;;  %v12011_v46 = vpop.f32.mrf.mxu3  ;;  %v16742_v31 = vor.u32 %v19806_v29, %v16739_v12  ;;  %v20018_v1 = vld [vmem:[%s20917_s23 + $0x6ac] sm:$0xf]  ;;  %v17587_v5 = vld [vmem:[%s20917_s23 + $0x6b8] sm:$0xf0]  ;;  %v17462_v12 = vor.u32 %v19986_v0, %v17459_v16 }
 0x89d   : > { %v17715_v29 = vld [vmem:[%s20917_s23 + $0x7b8] sm:$0xf0]  ;;  %v17590_v53 = vor.u32 %v20018_v1, %v17587_v5  ;;  %v20046_v21 = vld [vmem:[%s20917_s23 + $0x78c] sm:$0xf] }
 0x89e   : > { %12251 = vmatpush.bf16.msra.mxu2 %v17046_v35  ;;  %12226 = vmatpush.bf16.msra.mxu0 %v16774_v38  ;;  %v17491_v35 = vld [vmem:[%s20917_s23 + $0x5f8] sm:$0xf0]  ;;  %v20022_v38 = vld [vmem:[%s20917_s23 + $0x6cc] sm:$0xf] }
 0x89f   : > { %v17494_v4 = vor.u32 %v19994_v22, %v17491_v35  ;;  %v17606_v2 = vor.u32 %v20022_v38, %v17603_v57  ;;  %v17443_v15 = vld [vmem:[%s20917_s23 + $0x598] sm:$0xf0]  ;;  %v19946_v22 = vld [vmem:[%s20917_s23 + $0x46c] sm:$0xf] }
 0x8a0   : > { %12264 = vmatpush.bf16.msra.mxu3 %v17174_v52  ;;  %12239 = vmatpush.bf16.msra.mxu1 %v16902_v54  ;;  %v16998_v52 = vor.u32 %v19870_v27, %v16995_v18  ;;  %v20054_v54 = vld [vmem:[%s20917_s23 + $0x7cc] sm:$0xf]  ;;  %v17699_v18 = vld [vmem:[%s20917_s23 + $0x798] sm:$0xf0] }
 0x8a1   : > { %v20014_v27 = vld [vmem:[%s20917_s23 + $0x68c] sm:$0xf]  ;;  %v17702_v51 = vor.u32 %v20046_v21, %v17699_v18  ;;  %v17427_v13 = vld [vmem:[%s20917_s23 + $0x578] sm:$0xf0] }
 0x8a2   : > { %12252 = vmatpush.bf16.msra.mxu2 %v17030_v59  ;;  %12227 = vmatpush.bf16.msra.mxu0 %v16758_v3  ;;  %v17731_v59 = vld [vmem:[%s20917_s23 + $0x7d8] sm:$0xf0]  ;;  %v20050_v3 = vld [vmem:[%s20917_s23 + $0x7ac] sm:$0xf] }
 0x8a3   : > { %v17734_v49 = vor.u32 %v20054_v54, %v17731_v59  ;;  %v19978_v35 = vld [vmem:[%s20917_s23 + $0x56c] sm:$0xf]  ;;  %v17683_v32 = vld [vmem:[%s20917_s23 + $0x778] sm:$0xf0] }
 0x8a4   : > { %12265 = vmatpush.bf16.msra.mxu3 %v17158_v63  ;;  %12240 = vmatpush.bf16.msra.mxu1 %v16886_v24  ;;  %v19954_v63 = vld [vmem:[%s20917_s23 + $0x4ac] sm:$0xf]  ;;  %v17283_v50 = vld [vmem:[%s20917_s23 + $0x458] sm:$0xf0] }
 0x8a5   : > { %v19950_v24 = vld [vmem:[%s20917_s23 + $0x48c] sm:$0xf]  ;;  %v17411_v61 = vld [vmem:[%s20917_s23 + $0x558] sm:$0xf0] }
 0x8a6   : > { %12253 = vmatpush.bf16.msra.mxu2 %v17014_v44  ;;  %12228 = vmatpush.bf16.msra.mxu0 %v16742_v31  ;;  %v17315_v44 = vld [vmem:[%s20917_s23 + $0x498] sm:$0xf0]  ;;  %v20042_v19 = vld [vmem:[%s20917_s23 + $0x76c] sm:$0xf] }
 0x8a7   : > { %v17318_v33 = vor.u32 %v19950_v24, %v17315_v44  ;;  %v17299_v31 = vld [vmem:[%s20917_s23 + $0x478] sm:$0xf0]  ;;  %v19974_v17 = vld [vmem:[%s20917_s23 + $0x54c] sm:$0xf]  ;;  %v17686_v20 = vor.u32 %v20042_v19, %v17683_v32 }
 0x8a8   : > { %12266 = vmatpush.bf16.msra.mxu3 %v17142_v6  ;;  %12241 = vmatpush.bf16.msra.mxu1 %v16870_v36  ;;  %v17571_v6 = vld [vmem:[%s20917_s23 + $0x698] sm:$0xf0]  ;;  %v12035_v34 = vpop.f32.mrf.mxu1  ;;  %v20010_v36 = vld [vmem:[%s20917_s23 + $0x66c] sm:$0xf] }
 0x8a9   : > { %12229 = vmatmul.bf16.vlgmr.msra.gmra.mxu0 %v23313_v42  ;;  %v17334_v42 = vor.u32 %v19954_v63, %v17331_v45  ;;  %v17574_v41 = vor.u32 %v20014_v27, %v17571_v6  ;;  %v20006_v38 = vld [vmem:[%s20917_s23 + $0x64c] sm:$0xf]  ;;  %v17539_v57 = vld [vmem:[%s20917_s23 + $0x658] sm:$0xf0] }
 0x8aa   : > { %12254 = vmatpush.bf16.msra.mxu2 %v16998_v52  ;;  %12273 = vmatpush.bf16.msrb.mxu0 %v17366_v10  ;;  %v17555_v52 = vld [vmem:[%s20917_s23 + $0x678] sm:$0xf0]  ;;  %v17430_v10 = vor.u32 %v19978_v35, %v17427_v13  ;;  %v17542_v16 = vor.u32 %v20006_v38, %v17539_v57  ;;  %v19938_v1 = vld [vmem:[%s20917_s23 + $0x42c] sm:$0xf] }
 0x8ab   : > { %12242 = vmatmul.bf16.vlgmr.msra.gmra.mxu1 %v23315_v37  ;;  %v19982_v37 = vld [vmem:[%s20917_s23 + $0x58c] sm:$0xf]  ;;  %v17267_v5 = vld [vmem:[%s20917_s23 + $0x438] sm:$0xf0] }
 0x8ac   : > { %12267 = vmatpush.bf16.msra.mxu3 %v17126_v43  ;;  %12286 = vmatpush.bf16.msrb.mxu1 %v17494_v4  ;;  %v17446_v9 = vor.u32 %v19982_v37, %v17443_v15  ;;  %v17302_v43 = vor.u32 %v19946_v22, %v17299_v31  ;;  %v17558_v4 = vor.u32 %v20010_v36, %v17555_v52  ;;  %v20034_v24 = vld [vmem:[%s20917_s23 + $0x72c] sm:$0xf]  ;;  %v17651_v44 = vld [vmem:[%s20917_s23 + $0x738] sm:$0xf0] }
 0x8ad   : > { %12255 = vmatmul.bf16.vlgmr.msra.gmra.mxu2 %v23317_v39  ;;  %v17718_v39 = vor.u32 %v20050_v3, %v17715_v29  ;;  %v19970_v3 = vld [vmem:[%s20917_s23 + $0x52c] sm:$0xf]  ;;  %v17270_v37 = vor.u32 %v19938_v1, %v17267_v5  ;;  %v17251_v15 = vld [vmem:[%s20917_s23 + $0x418] sm:$0xf0] }
 0x8ae   : > { %12299 = vmatpush.bf16.msrb.mxu2 %v17622_v47  ;;  %12274 = vmatpush.bf16.msrb.mxu0 %v17350_v28  ;;  %v19942_v47 = vld [vmem:[%s20917_s23 + $0x44c] sm:$0xf]  ;;  %v17379_v21 = vld [vmem:[%s20917_s23 + $0x518] sm:$0xf0] }
 0x8af   : > { %12268 = vmatmul.bf16.vlgmr.msra.gmra.mxu3 %v23322_v56  ;;  %v12022_v56 = vpop.f32.mrf.mxu0  ;;  %v17286_v45 = vor.u32 %v19942_v47, %v17283_v50  ;;  %v19998_v18 = vld [vmem:[%s20917_s23 + $0x60c] sm:$0xf]  ;;  %v17875_v35 = vld [vmem:[%s20917_s23 + $0x8f8] sm:$0xf0] }
 0x8b0   : > { %12312 = vmatpush.bf16.msrb.mxu3 %v17750_v30  ;;  %12287 = vmatpush.bf16.msrb.mxu1 %v17478_v60  ;;  %v12036_v46 = vadd.f32 %v12035_v34, %v12022_v56  ;;  %v12048_v30 = vpop.f32.mrf.mxu2  ;;  %v20038_v60 = vld [vmem:[%s20917_s23 + $0x74c] sm:$0xf]  ;;  %v12037_v63 = vpop.f32.mrf.mxu1  ;;  %v17654_v34 = vor.u32 %v20034_v24, %v17651_v44  ;;  %v18003_v36 = vld [vmem:[%s20917_s23 + $0x9f8] sm:$0xf0] }
 0x8b1   : > { %v19966_v56 = vld [vmem:[%s20917_s23 + $0x50c] sm:$0xf]  ;;  %v18131_v19 = vld [vmem:[%s20917_s23 + $0xaf8] sm:$0xf0] }
 0x8b2   : > { %12300 = vmatpush.bf16.msrb.mxu2 %v17606_v2  ;;  %12275 = vmatpush.bf16.msrb.mxu0 %v17334_v42  ;;  %v12049_v54 = vadd.f32 %v12048_v30, %v12036_v46  ;;  %v12061_v59 = vpop.f32.mrf.mxu3  ;;  %v17667_v2 = vld [vmem:[%s20917_s23 + $0x758] sm:$0xf0]  ;;  %v20090_v31 = vld [vmem:[%s20917_s23 + $0x8ec] sm:$0xf]  ;;  %v17382_v32 = vor.u32 %v19966_v56, %v17379_v21 }
 0x8b3   : > { %v17670_v29 = vor.u32 %v20038_v60, %v17667_v2  ;;  %v17395_v42 = vld [vmem:[%s20917_s23 + $0x538] sm:$0xf0]  ;;  %v20154_v52 = vld [vmem:[%s20917_s23 + $0xaec] sm:$0xf]  ;;  %v17878_v50 = vor.u32 %v20090_v31, %v17875_v35 }
 0x8b4   : > { %12313 = vmatpush.bf16.msrb.mxu3 %v17734_v49  ;;  %12288 = vmatpush.bf16.msrb.mxu1 %v17462_v12  ;;  %v24302_v0 = vadd.f32 %v12061_v59, %v12049_v54  ;;  %v17414_v49 = vor.u32 %v19974_v17, %v17411_v61  ;;  %v20002_v12 = vld [vmem:[%s20917_s23 + $0x62c] sm:$0xf]  ;;  %v17398_v27 = vor.u32 %v19970_v3, %v17395_v42  ;;  %v17507_v46 = vld [vmem:[%s20917_s23 + $0x618] sm:$0xf0] }
 0x8b5   : > { %v20086_v30 = vld [vmem:[%s20917_s23 + $0x8cc] sm:$0xf]  ;;  %v17859_v61 = vld [vmem:[%s20917_s23 + $0x8d8] sm:$0xf0] }
 0x8b6   : > { %12301 = vmatpush.bf16.msrb.mxu2 %v17590_v53  ;;  %12276 = vmatpush.bf16.msrb.mxu0 %v17318_v33  ;;  %v17523_v53 = vld [vmem:[%s20917_s23 + $0x638] sm:$0xf0]  ;;  %v20118_v38 = vld [vmem:[%s20917_s23 + $0x9cc] sm:$0xf]  ;;  %v17862_v63 = vor.u32 %v20086_v30, %v17859_v61 }
 0x8b7   : > { %v12024_v28 = vpop.f32.mrf.mxu0  ;;  %v17526_v6 = vor.u32 %v20002_v12, %v17523_v53  ;;  %v17987_v54 = vld [vmem:[%s20917_s23 + $0x9d8] sm:$0xf0]  ;;  %v20150_v59 = vld [vmem:[%s20917_s23 + $0xacc] sm:$0xf] }
 0x8b8   : > { %12314 = vmatpush.bf16.msrb.mxu3 %v17718_v39  ;;  %12289 = vmatpush.bf16.msrb.mxu1 %v17446_v9  ;;  %v19934_v39 = vld [vmem:[%s20917_s23 + $0x40c] sm:$0xf]  ;;  %v12050_v33 = vpop.f32.mrf.mxu2  ;;  %v18115_v28 = vld [vmem:[%s20917_s23 + $0xad8] sm:$0xf0] }
 0x8b9   : > { %v20030_v9 = vld [vmem:[%s20917_s23 + $0x70c] sm:$0xf]  ;;  %v17254_v13 = vor.u32 %v19934_v39, %v17251_v15  ;;  %v18243_v2 = vld [vmem:[%s20917_s23 + $0xbd8] sm:$0xf0] }
 0x8ba   : > { %12302 = vmatpush.bf16.msrb.mxu2 %v17574_v41  ;;  %12277 = vmatpush.bf16.msrb.mxu0 %v17302_v43  ;;  %v17635_v41 = vld [vmem:[%s20917_s23 + $0x718] sm:$0xf0]  ;;  %v12063_v22 = vpop.f32.mrf.mxu3  ;;  %v17510_v43 = vor.u32 %v19998_v18, %v17507_v46  ;;  %v20182_v60 = vld [vmem:[%s20917_s23 + $0xbcc] sm:$0xf] }
 0x8bb   : > { %v17638_v47 = vor.u32 %v20030_v9, %v17635_v41  ;;  %v17843_v1 = vld [vmem:[%s20917_s23 + $0x8b8] sm:$0xf0]  ;;  %v20114_v5 = vld [vmem:[%s20917_s23 + $0x9ac] sm:$0xf]  ;;  %v18246_v3 = vor.u32 %v20182_v60, %v18243_v2 }
 0x8bc   : > { %12315 = vmatpush.bf16.msrb.mxu3 %v17702_v51  ;;  %12290 = vmatpush.bf16.msrb.mxu1 %v17430_v10  ;;  %v20122_v51 = vld [vmem:[%s20917_s23 + $0x9ec] sm:$0xf]  ;;  %v18099_v12 = vld [vmem:[%s20917_s23 + $0xab8] sm:$0xf0] }
 0x8bd   : > { %v20186_v10 = vld [vmem:[%s20917_s23 + $0xbec] sm:$0xf]  ;;  %v18006_v17 = vor.u32 %v20122_v51, %v18003_v36  ;;  %v18227_v24 = vld [vmem:[%s20917_s23 + $0xbb8] sm:$0xf0] }
 0x8be   : > { %12303 = vmatpush.bf16.msrb.mxu2 %v17558_v4  ;;  %12278 = vmatpush.bf16.msrb.mxu0 %v17286_v45  ;;  %v18259_v4 = vld [vmem:[%s20917_s23 + $0xbf8] sm:$0xf0]  ;;  %v17990_v45 = vor.u32 %v20118_v38, %v17987_v54  ;;  %v20146_v42 = vld [vmem:[%s20917_s23 + $0xaac] sm:$0xf] }
 0x8bf   : > { %v18262_v57 = vor.u32 %v20186_v10, %v18259_v4  ;;  %v20178_v53 = vld [vmem:[%s20917_s23 + $0xbac] sm:$0xf]  ;;  %v17827_v15 = vld [vmem:[%s20917_s23 + $0x898] sm:$0xf0] }
 0x8c0   : > { %12316 = vmatpush.bf16.msrb.mxu3 %v17686_v20  ;;  %12291 = vmatpush.bf16.msrb.mxu1 %v17414_v49  ;;  %v18134_v20 = vor.u32 %v20154_v52, %v18131_v19  ;;  %v18118_v49 = vor.u32 %v20150_v59, %v18115_v28  ;;  %v20078_v39 = vld [vmem:[%s20917_s23 + $0x88c] sm:$0xf]  ;;  %v18083_v56 = vld [vmem:[%s20917_s23 + $0xa98] sm:$0xf0] }
 0x8c1   : > { %v20174_v21 = vld [vmem:[%s20917_s23 + $0xb8c] sm:$0xf]  ;;  %v18211_v18 = vld [vmem:[%s20917_s23 + $0xb98] sm:$0xf0]  ;;  %v17830_v33 = vor.u32 %v20078_v39, %v17827_v15 }
 0x8c2   : > { %12304 = vmatpush.bf16.msrb.mxu2 %v17542_v16  ;;  %12279 = vmatpush.bf16.msrb.mxu0 %v17270_v37  ;;  %v20082_v16 = vld [vmem:[%s20917_s23 + $0x8ac] sm:$0xf]  ;;  %v18102_v37 = vor.u32 %v20146_v42, %v18099_v12  ;;  %v17811_v22 = vld [vmem:[%s20917_s23 + $0x878] sm:$0xf0]  ;;  %v18214_v35 = vor.u32 %v20174_v21, %v18211_v18 }
 0x8c3   : > { %v20074_v41 = vld [vmem:[%s20917_s23 + $0x86c] sm:$0xf]  ;;  %v17939_v51 = vld [vmem:[%s20917_s23 + $0x978] sm:$0xf0] }
 0x8c4   : > { %12317 = vmatpush.bf16.msrb.mxu3 %v17670_v29  ;;  %12292 = vmatpush.bf16.msrb.mxu1 %v17398_v27  ;;  %v17971_v29 = vld [vmem:[%s20917_s23 + $0x9b8] sm:$0xf0]  ;;  %v20106_v31 = vld [vmem:[%s20917_s23 + $0x96c] sm:$0xf] }
 0x8c5   : > { %v17974_v44 = vor.u32 %v20114_v5, %v17971_v29  ;;  %v17955_v27 = vld [vmem:[%s20917_s23 + $0x998] sm:$0xf0]  ;;  %v20170_v52 = vld [vmem:[%s20917_s23 + $0xb6c] sm:$0xf] }
 0x8c6   : > { %12305 = vmatpush.bf16.msrb.mxu2 %v17526_v6  ;;  %12280 = vmatpush.bf16.msrb.mxu0 %v17254_v13  ;;  %v20142_v6 = vld [vmem:[%s20917_s23 + $0xa8c] sm:$0xf]  ;;  %v18067_v36 = vld [vmem:[%s20917_s23 + $0xa78] sm:$0xf0] }
 0x8c7   : > { %v18086_v9 = vor.u32 %v20142_v6, %v18083_v56  ;;  %v20138_v13 = vld [vmem:[%s20917_s23 + $0xa6c] sm:$0xf]  ;;  %v18195_v19 = vld [vmem:[%s20917_s23 + $0xb78] sm:$0xf0] }
 0x8c8   : > { %12318 = vmatpush.bf16.msrb.mxu3 %v17654_v34  ;;  %12293 = vmatpush.bf16.msrb.mxu1 %v17382_v32  ;;  %v24358_v34 = vpop.f32.mrf.mxu1  ;;  %v17814_v32 = vor.u32 %v20074_v41, %v17811_v22  ;;  %v18070_v10 = vor.u32 %v20138_v13, %v18067_v36  ;;  %v20070_v4 = vld [vmem:[%s20917_s23 + $0x84c] sm:$0xf]  ;;  %v17923_v30 = vld [vmem:[%s20917_s23 + $0x958] sm:$0xf0] }
 0x8c9   : > { %12281 = vmatmul.bf16.vlgmr.msrb.gmra.mxu0 %v23399_v8  ;;  %v17846_v8 = vor.u32 %v20082_v16, %v17843_v1  ;;  %v20134_v61 = vld [vmem:[%s20917_s23 + $0xa4c] sm:$0xf]  ;;  %v18051_v38 = vld [vmem:[%s20917_s23 + $0xa58] sm:$0xf0] }
 0x8ca   : > { %12306 = vmatpush.bf16.msrb.mxu2 %v17510_v43  ;;  %12325 = vmatpush.bf16.msra.mxu0 %v17878_v50  ;;  %v17942_v43 = vor.u32 %v20106_v31, %v17939_v51  ;;  %v20102_v50 = vld [vmem:[%s20917_s23 + $0x94c] sm:$0xf]  ;;  %v18179_v28 = vld [vmem:[%s20917_s23 + $0xb58] sm:$0xf0] }
 0x8cb   : > { %12294 = vmatmul.bf16.vlgmr.msrb.gmra.mxu1 %v23401_v48  ;;  %v20110_v48 = vld [vmem:[%s20917_s23 + $0x98c] sm:$0xf]  ;;  %v17779_v16 = vld [vmem:[%s20917_s23 + $0x838] sm:$0xf0] }
 0x8cc   : > { %12319 = vmatpush.bf16.msrb.mxu3 %v17638_v47  ;;  %12338 = vmatpush.bf16.msra.mxu1 %v18006_v17  ;;  %v17958_v46 = vor.u32 %v20110_v48, %v17955_v27  ;;  %v17795_v47 = vld [vmem:[%s20917_s23 + $0x858] sm:$0xf0]  ;;  %v18198_v17 = vor.u32 %v20170_v52, %v18195_v19  ;;  %v20166_v59 = vld [vmem:[%s20917_s23 + $0xb4c] sm:$0xf] }
 0x8cd   : > { %12307 = vmatmul.bf16.vlgmr.msrb.gmra.mxu2 %v23403_v55  ;;  %v18230_v55 = vor.u32 %v20178_v53, %v18227_v24  ;;  %v17798_v2 = vor.u32 %v20070_v4, %v17795_v47  ;;  %v20098_v1 = vld [vmem:[%s20917_s23 + $0x92c] sm:$0xf]  ;;  %v18182_v5 = vor.u32 %v20166_v59, %v18179_v28  ;;  %v18035_v42 = vld [vmem:[%s20917_s23 + $0xa38] sm:$0xf0] }
 0x8ce   : > { %12351 = vmatpush.bf16.msra.mxu2 %v18134_v20  ;;  %12326 = vmatpush.bf16.msra.mxu0 %v17862_v63  ;;  %v17926_v63 = vor.u32 %v20102_v50, %v17923_v30  ;;  %v20130_v29 = vld [vmem:[%s20917_s23 + $0xa2c] sm:$0xf]  ;;  %v18163_v53 = vld [vmem:[%s20917_s23 + $0xb38] sm:$0xf0] }
 0x8cf   : > { %12320 = vmatmul.bf16.vlgmr.msrb.gmra.mxu3 %v23408_v23  ;;  %v24354_v23 = vpop.f32.mrf.mxu0  ;;  %v20162_v12 = vld [vmem:[%s20917_s23 + $0xb2c] sm:$0xf]  ;;  %v18038_v39 = vor.u32 %v20130_v29, %v18035_v42  ;;  %v17891_v48 = vld [vmem:[%s20917_s23 + $0x918] sm:$0xf0] }
 0x8d0   : > { %12364 = vmatpush.bf16.msra.mxu3 %v18262_v57  ;;  %12339 = vmatpush.bf16.msra.mxu1 %v17990_v45  ;;  %v24371_v20 = vpop.f32.mrf.mxu2  ;;  %v12089_v60 = vpop.f32.mrf.mxu1  ;;  %v18054_v45 = vor.u32 %v20134_v61, %v18051_v38  ;;  %v20094_v15 = vld [vmem:[%s20917_s23 + $0x90c] sm:$0xf]  ;;  %v18166_v27 = vor.u32 %v20162_v12, %v18163_v53  ;;  %v18019_v56 = vld [vmem:[%s20917_s23 + $0xa18] sm:$0xf0] }
 0x8d1   : > { %v20158_v21 = vld [vmem:[%s20917_s23 + $0xb0c] sm:$0xf]  ;;  %v18147_v18 = vld [vmem:[%s20917_s23 + $0xb18] sm:$0xf0]  ;;  %v17894_v13 = vor.u32 %v20094_v15, %v17891_v48 }
 0x8d2   : > { %12352 = vmatpush.bf16.msra.mxu2 %v18118_v49  ;;  %12327 = vmatpush.bf16.msra.mxu0 %v17846_v8  ;;  %v24376_v57 = vpop.f32.mrf.mxu3  ;;  %v20066_v49 = vld [vmem:[%s20917_s23 + $0x82c] sm:$0xf]  ;;  %v18515_v31 = vld [vmem:[%s20917_s23 + $0xdf8] sm:$0xf0] }
 0x8d3   : > { %v17782_v24 = vor.u32 %v20066_v49, %v17779_v16  ;;  %v20062_v8 = vld [vmem:[%s20917_s23 + $0x80c] sm:$0xf]  ;;  %v18643_v51 = vld [vmem:[%s20917_s23 + $0xef8] sm:$0xf0] }
 0x8d4   : > { %12365 = vmatpush.bf16.msra.mxu3 %v18246_v3  ;;  %12340 = vmatpush.bf16.msra.mxu1 %v17974_v44  ;;  %v17907_v3 = vld [vmem:[%s20917_s23 + $0x938] sm:$0xf0]  ;;  %v20250_v41 = vld [vmem:[%s20917_s23 + $0xdec] sm:$0xf] }
 0x8d5   : > { %v17763_v44 = vld [vmem:[%s20917_s23 + $0x818] sm:$0xf0]  ;;  %v20314_v52 = vld [vmem:[%s20917_s23 + $0xfec] sm:$0xf] }
 0x8d6   : > { %12353 = vmatpush.bf16.msra.mxu2 %v18102_v37  ;;  %12328 = vmatpush.bf16.msra.mxu0 %v17830_v33  ;;  %v17910_v37 = vor.u32 %v20098_v1, %v17907_v3  ;;  %v17766_v22 = vor.u32 %v20062_v8, %v17763_v44  ;;  %v18771_v19 = vld [vmem:[%s20917_s23 + $0xff8] sm:$0xf0]  ;;  %v20214_v47 = vld [vmem:[%s20917_s23 + $0xccc] sm:$0xf] }
 0x8d7   : > { %v12076_v54 = vpop.f32.mrf.mxu0  ;;  %v18371_v50 = vld [vmem:[%s20917_s23 + $0xcd8] sm:$0xf0]  ;;  %v18774_v30 = vor.u32 %v20314_v52, %v18771_v19  ;;  %v20278_v38 = vld [vmem:[%s20917_s23 + $0xecc] sm:$0xf] }
 0x8d8   : > { %12366 = vmatpush.bf16.msra.mxu3 %v18230_v55  ;;  %12341 = vmatpush.bf16.msra.mxu1 %v17958_v46  ;;  %v20126_v55 = vld [vmem:[%s20917_s23 + $0xa0c] sm:$0xf]  ;;  %v12102_v6 = vpop.f32.mrf.mxu2  ;;  %v18499_v61 = vld [vmem:[%s20917_s23 + $0xdd8] sm:$0xf0]  ;;  %v18374_v60 = vor.u32 %v20214_v47, %v18371_v50 }
 0x8d9   : > { %v20218_v46 = vld [vmem:[%s20917_s23 + $0xcec] sm:$0xf]  ;;  %v18022_v36 = vor.u32 %v20126_v55, %v18019_v56  ;;  %v18627_v54 = vld [vmem:[%s20917_s23 + $0xed8] sm:$0xf0] }
 0x8da   : > { %12354 = vmatpush.bf16.msra.mxu2 %v18086_v9  ;;  %12329 = vmatpush.bf16.msra.mxu0 %v17814_v32  ;;  %v12115_v33 = vpop.f32.mrf.mxu3  ;;  %v18387_v9 = vld [vmem:[%s20917_s23 + $0xcf8] sm:$0xf0]  ;;  %v18150_v32 = vor.u32 %v20158_v21, %v18147_v18  ;;  %v20310_v59 = vld [vmem:[%s20917_s23 + $0xfcc] sm:$0xf] }
 0x8db   : > { %v18755_v28 = vld [vmem:[%s20917_s23 + $0xfd8] sm:$0xf0]  ;;  %v20242_v16 = vld [vmem:[%s20917_s23 + $0xdac] sm:$0xf] }
 0x8dc   : > { %12367 = vmatpush.bf16.msra.mxu3 %v18214_v35  ;;  %12342 = vmatpush.bf16.msra.mxu1 %v17942_v43  ;;  %v20282_v35 = vld [vmem:[%s20917_s23 + $0xeec] sm:$0xf]  ;;  %v18390_v43 = vor.u32 %v20218_v46, %v18387_v9  ;;  %v18355_v49 = vld [vmem:[%s20917_s23 + $0xcb8] sm:$0xf0]  ;;  %v18758_v1 = vor.u32 %v20310_v59, %v18755_v28 }
 0x8dd   : > { %v18646_v4 = vor.u32 %v20282_v35, %v18643_v51  ;;  %v20274_v3 = vld [vmem:[%s20917_s23 + $0xeac] sm:$0xf]  ;;  %v18611_v29 = vld [vmem:[%s20917_s23 + $0xeb8] sm:$0xf0] }
 0x8de   : > { %12355 = vmatpush.bf16.msra.mxu2 %v18070_v10  ;;  %12330 = vmatpush.bf16.msra.mxu0 %v17798_v2  ;;  %v18518_v10 = vor.u32 %v20250_v41, %v18515_v31  ;;  %v20306_v42 = vld [vmem:[%s20917_s23 + $0xfac] sm:$0xf]  ;;  %v18739_v12 = vld [vmem:[%s20917_s23 + $0xfb8] sm:$0xf0] }
 0x8df   : > { %v20206_v8 = vld [vmem:[%s20917_s23 + $0xc8c] sm:$0xf]  ;;  %v18339_v44 = vld [vmem:[%s20917_s23 + $0xc98] sm:$0xf0] }
 0x8e0   : > { %12368 = vmatpush.bf16.msra.mxu3 %v18198_v17  ;;  %12343 = vmatpush.bf16.msra.mxu1 %v17926_v63  ;;  %v20246_v17 = vld [vmem:[%s20917_s23 + $0xdcc] sm:$0xf]  ;;  %v18630_v63 = vor.u32 %v20278_v38, %v18627_v54  ;;  %v18595_v15 = vld [vmem:[%s20917_s23 + $0xe98] sm:$0xf0]  ;;  %v18342_v6 = vor.u32 %v20206_v8, %v18339_v44 }
 0x8e1   : > { %v18502_v2 = vor.u32 %v20246_v17, %v18499_v61  ;;  %v20302_v48 = vld [vmem:[%s20917_s23 + $0xf8c] sm:$0xf]  ;;  %v18723_v55 = vld [vmem:[%s20917_s23 + $0xf98] sm:$0xf0] }
 0x8e2   : > { %12356 = vmatpush.bf16.msra.mxu2 %v18054_v45  ;;  %12331 = vmatpush.bf16.msra.mxu0 %v17782_v24  ;;  %v20210_v45 = vld [vmem:[%s20917_s23 + $0xcac] sm:$0xf]  ;;  %v18614_v24 = vor.u32 %v20274_v3, %v18611_v29  ;;  %v18323_v33 = vld [vmem:[%s20917_s23 + $0xc78] sm:$0xf0]  ;;  %v18726_v9 = vor.u32 %v20302_v48, %v18723_v55 }
 0x8e3   : > { %v20202_v18 = vld [vmem:[%s20917_s23 + $0xc6c] sm:$0xf]  ;;  %v18451_v41 = vld [vmem:[%s20917_s23 + $0xd78] sm:$0xf0] }
 0x8e4   : > { %12369 = vmatpush.bf16.msra.mxu3 %v18182_v5  ;;  %12344 = vmatpush.bf16.msra.mxu1 %v17910_v37  ;;  %v18483_v5 = vld [vmem:[%s20917_s23 + $0xdb8] sm:$0xf0]  ;;  %v20234_v46 = vld [vmem:[%s20917_s23 + $0xd6c] sm:$0xf] }
 0x8e5   : > { %v18486_v53 = vor.u32 %v20242_v16, %v18483_v5  ;;  %v18467_v37 = vld [vmem:[%s20917_s23 + $0xd98] sm:$0xf0]  ;;  %v20298_v35 = vld [vmem:[%s20917_s23 + $0xf6c] sm:$0xf] }
 0x8e6   : > { %12357 = vmatpush.bf16.msra.mxu2 %v18038_v39  ;;  %12332 = vmatpush.bf16.msra.mxu0 %v17766_v22  ;;  %v20270_v39 = vld [vmem:[%s20917_s23 + $0xe8c] sm:$0xf]  ;;  %v18579_v31 = vld [vmem:[%s20917_s23 + $0xe78] sm:$0xf0] }
 0x8e7   : > { %v18598_v21 = vor.u32 %v20270_v39, %v18595_v15  ;;  %v20266_v22 = vld [vmem:[%s20917_s23 + $0xe6c] sm:$0xf]  ;;  %v18707_v51 = vld [vmem:[%s20917_s23 + $0xf78] sm:$0xf0] }
 0x8e8   : > { %12370 = vmatpush.bf16.msra.mxu3 %v18166_v27  ;;  %12345 = vmatpush.bf16.msra.mxu1 %v17894_v13  ;;  %v24434_v27 = vpop.f32.mrf.mxu1  ;;  %v18326_v13 = vor.u32 %v20202_v18, %v18323_v33  ;;  %v18582_v52 = vor.u32 %v20266_v22, %v18579_v31  ;;  %v20198_v19 = vld [vmem:[%s20917_s23 + $0xc4c] sm:$0xf]  ;;  %v18435_v47 = vld [vmem:[%s20917_s23 + $0xd58] sm:$0xf0] }
 0x8e9   : > { %12333 = vmatmul.bf16.vlgmr.msra.gmra.mxu0 %v23487_v26  ;;  %v18358_v26 = vor.u32 %v20210_v45, %v18355_v49  ;;  %v20262_v50 = vld [vmem:[%s20917_s23 + $0xe4c] sm:$0xf]  ;;  %v18563_v17 = vld [vmem:[%s20917_s23 + $0xe58] sm:$0xf0] }
 0x8ea   : > { %12358 = vmatpush.bf16.msra.mxu2 %v18022_v36  ;;  %12377 = vmatpush.bf16.msrb.mxu0 %v18390_v43  ;;  %v18454_v36 = vor.u32 %v20234_v46, %v18451_v41  ;;  %v20230_v43 = vld [vmem:[%s20917_s23 + $0xd4c] sm:$0xf]  ;;  %v18691_v59 = vld [vmem:[%s20917_s23 + $0xf58] sm:$0xf0] }
 0x8eb   : > { %12346 = vmatmul.bf16.vlgmr.msra.gmra.mxu1 %v23489_v14  ;;  %v20238_v14 = vld [vmem:[%s20917_s23 + $0xd8c] sm:$0xf]  ;;  %v18291_v49 = vld [vmem:[%s20917_s23 + $0xc38] sm:$0xf0] }
 0x8ec   : > { %12371 = vmatpush.bf16.msra.mxu3 %v18150_v32  ;;  %12390 = vmatpush.bf16.msrb.mxu1 %v18518_v10  ;;  %v18470_v56 = vor.u32 %v20238_v14, %v18467_v37  ;;  %v18307_v32 = vld [vmem:[%s20917_s23 + $0xc58] sm:$0xf0]  ;;  %v18710_v10 = vor.u32 %v20298_v35, %v18707_v51  ;;  %v20294_v54 = vld [vmem:[%s20917_s23 + $0xf4c] sm:$0xf] }
 0x8ed   : > { %12359 = vmatmul.bf16.vlgmr.msra.gmra.mxu2 %v23491_v11  ;;  %v18742_v11 = vor.u32 %v20306_v42, %v18739_v12  ;;  %v20194_v45 = vld [vmem:[%s20917_s23 + $0xc2c] sm:$0xf]  ;;  %v18547_v5 = vld [vmem:[%s20917_s23 + $0xe38] sm:$0xf0] }
 0x8ee   : > { %12403 = vmatpush.bf16.msrb.mxu2 %v18646_v4  ;;  %12378 = vmatpush.bf16.msrb.mxu0 %v18374_v60  ;;  %v18310_v60 = vor.u32 %v20198_v19, %v18307_v32  ;;  %v20226_v16 = vld [vmem:[%s20917_s23 + $0xd2c] sm:$0xf]  ;;  %v18675_v42 = vld [vmem:[%s20917_s23 + $0xf38] sm:$0xf0]  ;;  %v18294_v12 = vor.u32 %v20194_v45, %v18291_v49 }
 0x8ef   : > { %12372 = vmatmul.bf16.vlgmr.msra.gmra.mxu3 %v23496_v25  ;;  %v24430_v25 = vpop.f32.mrf.mxu0  ;;  %v20290_v29 = vld [vmem:[%s20917_s23 + $0xf2c] sm:$0xf]  ;;  %v18275_v44 = vld [vmem:[%s20917_s23 + $0xc18] sm:$0xf0] }
 0x8f0   : > { %12416 = vmatpush.bf16.msrb.mxu3 %v18774_v30  ;;  %12391 = vmatpush.bf16.msrb.mxu1 %v18502_v2  ;;  %v24447_v4 = vpop.f32.mrf.mxu2  ;;  %v12075_v30 = vadd.f32 %v24354_v23, %v24302_v0  ;;  %v12141_v28 = vpop.f32.mrf.mxu1  ;;  %v18438_v2 = vor.u32 %v20230_v43, %v18435_v47  ;;  %v18694_v0 = vor.u32 %v20294_v54, %v18691_v59  ;;  %v18419_v23 = vld [vmem:[%s20917_s23 + $0xd38] sm:$0xf0]  ;;  %v20190_v8 = vld [vmem:[%s20917_s23 + $0xc0c] sm:$0xf] }
 0x8f1   : > { %v20222_v14 = vld [vmem:[%s20917_s23 + $0xd0c] sm:$0xf]  ;;  %v18403_v37 = vld [vmem:[%s20917_s23 + $0xd18] sm:$0xf0] }
 0x8f2   : > { %12404 = vmatpush.bf16.msrb.mxu2 %v18630_v63  ;;  %12379 = vmatpush.bf16.msrb.mxu0 %v18358_v26  ;;  %v12165_v61 = vpop.f32.mrf.mxu3  ;;  %v18566_v63 = vor.u32 %v20262_v50, %v18563_v17  ;;  %v12088_v3 = vadd.f32 %v24358_v34, %v12075_v30  ;;  %v18678_v34 = vor.u32 %v20290_v29, %v18675_v42  ;;  %v20254_v39 = vld [vmem:[%s20917_s23 + $0xe0c] sm:$0xf]  ;;  %v18531_v15 = vld [vmem:[%s20917_s23 + $0xe18] sm:$0xf0] }
 0x8f3   : > { %v20286_v55 = vld [vmem:[%s20917_s23 + $0xf0c] sm:$0xf]  ;;  %v18534_v18 = vor.u32 %v20254_v39, %v18531_v15 }
 0x8f4   : > { %12417 = vmatpush.bf16.msrb.mxu3 %v18758_v1  ;;  %12392 = vmatpush.bf16.msrb.mxu1 %v18486_v53  ;;  %v20258_v1 = vld [vmem:[%s20917_s23 + $0xe2c] sm:$0xf]  ;;  %v12101_v26 = vadd.f32 %v24371_v20, %v12088_v3  ;;  %v18422_v53 = vor.u32 %v20226_v16, %v18419_v23 }
 0x8f6   : > { %12405 = vmatpush.bf16.msrb.mxu2 %v18614_v24  ;;  %12380 = vmatpush.bf16.msrb.mxu0 %v18342_v6  ;;  %v18550_v24 = vor.u32 %v20258_v1, %v18547_v5  ;;  %v18659_v6 = vld [vmem:[%s20917_s23 + $0xf18] sm:$0xf0]  ;;  %v12114_v20 = vadd.f32 %v24376_v57, %v12101_v26 }
 0x8f7   : > { %v12128_v38 = vpop.f32.mrf.mxu0  ;;  %v18662_v33 = vor.u32 %v20286_v55, %v18659_v6 }
 0x8f8   : > { %12418 = vmatpush.bf16.msrb.mxu3 %v18742_v11  ;;  %12393 = vmatpush.bf16.msrb.mxu1 %v18470_v56  ;;  %v12154_v11 = vpop.f32.mrf.mxu2  ;;  %v18278_v56 = vor.u32 %v20190_v8, %v18275_v44  ;;  %v12127_v46 = vadd.f32 %v24430_v25, %v12114_v20 }
 0x8fa   : > { %12406 = vmatpush.bf16.msrb.mxu2 %v18598_v21  ;;  %12381 = vmatpush.bf16.msrb.mxu0 %v18326_v13  ;;  %v12167_v48 = vpop.f32.mrf.mxu3  ;;  %v18406_v21 = vor.u32 %v20222_v14, %v18403_v37 }
 0x8fc   : > { %12419 = vmatpush.bf16.msrb.mxu3 %v18726_v9  ;;  %12394 = vmatpush.bf16.msrb.mxu1 %v18454_v36  ;;  %v12140_v9 = vadd.f32 %v24434_v27, %v12127_v46  ;;  %v8523_v27 = vld [vmem:[#allocation3 + $0x8] sm:$0xff] }
 0x8fe   : > { %12407 = vmatpush.bf16.msrb.mxu2 %v18582_v52  ;;  %12382 = vmatpush.bf16.msrb.mxu0 %v18310_v60  ;;  %v12153_v57 = vadd.f32 %v24447_v4, %v12140_v9 }
 0x900   : > { %12420 = vmatpush.bf16.msrb.mxu3 %v18710_v10  ;;  %12395 = vmatpush.bf16.msrb.mxu1 %v18438_v2  ;;  %v12166_v41 = vadd.f32 %v12165_v61, %v12153_v57 }
 0x902   : > { %12408 = vmatpush.bf16.msrb.mxu2 %v18566_v63  ;;  %12383 = vmatpush.bf16.msrb.mxu0 %v18294_v12 }
 0x904   : > { %12421 = vmatpush.bf16.msrb.mxu3 %v18694_v0  ;;  %12396 = vmatpush.bf16.msrb.mxu1 %v18422_v53 }
 0x906   : > { %12409 = vmatpush.bf16.msrb.mxu2 %v18550_v24  ;;  %12384 = vmatpush.bf16.msrb.mxu0 %v18278_v56  ;;  %v12178_v22 = vpop.f32.mrf.mxu0 }
 0x907   : > { %v12179_v25 = vadd.f32 %v12178_v22, %v12166_v41 }
 0x908   : > { %12422 = vmatpush.bf16.msrb.mxu3 %v18678_v34  ;;  %12397 = vmatpush.bf16.msrb.mxu1 %v18406_v21  ;;  %v12191_v31 = vpop.f32.mrf.mxu1  ;;  %v8524_v21 = vld [vmem:[#allocation3 + $0x10] sm:$0xff] }
 0x909   : > { %12385 = vmatmul.bf16.vlgmr.msrb.gmra.mxu0 %v23581_v7  ;;  %v12192_v35 = vadd.f32 %v12191_v31, %v12179_v25 }
 0x90a   : > { %12410 = vmatpush.bf16.msrb.mxu2 %v18534_v18 }
 0x90b   : > { %12398 = vmatmul.bf16.vlgmr.msrb.gmra.mxu1 %v23583_v62 }
 0x90c   : > { %12423 = vmatpush.bf16.msrb.mxu3 %v18662_v33 }
 0x90d   : > { %12411 = vmatmul.bf16.vlgmr.msrb.gmra.mxu2 %v23585_v40 }
 0x90e   : > { %v12180_v52 = vpop.f32.mrf.mxu0 }
 0x90f   : > { %12424 = vmatmul.bf16.vlgmr.msrb.gmra.mxu3 %v23634_v58 }
 0x910   : > { %v12204_v51 = vpop.f32.mrf.mxu2  ;;  %v12193_v19 = vpop.f32.mrf.mxu1 }
 0x911   : > { %v12205_v13 = vadd.f32 %v12204_v51, %v12192_v35 }
 0x912   : > { %v12217_v36 = vpop.f32.mrf.mxu3 }
 0x913   : > { %v12218_v7 = vadd.f32 %v12217_v36, %v12205_v13 }
 0x915   : > { %v12431_v32 = vadd.f32 %v12218_v7, %v8523_v27 }
 0x917   : > { %12435 = vst [vmem:[#allocation3 + $0x8] sm:$0xff] %v12431_v32 }
 0x918   : > { %v12206_v62 = vpop.f32.mrf.mxu2 }
 0x91a   : > { %v12219_v40 = vpop.f32.mrf.mxu3 }
 0x926   : > { %v12230_v43 = vpop.f32.mrf.mxu0 }
 0x928   : > { %v12243_v10 = vpop.f32.mrf.mxu1 }
 0x929   : > { %v12244_v4 = vadd.f32 %v12243_v10, %v12230_v43 }
 0x92e   : > { %v12232_v17 = vpop.f32.mrf.mxu0 }
 0x930   : > { %v12256_v58 = vpop.f32.mrf.mxu2  ;;  %v12245_v30 = vpop.f32.mrf.mxu1 }
 0x931   : > { %v12257_v47 = vadd.f32 %v12256_v58, %v12244_v4 }
 0x932   : > { %v12269_v50 = vpop.f32.mrf.mxu3 }
 0x933   : > { %v12270_v61 = vadd.f32 %v12269_v50, %v12257_v47 }
 0x938   : > { %v12258_v38 = vpop.f32.mrf.mxu2 }
 0x93a   : > { %v12271_v54 = vpop.f32.mrf.mxu3 }
 0x946   : > { %v12282_v59 = vpop.f32.mrf.mxu0 }
 0x947   : > { %v12283_v1 = vadd.f32 %v12282_v59, %v12270_v61 }
 0x948   : > { %v12295_v28 = vpop.f32.mrf.mxu1 }
 0x949   : > { %v12296_v12 = vadd.f32 %v12295_v28, %v12283_v1 }
 0x94e   : > { %v12284_v63 = vpop.f32.mrf.mxu0 }
 0x950   : > { %v12308_v60 = vpop.f32.mrf.mxu2  ;;  %v12297_v45 = vpop.f32.mrf.mxu1 }
 0x951   : > { %v12309_v26 = vadd.f32 %v12308_v60, %v12296_v12 }
 0x952   : > { %v12321_v2 = vpop.f32.mrf.mxu3 }
 0x953   : > { %v12322_v8 = vadd.f32 %v12321_v2, %v12309_v26 }
 0x958   : > { %v12310_v49 = vpop.f32.mrf.mxu2 }
 0x95a   : > { %v12323_v16 = vpop.f32.mrf.mxu3 }
 0x966   : > { %v12334_v0 = vpop.f32.mrf.mxu0 }
 0x967   : > { %v12335_v44 = vadd.f32 %v12334_v0, %v12322_v8 }
 0x968   : > { %v12347_v23 = vpop.f32.mrf.mxu1 }
 0x969   : > { %v12348_v14 = vadd.f32 %v12347_v23, %v12335_v44 }
 0x96e   : > { %v12336_v29 = vpop.f32.mrf.mxu0 }
 0x970   : > { %v12360_v5 = vpop.f32.mrf.mxu2  ;;  %v12349_v42 = vpop.f32.mrf.mxu1 }
 0x971   : > { %v12361_v34 = vadd.f32 %v12360_v5, %v12348_v14 }
 0x972   : > { %v12373_v3 = vpop.f32.mrf.mxu3 }
 0x973   : > { %v12374_v11 = vadd.f32 %v12373_v3, %v12361_v34 }
 0x978   : > { %v12362_v53 = vpop.f32.mrf.mxu2 }
 0x97a   : > { %v12375_v24 = vpop.f32.mrf.mxu3 }
 0x986   : > { %v12386_v37 = vpop.f32.mrf.mxu0 }
 0x987   : > { %v12387_v15 = vadd.f32 %v12386_v37, %v12374_v11 }
 0x988   : > { %v12399_v39 = vpop.f32.mrf.mxu1 }
 0x989   : > { %v12400_v48 = vadd.f32 %v12399_v39, %v12387_v15 }
 0x98e   : > { %v12388_v20 = vpop.f32.mrf.mxu0 }
 0x990   : > { %v12412_v55 = vpop.f32.mrf.mxu2  ;;  %v12401_v18 = vpop.f32.mrf.mxu1 }
 0x991   : > { %v12413_v6 = vadd.f32 %v12412_v55, %v12400_v48 }
 0x992   : > { %v12425_v56 = vpop.f32.mrf.mxu3 }
 0x993   : > { %v12426_v33 = vadd.f32 %v12425_v56, %v12413_v6 }
 0x995   : > { %v12432_v46 = vadd.f32 %v12426_v33, %v8524_v21 }
 0x996   : > { %12440 = sbr.rel (%p18775_p5) target bundleno = 2594 (0xa22), region = 92 }
 0x997   : > { %12436 = vst [vmem:[#allocation3 + $0x10] sm:$0xff] %v12432_v46 }
 0x998   : > { %v12414_v9 = vpop.f32.mrf.mxu2 }
 0x99a   : > { %v12427_v57 = vpop.f32.mrf.mxu3 }
 0x99b   : > { %v12441_v41 = vld [vmem:[#allocation3] sm:$0xff]  ;;  %v12442_v22 = vld [vmem:[#allocation3 + $0x18] sm:$0xff]  ;;  %v12443_v31 = vld [vmem:[#allocation3 + $0x8] sm:$0xff]  ;;  %vm12487_vm0 = vcmask 7168  }
 0x99c   : > { %v12445_v35 = vld [vmem:[#allocation12] sm:$0xf]  ;;  %v12463_v51 = vld [vmem:[#allocation13] sm:$0xf] }
 0x99d   : > { %v12447_v13 = vperm.slane %v12445_v35, 0  ;;  %v12448_v36 = vperm.slane %v12445_v35, 1  ;;  %v12449_v52 = vperm.slane %v12445_v35, 2  ;;  %v12450_v27 = vperm.slane %v12445_v35, 3  ;;  %v20423_v2 = vld [vmem:[#allocation4] ss:$0 sm:$0xff] }
 0x99e   : > { %v12444_v25 = vld [vmem:[#allocation3 + $0x10] sm:$0xff]  ;;  %v12465_v19 = vperm.slane %v12463_v51, 0  ;;  %v12466_v7 = vperm.slane %v12463_v51, 1  ;;  %v12467_v32 = vperm.slane %v12463_v51, 2  ;;  %v12468_v4 = vperm.slane %v12463_v51, 3 }
 0x99f   : > { %v12455_v62 = vadd.f32 %v12447_v13, %v12441_v41  ;;  %v12456_v40 = vadd.f32 %v12448_v36, %v12442_v22  ;;  %v12457_v43 = vadd.f32 %v12449_v52, %v12443_v31  ;;  %v12458_v10 = vadd.f32 %v12450_v27, %v12444_v25 }
 0x9a1   : > { %v12459_v58 = vmax.f32 %v12455_v62, 0.0  ;;  %v12460_v47 = vmax.f32 %v12456_v40, 0.0  ;;  %v12461_v50 = vmax.f32 %v12457_v43, 0.0  ;;  %v12462_v17 = vmax.f32 %v12458_v10, 0.0 }
 0x9a3   : > { %v12473_v30 = vmul.f32 %v12465_v19, %v12459_v58  ;;  %v12474_v61 = vmul.f32 %v12466_v7, %v12460_v47  ;;  %v12475_v38 = vmul.f32 %v12467_v32, %v12461_v50  ;;  %v12476_v54 = vmul.f32 %v12468_v4, %v12462_v17 }
 0x9a5   : > { %v12477_v59 = vadd.f32 %v12474_v61, %v12473_v30 }
 0x9a7   : > { %v12478_v28 = vadd.f32 %v12477_v59, %v12475_v38 }
 0x9a9   : > { %v12479_v60 = vadd.f32 %v12478_v28, %v12476_v54 }
 0x9ab   : > { %12480 = vadd.xlane.f32.xlu0 %v12479_v60 }
 0xa1e   : > { %v12481_v63 = vpop.xlane.xlu0 %12480 }
 0xa1f   : > { %v12486_v45 = vadd.f32 %v20423_v2, %v12481_v63 }
 0xa21   : > { %12488 = vst.msk [vmem:[%s24529_s13] sm:$0xff] %vm12487_vm0, %v12486_v45 }
 0xa22 PF: > { %s24530_s14 = sld [smem:[#allocation21_spill]]  ;;  %s24533_s11 = smov %s20676_s12 }
 0xa23   : > { %s24531_s28 = sld [smem:[#allocation20_spill]] }
 0xa24   : > { %s24532_s13 = sld [smem:[#allocation22_spill]] }
 0xa28   : > { %p21_p8 = scmp.ge.s32.totalorder %s24530_s14, 4  }
 0xa29   : > { %s24534_s12 = smov %s24531_s28 }
 0xa2a   :  { %23 = sbr.rel (!%p21_p8) target bundleno = 10 (0xa), region = 137 }
 0xa2f   :  { %12500 = vsyncpa [#allocation6], 1 }
 0xa30   :  { %12502 = vsyncpa [#allocation6 + $0x1], 1 }
 0xa31   :  { %12503 = vsyncpa [#allocation8], 1 }
 0xa32   :  { %12504 = vsyncpa [#allocation14], 1 }

</bundles_post_ra>
